<compile_context>
chip_gen: v5e
topology: v5e:2x2
jax: 0.10.0
libtpu: 0.0.40
codegen_flags: <defaults>
</compile_context>

<pallas_src>
import functools
import numpy as np
import jax
import jax.numpy as jnp
from jax import lax
from jax.experimental import pallas as pl
from jax.experimental.pallas import tpu as pltpu


D1, D2, D3 = 2, 3, 1            # dilations of stage 1 (Conv2), 2 (Conv3), 3 (Conv1)
HALO = D1 + D2 + D3             # input-row halo needed above/below an output row tile
P = 4                           # column frame width (>= max dilation; keeps Wp % 8 == 0)
PAD = 8                         # flat leading/trailing guard (>= max dilation, aligned)


def _round_up(x, m):
    return ((x + m - 1) // m) * m


def _pick_row_tile(h):
    for th in (32, 16, 8):
        if h % th == 0 and h // th >= 2:
            return th
    return h


# ----------------------------------------------------------------------------
# Fused kernel: 3 dilated conv + BN + ReLU stages + residual add, one row tile
# of one batch item per grid step.
# ----------------------------------------------------------------------------
def _respath2_kernel(x_ref, w1_ref, w2_ref, w3_ref, bn_ref, xres_ref, o_ref,
                     y1_ref, y2_ref, *, H, W, TH, R):
    # x_ref   : (1, PAD + HIN*Wp + PAD, Cp) bf16  zero-padded, framed, flat input tile
    # w*_ref  : (3, 3, Cp, Cp) bf16               HWIO weights (channel zero-padded)
    # bn_ref  : (6, Cp) f32                       rows = [s1, b1, s2, b2, s3, b3]
    # xres_ref: (1, TH*Wp, Cp) f32                framed flat residual
    # o_ref   : (1, TH*Wp, Cp) f32                framed flat output (wrapper crops frame)
    # y1_ref  : (PAD + ROWS1*Wp + PAD, Cp) bf16   stage-1 feature map (VMEM scratch)
    # y2_ref  : (PAD + ROWS2*Wp + PAD, Cp) bf16   stage-2 feature map (VMEM scratch)
    Wp = W + 2 * P
    ROWS1 = TH + 2 * (D2 + D3)
    ROWS2 = TH + 2 * D3
    Cp = x_ref.shape[-1]
    r0 = (pl.program_id(0) % R) * TH            # first output row of this tile

    # Keep the tiny guard pads of the persistent scratch well-defined (cheap).
    zpad = jnp.zeros((PAD, Cp), jnp.bfloat16)
    y1_ref[0:PAD, :] = zpad
    y1_ref[PAD + ROWS1 * Wp: PAD + ROWS1 * Wp + PAD, :] = zpad
    y2_ref[0:PAD, :] = zpad
    y2_ref[PAD + ROWS2 * Wp: PAD + ROWS2 * Wp + PAD, :] = zpad

    def conv_bn_relu(load, d, n_out, w_ref, scale, shift):
        # One dilated 3x3 conv stage on the framed flat layout.  Every tap is a
        # contiguous 2-D slice; the 9 partial products are accumulated in a
        # register-carried f32 value (no accumulator scratch).
        acc = None
        for dy in range(3):
            for dx in range(3):
                start = PAD + dy * d * Wp + (dx - 1) * d
                tap = load(start, n_out * Wp)                     # (n_out*Wp, Cp) bf16
                p = jnp.dot(tap, w_ref[dy, dx],
                            preferred_element_type=jnp.float32)
                acc = p if acc is None else acc + p
        return jnp.maximum(acc * scale + shift, 0.0)              # (n_out*Wp, Cp) f32

    def mask_store(y_flat, n_rows, first_row, dst_ref):
        # Zero rows outside the image and the column frame (emulates PyTorch's
        # zero padding of the post-ReLU feature map), then store as bf16.
        y = y_flat.reshape(n_rows, Wp, Cp)
        ri = lax.broadcasted_iota(jnp.int32, (n_rows, Wp, 1), 0) + first_row
        ci = lax.broadcasted_iota(jnp.int32, (n_rows, Wp, 1), 1)
        ok = (ri >= 0) & (ri < H) & (ci >= P) & (ci < P + W)
        y = jnp.where(ok, y, 0.0).astype(jnp.bfloat16)
        dst_ref[PAD:PAD + n_rows * Wp, :] = y.reshape(n_rows * Wp, Cp)

    # ---- stage 1: dilation 2, reads the zero-padded input tile ---------------
    y1 = conv_bn_relu(lambda s, n: x_ref[0, s:s + n, :], D1, ROWS1,
                      w1_ref, bn_ref[0:1, :], bn_ref[1:2, :])
    mask_store(y1, ROWS1, r0 - (D2 + D3), y1_ref)

    # ---- stage 2: dilation 3, reads stage-1 scratch ---------------------------
    y2 = conv_bn_relu(lambda s, n: y1_ref[s:s + n, :], D2, ROWS2,
                      w2_ref, bn_ref[2:3, :], bn_ref[3:4, :])
    mask_store(y2, ROWS2, r0 - D3, y2_ref)

    # ---- stage 3: dilation 1, fused residual add ------------------------------
    y3 = conv_bn_relu(lambda s, n: y2_ref[s:s + n, :], D3, TH,
                      w3_ref, bn_ref[4:5, :], bn_ref[5:6, :])
    o_ref[0] = (y3 + xres_ref[0]).astype(o_ref.dtype)


def respath2_pallas(x_nhwc, params):
    """x_nhwc: (N, H, W, C) f32 -> (N, H, W, C) f32."""
    N, H, W, C = x_nhwc.shape
    Cp = _round_up(C, 128)
    pc = Cp - C
    TH = _pick_row_tile(H)
    R = H // TH
    NT = N * R
    Wp = W + 2 * P
    HIN = TH + 2 * HALO
    ROWS1 = TH + 2 * (D2 + D3)
    ROWS2 = TH + 2 * D3

    xf = x_nhwc.astype(jnp.float32)

    # Overlapping halo'd row tiles in framed flat layout, bf16 for the MXU.
    xpad = jnp.pad(xf, ((0, 0), (HALO, HALO), (P, P), (0, pc)))
    tiles = jnp.stack([xpad[:, r * TH: r * TH + HIN] for r in range(R)], axis=1)
    tiles = tiles.reshape(NT, HIN * Wp, Cp)
    tiles = jnp.pad(tiles, ((0, 0), (PAD, PAD), (0, 0))).astype(jnp.bfloat16)

    # Residual as a separate lane-dense flat f32 operand (contiguous in-kernel read).
    xres = jnp.pad(xf, ((0, 0), (0, 0), (P, P), (0, pc)))
    xres = xres.reshape(N, R, TH, Wp, Cp).reshape(NT, TH * Wp, Cp)

    def pad_w(w):   # (3,3,C,C) -> (3,3,Cp,Cp) bf16
        return jnp.pad(w, ((0, 0), (0, 0), (0, pc), (0, pc))).astype(jnp.bfloat16)

    def pad_v(v):   # (C,) -> (Cp,) f32
        return jnp.pad(v, (0, pc)).astype(jnp.float32)

    w1, w2, w3 = pad_w(params["w1"]), pad_w(params["w2"]), pad_w(params["w3"])
    bn = jnp.stack([pad_v(params["bn1_scale"]), pad_v(params["bn1_shift"]),
                    pad_v(params["bn2_scale"]), pad_v(params["bn2_shift"]),
                    pad_v(params["bn3_scale"]), pad_v(params["bn3_shift"])])

    kernel = functools.partial(_respath2_kernel, H=H, W=W, TH=TH, R=R)

    out_flat = pl.pallas_call(
        kernel,
        out_shape=jax.ShapeDtypeStruct((NT, TH * Wp, Cp), jnp.float32),
        grid_spec=pltpu.PrefetchScalarGridSpec(
            num_scalar_prefetch=0,
            grid=(NT,),
            in_specs=[
                pl.BlockSpec((1, PAD + HIN * Wp + PAD, Cp), lambda t: (t, 0, 0)),
                pl.BlockSpec((3, 3, Cp, Cp), lambda t: (0, 0, 0, 0)),
                pl.BlockSpec((3, 3, Cp, Cp), lambda t: (0, 0, 0, 0)),
                pl.BlockSpec((3, 3, Cp, Cp), lambda t: (0, 0, 0, 0)),
                pl.BlockSpec((6, Cp), lambda t: (0, 0)),
                pl.BlockSpec((1, TH * Wp, Cp), lambda t: (t, 0, 0)),
            ],
            out_specs=pl.BlockSpec((1, TH * Wp, Cp), lambda t: (t, 0, 0)),
            scratch_shapes=[
                pltpu.VMEM((PAD + ROWS1 * Wp + PAD, Cp), jnp.bfloat16),
                pltpu.VMEM((PAD + ROWS2 * Wp + PAD, Cp), jnp.bfloat16),
            ],
        ),
        compiler_params=pltpu.CompilerParams(
            dimension_semantics=("parallel",),
            vmem_limit_bytes=64 * 1024 * 1024),
    )(tiles, w1, w2, w3, bn, xres)

    # Frame/channel crop + un-tiling are free XLA layout ops in the wrapper.
    out = out_flat.reshape(N, R, TH, Wp, Cp)[:, :, :, P:P + W, :C]
    return out.reshape(N, H, W, C)


@jax.jit
def respath2_forward(x_nchw, params):
    x = jnp.transpose(x_nchw, (0, 2, 3, 1)).astype(jnp.float32)   # NCHW -> NHWC
    y = respath2_pallas(x, params)
    return jnp.transpose(y, (0, 3, 1, 2))                          # NHWC -> NCHW


# ----------------------------------------------------------------------------
# Deterministic synthetic parameters (BN folded for eval mode)
# ----------------------------------------------------------------------------
def make_params(key, channels):
    ks = jax.random.split(key, 6)
    eps = 1e-5

    def bn(k, c):
        kg, kb, km, kv = jax.random.split(k, 4)
        gamma = 1.0 + 0.1 * jax.random.normal(kg, (c,), jnp.float32)
        beta = 0.1 * jax.random.normal(kb, (c,), jnp.float32)
        mean = 0.1 * jax.random.normal(km, (c,), jnp.float32)
        var = jax.random.uniform(kv, (c,), jnp.float32, 0.5, 1.5)
        scale = gamma / jnp.sqrt(var + eps)
        shift = beta - mean * scale
        return scale, shift

    s1, b1 = bn(ks[3], channels)
    s2, b2 = bn(ks[4], channels)
    s3, b3 = bn(ks[5], channels)
    return {
        "w1": 0.2 * jax.random.normal(ks[0], (3, 3, channels, channels), jnp.float32),
        "w2": 0.2 * jax.random.normal(ks[1], (3, 3, channels, channels), jnp.float32),
        "w3": 0.2 * jax.random.normal(ks[2], (3, 3, channels, channels), jnp.float32),
        "bn1_scale": s1, "bn1_shift": b1,
        "bn2_scale": s2, "bn2_shift": b2,
        "bn3_scale": s3, "bn3_shift": b3,
    }


# ----------------------------------------------------------------------------
# Pure-JAX reference (no Pallas) for validation.  Conv operands are rounded to
# bf16 to mirror the kernel's MXU-native bf16 operands (accumulation in f32).
# ----------------------------------------------------------------------------
def ref_forward(x_nchw, p):
    x = jnp.transpose(x_nchw, (0, 2, 3, 1)).astype(jnp.float32)

    def block(h, w, scale, shift, d):
        hb = h.astype(jnp.bfloat16).astype(jnp.float32)
        wb = w.astype(jnp.bfloat16).astype(jnp.float32)
        c = lax.conv_general_dilated(
            hb, wb, window_strides=(1, 1), padding=((d, d), (d, d)),
            rhs_dilation=(d, d),
            dimension_numbers=("NHWC", "HWIO", "NHWC"),
            precision=lax.Precision.HIGHEST)
        return jnp.maximum(c * scale + shift, 0.0)

    y1 = block(x, p["w1"], p["bn1_scale"], p["bn1_shift"], D1)
    y2 = block(y1, p["w2"], p["bn2_scale"], p["bn2_shift"], D2)
    y3 = block(y2, p["w3"], p["bn3_scale"], p["bn3_shift"], D3)
    return jnp.transpose(x + y3, (0, 3, 1, 2))


if __name__ == "__main__":
    key = jax.random.PRNGKey(0)
    kx, kp = jax.random.split(key)

    N, C, H, W = 2, 8, 16, 16
    x = jax.random.normal(kx, (N, C, H, W), jnp.float32)
    params = make_params(kp, C)

    out = jax.block_until_ready(respath2_forward(x, params))
    ref = jax.block_until_ready(ref_forward(x, params))

    # bf16 matmul operands -> compare against a bf16-operand reference with a
    # tolerance that is far below any structural (indexing/masking) error.
    np.testing.assert_allclose(np.asarray(out), np.asarray(ref),
                               rtol=2e-2, atol=2e-2)
    assert out.shape == (N, C, H, W)
    print("KERNEL_OK")
</pallas_src>

<mosaic_0001>
module attributes {stable_mosaic.version = 11 : i64} {
  func.func @_respath2_kernel(%arg0: i32, %arg1: memref<1x496x128xbf16, #tpu.memory_space<vmem>>, %arg2: memref<3x3x128x128xbf16, #tpu.memory_space<vmem>>, %arg3: memref<3x3x128x128xbf16, #tpu.memory_space<vmem>>, %arg4: memref<3x3x128x128xbf16, #tpu.memory_space<vmem>>, %arg5: memref<6x128xf32, #tpu.memory_space<vmem>>, %arg6: memref<1x192x128xf32, #tpu.memory_space<vmem>>, %arg7: memref<1x192x128xf32, #tpu.memory_space<vmem>>, %arg8: memref<400x128xbf16, #tpu.memory_space<vmem>>, %arg9: memref<256x128xbf16, #tpu.memory_space<vmem>>) attributes {dimension_semantics = [#tpu.dimension_semantics<parallel>], iteration_bounds = array<i64: 4>, scalar_prefetch = 0 : i64, scratch_operands = 2 : i64, tpu.core_type = #tpu.core_type<tc>, window_params = [{transform_indices = @transform_0, window_bounds = array<i64: 1, 496, 128>}, {pipeline_mode = #tpu.pipeline_mode<synchronous>, transform_indices = @transform_1, window_bounds = array<i64: 3, 3, 128, 128>}, {pipeline_mode = #tpu.pipeline_mode<synchronous>, transform_indices = @transform_2, window_bounds = array<i64: 3, 3, 128, 128>}, {pipeline_mode = #tpu.pipeline_mode<synchronous>, transform_indices = @transform_3, window_bounds = array<i64: 3, 3, 128, 128>}, {pipeline_mode = #tpu.pipeline_mode<synchronous>, transform_indices = @transform_4, window_bounds = array<i64: 6, 128>}, {transform_indices = @transform_5, window_bounds = array<i64: 1, 192, 128>}, {transform_indices = @transform_6, window_bounds = array<i64: 1, 192, 128>}]} {
    %c2_i32 = arith.constant 2 : i32
    %c0_i32 = arith.constant 0 : i32
    %0 = arith.cmpi eq, %c2_i32, %c0_i32 : i32
    %c1_i32 = arith.constant 1 : i32
    %1 = arith.select %0, %c1_i32, %c2_i32 : i32
    %2 = arith.remsi %arg0, %1 : i32
    %c0_i32_0 = arith.constant 0 : i32
    %3 = arith.cmpi ne, %2, %c0_i32_0 : i32
    %c0_i32_1 = arith.constant 0 : i32
    %4 = arith.cmpi slt, %2, %c0_i32_1 : i32
    %c0_i32_2 = arith.constant 0 : i32
    %5 = arith.cmpi slt, %1, %c0_i32_2 : i32
    %6 = arith.xori %4, %5 : i1
    %7 = arith.andi %6, %3 : i1
    %8 = arith.addi %2, %1 : i32
    %9 = arith.select %7, %8, %2 : i32
    %c8_i32 = arith.constant 8 : i32
    %10 = arith.muli %9, %c8_i32 : i32
    %cst = arith.constant 0.000000e+00 : bf16
    %11 = vector.broadcast %cst : bf16 to vector<8x128xbf16>
    %c0 = arith.constant 0 : index
    %c0_3 = arith.constant 0 : index
    %12 = vector.load %arg8[%c0, %c0_3] : memref<400x128xbf16, #tpu.memory_space<vmem>>, vector<8x128xbf16>
    tpu.vector_store %arg8[%c0, %c0_3], %11 {strides = array<i32>} : memref<400x128xbf16, #tpu.memory_space<vmem>>, vector<8x128xbf16>,
    %c392 = arith.constant 392 : index
    %c0_4 = arith.constant 0 : index
    %13 = vector.load %arg8[%c392, %c0_4] : memref<400x128xbf16, #tpu.memory_space<vmem>>, vector<8x128xbf16>
    tpu.vector_store %arg8[%c392, %c0_4], %11 {strides = array<i32>} : memref<400x128xbf16, #tpu.memory_space<vmem>>, vector<8x128xbf16>,
    %c0_5 = arith.constant 0 : index
    %c0_6 = arith.constant 0 : index
    %14 = vector.load %arg9[%c0_5, %c0_6] : memref<256x128xbf16, #tpu.memory_space<vmem>>, vector<8x128xbf16>
    tpu.vector_store %arg9[%c0_5, %c0_6], %11 {strides = array<i32>} : memref<256x128xbf16, #tpu.memory_space<vmem>>, vector<8x128xbf16>,
    %c248 = arith.constant 248 : index
    %c0_7 = arith.constant 0 : index
    %15 = vector.load %arg9[%c248, %c0_7] : memref<256x128xbf16, #tpu.memory_space<vmem>>, vector<8x128xbf16>
    tpu.vector_store %arg9[%c248, %c0_7], %11 {strides = array<i32>} : memref<256x128xbf16, #tpu.memory_space<vmem>>, vector<8x128xbf16>,
    %c0_8 = arith.constant 0 : index
    %c0_9 = arith.constant 0 : index
    %16 = vector.load %arg5[%c0_8, %c0_9] : memref<6x128xf32, #tpu.memory_space<vmem>>, vector<1x128xf32>
    %c1 = arith.constant 1 : index
    %c0_10 = arith.constant 0 : index
    %17 = vector.load %arg5[%c1, %c0_10] : memref<6x128xf32, #tpu.memory_space<vmem>>, vector<1x128xf32>
    %c0_11 = arith.constant 0 : index
    %c6 = arith.constant 6 : index
    %c0_12 = arith.constant 0 : index
    %18 = vector.load %arg1[%c0_11, %c6, %c0_12] : memref<1x496x128xbf16, #tpu.memory_space<vmem>>, vector<1x384x128xbf16>
    %19 = vector.shape_cast %18 : vector<1x384x128xbf16> to vector<384x128xbf16>
    %c0_13 = arith.constant 0 : index
    %c0_14 = arith.constant 0 : index
    %c0_15 = arith.constant 0 : index
    %c0_16 = arith.constant 0 : index
    %20 = vector.load %arg2[%c0_13, %c0_14, %c0_15, %c0_16] : memref<3x3x128x128xbf16, #tpu.memory_space<vmem>>, vector<1x1x128x128xbf16>
    %21 = vector.shape_cast %20 : vector<1x1x128x128xbf16> to vector<128x128xbf16>
    %cst_17 = arith.constant dense<0.000000e+00> : vector<384x128xf32>
    %22 = tpu.matmul %19, %21, %cst_17 {dimension_numbers = #tpu.dot_dimension_numbers<[1], [0], [0], [1], [0, 0, 1, 1], [], []>} : vector<384x128xbf16>, vector<128x128xbf16>, vector<384x128xf32> -> vector<384x128xf32>
    %c0_18 = arith.constant 0 : index
    %c8 = arith.constant 8 : index
    %c0_19 = arith.constant 0 : index
    %23 = vector.load %arg1[%c0_18, %c8, %c0_19] : memref<1x496x128xbf16, #tpu.memory_space<vmem>>, vector<1x384x128xbf16>
    %24 = vector.shape_cast %23 : vector<1x384x128xbf16> to vector<384x128xbf16>
    %c0_20 = arith.constant 0 : index
    %c1_21 = arith.constant 1 : index
    %c0_22 = arith.constant 0 : index
    %c0_23 = arith.constant 0 : index
    %25 = vector.load %arg2[%c0_20, %c1_21, %c0_22, %c0_23] : memref<3x3x128x128xbf16, #tpu.memory_space<vmem>>, vector<1x1x128x128xbf16>
    %26 = vector.shape_cast %25 : vector<1x1x128x128xbf16> to vector<128x128xbf16>
    %cst_24 = arith.constant dense<0.000000e+00> : vector<384x128xf32>
    %27 = tpu.matmul %24, %26, %cst_24 {dimension_numbers = #tpu.dot_dimension_numbers<[1], [0], [0], [1], [0, 0, 1, 1], [], []>} : vector<384x128xbf16>, vector<128x128xbf16>, vector<384x128xf32> -> vector<384x128xf32>
    %28 = arith.addf %22, %27 : vector<384x128xf32>
    %c0_25 = arith.constant 0 : index
    %c10 = arith.constant 10 : index
    %c0_26 = arith.constant 0 : index
    %29 = vector.load %arg1[%c0_25, %c10, %c0_26] : memref<1x496x128xbf16, #tpu.memory_space<vmem>>, vector<1x384x128xbf16>
    %30 = vector.shape_cast %29 : vector<1x384x128xbf16> to vector<384x128xbf16>
    %c0_27 = arith.constant 0 : index
    %c2 = arith.constant 2 : index
    %c0_28 = arith.constant 0 : index
    %c0_29 = arith.constant 0 : index
    %31 = vector.load %arg2[%c0_27, %c2, %c0_28, %c0_29] : memref<3x3x128x128xbf16, #tpu.memory_space<vmem>>, vector<1x1x128x128xbf16>
    %32 = vector.shape_cast %31 : vector<1x1x128x128xbf16> to vector<128x128xbf16>
    %cst_30 = arith.constant dense<0.000000e+00> : vector<384x128xf32>
    %33 = tpu.matmul %30, %32, %cst_30 {dimension_numbers = #tpu.dot_dimension_numbers<[1], [0], [0], [1], [0, 0, 1, 1], [], []>} : vector<384x128xbf16>, vector<128x128xbf16>, vector<384x128xf32> -> vector<384x128xf32>
    %34 = arith.addf %28, %33 : vector<384x128xf32>
    %c0_31 = arith.constant 0 : index
    %c54 = arith.constant 54 : index
    %c0_32 = arith.constant 0 : index
    %35 = vector.load %arg1[%c0_31, %c54, %c0_32] : memref<1x496x128xbf16, #tpu.memory_space<vmem>>, vector<1x384x128xbf16>
    %36 = vector.shape_cast %35 : vector<1x384x128xbf16> to vector<384x128xbf16>
    %c1_33 = arith.constant 1 : index
    %c0_34 = arith.constant 0 : index
    %c0_35 = arith.constant 0 : index
    %c0_36 = arith.constant 0 : index
    %37 = vector.load %arg2[%c1_33, %c0_34, %c0_35, %c0_36] : memref<3x3x128x128xbf16, #tpu.memory_space<vmem>>, vector<1x1x128x128xbf16>
    %38 = vector.shape_cast %37 : vector<1x1x128x128xbf16> to vector<128x128xbf16>
    %cst_37 = arith.constant dense<0.000000e+00> : vector<384x128xf32>
    %39 = tpu.matmul %36, %38, %cst_37 {dimension_numbers = #tpu.dot_dimension_numbers<[1], [0], [0], [1], [0, 0, 1, 1], [], []>} : vector<384x128xbf16>, vector<128x128xbf16>, vector<384x128xf32> -> vector<384x128xf32>
    %40 = arith.addf %34, %39 : vector<384x128xf32>
    %c0_38 = arith.constant 0 : index
    %c56 = arith.constant 56 : index
    %c0_39 = arith.constant 0 : index
    %41 = vector.load %arg1[%c0_38, %c56, %c0_39] : memref<1x496x128xbf16, #tpu.memory_space<vmem>>, vector<1x384x128xbf16>
    %42 = vector.shape_cast %41 : vector<1x384x128xbf16> to vector<384x128xbf16>
    %c1_40 = arith.constant 1 : index
    %c1_41 = arith.constant 1 : index
    %c0_42 = arith.constant 0 : index
    %c0_43 = arith.constant 0 : index
    %43 = vector.load %arg2[%c1_40, %c1_41, %c0_42, %c0_43] : memref<3x3x128x128xbf16, #tpu.memory_space<vmem>>, vector<1x1x128x128xbf16>
    %44 = vector.shape_cast %43 : vector<1x1x128x128xbf16> to vector<128x128xbf16>
    %cst_44 = arith.constant dense<0.000000e+00> : vector<384x128xf32>
    %45 = tpu.matmul %42, %44, %cst_44 {dimension_numbers = #tpu.dot_dimension_numbers<[1], [0], [0], [1], [0, 0, 1, 1], [], []>} : vector<384x128xbf16>, vector<128x128xbf16>, vector<384x128xf32> -> vector<384x128xf32>
    %46 = arith.addf %40, %45 : vector<384x128xf32>
    %c0_45 = arith.constant 0 : index
    %c58 = arith.constant 58 : index
    %c0_46 = arith.constant 0 : index
    %47 = vector.load %arg1[%c0_45, %c58, %c0_46] : memref<1x496x128xbf16, #tpu.memory_space<vmem>>, vector<1x384x128xbf16>
    %48 = vector.shape_cast %47 : vector<1x384x128xbf16> to vector<384x128xbf16>
    %c1_47 = arith.constant 1 : index
    %c2_48 = arith.constant 2 : index
    %c0_49 = arith.constant 0 : index
    %c0_50 = arith.constant 0 : index
    %49 = vector.load %arg2[%c1_47, %c2_48, %c0_49, %c0_50] : memref<3x3x128x128xbf16, #tpu.memory_space<vmem>>, vector<1x1x128x128xbf16>
    %50 = vector.shape_cast %49 : vector<1x1x128x128xbf16> to vector<128x128xbf16>
    %cst_51 = arith.constant dense<0.000000e+00> : vector<384x128xf32>
    %51 = tpu.matmul %48, %50, %cst_51 {dimension_numbers = #tpu.dot_dimension_numbers<[1], [0], [0], [1], [0, 0, 1, 1], [], []>} : vector<384x128xbf16>, vector<128x128xbf16>, vector<384x128xf32> -> vector<384x128xf32>
    %52 = arith.addf %46, %51 : vector<384x128xf32>
    %c0_52 = arith.constant 0 : index
    %c102 = arith.constant 102 : index
    %c0_53 = arith.constant 0 : index
    %53 = vector.load %arg1[%c0_52, %c102, %c0_53] : memref<1x496x128xbf16, #tpu.memory_space<vmem>>, vector<1x384x128xbf16>
    %54 = vector.shape_cast %53 : vector<1x384x128xbf16> to vector<384x128xbf16>
    %c2_54 = arith.constant 2 : index
    %c0_55 = arith.constant 0 : index
    %c0_56 = arith.constant 0 : index
    %c0_57 = arith.constant 0 : index
    %55 = vector.load %arg2[%c2_54, %c0_55, %c0_56, %c0_57] : memref<3x3x128x128xbf16, #tpu.memory_space<vmem>>, vector<1x1x128x128xbf16>
    %56 = vector.shape_cast %55 : vector<1x1x128x128xbf16> to vector<128x128xbf16>
    %cst_58 = arith.constant dense<0.000000e+00> : vector<384x128xf32>
    %57 = tpu.matmul %54, %56, %cst_58 {dimension_numbers = #tpu.dot_dimension_numbers<[1], [0], [0], [1], [0, 0, 1, 1], [], []>} : vector<384x128xbf16>, vector<128x128xbf16>, vector<384x128xf32> -> vector<384x128xf32>
    %58 = arith.addf %52, %57 : vector<384x128xf32>
    %c0_59 = arith.constant 0 : index
    %c104 = arith.constant 104 : index
    %c0_60 = arith.constant 0 : index
    %59 = vector.load %arg1[%c0_59, %c104, %c0_60] : memref<1x496x128xbf16, #tpu.memory_space<vmem>>, vector<1x384x128xbf16>
    %60 = vector.shape_cast %59 : vector<1x384x128xbf16> to vector<384x128xbf16>
    %c2_61 = arith.constant 2 : index
    %c1_62 = arith.constant 1 : index
    %c0_63 = arith.constant 0 : index
    %c0_64 = arith.constant 0 : index
    %61 = vector.load %arg2[%c2_61, %c1_62, %c0_63, %c0_64] : memref<3x3x128x128xbf16, #tpu.memory_space<vmem>>, vector<1x1x128x128xbf16>
    %62 = vector.shape_cast %61 : vector<1x1x128x128xbf16> to vector<128x128xbf16>
    %cst_65 = arith.constant dense<0.000000e+00> : vector<384x128xf32>
    %63 = tpu.matmul %60, %62, %cst_65 {dimension_numbers = #tpu.dot_dimension_numbers<[1], [0], [0], [1], [0, 0, 1, 1], [], []>} : vector<384x128xbf16>, vector<128x128xbf16>, vector<384x128xf32> -> vector<384x128xf32>
    %64 = arith.addf %58, %63 : vector<384x128xf32>
    %c0_66 = arith.constant 0 : index
    %c106 = arith.constant 106 : index
    %c0_67 = arith.constant 0 : index
    %65 = vector.load %arg1[%c0_66, %c106, %c0_67] : memref<1x496x128xbf16, #tpu.memory_space<vmem>>, vector<1x384x128xbf16>
    %66 = vector.shape_cast %65 : vector<1x384x128xbf16> to vector<384x128xbf16>
    %c2_68 = arith.constant 2 : index
    %c2_69 = arith.constant 2 : index
    %c0_70 = arith.constant 0 : index
    %c0_71 = arith.constant 0 : index
    %67 = vector.load %arg2[%c2_68, %c2_69, %c0_70, %c0_71] : memref<3x3x128x128xbf16, #tpu.memory_space<vmem>>, vector<1x1x128x128xbf16>
    %68 = vector.shape_cast %67 : vector<1x1x128x128xbf16> to vector<128x128xbf16>
    %cst_72 = arith.constant dense<0.000000e+00> : vector<384x128xf32>
    %69 = tpu.matmul %66, %68, %cst_72 {dimension_numbers = #tpu.dot_dimension_numbers<[1], [0], [0], [1], [0, 0, 1, 1], [], []>} : vector<384x128xbf16>, vector<128x128xbf16>, vector<384x128xf32> -> vector<384x128xf32>
    %70 = arith.addf %64, %69 : vector<384x128xf32>
    %71 = vector.broadcast %16 : vector<1x128xf32> to vector<384x128xf32>
    %72 = arith.mulf %70, %71 : vector<384x128xf32>
    %73 = vector.broadcast %17 : vector<1x128xf32> to vector<384x128xf32>
    %74 = arith.addf %72, %73 : vector<384x128xf32>
    %cst_73 = arith.constant 0.000000e+00 : f32
    %75 = vector.broadcast %cst_73 : f32 to vector<384x128xf32>
    %76 = arith.maximumf %74, %75 : vector<384x128xf32>
    %c4_i32 = arith.constant 4 : i32
    %77 = arith.subi %10, %c4_i32 : i32
    %78 = vector.shape_cast %76 : vector<384x128xf32> to vector<16x24x128xf32>
    %79 = tpu.iota {dimensions = array<i32: 0>} : vector<16x24x1xi32>
    %80 = vector.broadcast %77 : i32 to vector<16x24x1xi32>
    %81 = arith.addi %79, %80 : vector<16x24x1xi32>
    %82 = tpu.iota {dimensions = array<i32: 1>} : vector<16x24x1xi32>
    %c0_i32_74 = arith.constant 0 : i32
    %83 = vector.broadcast %c0_i32_74 : i32 to vector<16x24x1xi32>
    %84 = arith.cmpi sge, %81, %83 : vector<16x24x1xi32>
    %c16_i32 = arith.constant 16 : i32
    %85 = vector.broadcast %c16_i32 : i32 to vector<16x24x1xi32>
    %86 = arith.cmpi slt, %81, %85 : vector<16x24x1xi32>
    %87 = arith.andi %84, %86 : vector<16x24x1xi1>
    %c4_i32_75 = arith.constant 4 : i32
    %88 = vector.broadcast %c4_i32_75 : i32 to vector<16x24x1xi32>
    %89 = arith.cmpi sge, %82, %88 : vector<16x24x1xi32>
    %90 = arith.andi %87, %89 : vector<16x24x1xi1>
    %c20_i32 = arith.constant 20 : i32
    %91 = vector.broadcast %c20_i32 : i32 to vector<16x24x1xi32>
    %92 = arith.cmpi slt, %82, %91 : vector<16x24x1xi32>
    %93 = arith.andi %90, %92 : vector<16x24x1xi1>
    %cst_76 = arith.constant 0.000000e+00 : f32
    %94 = vector.shape_cast %93 : vector<16x24x1xi1> to vector<16x24x1xi1>
    %95 = vector.broadcast %94 : vector<16x24x1xi1> to vector<16x24x128xi1>
    %96 = vector.broadcast %cst_76 : f32 to vector<16x24x128xf32>
    %97 = arith.select %95, %78, %96 : vector<16x24x128xi1>, vector<16x24x128xf32>
    %98 = arith.truncf %97 : vector<16x24x128xf32> to vector<16x24x128xbf16>
    %99 = vector.shape_cast %98 : vector<16x24x128xbf16> to vector<384x128xbf16>
    %c8_77 = arith.constant 8 : index
    %c0_78 = arith.constant 0 : index
    %100 = vector.load %arg8[%c8_77, %c0_78] : memref<400x128xbf16, #tpu.memory_space<vmem>>, vector<384x128xbf16>
    tpu.vector_store %arg8[%c8_77, %c0_78], %99 {strides = array<i32>} : memref<400x128xbf16, #tpu.memory_space<vmem>>, vector<384x128xbf16>,
    %c2_79 = arith.constant 2 : index
    %c0_80 = arith.constant 0 : index
    %101 = vector.load %arg5[%c2_79, %c0_80] : memref<6x128xf32, #tpu.memory_space<vmem>>, vector<1x128xf32>
    %c3 = arith.constant 3 : index
    %c0_81 = arith.constant 0 : index
    %102 = vector.load %arg5[%c3, %c0_81] : memref<6x128xf32, #tpu.memory_space<vmem>>, vector<1x128xf32>
    %c5 = arith.constant 5 : index
    %c0_82 = arith.constant 0 : index
    %103 = vector.load %arg8[%c5, %c0_82] : memref<400x128xbf16, #tpu.memory_space<vmem>>, vector<240x128xbf16>
    %c0_83 = arith.constant 0 : index
    %c0_84 = arith.constant 0 : index
    %c0_85 = arith.constant 0 : index
    %c0_86 = arith.constant 0 : index
    %104 = vector.load %arg3[%c0_83, %c0_84, %c0_85, %c0_86] : memref<3x3x128x128xbf16, #tpu.memory_space<vmem>>, vector<1x1x128x128xbf16>
    %105 = vector.shape_cast %104 : vector<1x1x128x128xbf16> to vector<128x128xbf16>
    %cst_87 = arith.constant dense<0.000000e+00> : vector<240x128xf32>
    %106 = tpu.matmul %103, %105, %cst_87 {dimension_numbers = #tpu.dot_dimension_numbers<[1], [0], [0], [1], [0, 0, 1, 1], [], []>} : vector<240x128xbf16>, vector<128x128xbf16>, vector<240x128xf32> -> vector<240x128xf32>
    %c8_88 = arith.constant 8 : index
    %c0_89 = arith.constant 0 : index
    %107 = vector.load %arg8[%c8_88, %c0_89] : memref<400x128xbf16, #tpu.memory_space<vmem>>, vector<240x128xbf16>
    %c0_90 = arith.constant 0 : index
    %c1_91 = arith.constant 1 : index
    %c0_92 = arith.constant 0 : index
    %c0_93 = arith.constant 0 : index
    %108 = vector.load %arg3[%c0_90, %c1_91, %c0_92, %c0_93] : memref<3x3x128x128xbf16, #tpu.memory_space<vmem>>, vector<1x1x128x128xbf16>
    %109 = vector.shape_cast %108 : vector<1x1x128x128xbf16> to vector<128x128xbf16>
    %cst_94 = arith.constant dense<0.000000e+00> : vector<240x128xf32>
    %110 = tpu.matmul %107, %109, %cst_94 {dimension_numbers = #tpu.dot_dimension_numbers<[1], [0], [0], [1], [0, 0, 1, 1], [], []>} : vector<240x128xbf16>, vector<128x128xbf16>, vector<240x128xf32> -> vector<240x128xf32>
    %111 = arith.addf %106, %110 : vector<240x128xf32>
    %c11 = arith.constant 11 : index
    %c0_95 = arith.constant 0 : index
    %112 = vector.load %arg8[%c11, %c0_95] : memref<400x128xbf16, #tpu.memory_space<vmem>>, vector<240x128xbf16>
    %c0_96 = arith.constant 0 : index
    %c2_97 = arith.constant 2 : index
    %c0_98 = arith.constant 0 : index
    %c0_99 = arith.constant 0 : index
    %113 = vector.load %arg3[%c0_96, %c2_97, %c0_98, %c0_99] : memref<3x3x128x128xbf16, #tpu.memory_space<vmem>>, vector<1x1x128x128xbf16>
    %114 = vector.shape_cast %113 : vector<1x1x128x128xbf16> to vector<128x128xbf16>
    %cst_100 = arith.constant dense<0.000000e+00> : vector<240x128xf32>
    %115 = tpu.matmul %112, %114, %cst_100 {dimension_numbers = #tpu.dot_dimension_numbers<[1], [0], [0], [1], [0, 0, 1, 1], [], []>} : vector<240x128xbf16>, vector<128x128xbf16>, vector<240x128xf32> -> vector<240x128xf32>
    %116 = arith.addf %111, %115 : vector<240x128xf32>
    %c77 = arith.constant 77 : index
    %c0_101 = arith.constant 0 : index
    %117 = vector.load %arg8[%c77, %c0_101] : memref<400x128xbf16, #tpu.memory_space<vmem>>, vector<240x128xbf16>
    %c1_102 = arith.constant 1 : index
    %c0_103 = arith.constant 0 : index
    %c0_104 = arith.constant 0 : index
    %c0_105 = arith.constant 0 : index
    %118 = vector.load %arg3[%c1_102, %c0_103, %c0_104, %c0_105] : memref<3x3x128x128xbf16, #tpu.memory_space<vmem>>, vector<1x1x128x128xbf16>
    %119 = vector.shape_cast %118 : vector<1x1x128x128xbf16> to vector<128x128xbf16>
    %cst_106 = arith.constant dense<0.000000e+00> : vector<240x128xf32>
    %120 = tpu.matmul %117, %119, %cst_106 {dimension_numbers = #tpu.dot_dimension_numbers<[1], [0], [0], [1], [0, 0, 1, 1], [], []>} : vector<240x128xbf16>, vector<128x128xbf16>, vector<240x128xf32> -> vector<240x128xf32>
    %121 = arith.addf %116, %120 : vector<240x128xf32>
    %c80 = arith.constant 80 : index
    %c0_107 = arith.constant 0 : index
    %122 = vector.load %arg8[%c80, %c0_107] : memref<400x128xbf16, #tpu.memory_space<vmem>>, vector<240x128xbf16>
    %c1_108 = arith.constant 1 : index
    %c1_109 = arith.constant 1 : index
    %c0_110 = arith.constant 0 : index
    %c0_111 = arith.constant 0 : index
    %123 = vector.load %arg3[%c1_108, %c1_109, %c0_110, %c0_111] : memref<3x3x128x128xbf16, #tpu.memory_space<vmem>>, vector<1x1x128x128xbf16>
    %124 = vector.shape_cast %123 : vector<1x1x128x128xbf16> to vector<128x128xbf16>
    %cst_112 = arith.constant dense<0.000000e+00> : vector<240x128xf32>
    %125 = tpu.matmul %122, %124, %cst_112 {dimension_numbers = #tpu.dot_dimension_numbers<[1], [0], [0], [1], [0, 0, 1, 1], [], []>} : vector<240x128xbf16>, vector<128x128xbf16>, vector<240x128xf32> -> vector<240x128xf32>
    %126 = arith.addf %121, %125 : vector<240x128xf32>
    %c83 = arith.constant 83 : index
    %c0_113 = arith.constant 0 : index
    %127 = vector.load %arg8[%c83, %c0_113] : memref<400x128xbf16, #tpu.memory_space<vmem>>, vector<240x128xbf16>
    %c1_114 = arith.constant 1 : index
    %c2_115 = arith.constant 2 : index
    %c0_116 = arith.constant 0 : index
    %c0_117 = arith.constant 0 : index
    %128 = vector.load %arg3[%c1_114, %c2_115, %c0_116, %c0_117] : memref<3x3x128x128xbf16, #tpu.memory_space<vmem>>, vector<1x1x128x128xbf16>
    %129 = vector.shape_cast %128 : vector<1x1x128x128xbf16> to vector<128x128xbf16>
    %cst_118 = arith.constant dense<0.000000e+00> : vector<240x128xf32>
    %130 = tpu.matmul %127, %129, %cst_118 {dimension_numbers = #tpu.dot_dimension_numbers<[1], [0], [0], [1], [0, 0, 1, 1], [], []>} : vector<240x128xbf16>, vector<128x128xbf16>, vector<240x128xf32> -> vector<240x128xf32>
    %131 = arith.addf %126, %130 : vector<240x128xf32>
    %c149 = arith.constant 149 : index
    %c0_119 = arith.constant 0 : index
    %132 = vector.load %arg8[%c149, %c0_119] : memref<400x128xbf16, #tpu.memory_space<vmem>>, vector<240x128xbf16>
    %c2_120 = arith.constant 2 : index
    %c0_121 = arith.constant 0 : index
    %c0_122 = arith.constant 0 : index
    %c0_123 = arith.constant 0 : index
    %133 = vector.load %arg3[%c2_120, %c0_121, %c0_122, %c0_123] : memref<3x3x128x128xbf16, #tpu.memory_space<vmem>>, vector<1x1x128x128xbf16>
    %134 = vector.shape_cast %133 : vector<1x1x128x128xbf16> to vector<128x128xbf16>
    %cst_124 = arith.constant dense<0.000000e+00> : vector<240x128xf32>
    %135 = tpu.matmul %132, %134, %cst_124 {dimension_numbers = #tpu.dot_dimension_numbers<[1], [0], [0], [1], [0, 0, 1, 1], [], []>} : vector<240x128xbf16>, vector<128x128xbf16>, vector<240x128xf32> -> vector<240x128xf32>
    %136 = arith.addf %131, %135 : vector<240x128xf32>
    %c152 = arith.constant 152 : index
    %c0_125 = arith.constant 0 : index
    %137 = vector.load %arg8[%c152, %c0_125] : memref<400x128xbf16, #tpu.memory_space<vmem>>, vector<240x128xbf16>
    %c2_126 = arith.constant 2 : index
    %c1_127 = arith.constant 1 : index
    %c0_128 = arith.constant 0 : index
    %c0_129 = arith.constant 0 : index
    %138 = vector.load %arg3[%c2_126, %c1_127, %c0_128, %c0_129] : memref<3x3x128x128xbf16, #tpu.memory_space<vmem>>, vector<1x1x128x128xbf16>
    %139 = vector.shape_cast %138 : vector<1x1x128x128xbf16> to vector<128x128xbf16>
    %cst_130 = arith.constant dense<0.000000e+00> : vector<240x128xf32>
    %140 = tpu.matmul %137, %139, %cst_130 {dimension_numbers = #tpu.dot_dimension_numbers<[1], [0], [0], [1], [0, 0, 1, 1], [], []>} : vector<240x128xbf16>, vector<128x128xbf16>, vector<240x128xf32> -> vector<240x128xf32>
    %141 = arith.addf %136, %140 : vector<240x128xf32>
    %c155 = arith.constant 155 : index
    %c0_131 = arith.constant 0 : index
    %142 = vector.load %arg8[%c155, %c0_131] : memref<400x128xbf16, #tpu.memory_space<vmem>>, vector<240x128xbf16>
    %c2_132 = arith.constant 2 : index
    %c2_133 = arith.constant 2 : index
    %c0_134 = arith.constant 0 : index
    %c0_135 = arith.constant 0 : index
    %143 = vector.load %arg3[%c2_132, %c2_133, %c0_134, %c0_135] : memref<3x3x128x128xbf16, #tpu.memory_space<vmem>>, vector<1x1x128x128xbf16>
    %144 = vector.shape_cast %143 : vector<1x1x128x128xbf16> to vector<128x128xbf16>
    %cst_136 = arith.constant dense<0.000000e+00> : vector<240x128xf32>
    %145 = tpu.matmul %142, %144, %cst_136 {dimension_numbers = #tpu.dot_dimension_numbers<[1], [0], [0], [1], [0, 0, 1, 1], [], []>} : vector<240x128xbf16>, vector<128x128xbf16>, vector<240x128xf32> -> vector<240x128xf32>
    %146 = arith.addf %141, %145 : vector<240x128xf32>
    %147 = vector.broadcast %101 : vector<1x128xf32> to vector<240x128xf32>
    %148 = arith.mulf %146, %147 : vector<240x128xf32>
    %149 = vector.broadcast %102 : vector<1x128xf32> to vector<240x128xf32>
    %150 = arith.addf %148, %149 : vector<240x128xf32>
    %cst_137 = arith.constant 0.000000e+00 : f32
    %151 = vector.broadcast %cst_137 : f32 to vector<240x128xf32>
    %152 = arith.maximumf %150, %151 : vector<240x128xf32>
    %c1_i32_138 = arith.constant 1 : i32
    %153 = arith.subi %10, %c1_i32_138 : i32
    %154 = vector.shape_cast %152 : vector<240x128xf32> to vector<10x24x128xf32>
    %155 = tpu.iota {dimensions = array<i32: 0>} : vector<10x24x1xi32>
    %156 = vector.broadcast %153 : i32 to vector<10x24x1xi32>
    %157 = arith.addi %155, %156 : vector<10x24x1xi32>
    %158 = tpu.iota {dimensions = array<i32: 1>} : vector<10x24x1xi32>
    %c0_i32_139 = arith.constant 0 : i32
    %159 = vector.broadcast %c0_i32_139 : i32 to vector<10x24x1xi32>
    %160 = arith.cmpi sge, %157, %159 : vector<10x24x1xi32>
    %c16_i32_140 = arith.constant 16 : i32
    %161 = vector.broadcast %c16_i32_140 : i32 to vector<10x24x1xi32>
    %162 = arith.cmpi slt, %157, %161 : vector<10x24x1xi32>
    %163 = arith.andi %160, %162 : vector<10x24x1xi1>
    %c4_i32_141 = arith.constant 4 : i32
    %164 = vector.broadcast %c4_i32_141 : i32 to vector<10x24x1xi32>
    %165 = arith.cmpi sge, %158, %164 : vector<10x24x1xi32>
    %166 = arith.andi %163, %165 : vector<10x24x1xi1>
    %c20_i32_142 = arith.constant 20 : i32
    %167 = vector.broadcast %c20_i32_142 : i32 to vector<10x24x1xi32>
    %168 = arith.cmpi slt, %158, %167 : vector<10x24x1xi32>
    %169 = arith.andi %166, %168 : vector<10x24x1xi1>
    %cst_143 = arith.constant 0.000000e+00 : f32
    %170 = vector.shape_cast %169 : vector<10x24x1xi1> to vector<10x24x1xi1>
    %171 = vector.broadcast %170 : vector<10x24x1xi1> to vector<10x24x128xi1>
    %172 = vector.broadcast %cst_143 : f32 to vector<10x24x128xf32>
    %173 = arith.select %171, %154, %172 : vector<10x24x128xi1>, vector<10x24x128xf32>
    %174 = arith.truncf %173 : vector<10x24x128xf32> to vector<10x24x128xbf16>
    %175 = vector.shape_cast %174 : vector<10x24x128xbf16> to vector<240x128xbf16>
    %c8_144 = arith.constant 8 : index
    %c0_145 = arith.constant 0 : index
    %176 = vector.load %arg9[%c8_144, %c0_145] : memref<256x128xbf16, #tpu.memory_space<vmem>>, vector<240x128xbf16>
    tpu.vector_store %arg9[%c8_144, %c0_145], %175 {strides = array<i32>} : memref<256x128xbf16, #tpu.memory_space<vmem>>, vector<240x128xbf16>,
    %c4 = arith.constant 4 : index
    %c0_146 = arith.constant 0 : index
    %177 = vector.load %arg5[%c4, %c0_146] : memref<6x128xf32, #tpu.memory_space<vmem>>, vector<1x128xf32>
    %c5_147 = arith.constant 5 : index
    %c0_148 = arith.constant 0 : index
    %178 = vector.load %arg5[%c5_147, %c0_148] : memref<6x128xf32, #tpu.memory_space<vmem>>, vector<1x128xf32>
    %c7 = arith.constant 7 : index
    %c0_149 = arith.constant 0 : index
    %179 = vector.load %arg9[%c7, %c0_149] : memref<256x128xbf16, #tpu.memory_space<vmem>>, vector<192x128xbf16>
    %c0_150 = arith.constant 0 : index
    %c0_151 = arith.constant 0 : index
    %c0_152 = arith.constant 0 : index
    %c0_153 = arith.constant 0 : index
    %180 = vector.load %arg4[%c0_150, %c0_151, %c0_152, %c0_153] : memref<3x3x128x128xbf16, #tpu.memory_space<vmem>>, vector<1x1x128x128xbf16>
    %181 = vector.shape_cast %180 : vector<1x1x128x128xbf16> to vector<128x128xbf16>
    %cst_154 = arith.constant dense<0.000000e+00> : vector<192x128xf32>
    %182 = tpu.matmul %179, %181, %cst_154 {dimension_numbers = #tpu.dot_dimension_numbers<[1], [0], [0], [1], [0, 0, 1, 1], [], []>} : vector<192x128xbf16>, vector<128x128xbf16>, vector<192x128xf32> -> vector<192x128xf32>
    %c8_155 = arith.constant 8 : index
    %c0_156 = arith.constant 0 : index
    %183 = vector.load %arg9[%c8_155, %c0_156] : memref<256x128xbf16, #tpu.memory_space<vmem>>, vector<192x128xbf16>
    %c0_157 = arith.constant 0 : index
    %c1_158 = arith.constant 1 : index
    %c0_159 = arith.constant 0 : index
    %c0_160 = arith.constant 0 : index
    %184 = vector.load %arg4[%c0_157, %c1_158, %c0_159, %c0_160] : memref<3x3x128x128xbf16, #tpu.memory_space<vmem>>, vector<1x1x128x128xbf16>
    %185 = vector.shape_cast %184 : vector<1x1x128x128xbf16> to vector<128x128xbf16>
    %cst_161 = arith.constant dense<0.000000e+00> : vector<192x128xf32>
    %186 = tpu.matmul %183, %185, %cst_161 {dimension_numbers = #tpu.dot_dimension_numbers<[1], [0], [0], [1], [0, 0, 1, 1], [], []>} : vector<192x128xbf16>, vector<128x128xbf16>, vector<192x128xf32> -> vector<192x128xf32>
    %187 = arith.addf %182, %186 : vector<192x128xf32>
    %c9 = arith.constant 9 : index
    %c0_162 = arith.constant 0 : index
    %188 = vector.load %arg9[%c9, %c0_162] : memref<256x128xbf16, #tpu.memory_space<vmem>>, vector<192x128xbf16>
    %c0_163 = arith.constant 0 : index
    %c2_164 = arith.constant 2 : index
    %c0_165 = arith.constant 0 : index
    %c0_166 = arith.constant 0 : index
    %189 = vector.load %arg4[%c0_163, %c2_164, %c0_165, %c0_166] : memref<3x3x128x128xbf16, #tpu.memory_space<vmem>>, vector<1x1x128x128xbf16>
    %190 = vector.shape_cast %189 : vector<1x1x128x128xbf16> to vector<128x128xbf16>
    %cst_167 = arith.constant dense<0.000000e+00> : vector<192x128xf32>
    %191 = tpu.matmul %188, %190, %cst_167 {dimension_numbers = #tpu.dot_dimension_numbers<[1], [0], [0], [1], [0, 0, 1, 1], [], []>} : vector<192x128xbf16>, vector<128x128xbf16>, vector<192x128xf32> -> vector<192x128xf32>
    %192 = arith.addf %187, %191 : vector<192x128xf32>
    %c31 = arith.constant 31 : index
    %c0_168 = arith.constant 0 : index
    %193 = vector.load %arg9[%c31, %c0_168] : memref<256x128xbf16, #tpu.memory_space<vmem>>, vector<192x128xbf16>
    %c1_169 = arith.constant 1 : index
    %c0_170 = arith.constant 0 : index
    %c0_171 = arith.constant 0 : index
    %c0_172 = arith.constant 0 : index
    %194 = vector.load %arg4[%c1_169, %c0_170, %c0_171, %c0_172] : memref<3x3x128x128xbf16, #tpu.memory_space<vmem>>, vector<1x1x128x128xbf16>
    %195 = vector.shape_cast %194 : vector<1x1x128x128xbf16> to vector<128x128xbf16>
    %cst_173 = arith.constant dense<0.000000e+00> : vector<192x128xf32>
    %196 = tpu.matmul %193, %195, %cst_173 {dimension_numbers = #tpu.dot_dimension_numbers<[1], [0], [0], [1], [0, 0, 1, 1], [], []>} : vector<192x128xbf16>, vector<128x128xbf16>, vector<192x128xf32> -> vector<192x128xf32>
    %197 = arith.addf %192, %196 : vector<192x128xf32>
    %c32 = arith.constant 32 : index
    %c0_174 = arith.constant 0 : index
    %198 = vector.load %arg9[%c32, %c0_174] : memref<256x128xbf16, #tpu.memory_space<vmem>>, vector<192x128xbf16>
    %c1_175 = arith.constant 1 : index
    %c1_176 = arith.constant 1 : index
    %c0_177 = arith.constant 0 : index
    %c0_178 = arith.constant 0 : index
    %199 = vector.load %arg4[%c1_175, %c1_176, %c0_177, %c0_178] : memref<3x3x128x128xbf16, #tpu.memory_space<vmem>>, vector<1x1x128x128xbf16>
    %200 = vector.shape_cast %199 : vector<1x1x128x128xbf16> to vector<128x128xbf16>
    %cst_179 = arith.constant dense<0.000000e+00> : vector<192x128xf32>
    %201 = tpu.matmul %198, %200, %cst_179 {dimension_numbers = #tpu.dot_dimension_numbers<[1], [0], [0], [1], [0, 0, 1, 1], [], []>} : vector<192x128xbf16>, vector<128x128xbf16>, vector<192x128xf32> -> vector<192x128xf32>
    %202 = arith.addf %197, %201 : vector<192x128xf32>
    %c33 = arith.constant 33 : index
    %c0_180 = arith.constant 0 : index
    %203 = vector.load %arg9[%c33, %c0_180] : memref<256x128xbf16, #tpu.memory_space<vmem>>, vector<192x128xbf16>
    %c1_181 = arith.constant 1 : index
    %c2_182 = arith.constant 2 : index
    %c0_183 = arith.constant 0 : index
    %c0_184 = arith.constant 0 : index
    %204 = vector.load %arg4[%c1_181, %c2_182, %c0_183, %c0_184] : memref<3x3x128x128xbf16, #tpu.memory_space<vmem>>, vector<1x1x128x128xbf16>
    %205 = vector.shape_cast %204 : vector<1x1x128x128xbf16> to vector<128x128xbf16>
    %cst_185 = arith.constant dense<0.000000e+00> : vector<192x128xf32>
    %206 = tpu.matmul %203, %205, %cst_185 {dimension_numbers = #tpu.dot_dimension_numbers<[1], [0], [0], [1], [0, 0, 1, 1], [], []>} : vector<192x128xbf16>, vector<128x128xbf16>, vector<192x128xf32> -> vector<192x128xf32>
    %207 = arith.addf %202, %206 : vector<192x128xf32>
    %c55 = arith.constant 55 : index
    %c0_186 = arith.constant 0 : index
    %208 = vector.load %arg9[%c55, %c0_186] : memref<256x128xbf16, #tpu.memory_space<vmem>>, vector<192x128xbf16>
    %c2_187 = arith.constant 2 : index
    %c0_188 = arith.constant 0 : index
    %c0_189 = arith.constant 0 : index
    %c0_190 = arith.constant 0 : index
    %209 = vector.load %arg4[%c2_187, %c0_188, %c0_189, %c0_190] : memref<3x3x128x128xbf16, #tpu.memory_space<vmem>>, vector<1x1x128x128xbf16>
    %210 = vector.shape_cast %209 : vector<1x1x128x128xbf16> to vector<128x128xbf16>
    %cst_191 = arith.constant dense<0.000000e+00> : vector<192x128xf32>
    %211 = tpu.matmul %208, %210, %cst_191 {dimension_numbers = #tpu.dot_dimension_numbers<[1], [0], [0], [1], [0, 0, 1, 1], [], []>} : vector<192x128xbf16>, vector<128x128xbf16>, vector<192x128xf32> -> vector<192x128xf32>
    %212 = arith.addf %207, %211 : vector<192x128xf32>
    %c56_192 = arith.constant 56 : index
    %c0_193 = arith.constant 0 : index
    %213 = vector.load %arg9[%c56_192, %c0_193] : memref<256x128xbf16, #tpu.memory_space<vmem>>, vector<192x128xbf16>
    %c2_194 = arith.constant 2 : index
    %c1_195 = arith.constant 1 : index
    %c0_196 = arith.constant 0 : index
    %c0_197 = arith.constant 0 : index
    %214 = vector.load %arg4[%c2_194, %c1_195, %c0_196, %c0_197] : memref<3x3x128x128xbf16, #tpu.memory_space<vmem>>, vector<1x1x128x128xbf16>
    %215 = vector.shape_cast %214 : vector<1x1x128x128xbf16> to vector<128x128xbf16>
    %cst_198 = arith.constant dense<0.000000e+00> : vector<192x128xf32>
    %216 = tpu.matmul %213, %215, %cst_198 {dimension_numbers = #tpu.dot_dimension_numbers<[1], [0], [0], [1], [0, 0, 1, 1], [], []>} : vector<192x128xbf16>, vector<128x128xbf16>, vector<192x128xf32> -> vector<192x128xf32>
    %217 = arith.addf %212, %216 : vector<192x128xf32>
    %c57 = arith.constant 57 : index
    %c0_199 = arith.constant 0 : index
    %218 = vector.load %arg9[%c57, %c0_199] : memref<256x128xbf16, #tpu.memory_space<vmem>>, vector<192x128xbf16>
    %c2_200 = arith.constant 2 : index
    %c2_201 = arith.constant 2 : index
    %c0_202 = arith.constant 0 : index
    %c0_203 = arith.constant 0 : index
    %219 = vector.load %arg4[%c2_200, %c2_201, %c0_202, %c0_203] : memref<3x3x128x128xbf16, #tpu.memory_space<vmem>>, vector<1x1x128x128xbf16>
    %220 = vector.shape_cast %219 : vector<1x1x128x128xbf16> to vector<128x128xbf16>
    %cst_204 = arith.constant dense<0.000000e+00> : vector<192x128xf32>
    %221 = tpu.matmul %218, %220, %cst_204 {dimension_numbers = #tpu.dot_dimension_numbers<[1], [0], [0], [1], [0, 0, 1, 1], [], []>} : vector<192x128xbf16>, vector<128x128xbf16>, vector<192x128xf32> -> vector<192x128xf32>
    %222 = arith.addf %217, %221 : vector<192x128xf32>
    %223 = vector.broadcast %177 : vector<1x128xf32> to vector<192x128xf32>
    %224 = arith.mulf %222, %223 : vector<192x128xf32>
    %225 = vector.broadcast %178 : vector<1x128xf32> to vector<192x128xf32>
    %226 = arith.addf %224, %225 : vector<192x128xf32>
    %cst_205 = arith.constant 0.000000e+00 : f32
    %227 = vector.broadcast %cst_205 : f32 to vector<192x128xf32>
    %228 = arith.maximumf %226, %227 : vector<192x128xf32>
    %c0_206 = arith.constant 0 : index
    %c0_207 = arith.constant 0 : index
    %c0_208 = arith.constant 0 : index
    %229 = vector.load %arg6[%c0_206, %c0_207, %c0_208] : memref<1x192x128xf32, #tpu.memory_space<vmem>>, vector<1x192x128xf32>
    %230 = vector.shape_cast %229 : vector<1x192x128xf32> to vector<192x128xf32>
    %231 = arith.addf %228, %230 : vector<192x128xf32>
    %c0_209 = arith.constant 0 : index
    %c0_210 = arith.constant 0 : index
    %c0_211 = arith.constant 0 : index
    %232 = vector.load %arg7[%c0_209, %c0_210, %c0_211] : memref<1x192x128xf32, #tpu.memory_space<vmem>>, vector<1x192x128xf32>
    %233 = vector.shape_cast %232 : vector<1x192x128xf32> to vector<192x128xf32>
    %234 = vector.shape_cast %231 : vector<192x128xf32> to vector<1x192x128xf32>
    tpu.vector_store %arg7[%c0_209, %c0_210, %c0_211], %234 {strides = array<i32>} : memref<1x192x128xf32, #tpu.memory_space<vmem>>, vector<1x192x128xf32>,
    return
  }
  func.func @transform_0(%arg0: i32) -> (i32, i32, i32) {
    %c0_i32 = arith.constant 0 : i32
    %c0_i32_0 = arith.constant 0 : i32
    %c0_i32_1 = arith.constant 0 : i32
    return %arg0, %c0_i32, %c0_i32_0 : i32, i32, i32
  }
  func.func @transform_1(%arg0: i32) -> (i32, i32, i32, i32) {
    %c0_i32 = arith.constant 0 : i32
    %c0_i32_0 = arith.constant 0 : i32
    %c0_i32_1 = arith.constant 0 : i32
    %c0_i32_2 = arith.constant 0 : i32
    %c0_i32_3 = arith.constant 0 : i32
    return %c0_i32, %c0_i32_0, %c0_i32_1, %c0_i32_2 : i32, i32, i32, i32
  }
  func.func @transform_2(%arg0: i32) -> (i32, i32, i32, i32) {
    %c0_i32 = arith.constant 0 : i32
    %c0_i32_0 = arith.constant 0 : i32
    %c0_i32_1 = arith.constant 0 : i32
    %c0_i32_2 = arith.constant 0 : i32
    %c0_i32_3 = arith.constant 0 : i32
    return %c0_i32, %c0_i32_0, %c0_i32_1, %c0_i32_2 : i32, i32, i32, i32
  }
  func.func @transform_3(%arg0: i32) -> (i32, i32, i32, i32) {
    %c0_i32 = arith.constant 0 : i32
    %c0_i32_0 = arith.constant 0 : i32
    %c0_i32_1 = arith.constant 0 : i32
    %c0_i32_2 = arith.constant 0 : i32
    %c0_i32_3 = arith.constant 0 : i32
    return %c0_i32, %c0_i32_0, %c0_i32_1, %c0_i32_2 : i32, i32, i32, i32
  }
  func.func @transform_4(%arg0: i32) -> (i32, i32) {
    %c0_i32 = arith.constant 0 : i32
    %c0_i32_0 = arith.constant 0 : i32
    %c0_i32_1 = arith.constant 0 : i32
    return %c0_i32, %c0_i32_0 : i32, i32
  }
  func.func @transform_5(%arg0: i32) -> (i32, i32, i32) {
    %c0_i32 = arith.constant 0 : i32
    %c0_i32_0 = arith.constant 0 : i32
    %c0_i32_1 = arith.constant 0 : i32
    return %arg0, %c0_i32, %c0_i32_0 : i32, i32, i32
  }
  func.func @transform_6(%arg0: i32) -> (i32, i32, i32) {
    %c0_i32 = arith.constant 0 : i32
    %c0_i32_0 = arith.constant 0 : i32
    %c0_i32_1 = arith.constant 0 : i32
    return %arg0, %c0_i32, %c0_i32_0 : i32, i32, i32
  }
}

</mosaic_0001>

<bundles_post_ra>
// kernel: respath2_forward.1
= control target key start
LH: loop header
LB: loop body
LE: loop exit
PB: predicated region body
PF: predicated region fallthrough
CT: control target
= control target key end

     0   :  { %s15379_s21 = smov 0   ;;  %s19426_s0 = inlined_call_operand.vmem [shape: bf16[4,496,128], index: 0, kind: input, shape index: {}]   ;;  %s19427_s1 = inlined_call_operand.vmem [shape: bf16[3,3,128,128], index: 1, kind: input, shape index: {}]   ;;  %s19428_s2 = inlined_call_operand.vmem [shape: bf16[3,3,128,128], index: 2, kind: input, shape index: {}]   ;;  %s19429_s3 = inlined_call_operand.vmem [shape: bf16[3,3,128,128], index: 3, kind: input, shape index: {}]   ;;  %s19430_s4 = inlined_call_operand.vmem [shape: f32[6,128], index: 4, kind: input, shape index: {}]   ;;  %s19431_s5 = inlined_call_operand.vmem [shape: f32[4,192,128], index: 5, kind: input, shape index: {}]   ;;  %s19432_s6 = inlined_call_operand.vmem [shape: f32[4,192,128], index: 6, kind: output, shape index: {}]  }
   0x1 LB: > { %s15385_s22 = sadd.s32 4294967295, %s15341_s21   ;;  %p11067_p0 = scmp.ge.s32.totalorder %s15341_s21, 1  ;;  %s15341_s21 = sphi %s15379_s21, %s16_s21  }
   0x2   : > { %p222_p1 = scmp.lt.s32.totalorder %s15341_s21, 5 }
   0x4   : > { %p223_p2 = pnand %p11067_p0, %p222_p1 }
   0x6   : > { %226 = sbr.rel (%p223_p2) target bundleno = 2415 (0x96f), region = 44 }
   0xb   : > { %v12954_v0 = vld [vmem:[%s19427_s1 + $0x78] sm:$0xff]  ;;  %p257_p3 = scmp.lt.s32.totalorder %s15385_s22, 3  ;;  %v12953_v2 = vld [vmem:[%s19427_s1 + $0x70] sm:$0xff]  ;;  %v12952_v6 = vld [vmem:[%s19427_s1 + $0x68] sm:$0xff]  ;;  %vm725_vm0 = vcmask 1044480   ;;  %vm1165_vm1 = vcmask 1046528  }
   0xc   : > { %v12994_v1 = vld [vmem:[%s19427_s1 + $0xf8] sm:$0xff]  ;;  %567 = vmatpush.bf16.msra.mxu0 %v12954_v0  ;;  %v12993_v3 = vld [vmem:[%s19427_s1 + $0xf0] sm:$0xff]  ;;  %v12992_v7 = vld [vmem:[%s19427_s1 + $0xe8] sm:$0xff]  ;;  %s274_s28 = ssub.s32 0, %s15385_s22  ;;  %p273_p4 = scmp.lt.s32.totalorder %s15385_s22, 0 }
   0xd   : > { %1774 = vmatpush.bf16.msra.mxu3 %v12994_v1  ;;  %s15403_s7 = scalar_select %p257_p3, %s15385_s22, 3  ;;  %v15409_v4 = vld [vmem:[%s19427_s1 + $0xb8] sm:$0xff]  ;;  %v15432_v8 = vld [vmem:[%s19427_s1 + $0xb0] sm:$0xff]  ;;  %v12951_v12 = vld [vmem:[%s19427_s1 + $0x60] sm:$0xff]  ;;  %vm4864_vm10 = vsmask.f32 5376 }
   0xe   : > { %v15414_v5 = vld [vmem:[%s19427_s1 + $0x38] sm:$0xff]  ;;  %15116 = vmatpush.bf16.msra.mxu2 %v15409_v4  ;;  %v15437_v9 = vld [vmem:[%s19427_s1 + $0x30] sm:$0xff]  ;;  %v12991_v13 = vld [vmem:[%s19427_s1 + $0xe0] sm:$0xff]  ;;  %s11071_s29 = smin.u32 %s15385_s22, %s274_s28 }
   0xf   : > { %s15268_s8 = smul.u32 248, %s15403_s7  ;;  %15108 = vmatpush.bf16.msra.mxu1 %v15414_v5  ;;  %v15450_v16 = vld [vmem:[%s19427_s1 + $0xa8] sm:$0xff]  ;;  %v12950_v19 = vld [vmem:[%s19427_s1 + $0x58] sm:$0xff]  ;;  %v15473_v22 = vld [vmem:[%s19427_s1 + $0xa0] sm:$0xff]  ;;  %s276_s30 = sand.u32 1, %s11071_s29  }
  0x10   : > { %568 = vmatpush.bf16.msra.mxu0 %v12953_v2  ;;  %v15455_v17 = vld [vmem:[%s19427_s1 + $0x28] sm:$0xff]  ;;  %v12990_v20 = vld [vmem:[%s19427_s1 + $0xd8] sm:$0xff]  ;;  %v15478_v23 = vld [vmem:[%s19427_s1 + $0x20] sm:$0xff]  ;;  %s15269_s13 = smul.u32 192, %s15403_s7 }
  0x11   : > { %1775 = vmatpush.bf16.msra.mxu3 %v12993_v3  ;;  %s15425_s19 = scalar_lea.vmem %s19426_s0, %s15268_s8  ;;  %v12949_v24 = vld [vmem:[%s19427_s1 + $0x50] sm:$0xff]  ;;  %v15491_v27 = vld [vmem:[%s19427_s1 + $0x98] sm:$0xff]  ;;  %v12948_v29 = vld [vmem:[%s19427_s1 + $0x48] sm:$0xff]  ;;  %s277_s8 = ssub.s32 0, %s276_s30 }
  0x12   : > { %v1465_v10 = vld [vmem:[%s15425_s19 + $0x1c] sm:$0xf]  ;;  %v14096_v11 = vld [vmem:[%s15425_s19 + $0x20] sm:$0xff]   ;;  %15117 = vmatpush.bf16.msra.mxu2 %v15432_v8  ;;  %v1464_v21 = vld [vmem:[%s15425_s19 + $0x18] sm:$0x8]  ;;  %s19887_s8 = smov (!%p273_p4, %s277_s8), %s276_s30  ;;  %s19232_s24 = scalar_lea.vmem %s19432_s6, %s15269_s13 }
  0x13   : > { %v13402_v14 = vunpack.c.l.b16 %v14096_v11  ;;  %v1580_v15 = vunpack.c.l.b16 %v1465_v10  ;;  %15109 = vmatpush.bf16.msra.mxu1 %v15437_v9  ;;  %v12989_v25 = vld [vmem:[%s19427_s1 + $0xd0] sm:$0xff]  ;;  %v1579_v26 = vunpack.c.l.b16 %v1464_v21  ;;  %v12942_v28 = vld [vmem:[%s19427_s1 + $0x18] sm:$0xff]  ;;  %v12988_v30 = vld [vmem:[%s19427_s1 + $0xc8] sm:$0xff]  ;;  %v1654_v41 = vrot.slane %v14096_v11, 3  ;;  %p11073_p5 = scmp.lt.s32.totalorder %s19887_s8, 0  ;;  %s283_s22 = sadd.s32 2, %s19887_s8 }
  0x14   : > { %569 = vmatpush.bf16.msra.mxu0 %v12952_v6  ;;  %v15503_v31 = vld [vmem:[%s15425_s19 + $0x4] sm:$0xf]  ;;  %v15506_v32 = vld [vmem:[%s15425_s19 + $0x8] sm:$0xff]   ;;  %v15512_v34 = vld [vmem:[%s19427_s1 + $0x90] sm:$0xff] }
  0x15   : > { %1776 = vmatpush.bf16.msra.mxu3 %v12992_v7  ;;  %v15457_v18 = vpack.c.b16 %v13402_v14, %v1580_v15  ;;  %v1628_v33 = vpack.c.b16 %v1580_v15, %v1579_v26  ;;  %v12941_v35 = vld [vmem:[%s19427_s1 + $0x10] sm:$0xff]  ;;  %v13310_v36 = vunpack.c.l.b16 %v15506_v32  ;;  %v19435_v37 = vunpack.c.l.b16 %v15503_v31  ;;  %v12947_v38 = vld [vmem:[%s19427_s1 + $0x40] sm:$0xff]  ;;  %v15529_v42 = vld [vmem:[%s19427_s1 + $0x88] sm:$0xff]  ;;  %s19889_s22 = smov (!%p11073_p5, %s283_s22), %s19887_s8 }
  0x16   : > { %15118 = vmatpush.bf16.msra.mxu2 %v15450_v16  ;;  %v12987_v39 = vld [vmem:[%s19427_s1 + $0xc0] sm:$0xff]  ;;  %v15532_v43 = vld [vmem:[%s15425_s19 + $0x14] sm:$0xff]  ;;  %v12940_v45 = vld [vmem:[%s19427_s1 + $0x8] sm:$0xff]  ;;  %s11074_s11 = sshll.u32 %s19889_s22, 3 }
  0x17   : > { %15110 = vmatpush.bf16.msra.mxu1 %v15455_v17  ;;  %v1653_v40 = vrot.slane %v1628_v33, 3  ;;  %v12958_v44 = vld [vmem:[%s15425_s19 + $0x1c] sm:$0xff]  ;;  %v471_v46 = vpack.c.b16 %v13310_v36, %v19435_v37  ;;  %v15541_v47 = vld [vmem:[%s15425_s19 + $0x10] sm:$0xff]   ;;  %v19433_v51 = vrot.slane %v15532_v43, 1  ;;  %v14097_v58 = vld [vmem:[%s15425_s19 + $0x28] sm:$0xff]   ;;  %s11779_s12 = sadd.s32 4294967292, %s11074_s11 }
  0x18   : > { %570 = vmatpush.bf16.msra.mxu0 %v12951_v12  ;;  %v14075_v48 = vld [vmem:[%s15425_s19 + $0x18] sm:$0xff]   ;;  %v15550_v50 = vld [vmem:[%s19427_s1 + $0x80] sm:$0xff]  ;;  %v1171_v52 = vrot.slane %v12958_v44, 1  ;;  %v19434_v54 = vrot.slane %v15541_v47, 3  ;;  %v1656_v59 = vrot.slane %v14097_v58, 3  ;;  %v15126_v61 = vld [vmem:[%s15425_s19 + $0xc] sm:$0xff]  }
  0x19   : > { %1777 = vmatpush.bf16.msra.mxu3 %v12991_v13  ;;  %v1655_v49 = vsel %vm725_vm0, %v1653_v40, %v1654_v41  ;;  %v12939_v53 = vld [vmem:[%s19427_s1] sm:$0xff]  ;;  %v731_v55 = vrot.slane %v14075_v48, 3  ;;  %v14098_v2 = vld [vmem:[%s15425_s19 + $0x30] sm:$0xff]   ;;  %v14099_v11 = vld [vmem:[%s15425_s19 + $0x38] sm:$0xff]   ;;  %s12376_s18 = sadd.s32 4294967295, %s11074_s11 }
  0x1a   : > { %15119 = vmatpush.bf16.msra.mxu2 %v15473_v22  ;;  %v1172_v56 = vsel %vm1165_vm1, %v19433_v51, %v1171_v52  ;;  %v12959_v60 = vld [vmem:[%s15425_s19 + $0x24] sm:$0xff]  ;;  %v1657_v62 = vsel %vm725_vm0, %v1654_v41, %v1656_v59  ;;  %v1658_v3 = vrot.slane %v14098_v2, 3  ;;  %v15128_v6 = vld [vmem:[%s15425_s19 + $0x14] sm:$0xff]   ;;  %v15130_v13 = vld [vmem:[%s15425_s19 + $0x1c] sm:$0xff]  }
  0x1b   : > { %15111 = vmatpush.bf16.msra.mxu1 %v15478_v23  ;;  %v732_v57 = vsel %vm725_vm0, %v19434_v54, %v731_v55  ;;  %v1173_v63 = vrot.slane %v12959_v60, 1  ;;  %v734_v1 = vsel %vm725_vm0, %v731_v55, %v1654_v41  ;;  %v12961_v12 = vld [vmem:[%s15425_s19 + $0x34] sm:$0xff]  ;;  %v12963_v26 = vld [vmem:[%s15425_s19 + $0x44] sm:$0xff]  ;;  %v292_v54 = vld [vmem:[%s15425_s19] sm:$0x8] }
  0x1c   : > { %571 = vmatpush.bf16.msra.mxu0 %v12950_v19  ;;  %v1659_v7 = vsel %vm725_vm0, %v1656_v59, %v1658_v3  ;;  %v1177_v14 = vrot.slane %v12961_v12, 1  ;;  %v12962_v19 = vld [vmem:[%s15425_s19 + $0x3c] sm:$0xff]  ;;  %v14102_v33 = vld [vmem:[%s15425_s19 + $0x50] sm:$0xff]   ;;  %v15140_v55 = vld [vmem:[%s15425_s19 + $0x44] sm:$0xff]  }
  0x1d   : > { %1778 = vmatpush.bf16.msra.mxu3 %v12990_v20  ;;  %v1174_v0 = vsel %vm1165_vm1, %v1171_v52, %v1173_v63  ;;  %v15132_v20 = vld [vmem:[%s15425_s19 + $0x24] sm:$0xff]   ;;  %v15136_v36 = vld [vmem:[%s15425_s19 + $0x34] sm:$0xff]  }
  0x1e   : > { %15120 = vmatpush.bf16.msra.mxu2 %v15491_v27  ;;  %v14103_v41 = vld [vmem:[%s15425_s19 + $0x58] sm:$0xff]   ;;  %v12967_v2 = vld [vmem:[%s15425_s19 + $0x64] sm:$0xff] }
  0x1f   : > { %15112 = vmatpush.bf16.msra.mxu1 %v12942_v28  ;;  %v12965_v44 = vld [vmem:[%s15425_s19 + $0x54] sm:$0xff] }
  0x20   : > { %572 = vmatpush.bf16.msra.mxu0 %v12949_v24  ;;  %v14101_v24 = vld [vmem:[%s15425_s19 + $0x48] sm:$0xff]   ;;  %v1185_v48 = vrot.slane %v12965_v44, 1 }
  0x21   : > { %1779 = vmatpush.bf16.msra.mxu3 %v12989_v25  ;;  %v1664_v25 = vrot.slane %v14101_v24, 3 }
  0x22   : > { %15121 = vmatpush.bf16.msra.mxu2 %v15512_v34 }
  0x23   : > { %15113 = vmatpush.bf16.msra.mxu1 %v12941_v35 }
  0x24   : > { %573 = vmatpush.bf16.msra.mxu0 %v12948_v29  ;;  %v1181_v29 = vrot.slane %v12963_v26, 1 }
  0x25   : > { %1780 = vmatpush.bf16.msra.mxu3 %v12988_v30 }
  0x26   : > { %15122 = vmatpush.bf16.msra.mxu2 %v15529_v42 }
  0x27   : > { %15114 = vmatpush.bf16.msra.mxu1 %v12940_v45 }
  0x28   : > { %574 = vmatpush.bf16.msra.mxu0 %v12947_v38 }
  0x29   : > { %1781 = vmatpush.bf16.msra.mxu3 %v12987_v39 }
  0x2a   : > { %15123 = vmatpush.bf16.msra.mxu2 %v15550_v50 }
  0x2b   : > { %575 = vmatmul.bf16.vlgmr.msra.gmra.mxu0 %v471_v46  ;;  %15115 = vmatpush.bf16.msra.mxu1 %v12939_v53 }
  0x2c   : > { %847 = vmatpush.bf16.msrb.mxu0 %v15414_v5  ;;  %1782 = vmatmul.bf16.vlgmr.msra.gmra.mxu3 %v1655_v49  ;;  %v12960_v5 = vld [vmem:[%s15425_s19 + $0x2c] sm:$0xff] }
  0x2d   : > { %1305 = vmatmul.bf16.vlgmr.msra.gmra.mxu2 %v1172_v56 }
  0x2e   : > { %865 = vmatmul.bf16.vlgmr.msra.gmra.mxu1 %v732_v57 }
  0x30   : > { %848 = vmatpush.bf16.msrb.mxu0 %v15437_v9  ;;  %v1175_v9 = vrot.slane %v12960_v5, 1 }
  0x32   : > { %v1176_v10 = vsel %vm1165_vm1, %v1173_v63, %v1175_v9  ;;  %v1178_v15 = vsel %vm1165_vm1, %v1175_v9, %v1177_v14  ;;  %v14105_v63 = vld [vmem:[%s15425_s19 + $0x68] sm:$0xff]  }
  0x34   : > { %849 = vmatpush.bf16.msrb.mxu0 %v15455_v17 }
  0x38   : > { %850 = vmatpush.bf16.msrb.mxu0 %v15478_v23 }
  0x3b   : > { %580 = vmatmul.bf16.gmra.mxu0 %v15126_v61 }
  0x3c   : > { %851 = vmatpush.bf16.msrb.mxu0 %v12942_v28  ;;  %1787 = vmatmul.bf16.gmra.mxu3 %v1657_v62 }
  0x3d   : > { %1310 = vmatmul.bf16.gmra.mxu2 %v1174_v0 }
  0x3e   : > { %870 = vmatmul.bf16.gmra.mxu1 %v734_v1  ;;  %v1672_v1 = vrot.slane %v14105_v63, 3 }
  0x40   : > { %852 = vmatpush.bf16.msrb.mxu0 %v12941_v35  ;;  %v12964_v35 = vld [vmem:[%s15425_s19 + $0x4c] sm:$0xff] }
  0x41   : > { %v1183_v39 = vrot.slane %v12964_v35, 1 }
  0x43   : > { %v1184_v40 = vsel %vm1165_vm1, %v1181_v29, %v1183_v39  ;;  %v1186_v49 = vsel %vm1165_vm1, %v1183_v39, %v1185_v48 }
  0x44   : > { %853 = vmatpush.bf16.msrb.mxu0 %v12940_v45  ;;  %v15138_v45 = vld [vmem:[%s15425_s19 + $0x3c] sm:$0xff]  }
  0x48   : > { %854 = vmatpush.bf16.msrb.mxu0 %v12939_v53  ;;  %v12966_v53 = vld [vmem:[%s15425_s19 + $0x5c] sm:$0xff] }
  0x49   : > { %v1187_v58 = vrot.slane %v12966_v53, 1 }
  0x4b   : > { %585 = vmatmul.bf16.gmra.mxu0 %v15128_v6  ;;  %v1188_v59 = vsel %vm1165_vm1, %v1185_v48, %v1187_v58  ;;  %v15142_v6 = vld [vmem:[%s15425_s19 + $0x4c] sm:$0xff]  }
  0x4c   : > { %1287 = vmatpush.bf16.msra.mxu0 %v15409_v4  ;;  %1792 = vmatmul.bf16.gmra.mxu3 %v1659_v7  ;;  %v1660_v4 = vrot.slane %v14099_v11, 3 }
  0x4d   : > { %1315 = vmatmul.bf16.gmra.mxu2 %v1176_v10  ;;  %v1189_v10 = vrot.slane %v12967_v2, 1 }
  0x4e   : > { %875 = vmatmul.bf16.gmra.mxu1 %v1657_v62 }
  0x50   : > { %1288 = vmatpush.bf16.msra.mxu0 %v15432_v8  ;;  %v1661_v8 = vsel %vm725_vm0, %v1658_v3, %v1660_v4 }
  0x54   : > { %1289 = vmatpush.bf16.msra.mxu0 %v15450_v16  ;;  %v14100_v16 = vld [vmem:[%s15425_s19 + $0x40] sm:$0xff]  }
  0x55   : > { %v1662_v17 = vrot.slane %v14100_v16, 3 }
  0x57   : > { %v1663_v21 = vsel %vm725_vm0, %v1660_v4, %v1662_v17  ;;  %v1665_v28 = vsel %vm725_vm0, %v1662_v17, %v1664_v25  ;;  %v1190_v4 = vsel %vm1165_vm1, %v1187_v58, %v1189_v10  ;;  %v12968_v17 = vld [vmem:[%s15425_s19 + $0x6c] sm:$0xff] }
  0x58   : > { %1290 = vmatpush.bf16.msra.mxu0 %v15473_v22  ;;  %v1179_v22 = vrot.slane %v12962_v19, 1 }
  0x5a   : > { %v1180_v23 = vsel %vm1165_vm1, %v1177_v14, %v1179_v22  ;;  %v1182_v30 = vsel %vm1165_vm1, %v1179_v22, %v1181_v29  ;;  %v14106_v14 = vld [vmem:[%s15425_s19 + $0x70] sm:$0xff]  }
  0x5b   : > { %590 = vmatmul.bf16.gmra.mxu0 %v15130_v13  ;;  %v1674_v16 = vrot.slane %v14106_v14, 3 }
  0x5c   : > { %1291 = vmatpush.bf16.msra.mxu0 %v15491_v27  ;;  %1797 = vmatmul.bf16.gmra.mxu3 %v1661_v8  ;;  %v15134_v27 = vld [vmem:[%s15425_s19 + $0x2c] sm:$0xff]  }
  0x5d   : > { %1320 = vmatmul.bf16.gmra.mxu2 %v1178_v15 }
  0x5e   : > { %880 = vmatmul.bf16.gmra.mxu1 %v1659_v7 }
  0x60   : > { %1292 = vmatpush.bf16.msra.mxu0 %v15512_v34  ;;  %v1666_v34 = vrot.slane %v14102_v33, 3 }
  0x62   : > { %v1667_v38 = vsel %vm725_vm0, %v1664_v25, %v1666_v34  ;;  %v1191_v25 = vrot.slane %v12968_v17, 1 }
  0x64   : > { %1293 = vmatpush.bf16.msra.mxu0 %v15529_v42  ;;  %v1668_v42 = vrot.slane %v14103_v41, 3  ;;  %v12969_v41 = vld [vmem:[%s15425_s19 + $0x74] sm:$0xff] }
  0x66   : > { %v1669_v46 = vsel %vm725_vm0, %v1666_v34, %v1668_v42 }
  0x68   : > { %1294 = vmatpush.bf16.msra.mxu0 %v15550_v50  ;;  %v14104_v50 = vld [vmem:[%s15425_s19 + $0x60] sm:$0xff]  }
  0x69   : > { %v1670_v52 = vrot.slane %v14104_v50, 3 }
  0x6b   : > { %595 = vmatmul.bf16.gmra.mxu0 %v15132_v20  ;;  %v1671_v57 = vsel %vm725_vm0, %v1668_v42, %v1670_v52  ;;  %v1673_v9 = vsel %vm725_vm0, %v1670_v52, %v1672_v1  ;;  %v1193_v52 = vrot.slane %v12969_v41, 1 }
  0x6c   : > { %1802 = vmatmul.bf16.gmra.mxu3 %v1663_v21 }
  0x6d   : > { %1325 = vmatmul.bf16.gmra.mxu2 %v1180_v23  ;;  %v1675_v23 = vsel %vm725_vm0, %v1672_v1, %v1674_v16  ;;  %v14108_v1 = vld [vmem:[%s15425_s19 + $0x80] sm:$0xff]  }
  0x6e   : > { %885 = vmatmul.bf16.gmra.mxu1 %v1661_v8 }
  0x7b   : > { %600 = vmatmul.bf16.gmra.mxu0 %v15134_v27 }
  0x7c   : > { %1807 = vmatmul.bf16.gmra.mxu3 %v1665_v28 }
  0x7d   : > { %1330 = vmatmul.bf16.gmra.mxu2 %v1182_v30 }
  0x7e   : > { %890 = vmatmul.bf16.gmra.mxu1 %v1663_v21  ;;  %v15144_v21 = vld [vmem:[%s15425_s19 + $0x54] sm:$0xff]  }
  0x8b   : > { %605 = vmatmul.bf16.gmra.mxu0 %v15136_v36  ;;  %v14107_v36 = vld [vmem:[%s15425_s19 + $0x78] sm:$0xff]  }
  0x8c   : > { %1812 = vmatmul.bf16.gmra.mxu3 %v1667_v38 }
  0x8d   : > { %1335 = vmatmul.bf16.gmra.mxu2 %v1184_v40  ;;  %v1676_v40 = vrot.slane %v14107_v36, 3 }
  0x8e   : > { %895 = vmatmul.bf16.gmra.mxu1 %v1665_v28  ;;  %v1192_v28 = vsel %vm1165_vm1, %v1189_v10, %v1191_v25 }
  0x9b   : > { %610 = vmatmul.bf16.gmra.mxu0 %v15138_v45 }
  0x9c   : > { %1817 = vmatmul.bf16.gmra.mxu3 %v1669_v46 }
  0x9d   : > { %1340 = vmatmul.bf16.gmra.mxu2 %v1186_v49  ;;  %v1677_v49 = vsel %vm725_vm0, %v1674_v16, %v1676_v40 }
  0x9e   : > { %900 = vmatmul.bf16.gmra.mxu1 %v1667_v38 }
  0xa8   : > { %v15614_v56 = vpop.f32.mrf.mxu0 }
  0xab   : > { %615 = vmatmul.bf16.gmra.mxu0 %v15140_v55  ;;  %v866_v61 = vpop.f32.mrf.mxu1 }
  0xac   : > { %1822 = vmatmul.bf16.gmra.mxu3 %v1671_v57 }
  0xad   : > { %1345 = vmatmul.bf16.gmra.mxu2 %v1188_v59 }
  0xae   : > { %905 = vmatmul.bf16.gmra.mxu1 %v1669_v46  ;;  %v15146_v46 = vld [vmem:[%s15425_s19 + $0x5c] sm:$0xff]  }
  0xaf   : > { %v15618_v60 = vpop.f32.mrf.mxu3 }
  0xb0   : > { %v15620_v62 = vpop.f32.mrf.mxu0  ;;  %v1306_v0 = vpop.f32.mrf.mxu2 }
  0xb3   : > { %v868_v5 = vpop.f32.mrf.mxu1 }
  0xb7   : > { %v15624_v3 = vpop.f32.mrf.mxu3 }
  0xb8   : > { %v15627_v7 = vpop.f32.mrf.mxu0  ;;  %v1308_v11 = vpop.f32.mrf.mxu2 }
  0xbb   : > { %620 = vmatmul.bf16.gmra.mxu0 %v15142_v6  ;;  %v871_v13 = vpop.f32.mrf.mxu1  ;;  %v1678_v6 = vrot.slane %v14108_v1, 3 }
  0xbc   : > { %1827 = vmatmul.bf16.gmra.mxu3 %v1673_v9 }
  0xbd   : > { %1350 = vmatmul.bf16.gmra.mxu2 %v1190_v4 }
  0xbe   : > { %910 = vmatmul.bf16.gmra.mxu1 %v1671_v57  ;;  %v1194_v57 = vsel %vm1165_vm1, %v1191_v25, %v1193_v52 }
  0xbf   : > { %v15631_v12 = vpop.f32.mrf.mxu3 }
  0xc0   : > { %v15633_v8 = vpop.f32.mrf.mxu0  ;;  %v1311_v15 = vpop.f32.mrf.mxu2 }
  0xc3   : > { %v873_v20 = vpop.f32.mrf.mxu1 }
  0xc7   : > { %v15637_v19 = vpop.f32.mrf.mxu3 }
  0xc8   : > { %v586_v22 = vpop.f32.mrf.mxu0  ;;  %v1313_v27 = vpop.f32.mrf.mxu2 }
  0xc9   : > { %v867_v24 = vadd.f32 %v866_v61, %v586_v22 }
  0xcb   : > { %v1420_v26 = vadd.f32 %v1306_v0, %v867_v24  ;;  %625 = vmatmul.bf16.gmra.mxu0 %v15144_v21  ;;  %v876_v30 = vpop.f32.mrf.mxu1 }
  0xcc   : > { %1832 = vmatmul.bf16.gmra.mxu3 %v1675_v23 }
  0xcd   : > { %1355 = vmatmul.bf16.gmra.mxu2 %v1192_v28  ;;  %v14109_v28 = vld [vmem:[%s15425_s19 + $0x88] sm:$0xff]  }
  0xce   : > { %915 = vmatmul.bf16.gmra.mxu1 %v1673_v9  ;;  %v12970_v9 = vld [vmem:[%s15425_s19 + $0x7c] sm:$0xff] }
  0xcf   : > { %v1793_v29 = vpop.f32.mrf.mxu3  ;;  %v1195_v17 = vrot.slane %v12970_v9, 1 }
  0xd0   : > { %v15642_v33 = vadd.f32 %v1793_v29, %v1420_v26  ;;  %v588_v34 = vpop.f32.mrf.mxu0  ;;  %v1316_v39 = vpop.f32.mrf.mxu2 }
  0xd1   : > { %v869_v35 = vadd.f32 %v868_v5, %v588_v34  ;;  %v1196_v22 = vsel %vm1165_vm1, %v1193_v52, %v1195_v17  ;;  %v1680_v34 = vrot.slane %v14109_v28, 3  ;;  %v14111_v28 = vld [vmem:[%s15425_s19 + $0x98] sm:$0xff]  }
  0xd3   : > { %v1421_v38 = vadd.f32 %v1308_v11, %v869_v35  ;;  %v878_v44 = vpop.f32.mrf.mxu1  ;;  %v12971_v35 = vld [vmem:[%s15425_s19 + $0x84] sm:$0xff] }
  0xd7   : > { %v1795_v42 = vpop.f32.mrf.mxu3 }
  0xd8   : > { %v15646_v45 = vadd.f32 %v1795_v42, %v1421_v38  ;;  %v591_v48 = vpop.f32.mrf.mxu0  ;;  %v1318_v55 = vpop.f32.mrf.mxu2  ;;  %v1681_v42 = vsel %vm725_vm0, %v1678_v6, %v1680_v34 }
  0xd9   : > { %v872_v50 = vadd.f32 %v871_v13, %v591_v48  ;;  %v15148_v13 = vld [vmem:[%s15425_s19 + $0x64] sm:$0xff]   ;;  %v1197_v48 = vrot.slane %v12971_v35, 1 }
  0xdb   : > { %v1422_v53 = vadd.f32 %v1311_v15, %v872_v50  ;;  %630 = vmatmul.bf16.gmra.mxu0 %v15146_v46  ;;  %v881_v59 = vpop.f32.mrf.mxu1  ;;  %v1679_v15 = vsel %vm725_vm0, %v1676_v40, %v1678_v6  ;;  %v15150_v40 = vld [vmem:[%s15425_s19 + $0x6c] sm:$0xff]  }
  0xdc   : > { %1837 = vmatmul.bf16.gmra.mxu3 %v1677_v49 }
  0xdd   : > { %1360 = vmatmul.bf16.gmra.mxu2 %v1194_v57 }
  0xde   : > { %920 = vmatmul.bf16.gmra.mxu1 %v1675_v23 }
  0xdf   : > { %v1798_v58 = vpop.f32.mrf.mxu3 }
  0xe0   : > { %v15651_v61 = vadd.f32 %v1798_v58, %v1422_v53  ;;  %v593_v63 = vpop.f32.mrf.mxu0  ;;  %v1321_v5 = vpop.f32.mrf.mxu2 }
  0xe1   : > { %v874_v0 = vadd.f32 %v873_v20, %v593_v63  ;;  %v14110_v63 = vld [vmem:[%s15425_s19 + $0x90] sm:$0xff]  }
  0xe2   : > { %v1682_v1 = vrot.slane %v14110_v63, 3 }
  0xe3   : > { %v1423_v2 = vadd.f32 %v1313_v27, %v874_v0  ;;  %v883_v11 = vpop.f32.mrf.mxu1 }
  0xe7   : > { %v1800_v10 = vpop.f32.mrf.mxu3 }
  0xe8   : > { %v15655_v4 = vadd.f32 %v1800_v10, %v1423_v2  ;;  %v596_v14 = vpop.f32.mrf.mxu0  ;;  %v1323_v20 = vpop.f32.mrf.mxu2  ;;  %v12972_v2 = vld [vmem:[%s15425_s19 + $0x8c] sm:$0xff]  ;;  %v15152_v10 = vld [vmem:[%s15425_s19 + $0x74] sm:$0xff]  }
  0xe9   : > { %v877_v16 = vadd.f32 %v876_v30, %v596_v14  ;;  %v1683_v14 = vsel %vm725_vm0, %v1680_v34, %v1682_v1  ;;  %v1684_v34 = vrot.slane %v14111_v28, 3 }
  0xeb   : > { %v1424_v21 = vadd.f32 %v1316_v39, %v877_v16  ;;  %635 = vmatmul.bf16.gmra.mxu0 %v15148_v13  ;;  %v886_v24 = vpop.f32.mrf.mxu1 }
  0xec   : > { %1842 = vmatmul.bf16.gmra.mxu3 %v1679_v15 }
  0xed   : > { %1365 = vmatmul.bf16.gmra.mxu2 %v1196_v22 }
  0xee   : > { %925 = vmatmul.bf16.gmra.mxu1 %v1677_v49  ;;  %v1198_v49 = vsel %vm1165_vm1, %v1195_v17, %v1197_v48  ;;  %v1199_v17 = vrot.slane %v12972_v2, 1 }
  0xef   : > { %v1803_v23 = vpop.f32.mrf.mxu3 }
  0xf0   : > { %v15660_v25 = vadd.f32 %v1803_v23, %v1424_v21  ;;  %v598_v26 = vpop.f32.mrf.mxu0  ;;  %v1326_v30 = vpop.f32.mrf.mxu2 }
  0xf1   : > { %v879_v27 = vadd.f32 %v878_v44, %v598_v26 }
  0xf3   : > { %v1425_v29 = vadd.f32 %v1318_v55, %v879_v27  ;;  %v888_v38 = vpop.f32.mrf.mxu1 }
  0xf7   : > { %v1805_v36 = vpop.f32.mrf.mxu3 }
  0xf8   : > { %v15664_v39 = vadd.f32 %v1805_v36, %v1425_v29  ;;  %v601_v41 = vpop.f32.mrf.mxu0  ;;  %v1328_v44 = vpop.f32.mrf.mxu2 }
  0xf9   : > { %v882_v46 = vadd.f32 %v881_v59, %v601_v41  ;;  %v15154_v41 = vld [vmem:[%s15425_s19 + $0x7c] sm:$0xff]  }
  0xfb   : > { %v1426_v50 = vadd.f32 %v1321_v5, %v882_v46  ;;  %640 = vmatmul.bf16.gmra.mxu0 %v15150_v40  ;;  %v891_v53 = vpop.f32.mrf.mxu1  ;;  %v13042_v46 = vld [vmem:[%s19427_s1 + $0x1b8] sm:$0xff] }
  0xfc   : > { %1847 = vmatmul.bf16.gmra.mxu3 %v1681_v42  ;;  %3041 = vmatpush.bf16.msrb.mxu2 %v13042_v46 }
  0xfd   : > { %1370 = vmatmul.bf16.gmra.mxu2 %v1198_v49 }
  0xfe   : > { %930 = vmatmul.bf16.gmra.mxu1 %v1679_v15  ;;  %v1200_v15 = vsel %vm1165_vm1, %v1197_v48, %v1199_v17 }
  0xff   : > { %v1808_v52 = vpop.f32.mrf.mxu3 }
 0x100   : > { %v15669_v55 = vadd.f32 %v1808_v52, %v1426_v50  ;;  %v603_v57 = vpop.f32.mrf.mxu0  ;;  %v1331_v59 = vpop.f32.mrf.mxu2  ;;  %v1685_v50 = vsel %vm725_vm0, %v1682_v1, %v1684_v34  ;;  %v13034_v52 = vld [vmem:[%s19427_s1 + $0x178] sm:$0xff] }
 0x101   : > { %v884_v58 = vadd.f32 %v883_v11, %v603_v57  ;;  %2554 = vmatpush.bf16.msrb.mxu1 %v13034_v52 }
 0x103   : > { %v1427_v0 = vadd.f32 %v1323_v20, %v884_v58  ;;  %v893_v6 = vpop.f32.mrf.mxu1 }
 0x107   : > { %v1810_v5 = vpop.f32.mrf.mxu3 }
 0x108   : > { %v15673_v9 = vadd.f32 %v1810_v5, %v1427_v0  ;;  %v606_v13 = vpop.f32.mrf.mxu0  ;;  %v1333_v11 = vpop.f32.mrf.mxu2 }
 0x109   : > { %v887_v16 = vadd.f32 %v886_v24, %v606_v13  ;;  %v12974_v13 = vld [vmem:[%s15425_s19 + $0x9c] sm:$0xff] }
 0x10a   : > { %v1203_v28 = vrot.slane %v12974_v13, 1 }
 0x10b   : > { %v1428_v21 = vadd.f32 %v1326_v30, %v887_v16  ;;  %645 = vmatmul.bf16.gmra.mxu0 %v15152_v10  ;;  %v896_v22 = vpop.f32.mrf.mxu1  ;;  %v12973_v30 = vld [vmem:[%s15425_s19 + $0x94] sm:$0xff] }
 0x10c   : > { %1852 = vmatmul.bf16.gmra.mxu3 %v1683_v14 }
 0x10d   : > { %1375 = vmatmul.bf16.gmra.mxu2 %v1200_v15 }
 0x10e   : > { %935 = vmatmul.bf16.gmra.mxu1 %v1681_v42 }
 0x10f   : > { %v1813_v20 = vpop.f32.mrf.mxu3 }
 0x110   : > { %v15678_v23 = vadd.f32 %v1813_v20, %v1428_v21  ;;  %v608_v26 = vpop.f32.mrf.mxu0  ;;  %v1336_v24 = vpop.f32.mrf.mxu2 }
 0x111   : > { %v889_v27 = vadd.f32 %v888_v38, %v608_v26  ;;  %v1201_v38 = vrot.slane %v12973_v30, 1 }
 0x113   : > { %v1429_v29 = vadd.f32 %v1328_v44, %v889_v27  ;;  %v898_v36 = vpop.f32.mrf.mxu1  ;;  %v1202_v57 = vsel %vm1165_vm1, %v1199_v17, %v1201_v38  ;;  %v15156_v17 = vld [vmem:[%s15425_s19 + $0x84] sm:$0xff]  }
 0x117   : > { %v1815_v35 = vpop.f32.mrf.mxu3 }
 0x118   : > { %v15682_v40 = vadd.f32 %v1815_v35, %v1429_v29  ;;  %v611_v48 = vpop.f32.mrf.mxu0  ;;  %v1338_v44 = vpop.f32.mrf.mxu2 }
 0x119   : > { %v892_v49 = vadd.f32 %v891_v53, %v611_v48  ;;  %v14113_v48 = vld [vmem:[%s15425_s19 + $0xa8] sm:$0xff]  }
 0x11b   : > { %v1430_v42 = vadd.f32 %v1331_v59, %v892_v49  ;;  %650 = vmatmul.bf16.gmra.mxu0 %v15154_v41  ;;  %v901_v63 = vpop.f32.mrf.mxu1  ;;  %v14112_v59 = vld [vmem:[%s15425_s19 + $0xa0] sm:$0xff]   ;;  %v1688_v49 = vrot.slane %v14113_v48, 3 }
 0x11c   : > { %1857 = vmatmul.bf16.gmra.mxu3 %v1685_v50  ;;  %v1686_v10 = vrot.slane %v14112_v59, 3 }
 0x11d   : > { %1380 = vmatmul.bf16.gmra.mxu2 %v1202_v57 }
 0x11e   : > { %940 = vmatmul.bf16.gmra.mxu1 %v1683_v14  ;;  %v1687_v26 = vsel %vm725_vm0, %v1684_v34, %v1686_v10  ;;  %v1204_v14 = vsel %vm1165_vm1, %v1201_v38, %v1203_v28 }
 0x11f   : > { %v1818_v58 = vpop.f32.mrf.mxu3 }
 0x120   : > { %v15693_v0 = vadd.f32 %v1818_v58, %v1430_v42  ;;  %v613_v53 = vpop.f32.mrf.mxu0  ;;  %v1341_v5 = vpop.f32.mrf.mxu2  ;;  %v15158_v58 = vld [vmem:[%s15425_s19 + $0x8c] sm:$0xff]  }
 0x121   : > { %v894_v1 = vadd.f32 %v893_v6, %v613_v53  ;;  %v1689_v53 = vsel %vm725_vm0, %v1686_v10, %v1688_v49 }
 0x123   : > { %v1431_v2 = vadd.f32 %v1333_v11, %v894_v1  ;;  %v903_v21 = vpop.f32.mrf.mxu1 }
 0x127   : > { %v1820_v16 = vpop.f32.mrf.mxu3 }
 0x128   : > { %v15697_v15 = vadd.f32 %v1820_v16, %v1431_v2  ;;  %v616_v20 = vpop.f32.mrf.mxu0  ;;  %v1343_v6 = vpop.f32.mrf.mxu2 }
 0x129   : > { %v897_v27 = vadd.f32 %v896_v22, %v616_v20 }
 0x12b   : > { %v1432_v29 = vadd.f32 %v1336_v24, %v897_v27  ;;  %655 = vmatmul.bf16.gmra.mxu0 %v15156_v17  ;;  %v906_v30 = vpop.f32.mrf.mxu1  ;;  %v12975_v24 = vld [vmem:[%s15425_s19 + $0xa4] sm:$0xff]  ;;  %v14114_v27 = vld [vmem:[%s15425_s19 + $0xb0] sm:$0xff]  }
 0x12c   : > { %1862 = vmatmul.bf16.gmra.mxu3 %v1687_v26  ;;  %v1205_v59 = vrot.slane %v12975_v24, 1 }
 0x12d   : > { %1385 = vmatmul.bf16.gmra.mxu2 %v1204_v14  ;;  %v12976_v14 = vld [vmem:[%s15425_s19 + $0xac] sm:$0xff] }
 0x12e   : > { %945 = vmatmul.bf16.gmra.mxu1 %v1685_v50  ;;  %v1206_v50 = vsel %vm1165_vm1, %v1203_v28, %v1205_v59 }
 0x12f   : > { %v1823_v11 = vpop.f32.mrf.mxu3 }
 0x130   : > { %v15702_v35 = vadd.f32 %v1823_v11, %v1432_v29  ;;  %v618_v41 = vpop.f32.mrf.mxu0  ;;  %v1346_v22 = vpop.f32.mrf.mxu2  ;;  %v1690_v29 = vrot.slane %v14114_v27, 3 }
 0x131   : > { %v899_v46 = vadd.f32 %v898_v36, %v618_v41 }
 0x133   : > { %v1433_v34 = vadd.f32 %v1338_v44, %v899_v46  ;;  %v908_v52 = vpop.f32.mrf.mxu1  ;;  %v15160_v46 = vld [vmem:[%s15425_s19 + $0x94] sm:$0xff]  }
 0x137   : > { %v1825_v42 = vpop.f32.mrf.mxu3 }
 0x138   : > { %v15706_v57 = vadd.f32 %v1825_v42, %v1433_v34  ;;  %v621_v38 = vpop.f32.mrf.mxu0  ;;  %v1348_v36 = vpop.f32.mrf.mxu2  ;;  %v1207_v34 = vrot.slane %v12976_v14, 1 }
 0x139   : > { %v902_v1 = vadd.f32 %v901_v63, %v621_v38 }
 0x13b   : > { %v1434_v2 = vadd.f32 %v1341_v5, %v902_v1  ;;  %660 = vmatmul.bf16.gmra.mxu0 %v15158_v58  ;;  %v911_v13 = vpop.f32.mrf.mxu1  ;;  %v13041_v5 = vld [vmem:[%s19427_s1 + $0x1b0] sm:$0xff]  ;;  %v1208_v58 = vsel %vm1165_vm1, %v1205_v59, %v1207_v34  ;;  %v15162_v59 = vld [vmem:[%s15425_s19 + $0x9c] sm:$0xff]  }
 0x13c   : > { %1867 = vmatmul.bf16.gmra.mxu3 %v1689_v53  ;;  %3042 = vmatpush.bf16.msrb.mxu2 %v13041_v5 }
 0x13d   : > { %1390 = vmatmul.bf16.gmra.mxu2 %v1206_v50 }
 0x13e   : > { %950 = vmatmul.bf16.gmra.mxu1 %v1687_v26  ;;  %v1691_v26 = vsel %vm725_vm0, %v1688_v49, %v1690_v29 }
 0x13f   : > { %v1828_v44 = vpop.f32.mrf.mxu3 }
 0x140   : > { %v15711_v16 = vadd.f32 %v1828_v44, %v1434_v2  ;;  %v623_v17 = vpop.f32.mrf.mxu0  ;;  %v1351_v63 = vpop.f32.mrf.mxu2 }
 0x141   : > { %v904_v20 = vadd.f32 %v903_v21, %v623_v17  ;;  %v13033_v21 = vld [vmem:[%s19427_s1 + $0x170] sm:$0xff]  ;;  %v14115_v17 = vld [vmem:[%s15425_s19 + $0xb8] sm:$0xff]  }
 0x142   : > { %2555 = vmatpush.bf16.msrb.mxu1 %v13033_v21 }
 0x143   : > { %v1435_v10 = vadd.f32 %v1343_v6, %v904_v20  ;;  %v913_v11 = vpop.f32.mrf.mxu1  ;;  %v15729_v20 = vrot.slane %v14115_v17, 3 }
 0x147   : > { %v1830_v28 = vpop.f32.mrf.mxu3 }
 0x148   : > { %v15718_v41 = vadd.f32 %v1830_v28, %v1435_v10  ;;  %v626_v48 = vpop.f32.mrf.mxu0  ;;  %v1353_v42 = vpop.f32.mrf.mxu2  ;;  %v1693_v28 = vsel %vm725_vm0, %v1690_v29, %v15729_v20 }
 0x149   : > { %v907_v6 = vadd.f32 %v906_v30, %v626_v48 }
 0x14b   : > { %v1436_v24 = vadd.f32 %v1346_v22, %v907_v6  ;;  %665 = vmatmul.bf16.gmra.mxu0 %v15160_v46  ;;  %v916_v1 = vpop.f32.mrf.mxu1  ;;  %v12977_v22 = vld [vmem:[%s15425_s19 + $0xb4] sm:$0xff] }
 0x14c   : > { %1872 = vmatmul.bf16.gmra.mxu3 %v1691_v26 }
 0x14d   : > { %1395 = vmatmul.bf16.gmra.mxu2 %v1208_v58 }
 0x14e   : > { %955 = vmatmul.bf16.gmra.mxu1 %v1689_v53 }
 0x14f   : > { %v1833_v38 = vpop.f32.mrf.mxu3 }
 0x150   : > { %v15726_v2 = vadd.f32 %v1833_v38, %v1436_v24  ;;  %v628_v50 = vpop.f32.mrf.mxu0  ;;  %v1356_v49 = vpop.f32.mrf.mxu2 }
 0x151   : > { %v909_v44 = vadd.f32 %v908_v52, %v628_v50  ;;  %v1209_v52 = vrot.slane %v12977_v22, 1  ;;  %v14116_v50 = vld [vmem:[%s15425_s19 + $0xc0] sm:$0xff]  }
 0x153   : > { %v1437_v30 = vadd.f32 %v1348_v36, %v909_v44  ;;  %v15732_v10 = vpop.f32.mrf.mxu1  ;;  %v1210_v36 = vsel %vm1165_vm1, %v1207_v34, %v1209_v52  ;;  %v12978_v44 = vld [vmem:[%s15425_s19 + $0xbc] sm:$0xff]  ;;  %v15164_v34 = vld [vmem:[%s15425_s19 + $0xa4] sm:$0xff]  }
 0x157   : > { %v1835_v27 = vpop.f32.mrf.mxu3 }
 0x158   : > { %v15734_v5 = vadd.f32 %v1835_v27, %v1437_v30  ;;  %v631_v14 = vpop.f32.mrf.mxu0  ;;  %v15739_v53 = vpop.f32.mrf.mxu2 }
 0x159   : > { %v912_v46 = vadd.f32 %v911_v13, %v631_v14 }
 0x15b   : > { %v1438_v21 = vadd.f32 %v1351_v63, %v912_v46  ;;  %670 = vmatmul.bf16.gmra.mxu0 %v15162_v59  ;;  %v921_v6 = vpop.f32.mrf.mxu1  ;;  %v1694_v63 = vrot.slane %v14116_v50, 3 }
 0x15c   : > { %1877 = vmatmul.bf16.gmra.mxu3 %v1693_v28 }
 0x15d   : > { %1400 = vmatmul.bf16.gmra.mxu2 %v1210_v36  ;;  %v1695_v59 = vsel %vm725_vm0, %v15729_v20, %v1694_v63 }
 0x15e   : > { %960 = vmatmul.bf16.gmra.mxu1 %v1691_v26 }
 0x15f   : > { %v1838_v48 = vpop.f32.mrf.mxu3 }
 0x160   : > { %v15742_v24 = vadd.f32 %v1838_v48, %v1438_v21  ;;  %v633_v58 = vpop.f32.mrf.mxu0  ;;  %v1361_v29 = vpop.f32.mrf.mxu2 }
 0x161   : > { %v914_v38 = vadd.f32 %v913_v11, %v633_v58  ;;  %v1211_v11 = vrot.slane %v12978_v44, 1  ;;  %v13040_v58 = vld [vmem:[%s19427_s1 + $0x1a8] sm:$0xff]  ;;  %v340_v44 = vld [vmem:[%s15425_s19 + $0xc0] sm:$0x7] }
 0x162   : > { %3043 = vmatpush.bf16.msrb.mxu2 %v13040_v58 }
 0x163   : > { %v1439_v13 = vadd.f32 %v1353_v42, %v914_v38  ;;  %v15746_v30 = vpop.f32.mrf.mxu1  ;;  %v1212_v42 = vsel %vm1165_vm1, %v1209_v52, %v1211_v11  ;;  %v1024_v38 = vld [vmem:[%s15425_s19 + $0xc4] sm:$0x1]  ;;  %v13032_v52 = vld [vmem:[%s19427_s1 + $0x168] sm:$0xff] }
 0x164   : > { %2556 = vmatpush.bf16.msrb.mxu1 %v13032_v52  ;;  %v698_v52 = vunpack.c.l.b16 %v292_v54 }
 0x167   : > { %v1840_v17 = vpop.f32.mrf.mxu3 }
 0x168   : > { %v15748_v22 = vadd.f32 %v1840_v17, %v1439_v13  ;;  %v636_v27 = vpop.f32.mrf.mxu0  ;;  %v15753_v26 = vpop.f32.mrf.mxu2 }
 0x169   : > { %v917_v14 = vadd.f32 %v916_v1, %v636_v27  ;;  %v14117_v1 = vld [vmem:[%s15425_s19 + $0xc8] sm:$0xff]  }
 0x16a   : > { %v1696_v17 = vrot.slane %v14117_v1, 3 }
 0x16b   : > { %v1440_v46 = vadd.f32 %v1356_v49, %v917_v14  ;;  %675 = vmatmul.bf16.gmra.mxu0 %v15164_v34  ;;  %v926_v36 = vpop.f32.mrf.mxu1  ;;  %v1139_v49 = vunpack.c.l.b16 %v1024_v38  ;;  %v699_v34 = vunpack.c.l.b16 %v340_v44 }
 0x16c   : > { %1882 = vmatmul.bf16.gmra.mxu3 %v1695_v59 }
 0x16d   : > { %1405 = vmatmul.bf16.gmra.mxu2 %v1212_v42  ;;  %v1164_v27 = vpack.c.b16 %v1139_v49, %v1139_v49  ;;  %v15166_v42 = vld [vmem:[%s15425_s19 + $0xac] sm:$0xff]  }
 0x16e   : > { %965 = vmatmul.bf16.gmra.mxu1 %v1693_v28 }
 0x16f   : > { %v1843_v21 = vpop.f32.mrf.mxu3  ;;  %v1213_v38 = vrot.slane %v1164_v27, 1  ;;  %v19462_v27 = vunpack.c.l.b16 %v15503_v31 }
 0x170   : > { %v15756_v48 = vadd.f32 %v1843_v21, %v1440_v46  ;;  %v15762_v50 = vpop.f32.mrf.mxu0  ;;  %v1366_v13 = vpop.f32.mrf.mxu2  ;;  %v724_v46 = vpack.c.b16 %v699_v34, %v699_v34  ;;  %v1697_v21 = vsel %vm725_vm0, %v1694_v63, %v1696_v17 }
 0x171   : > { %v1214_v49 = vsel %vm1165_vm1, %v1211_v11, %v1213_v38 }
 0x172   : > { %v773_v51 = vrot.slane %v724_v46, 3  ;;  %v700_v46 = vpack.c.b16 %v19462_v27, %v698_v52 }
 0x173   : > { %v15771_v14 = vpop.f32.mrf.mxu1 }
 0x174   : > { %19460 = vst [vmem:[#allocation4_spill] sm:$0xff] %v15771_v14  ;;  %v774_v14 = vsel %vm725_vm0, %v15729_v20, %v773_v51  ;;  %v726_v54 = vrot.slane %v700_v46, 3 }
 0x177   : > { %v15769_v59 = vpop.f32.mrf.mxu3 }
 0x178   : > { %v641_v28 = vpop.f32.mrf.mxu0  ;;  %v15776_v1 = vpop.f32.mrf.mxu2 }
 0x179   : > { %v922_v58 = vadd.f32 %v921_v6, %v641_v28  ;;  %19461 = vst [vmem:[#allocation5_spill] sm:$0xff] %v15776_v1  ;;  %v19436_v28 = vrot.slane %v15506_v32, 3 }
 0x17b   : > { %v1442_v37 = vadd.f32 %v1361_v29, %v922_v58  ;;  %680 = vmatmul.bf16.gmra.mxu0 %v15166_v42  ;;  %v931_v34 = vpop.f32.mrf.mxu1  ;;  %v14118_v29 = vld [vmem:[%s15425_s19 + $0xd0] sm:$0xff]   ;;  %v728_v31 = vsel %vm725_vm0, %v726_v54, %v19436_v28  ;;  %v15169_v54 = vld [vmem:[%s15425_s19 + $0xbc] sm:$0xff] }
 0x17c   : > { %1887 = vmatmul.bf16.gmra.mxu3 %v1697_v21  ;;  %v1698_v11 = vrot.slane %v14118_v29, 3  ;;  %v13031_v28 = vld [vmem:[%s19427_s1 + $0x160] sm:$0xff] }
 0x17d   : > { %1410 = vmatmul.bf16.gmra.mxu2 %v1214_v49  ;;  %v1512_v49 = vld [vmem:[%s15425_s19 + $0xd8] sm:$0x7]  ;;  %2557 = vmatpush.bf16.msrb.mxu1 %v13031_v28 }
 0x17e   : > { %970 = vmatmul.bf16.gmra.mxu1 %v774_v14  ;;  %v1699_v20 = vsel %vm725_vm0, %v1696_v17, %v1698_v11 }
 0x17f   : > { %v1848_v44 = vpop.f32.mrf.mxu3 }
 0x180   : > { %v15781_v63 = vadd.f32 %v1848_v44, %v1442_v37  ;;  %v15783_v6 = vpop.f32.mrf.mxu0  ;;  %v1371_v42 = vpop.f32.mrf.mxu2  ;;  %v15168_v37 = vld [vmem:[%s15425_s19 + $0xb4] sm:$0xff]   ;;  %v1627_v44 = vunpack.c.l.b16 %v1512_v49 }
 0x182   : > { %v1652_v17 = vpack.c.b16 %v1627_v44, %v1627_v44 }
 0x183   : > { %v15791_v58 = vpop.f32.mrf.mxu1 }
 0x184   : > { %19464 = vst [vmem:[#allocation7_spill] sm:$0xff] %v15791_v58 }
 0x187   : > { %v15789_v21 = vpop.f32.mrf.mxu3 }
 0x188   : > { %19463 = vst [vmem:[#allocation6_spill] sm:$0xff] %v15789_v21  ;;  %v646_v51 = vpop.f32.mrf.mxu0  ;;  %v15799_v52 = vpop.f32.mrf.mxu2 }
 0x189   : > { %v927_v38 = vadd.f32 %v926_v36, %v646_v51  ;;  %19465 = vst [vmem:[#allocation8_spill] sm:$0xff] %v15799_v52  ;;  %v1700_v51 = vrot.slane %v1652_v17, 3 }
 0x18b   : > { %v1444_v14 = vadd.f32 %v1366_v13, %v927_v38  ;;  %685 = vmatmul.bf16.gmra.mxu0 %v15168_v37  ;;  %v936_v27 = vpop.f32.mrf.mxu1  ;;  %v1701_v37 = vsel %vm725_vm0, %v1698_v11, %v1700_v51 }
 0x18c   : > { %1892 = vmatmul.bf16.gmra.mxu3 %v1699_v20 }
 0x18f   : > { %v1853_v29 = vpop.f32.mrf.mxu3 }
 0x190   : > { %v15801_v46 = vadd.f32 %v1853_v29, %v1444_v14  ;;  %v15803_v58 = vpop.f32.mrf.mxu0  ;;  %v1376_v36 = vpop.f32.mrf.mxu2  ;;  %v13039_v14 = vld [vmem:[%s19427_s1 + $0x1a0] sm:$0xff] }
 0x191   : > { %19467 = vst [vmem:[#allocation10_spill] sm:$0xff] %v15803_v58  ;;  %3044 = vmatpush.bf16.msrb.mxu2 %v13039_v14  ;;  %v14786_v58 = vld [vmem:[%s15425_s19 + $0x84] sm:$0xff]  }
 0x192   : > { %19466 = vst [vmem:[#allocation9_spill] sm:$0xff] %v15801_v46 }
 0x193   : > { %v15807_v21 = vpop.f32.mrf.mxu1 }
 0x194   : > { %19469 = vst [vmem:[#allocation12_spill] sm:$0xff] %v15807_v21 }
 0x197   : > { %v15805_v1 = vpop.f32.mrf.mxu3 }
 0x198   : > { %19468 = vst [vmem:[#allocation11_spill] sm:$0xff] %v15805_v1  ;;  %v651_v13 = vpop.f32.mrf.mxu0  ;;  %v15811_v49 = vpop.f32.mrf.mxu2 }
 0x199   : > { %v932_v20 = vadd.f32 %v931_v34, %v651_v13  ;;  %19470 = vst [vmem:[#allocation13_spill] sm:$0xff] %v15811_v49 }
 0x19b   : > { %v1446_v38 = vadd.f32 %v1371_v42, %v932_v20  ;;  %690 = vmatmul.bf16.gmra.mxu0 %v15169_v54  ;;  %v941_v29 = vpop.f32.mrf.mxu1  ;;  %v13050_v42 = vld [vmem:[%s19427_s1 + $0x1f8] sm:$0xff] }
 0x19c   : > { %1897 = vmatmul.bf16.gmra.mxu3 %v1701_v37  ;;  %v13002_v20 = vld [vmem:[%s19427_s1 + $0x138] sm:$0xff] }
 0x19d   : > { %3334 = vmatpush.bf16.msrb.mxu3 %v13050_v42  ;;  %v13049_v42 = vld [vmem:[%s19427_s1 + $0x1f0] sm:$0xff] }
 0x19f   : > { %v1858_v44 = vpop.f32.mrf.mxu3 }
 0x1a0   : > { %v15816_v17 = vadd.f32 %v1858_v44, %v1446_v38  ;;  %v15821_v11 = vpop.f32.mrf.mxu0  ;;  %v1381_v34 = vpop.f32.mrf.mxu2  ;;  %v13001_v44 = vld [vmem:[%s19427_s1 + $0x130] sm:$0xff] }
 0x1a1   : > { %19472 = vst [vmem:[#allocation15_spill] sm:$0xff] %v15821_v11  ;;  %3335 = vmatpush.bf16.msrb.mxu3 %v13049_v42  ;;  %v19479_v42 = vrot.slane %v15541_v47, 3 }
 0x1a2   : > { %19471 = vst [vmem:[#allocation14_spill] sm:$0xff] %v15816_v17  ;;  %v13004_v17 = vld [vmem:[%s15425_s19 + $0x24] sm:$0xff] }
 0x1a3   : > { %v15828_v13 = vpop.f32.mrf.mxu1  ;;  %v2434_v46 = vrot.slane %v13004_v17, 1 }
 0x1a4   : > { %19474 = vst [vmem:[#allocation17_spill] sm:$0xff] %v15828_v13 }
 0x1a7   : > { %v15826_v51 = vpop.f32.mrf.mxu3 }
 0x1a8   : > { %19473 = vst [vmem:[#allocation16_spill] sm:$0xff] %v15826_v51  ;;  %v656_v54 = vpop.f32.mrf.mxu0  ;;  %v15833_v14 = vpop.f32.mrf.mxu2 }
 0x1a9   : > { %v937_v37 = vadd.f32 %v936_v27, %v656_v54  ;;  %19475 = vst [vmem:[#allocation18_spill] sm:$0xff] %v15833_v14  ;;  %v13048_v54 = vld [vmem:[%s19427_s1 + $0x1e8] sm:$0xff]  ;;  %v19480_v14 = vrot.slane %v15506_v32, 3  ;;  %v13046_v32 = vld [vmem:[%s19427_s1 + $0x1d8] sm:$0xff] }
 0x1aa   : > { %3336 = vmatpush.bf16.msrb.mxu3 %v13048_v54 }
 0x1ab   : > { %v1448_v38 = vadd.f32 %v1376_v36, %v937_v37  ;;  %855 = vmatmul.bf16.vlgmr.msrb.gmra.mxu0 %v728_v31  ;;  %v15845_v36 = vpop.f32.mrf.mxu1  ;;  %v13000_v31 = vld [vmem:[%s19427_s1 + $0x128] sm:$0xff]  ;;  %v730_v49 = vsel %vm725_vm0, %v19480_v14, %v19479_v42 }
 0x1ac   : > { %2067 = vmatpush.bf16.msrb.mxu0 %v13002_v20 }
 0x1af   : > { %v1863_v28 = vpop.f32.mrf.mxu3 }
 0x1b0   : > { %v15841_v13 = vadd.f32 %v1863_v28, %v1448_v38  ;;  %v15843_v27 = vpop.f32.mrf.mxu0  ;;  %2068 = vmatpush.bf16.msrb.mxu0 %v13001_v44  ;;  %v15853_v37 = vpop.f32.mrf.mxu2  ;;  %v12999_v38 = vld [vmem:[%s19427_s1 + $0x120] sm:$0xff] }
 0x1b1   : > { %19477 = vst [vmem:[#allocation20_spill] sm:$0xff] %v15843_v27  ;;  %v13047_v28 = vld [vmem:[%s19427_s1 + $0x1e0] sm:$0xff]  ;;  %v11413_v27 = vld [vmem:[%s15425_s19 + $0x1c] sm:$0xe] }
 0x1b2   : > { %19476 = vst [vmem:[#allocation19_spill] sm:$0xff] %v15841_v13  ;;  %3337 = vmatpush.bf16.msrb.mxu3 %v13047_v28  ;;  %v11173_v28 = vld [vmem:[%s15425_s19 + $0x4] sm:$0xe]  ;;  %v2732_v13 = vld [vmem:[%s15425_s19 + $0x34] sm:$0xf] }
 0x1b3   : > { %v15877_v14 = vpop.f32.mrf.mxu1 }
 0x1b4   : > { %2069 = vmatpush.bf16.msrb.mxu0 %v13000_v31  ;;  %v13038_v31 = vld [vmem:[%s19427_s1 + $0x198] sm:$0xff]  ;;  %19481 = vst [vmem:[#allocation22_spill] sm:$0xff] %v15877_v14 }
 0x1b5   : > { %3045 = vmatpush.bf16.msrb.mxu2 %v13038_v31 }
 0x1b6   : > { %3338 = vmatpush.bf16.msrb.mxu3 %v13046_v32  ;;  %v15900_v32 = vld [vmem:[%s15425_s19 + $0xc] sm:$0xff] }
 0x1b7   : > { %v15855_v20 = vpop.f32.mrf.mxu3 }
 0x1b8   : > { %19478 = vst [vmem:[#allocation21_spill] sm:$0xff] %v15855_v20  ;;  %v661_v44 = vpop.f32.mrf.mxu0  ;;  %2070 = vmatpush.bf16.msrb.mxu0 %v12999_v38  ;;  %v12998_v20 = vld [vmem:[%s19427_s1 + $0x118] sm:$0xff]  ;;  %v13037_v38 = vld [vmem:[%s19427_s1 + $0x190] sm:$0xff] }
 0x1b9   : > { %v942_v54 = vadd.f32 %v941_v29, %v661_v44  ;;  %v13030_v29 = vld [vmem:[%s19427_s1 + $0x158] sm:$0xff]  ;;  %v12955_v44 = vld [vmem:[%s15425_s19 + $0x4] sm:$0xf0]  ;;  %3046 = vmatpush.bf16.msrb.mxu2 %v13037_v38 }
 0x1ba   : > { %2558 = vmatpush.bf16.msrb.mxu1 %v13030_v29  ;;  %v11174_v14 = vor.u32 %v12955_v44, %v11173_v28  ;;  %v13029_v29 = vld [vmem:[%s19427_s1 + $0x150] sm:$0xff]  ;;  %v13036_v38 = vld [vmem:[%s19427_s1 + $0x188] sm:$0xff] }
 0x1bb   : > { %v1450_v47 = vadd.f32 %v1381_v34, %v942_v54  ;;  %860 = vmatmul.bf16.gmra.mxu0 %v730_v49  ;;  %v15887_v34 = vpop.f32.mrf.mxu2  ;;  %v12997_v49 = vld [vmem:[%s19427_s1 + $0x110] sm:$0xff]  ;;  %v13044_v28 = vld [vmem:[%s19427_s1 + $0x1c8] sm:$0xff] }
 0x1bc   : > { %2071 = vmatpush.bf16.msrb.mxu0 %v12998_v20  ;;  %19482 = vst [vmem:[#allocation23_spill] sm:$0xff] %v15887_v34  ;;  %v13045_v20 = vld [vmem:[%s19427_s1 + $0x1d0] sm:$0xff] }
 0x1bd   : > { %3339 = vmatpush.bf16.msrb.mxu3 %v13045_v20  ;;  %v2731_v34 = vld [vmem:[%s15425_s19 + $0x30] sm:$0x8]  ;;  %3047 = vmatpush.bf16.msrb.mxu2 %v13036_v38  ;;  %v1167_v20 = vrot.slane %v15900_v32, 1  ;;  %v13035_v38 = vld [vmem:[%s19427_s1 + $0x180] sm:$0xff] }
 0x1be   : > { %2559 = vmatpush.bf16.msrb.mxu1 %v13029_v29  ;;  %v2846_v44 = vunpack.c.l.b16 %v2731_v34  ;;  %v13028_v29 = vld [vmem:[%s19427_s1 + $0x148] sm:$0xff]  ;;  %v13043_v34 = vld [vmem:[%s19427_s1 + $0x1c0] sm:$0xff] }
 0x1bf   : > { %v1868_v42 = vpop.f32.mrf.mxu3 }
 0x1c0   : > { %v15895_v31 = vadd.f32 %v1868_v42, %v1450_v47  ;;  %v15897_v54 = vpop.f32.mrf.mxu0  ;;  %2072 = vmatpush.bf16.msrb.mxu0 %v12997_v49  ;;  %v12996_v47 = vld [vmem:[%s19427_s1 + $0x108] sm:$0xff]  ;;  %v2847_v42 = vunpack.c.l.b16 %v2732_v13  ;;  %v1166_v49 = vrot.slane %v11174_v14, 1  ;;  %v951_v13 = vpop.f32.mrf.mxu1  ;;  %v12995_v14 = vld [vmem:[%s19427_s1 + $0x100] sm:$0xff] }
 0x1c1   : > { %19484 = vst [vmem:[#allocation25_spill] sm:$0xff] %v15897_v54  ;;  %3340 = vmatpush.bf16.msrb.mxu3 %v13044_v28  ;;  %v14234_v54 = vld [vmem:[%s15425_s19 + $0x38] sm:$0xff]   ;;  %3048 = vmatpush.bf16.msrb.mxu2 %v13035_v38  ;;  %v13027_v38 = vld [vmem:[%s19427_s1 + $0x140] sm:$0xff] }
 0x1c2   : > { %19483 = vst [vmem:[#allocation24_spill] sm:$0xff] %v15895_v31  ;;  %v2895_v31 = vpack.c.b16 %v2847_v42, %v2846_v44  ;;  %2560 = vmatpush.bf16.msrb.mxu1 %v13028_v29  ;;  %v13494_v28 = vunpack.c.l.b16 %v14234_v54  ;;  %v13003_v44 = vld [vmem:[%s15425_s19 + $0x1c] sm:$0xf0] }
 0x1c3   : > { %v1391_v52 = vpop.f32.mrf.mxu2  ;;  %v11414_v11 = vor.u32 %v13003_v44, %v11413_v27 }
 0x1c4   : > { %2073 = vmatpush.bf16.msrb.mxu0 %v12996_v47  ;;  %v2920_v32 = vrot.slane %v2895_v31, 3  ;;  %v2921_v47 = vrot.slane %v14234_v54, 3  ;;  %v3238_v54 = vpack.c.b16 %v13494_v28, %v2847_v42  ;;  %v19491_v28 = vrot.slane %v15532_v43, 1 }
 0x1c5   : > { %3341 = vmatpush.bf16.msrb.mxu3 %v13043_v34  ;;  %v2433_v1 = vrot.slane %v11414_v11, 1 }
 0x1c6   : > { %v2922_v29 = vsel %vm725_vm0, %v2920_v32, %v2921_v47  ;;  %2561 = vmatpush.bf16.msrb.mxu1 %v13027_v38 }
 0x1c7   : > { %v15924_v21 = vpop.f32.mrf.mxu3  ;;  %3049 = vmatmul.bf16.vlgmr.msrb.gmra.mxu2 %v2922_v29  ;;  %v2435_v34 = vsel %vm1165_vm1, %v2433_v1, %v2434_v46  ;;  %v1170_v1 = vsel %vm1165_vm1, %v1167_v20, %v19491_v28  ;;  %v13005_v29 = vld [vmem:[%s15425_s19 + $0x2c] sm:$0xff] }
 0x1c8   : > { %19485 = vst [vmem:[#allocation26_spill] sm:$0xff] %v15924_v21  ;;  %v666_v51 = vpop.f32.mrf.mxu0  ;;  %v1168_v21 = vsel %vm1165_vm1, %v1166_v49, %v1167_v20  ;;  %2074 = vmatpush.bf16.msrb.mxu0 %v12995_v14  ;;  %3342 = vmatmul.bf16.vlgmr.msrb.gmra.mxu3 %v3238_v54  ;;  %v13082_v14 = vld [vmem:[%s19427_s1 + $0x238] sm:$0xff]  ;;  %v15950_v17 = vpop.f32.mrf.mxu1 }
 0x1c9   : > { %v947_v31 = vadd.f32 %v15845_v36, %v666_v51  ;;  %2562 = vmatmul.bf16.vlgmr.msrb.gmra.mxu1 %v2435_v34  ;;  %19488 = vst [vmem:[#allocation29_spill] sm:$0xff] %v15950_v17 }
 0x1cb   : > { %v1452_v49 = vadd.f32 %v15853_v37, %v947_v31  ;;  %1295 = vmatmul.bf16.vlgmr.msra.gmra.mxu0 %v1168_v21  ;;  %v15952_v11 = vpop.f32.mrf.mxu2  ;;  %v14235_v21 = vld [vmem:[%s15425_s19 + $0x40] sm:$0xff]  }
 0x1cc   : > { %3821 = vmatpush.bf16.msra.mxu0 %v13082_v14  ;;  %19489 = vst [vmem:[#allocation30_spill] sm:$0xff] %v15952_v11  ;;  %v2923_v42 = vrot.slane %v14235_v21, 3  ;;  %v14768_v31 = vld [vmem:[%s15425_s19 + $0x3c] sm:$0xff]  }
 0x1ce   : > { %v2924_v44 = vsel %vm725_vm0, %v2921_v47, %v2923_v42 }
 0x1cf   : > { %v1873_v51 = vpop.f32.mrf.mxu3 }
 0x1d0   : > { %v15946_v27 = vadd.f32 %v1873_v51, %v1452_v49  ;;  %v15948_v36 = vpop.f32.mrf.mxu0  ;;  %v956_v54 = vpop.f32.mrf.mxu1  ;;  %v2436_v49 = vrot.slane %v13005_v29, 1  ;;  %v13006_v29 = vld [vmem:[%s15425_s19 + $0x34] sm:$0xff] }
 0x1d1   : > { %19487 = vst [vmem:[#allocation28_spill] sm:$0xff] %v15948_v36 }
 0x1d2   : > { %19486 = vst [vmem:[#allocation27_spill] sm:$0xff] %v15946_v27  ;;  %v2437_v51 = vsel %vm1165_vm1, %v2434_v46, %v2436_v49  ;;  %v14736_v27 = vld [vmem:[%s15425_s19 + $0x5c] sm:$0xff]  }
 0x1d3   : > { %v1396_v34 = vpop.f32.mrf.mxu2 }
 0x1d7   : > { %v15955_v37 = vpop.f32.mrf.mxu3  ;;  %3054 = vmatmul.bf16.gmra.mxu2 %v2924_v44 }
 0x1d8   : > { %19490 = vst [vmem:[#allocation31_spill] sm:$0xff] %v15955_v37  ;;  %v671_v32 = vpop.f32.mrf.mxu0  ;;  %3347 = vmatmul.bf16.gmra.mxu3 %v14768_v31  ;;  %v15968_v21 = vpop.f32.mrf.mxu1  ;;  %v2438_v31 = vrot.slane %v13006_v29, 1 }
 0x1d9   : > { %v952_v38 = vadd.f32 %v951_v13, %v671_v32  ;;  %2567 = vmatmul.bf16.gmra.mxu1 %v2437_v51  ;;  %19494 = vst [vmem:[#allocation34_spill] sm:$0xff] %v15968_v21  ;;  %v14236_v13 = vld [vmem:[%s15425_s19 + $0x48] sm:$0xff]  }
 0x1da   : > { %v2439_v51 = vsel %vm1165_vm1, %v2436_v49, %v2438_v31  ;;  %v13007_v49 = vld [vmem:[%s15425_s19 + $0x3c] sm:$0xff]  ;;  %v14772_v21 = vld [vmem:[%s15425_s19 + $0x4c] sm:$0xff]  }
 0x1db   : > { %v1454_v14 = vadd.f32 %v1391_v52, %v952_v38  ;;  %1300 = vmatmul.bf16.gmra.mxu0 %v1170_v1  ;;  %v15973_v28 = vpop.f32.mrf.mxu2  ;;  %v2925_v52 = vrot.slane %v14236_v13, 3  ;;  %v14770_v38 = vld [vmem:[%s15425_s19 + $0x44] sm:$0xff]  }
 0x1dc   : > { %19496 = vst [vmem:[#allocation36_spill] sm:$0xff] %v15973_v28 }
 0x1dd   : > { %v2926_v44 = vsel %vm725_vm0, %v2923_v42, %v2925_v52 }
 0x1df   : > { %v1878_v43 = vpop.f32.mrf.mxu3 }
 0x1e0   : > { %v15964_v20 = vadd.f32 %v1878_v43, %v1454_v14  ;;  %v15966_v47 = vpop.f32.mrf.mxu0  ;;  %v961_v13 = vpop.f32.mrf.mxu1 }
 0x1e1   : > { %19493 = vst [vmem:[#allocation33_spill] sm:$0xff] %v15966_v47  ;;  %v13013_v47 = vld [vmem:[%s15425_s19 + $0x6c] sm:$0xff] }
 0x1e2   : > { %19492 = vst [vmem:[#allocation32_spill] sm:$0xff] %v15964_v20 }
 0x1e7   : > { %v15971_v32 = vpop.f32.mrf.mxu3  ;;  %3059 = vmatmul.bf16.gmra.mxu2 %v2926_v44 }
 0x1e8   : > { %19495 = vst [vmem:[#allocation35_spill] sm:$0xff] %v15971_v32  ;;  %v676_v1 = vpop.f32.mrf.mxu0  ;;  %3352 = vmatmul.bf16.gmra.mxu3 %v14770_v38 }
 0x1e9   : > { %v957_v46 = vadd.f32 %v956_v54, %v676_v1  ;;  %2572 = vmatmul.bf16.gmra.mxu1 %v2439_v51  ;;  %v1401_v54 = vpop.f32.mrf.mxu2  ;;  %v14237_v1 = vld [vmem:[%s15425_s19 + $0x50] sm:$0xff]  }
 0x1ea   : > { %v2927_v29 = vrot.slane %v14237_v1, 3  ;;  %v13081_v1 = vld [vmem:[%s19427_s1 + $0x230] sm:$0xff] }
 0x1eb   : > { %v1456_v14 = vadd.f32 %v1396_v34, %v957_v46  ;;  %2075 = vmatmul.bf16.vlgmr.msrb.gmra.mxu0 %v15457_v18  ;;  %v14722_v34 = vld [vmem:[%s15425_s19 + $0x24] sm:$0xff]   ;;  %v15988_v18 = vpop.f32.mrf.mxu1 }
 0x1ec   : > { %19500 = vst [vmem:[#allocation40_spill] sm:$0xff] %v15988_v18  ;;  %v2928_v38 = vsel %vm725_vm0, %v2925_v52, %v2927_v29  ;;  %3822 = vmatpush.bf16.msra.mxu0 %v13081_v1 }
 0x1ef   : > { %v1883_v43 = vpop.f32.mrf.mxu3 }
 0x1f0   : > { %v15980_v28 = vadd.f32 %v1883_v43, %v1456_v14  ;;  %v15982_v42 = vpop.f32.mrf.mxu0  ;;  %v2440_v43 = vrot.slane %v13007_v49, 1 }
 0x1f1   : > { %19498 = vst [vmem:[#allocation38_spill] sm:$0xff] %v15982_v42  ;;  %v15993_v14 = vpop.f32.mrf.mxu2 }
 0x1f2   : > { %19497 = vst [vmem:[#allocation37_spill] sm:$0xff] %v15980_v28  ;;  %v2441_v18 = vsel %vm1165_vm1, %v2438_v31, %v2440_v43  ;;  %v13008_v31 = vld [vmem:[%s15425_s19 + $0x44] sm:$0xff] }
 0x1f3   : > { %19501 = vst [vmem:[#allocation41_spill] sm:$0xff] %v15993_v14 }
 0x1f7   : > { %v15985_v44 = vpop.f32.mrf.mxu3  ;;  %3064 = vmatmul.bf16.gmra.mxu2 %v2928_v38  ;;  %v966_v38 = vpop.f32.mrf.mxu1 }
 0x1f8   : > { %19499 = vst [vmem:[#allocation39_spill] sm:$0xff] %v15985_v44  ;;  %v681_v46 = vpop.f32.mrf.mxu0  ;;  %3357 = vmatmul.bf16.gmra.mxu3 %v14772_v21 }
 0x1f9   : > { %v962_v51 = vadd.f32 %v961_v13, %v681_v46  ;;  %2577 = vmatmul.bf16.gmra.mxu1 %v2441_v18  ;;  %v1406_v49 = vpop.f32.mrf.mxu2  ;;  %v14774_v18 = vld [vmem:[%s15425_s19 + $0x54] sm:$0xff]  }
 0x1fb   : > { %v1458_v28 = vadd.f32 %v1401_v54, %v962_v51  ;;  %2080 = vmatmul.bf16.gmra.mxu0 %v14722_v34  ;;  %v14238_v54 = vld [vmem:[%s15425_s19 + $0x58] sm:$0xff]   ;;  %v14724_v51 = vld [vmem:[%s15425_s19 + $0x2c] sm:$0xff]  }
 0x1fc   : > { %v2929_v21 = vrot.slane %v14238_v54, 3 }
 0x1fe   : > { %v2930_v44 = vsel %vm725_vm0, %v2927_v29, %v2929_v21 }
 0x1ff   : > { %v1888_v52 = vpop.f32.mrf.mxu3 }
 0x200   : > { %v15999_v13 = vadd.f32 %v1888_v52, %v1458_v28  ;;  %v16001_v46 = vpop.f32.mrf.mxu0  ;;  %v2442_v28 = vrot.slane %v13008_v31, 1  ;;  %v14726_v31 = vld [vmem:[%s15425_s19 + $0x34] sm:$0xff]  }
 0x201   : > { %19503 = vst [vmem:[#allocation43_spill] sm:$0xff] %v16001_v46  ;;  %v16013_v46 = vpop.f32.mrf.mxu2 }
 0x202   : > { %19502 = vst [vmem:[#allocation42_spill] sm:$0xff] %v15999_v13  ;;  %v16010_v13 = vpop.f32.mrf.mxu1 }
 0x203   : > { %19505 = vst [vmem:[#allocation45_spill] sm:$0xff] %v16010_v13 }
 0x204   : > { %19506 = vst [vmem:[#allocation46_spill] sm:$0xff] %v16013_v46 }
 0x207   : > { %v16004_v34 = vpop.f32.mrf.mxu3  ;;  %3069 = vmatmul.bf16.gmra.mxu2 %v2930_v44  ;;  %v14239_v44 = vld [vmem:[%s15425_s19 + $0x60] sm:$0xff]  }
 0x208   : > { %19504 = vst [vmem:[#allocation44_spill] sm:$0xff] %v16004_v34  ;;  %v686_v14 = vpop.f32.mrf.mxu0  ;;  %3362 = vmatmul.bf16.gmra.mxu3 %v14774_v18  ;;  %v2443_v34 = vsel %vm1165_vm1, %v2440_v43, %v2442_v28 }
 0x209   : > { %v967_v1 = vadd.f32 %v966_v38, %v686_v14  ;;  %2582 = vmatmul.bf16.gmra.mxu1 %v2443_v34  ;;  %v1411_v18 = vpop.f32.mrf.mxu2  ;;  %v13009_v34 = vld [vmem:[%s15425_s19 + $0x4c] sm:$0xff] }
 0x20b   : > { %v1460_v52 = vadd.f32 %v1406_v49, %v967_v1  ;;  %2085 = vmatmul.bf16.gmra.mxu0 %v14724_v51  ;;  %v971_v49 = vpop.f32.mrf.mxu1  ;;  %v2931_v51 = vrot.slane %v14239_v44, 3 }
 0x20d   : > { %v2932_v43 = vsel %vm725_vm0, %v2929_v21, %v2931_v51  ;;  %v14240_v21 = vld [vmem:[%s15425_s19 + $0x68] sm:$0xff]  }
 0x20e   : > { %v2933_v42 = vrot.slane %v14240_v21, 3 }
 0x20f   : > { %v1893_v54 = vpop.f32.mrf.mxu3 }
 0x210   : > { %v16015_v29 = vadd.f32 %v1893_v54, %v1460_v52  ;;  %v16017_v14 = vpop.f32.mrf.mxu0  ;;  %v14776_v52 = vld [vmem:[%s15425_s19 + $0x5c] sm:$0xff]   ;;  %v2444_v54 = vrot.slane %v13009_v34, 1  ;;  %v13010_v34 = vld [vmem:[%s15425_s19 + $0x54] sm:$0xff] }
 0x211   : > { %19508 = vst [vmem:[#allocation48_spill] sm:$0xff] %v16017_v14 }
 0x212   : > { %19507 = vst [vmem:[#allocation47_spill] sm:$0xff] %v16015_v29 }
 0x217   : > { %v16020_v38 = vpop.f32.mrf.mxu3  ;;  %3074 = vmatmul.bf16.gmra.mxu2 %v2932_v43  ;;  %v2934_v43 = vsel %vm725_vm0, %v2931_v51, %v2933_v42 }
 0x218   : > { %19509 = vst [vmem:[#allocation49_spill] sm:$0xff] %v16020_v38  ;;  %v691_v1 = vpop.f32.mrf.mxu0  ;;  %3367 = vmatmul.bf16.gmra.mxu3 %v14776_v52  ;;  %v2445_v38 = vsel %vm1165_vm1, %v2442_v28, %v2444_v54  ;;  %v2446_v28 = vrot.slane %v13010_v34, 1  ;;  %v14730_v52 = vld [vmem:[%s15425_s19 + $0x44] sm:$0xff]  }
 0x219   : > { %v972_v13 = vadd.f32 %v971_v49, %v691_v1  ;;  %2587 = vmatmul.bf16.gmra.mxu1 %v2445_v38  ;;  %v14728_v49 = vld [vmem:[%s15425_s19 + $0x3c] sm:$0xff]  }
 0x21a   : > { %v2447_v38 = vsel %vm1165_vm1, %v2444_v54, %v2446_v28 }
 0x21b   : > { %v1462_v46 = vadd.f32 %v1411_v18, %v972_v13  ;;  %2090 = vmatmul.bf16.gmra.mxu0 %v14726_v31  ;;  %v14778_v13 = vld [vmem:[%s15425_s19 + $0x64] sm:$0xff]   ;;  %v14241_v18 = vld [vmem:[%s15425_s19 + $0x70] sm:$0xff]  }
 0x21c   : > { %v2935_v51 = vrot.slane %v14241_v18, 3  ;;  %v14242_v18 = vld [vmem:[%s15425_s19 + $0x78] sm:$0xff]  }
 0x21e   : > { %v2936_v21 = vsel %vm725_vm0, %v2933_v42, %v2935_v51  ;;  %v2937_v42 = vrot.slane %v14242_v18, 3 }
 0x21f   : > { %v1898_v44 = vpop.f32.mrf.mxu3 }
 0x220   : > { %v16027_v29 = vadd.f32 %v1898_v44, %v1462_v46  ;;  %v16029_v14 = vpop.f32.mrf.mxu0  ;;  %v13080_v46 = vld [vmem:[%s19427_s1 + $0x228] sm:$0xff] }
 0x221   : > { %19511 = vst [vmem:[#allocation51_spill] sm:$0xff] %v16029_v14  ;;  %3823 = vmatpush.bf16.msra.mxu0 %v13080_v46  ;;  %v16046_v46 = vpop.f32.mrf.mxu1  ;;  %v14732_v14 = vld [vmem:[%s15425_s19 + $0x4c] sm:$0xff]  }
 0x222   : > { %19510 = vst [vmem:[#allocation50_spill] sm:$0xff] %v16027_v29 }
 0x223   : > { %19512 = vst [vmem:[#allocation52_spill] sm:$0xff] %v16046_v46 }
 0x227   : > { %3079 = vmatmul.bf16.gmra.mxu2 %v2934_v43  ;;  %v13011_v43 = vld [vmem:[%s15425_s19 + $0x5c] sm:$0xff]  ;;  %v16051_v29 = vpop.f32.mrf.mxu3 }
 0x228   : > { %v856_v1 = vpop.f32.mrf.mxu0  ;;  %3372 = vmatmul.bf16.gmra.mxu3 %v14778_v13  ;;  %v2448_v34 = vrot.slane %v13011_v43, 1  ;;  %19514 = vst [vmem:[#allocation54_spill] sm:$0xff] %v16051_v29  ;;  %v13012_v43 = vld [vmem:[%s15425_s19 + $0x64] sm:$0xff] }
 0x229   : > { %2592 = vmatmul.bf16.gmra.mxu1 %v2447_v38  ;;  %v16048_v38 = vpop.f32.mrf.mxu2  ;;  %v2450_v11 = vrot.slane %v13012_v43, 1 }
 0x22a   : > { %v2449_v54 = vsel %vm1165_vm1, %v2446_v28, %v2448_v34  ;;  %19513 = vst [vmem:[#allocation53_spill] sm:$0xff] %v16048_v38  ;;  %v14782_v28 = vld [vmem:[%s15425_s19 + $0x74] sm:$0xff]  }
 0x22b   : > { %2095 = vmatmul.bf16.gmra.mxu0 %v14728_v49  ;;  %v14780_v49 = vld [vmem:[%s15425_s19 + $0x6c] sm:$0xff]   ;;  %v2451_v18 = vsel %vm1165_vm1, %v2448_v34, %v2450_v11 }
 0x230   : > { %v858_v31 = vpop.f32.mrf.mxu0 }
 0x237   : > { %3084 = vmatmul.bf16.gmra.mxu2 %v2936_v21  ;;  %v857_v21 = vadd.f32 %v856_v1, %v15614_v56  ;;  %v859_v1 = vadd.f32 %v858_v31, %v15620_v62  ;;  %v2452_v62 = vrot.slane %v13013_v47, 1  ;;  %v13079_v31 = vld [vmem:[%s19427_s1 + $0x220] sm:$0xff] }
 0x238   : > { %v861_v44 = vpop.f32.mrf.mxu0  ;;  %3377 = vmatmul.bf16.gmra.mxu3 %v14780_v49  ;;  %3824 = vmatpush.bf16.msra.mxu0 %v13079_v31 }
 0x239   : > { %2597 = vmatmul.bf16.gmra.mxu1 %v2449_v54  ;;  %v862_v43 = vadd.f32 %v861_v44, %v15627_v7  ;;  %v2453_v7 = vsel %vm1165_vm1, %v2450_v11, %v2452_v62 }
 0x23b   : > { %2100 = vmatmul.bf16.gmra.mxu0 %v14730_v52  ;;  %v2938_v52 = vsel %vm725_vm0, %v2935_v51, %v2937_v42 }
 0x240   : > { %v863_v13 = vpop.f32.mrf.mxu0 }
 0x246   : > { %v2563_v54 = vpop.f32.mrf.mxu1 }
 0x247   : > { %3089 = vmatmul.bf16.gmra.mxu2 %v2938_v52  ;;  %v14243_v52 = vld [vmem:[%s15425_s19 + $0x80] sm:$0xff]  }
 0x248   : > { %v1296_v32 = vpop.f32.mrf.mxu0  ;;  %3382 = vmatmul.bf16.gmra.mxu3 %v14782_v28  ;;  %v2939_v20 = vrot.slane %v14243_v52, 3 }
 0x249   : > { %v1416_v49 = vadd.f32 %v1296_v32, %v857_v21  ;;  %2602 = vmatmul.bf16.gmra.mxu1 %v2451_v18  ;;  %v14784_v18 = vld [vmem:[%s15425_s19 + $0x7c] sm:$0xff]  }
 0x24a   : > { %v3050_v38 = vpop.f32.mrf.mxu2  ;;  %v2940_v17 = vsel %vm725_vm0, %v2937_v42, %v2939_v20 }
 0x24b   : > { %2105 = vmatmul.bf16.gmra.mxu0 %v14732_v14  ;;  %v3343_v56 = vpop.f32.mrf.mxu3  ;;  %v14734_v14 = vld [vmem:[%s15425_s19 + $0x54] sm:$0xff]  }
 0x24e   : > { %v2565_v32 = vpop.f32.mrf.mxu1 }
 0x250   : > { %v1298_v51 = vpop.f32.mrf.mxu0 }
 0x251   : > { %v1417_v29 = vadd.f32 %v1298_v51, %v859_v1 }
 0x252   : > { %v3052_v21 = vpop.f32.mrf.mxu2 }
 0x253   : > { %v3345_v46 = vpop.f32.mrf.mxu3 }
 0x256   : > { %v2568_v37 = vpop.f32.mrf.mxu1 }
 0x257   : > { %3094 = vmatmul.bf16.gmra.mxu2 %v2940_v17  ;;  %v864_v17 = vadd.f32 %v863_v13, %v15633_v8 }
 0x258   : > { %v1301_v28 = vpop.f32.mrf.mxu0  ;;  %3387 = vmatmul.bf16.gmra.mxu3 %v14784_v18  ;;  %v1903_v18 = vadd.f32 %v15618_v60, %v1416_v49 }
 0x259   : > { %v1418_v34 = vadd.f32 %v1301_v28, %v862_v43  ;;  %2607 = vmatmul.bf16.gmra.mxu1 %v2453_v7  ;;  %v14244_v43 = vld [vmem:[%s15425_s19 + $0x88] sm:$0xff]   ;;  %v13014_v7 = vld [vmem:[%s15425_s19 + $0x74] sm:$0xff] }
 0x25a   : > { %v3055_v1 = vpop.f32.mrf.mxu2  ;;  %v2941_v28 = vrot.slane %v14244_v43, 3  ;;  %v2454_v13 = vrot.slane %v13014_v7, 1 }
 0x25b   : > { %2110 = vmatmul.bf16.gmra.mxu0 %v14734_v14  ;;  %v3348_v44 = vpop.f32.mrf.mxu3 }
 0x25c   : > { %v2942_v31 = vsel %vm725_vm0, %v2939_v20, %v2941_v28  ;;  %v2455_v43 = vsel %vm1165_vm1, %v2452_v62, %v2454_v13  ;;  %v14245_v62 = vld [vmem:[%s15425_s19 + $0x90] sm:$0xff]  }
 0x25d   : > { %v2943_v7 = vrot.slane %v14245_v62, 3 }
 0x25e   : > { %v2570_v47 = vpop.f32.mrf.mxu1 }
 0x260   : > { %v1303_v42 = vpop.f32.mrf.mxu0 }
 0x261   : > { %v1419_v51 = vadd.f32 %v1303_v42, %v864_v17 }
 0x262   : > { %v16071_v52 = vpop.f32.mrf.mxu2 }
 0x263   : > { %v16074_v14 = vpop.f32.mrf.mxu3 }
 0x266   : > { %v16081_v8 = vpop.f32.mrf.mxu1 }
 0x267   : > { %3099 = vmatmul.bf16.gmra.mxu2 %v2942_v31 }
 0x268   : > { %v2076_v11 = vpop.f32.mrf.mxu0  ;;  %3392 = vmatmul.bf16.gmra.mxu3 %v14786_v58 }
 0x269   : > { %v2196_v36 = vadd.f32 %v2076_v11, %v1903_v18  ;;  %2612 = vmatmul.bf16.gmra.mxu1 %v2455_v43  ;;  %v1904_v18 = vadd.f32 %v15624_v3, %v1417_v29  ;;  %v14738_v43 = vld [vmem:[%s15425_s19 + $0x64] sm:$0xff]   ;;  %v13090_v3 = vld [vmem:[%s19428_s2 + $0x38] sm:$0xff] }
 0x26a   : > { %v16083_v42 = vpop.f32.mrf.mxu2  ;;  %5071 = vmatpush.bf16.msra.mxu2 %v13090_v3 }
 0x26b   : > { %v2683_v17 = vadd.f32 %v2563_v54, %v2196_v36  ;;  %2115 = vmatmul.bf16.gmra.mxu0 %v14736_v27  ;;  %v16086_v49 = vpop.f32.mrf.mxu3 }
 0x26d   : > { %v3170_v60 = vadd.f32 %v3050_v38, %v2683_v17 }
 0x26e   : > { %v16091_v36 = vpop.f32.mrf.mxu1 }
 0x26f   : > { %v16088_v20 = vadd.f32 %v3343_v56, %v3170_v60  ;;  %v1905_v56 = vadd.f32 %v15631_v12, %v1418_v34  ;;  %v2944_v60 = vsel %vm725_vm0, %v2941_v28, %v2943_v7  ;;  %v13098_v12 = vld [vmem:[%s19428_s2 + $0x78] sm:$0xff] }
 0x270   : > { %v2078_v11 = vpop.f32.mrf.mxu0  ;;  %4760 = vmatpush.bf16.msra.mxu1 %v13098_v12 }
 0x271   : > { %v2197_v31 = vadd.f32 %v2078_v11, %v1904_v18 }
 0x272   : > { %v16093_v27 = vpop.f32.mrf.mxu2 }
 0x273   : > { %v2684_v58 = vadd.f32 %v2565_v32, %v2197_v31  ;;  %v16096_v38 = vpop.f32.mrf.mxu3  ;;  %v13015_v32 = vld [vmem:[%s15425_s19 + $0x7c] sm:$0xff] }
 0x274   : > { %v2456_v31 = vrot.slane %v13015_v32, 1 }
 0x275   : > { %v3171_v54 = vadd.f32 %v3052_v21, %v2684_v58  ;;  %v14788_v21 = vld [vmem:[%s15425_s19 + $0x8c] sm:$0xff]  }
 0x276   : > { %v16108_v11 = vpop.f32.mrf.mxu1  ;;  %v2457_v28 = vsel %vm1165_vm1, %v2454_v13, %v2456_v31 }
 0x277   : > { %v16098_v17 = vadd.f32 %v3345_v46, %v3171_v54  ;;  %3104 = vmatmul.bf16.gmra.mxu2 %v2944_v60 }
 0x278   : > { %v2081_v29 = vpop.f32.mrf.mxu0  ;;  %3397 = vmatmul.bf16.gmra.mxu3 %v14788_v21 }
 0x279   : > { %v2198_v18 = vadd.f32 %v2081_v29, %v1905_v56  ;;  %2617 = vmatmul.bf16.gmra.mxu1 %v2457_v28  ;;  %v13016_v28 = vld [vmem:[%s15425_s19 + $0x84] sm:$0xff] }
 0x27a   : > { %v16113_v34 = vpop.f32.mrf.mxu2 }
 0x27b   : > { %v2685_v46 = vadd.f32 %v2568_v37, %v2198_v18  ;;  %2120 = vmatmul.bf16.gmra.mxu0 %v14738_v43  ;;  %v3358_v54 = vpop.f32.mrf.mxu3  ;;  %v1906_v37 = vadd.f32 %v15637_v19, %v1419_v51  ;;  %v14246_v18 = vld [vmem:[%s15425_s19 + $0x98] sm:$0xff]  }
 0x27c   : > { %v14790_v51 = vld [vmem:[%s15425_s19 + $0x94] sm:$0xff]  }
 0x27d   : > { %v3172_v58 = vadd.f32 %v3055_v1, %v2685_v46  ;;  %v2945_v1 = vrot.slane %v14246_v18, 3  ;;  %v14740_v46 = vld [vmem:[%s15425_s19 + $0x6c] sm:$0xff]  }
 0x27e   : > { %v2580_v3 = vpop.f32.mrf.mxu1 }
 0x27f   : > { %v16116_v62 = vadd.f32 %v3348_v44, %v3172_v58  ;;  %v2946_v44 = vsel %vm725_vm0, %v2943_v7, %v2945_v1 }
 0x280   : > { %v2083_v56 = vpop.f32.mrf.mxu0 }
 0x281   : > { %v2199_v43 = vadd.f32 %v2083_v56, %v1906_v37 }
 0x282   : > { %v3067_v60 = vpop.f32.mrf.mxu2 }
 0x283   : > { %v2686_v29 = vadd.f32 %v2570_v47, %v2199_v43  ;;  %v3360_v13 = vpop.f32.mrf.mxu3  ;;  %v2458_v47 = vrot.slane %v13016_v28, 1 }
 0x285   : > { %v3173_v32 = vadd.f32 %v16071_v52, %v2686_v29  ;;  %v13078_v52 = vld [vmem:[%s19427_s1 + $0x218] sm:$0xff]  ;;  %v2459_v7 = vsel %vm1165_vm1, %v2456_v31, %v2458_v47 }
 0x286   : > { %v2583_v58 = vpop.f32.mrf.mxu1  ;;  %3825 = vmatpush.bf16.msra.mxu0 %v13078_v52 }
 0x287   : > { %v16122_v21 = vadd.f32 %v16074_v14, %v3173_v32  ;;  %3109 = vmatmul.bf16.gmra.mxu2 %v2946_v44 }
 0x288   : > { %v2086_v12 = vpop.f32.mrf.mxu0  ;;  %3402 = vmatmul.bf16.gmra.mxu3 %v14790_v51 }
 0x289   : > { %v2200_v19 = vadd.f32 %v2086_v12, %v15642_v33  ;;  %2622 = vmatmul.bf16.gmra.mxu1 %v2459_v7  ;;  %v14247_v12 = vld [vmem:[%s15425_s19 + $0xa0] sm:$0xff]  }
 0x28a   : > { %v16133_v14 = vpop.f32.mrf.mxu2 }
 0x28b   : > { %v2687_v37 = vadd.f32 %v16081_v8, %v2200_v19  ;;  %2125 = vmatmul.bf16.gmra.mxu0 %v14740_v46  ;;  %v3363_v56 = vpop.f32.mrf.mxu3  ;;  %v14742_v19 = vld [vmem:[%s15425_s19 + $0x74] sm:$0xff]  }
 0x28d   : > { %v3174_v33 = vadd.f32 %v16083_v42, %v2687_v37  ;;  %v2947_v42 = vrot.slane %v14247_v12, 3  ;;  %v13017_v37 = vld [vmem:[%s15425_s19 + $0x8c] sm:$0xff] }
 0x28e   : > { %v2585_v32 = vpop.f32.mrf.mxu1 }
 0x28f   : > { %v16138_v8 = vadd.f32 %v16086_v49, %v3174_v33  ;;  %v2948_v49 = vsel %vm725_vm0, %v2945_v1, %v2947_v42 }
 0x290   : > { %v2088_v43 = vpop.f32.mrf.mxu0 }
 0x291   : > { %v2201_v29 = vadd.f32 %v2088_v43, %v15646_v45  ;;  %v14792_v45 = vld [vmem:[%s15425_s19 + $0x9c] sm:$0xff]  }
 0x292   : > { %v3072_v46 = vpop.f32.mrf.mxu2 }
 0x293   : > { %v2688_v18 = vadd.f32 %v16091_v36, %v2201_v29  ;;  %v3365_v44 = vpop.f32.mrf.mxu3  ;;  %v2460_v36 = vrot.slane %v13017_v37, 1  ;;  %v14744_v37 = vld [vmem:[%s15425_s19 + $0x7c] sm:$0xff]  }
 0x295   : > { %v3175_v31 = vadd.f32 %v16093_v27, %v2688_v18 }
 0x296   : > { %v2588_v7 = vpop.f32.mrf.mxu1 }
 0x297   : > { %v16145_v28 = vadd.f32 %v16096_v38, %v3175_v31  ;;  %3114 = vmatmul.bf16.gmra.mxu2 %v2948_v49  ;;  %v2461_v38 = vsel %vm1165_vm1, %v2458_v47, %v2460_v36 }
 0x298   : > { %v2091_v51 = vpop.f32.mrf.mxu0  ;;  %3407 = vmatmul.bf16.gmra.mxu3 %v14792_v45  ;;  %v13018_v45 = vld [vmem:[%s15425_s19 + $0x94] sm:$0xff] }
 0x299   : > { %v2202_v52 = vadd.f32 %v2091_v51, %v15651_v61  ;;  %2627 = vmatmul.bf16.gmra.mxu1 %v2461_v38  ;;  %v14248_v51 = vld [vmem:[%s15425_s19 + $0xa8] sm:$0xff]   ;;  %v2462_v38 = vrot.slane %v13018_v45, 1 }
 0x29a   : > { %v16153_v33 = vpop.f32.mrf.mxu2 }
 0x29b   : > { %v2689_v27 = vadd.f32 %v16108_v11, %v2202_v52  ;;  %2130 = vmatmul.bf16.gmra.mxu0 %v14742_v19  ;;  %v16157_v1 = vpop.f32.mrf.mxu3 }
 0x29d   : > { %v3176_v43 = vadd.f32 %v16113_v34, %v2689_v27  ;;  %v2949_v34 = vrot.slane %v14248_v51, 3  ;;  %v14794_v27 = vld [vmem:[%s15425_s19 + $0xa4] sm:$0xff]  }
 0x29e   : > { %v16162_v11 = vpop.f32.mrf.mxu1 }
 0x29f   : > { %v16159_v61 = vadd.f32 %v3358_v54, %v3176_v43  ;;  %v13089_v54 = vld [vmem:[%s19428_s2 + $0x30] sm:$0xff] }
 0x2a0   : > { %v2093_v29 = vpop.f32.mrf.mxu0  ;;  %5072 = vmatpush.bf16.msra.mxu2 %v13089_v54 }
 0x2a1   : > { %v2203_v18 = vadd.f32 %v2093_v29, %v15655_v4  ;;  %v2950_v4 = vsel %vm725_vm0, %v2947_v42, %v2949_v34 }
 0x2a2   : > { %v16164_v12 = vpop.f32.mrf.mxu2 }
 0x2a3   : > { %v2690_v31 = vadd.f32 %v2580_v3, %v2203_v18  ;;  %v16167_v47 = vpop.f32.mrf.mxu3  ;;  %v2463_v18 = vsel %vm1165_vm1, %v2460_v36, %v2462_v38 }
 0x2a5   : > { %v3177_v19 = vadd.f32 %v3067_v60, %v2690_v31 }
 0x2a6   : > { %v2593_v60 = vpop.f32.mrf.mxu1 }
 0x2a7   : > { %v16169_v49 = vadd.f32 %v3360_v13, %v3177_v19  ;;  %3119 = vmatmul.bf16.gmra.mxu2 %v2950_v4  ;;  %v13097_v13 = vld [vmem:[%s19428_s2 + $0x70] sm:$0xff] }
 0x2a8   : > { %v2096_v52 = vpop.f32.mrf.mxu0  ;;  %3412 = vmatmul.bf16.gmra.mxu3 %v14794_v27  ;;  %4761 = vmatpush.bf16.msra.mxu1 %v13097_v13  ;;  %v14249_v4 = vld [vmem:[%s15425_s19 + $0xb0] sm:$0xff]   ;;  %v13019_v13 = vld [vmem:[%s15425_s19 + $0x9c] sm:$0xff] }
 0x2a9   : > { %v2204_v3 = vadd.f32 %v2096_v52, %v15660_v25  ;;  %2632 = vmatmul.bf16.gmra.mxu1 %v2463_v18  ;;  %v2951_v36 = vrot.slane %v14249_v4, 3  ;;  %v14796_v18 = vld [vmem:[%s15425_s19 + $0xac] sm:$0xff]  }
 0x2aa   : > { %v3080_v29 = vpop.f32.mrf.mxu2 }
 0x2ab   : > { %v2691_v43 = vadd.f32 %v2583_v58, %v2204_v3  ;;  %2135 = vmatmul.bf16.gmra.mxu0 %v14744_v37  ;;  %v3373_v25 = vpop.f32.mrf.mxu3 }
 0x2ad   : > { %v3178_v42 = vadd.f32 %v16133_v14, %v2691_v43  ;;  %v14746_v14 = vld [vmem:[%s15425_s19 + $0x84] sm:$0xff]   ;;  %v2952_v43 = vsel %vm725_vm0, %v2949_v34, %v2951_v36 }
 0x2ae   : > { %v2595_v51 = vpop.f32.mrf.mxu1 }
 0x2af   : > { %v16184_v31 = vadd.f32 %v3363_v56, %v3178_v42 }
 0x2b0   : > { %v2098_v58 = vpop.f32.mrf.mxu0 }
 0x2b1   : > { %v2205_v19 = vadd.f32 %v2098_v58, %v15664_v39  ;;  %v2464_v39 = vrot.slane %v13019_v13, 1 }
 0x2b2   : > { %v3082_v54 = vpop.f32.mrf.mxu2 }
 0x2b3   : > { %v2692_v37 = vadd.f32 %v2585_v32, %v2205_v19  ;;  %v3375_v45 = vpop.f32.mrf.mxu3  ;;  %v13077_v32 = vld [vmem:[%s19427_s1 + $0x210] sm:$0xff] }
 0x2b4   : > { %3826 = vmatpush.bf16.msra.mxu0 %v13077_v32 }
 0x2b5   : > { %v3179_v52 = vadd.f32 %v3072_v46, %v2692_v37 }
 0x2b6   : > { %v2598_v42 = vpop.f32.mrf.mxu1 }
 0x2b7   : > { %v16188_v3 = vadd.f32 %v3365_v44, %v3179_v52  ;;  %3124 = vmatmul.bf16.gmra.mxu2 %v2952_v43  ;;  %v2465_v44 = vsel %vm1165_vm1, %v2462_v38, %v2464_v39 }
 0x2b8   : > { %v2101_v27 = vpop.f32.mrf.mxu0  ;;  %3417 = vmatmul.bf16.gmra.mxu3 %v14796_v18 }
 0x2b9   : > { %v2206_v56 = vadd.f32 %v2101_v27, %v15669_v55  ;;  %2637 = vmatmul.bf16.gmra.mxu1 %v2465_v44  ;;  %v14250_v27 = vld [vmem:[%s15425_s19 + $0xb8] sm:$0xff]  }
 0x2ba   : > { %v16198_v46 = vpop.f32.mrf.mxu2 }
 0x2bb   : > { %v2693_v58 = vadd.f32 %v2588_v7, %v2206_v56  ;;  %2140 = vmatmul.bf16.gmra.mxu0 %v14746_v14  ;;  %v3378_v55 = vpop.f32.mrf.mxu3  ;;  %v14748_v56 = vld [vmem:[%s15425_s19 + $0x8c] sm:$0xff]  }
 0x2bd   : > { %v3180_v34 = vadd.f32 %v16153_v33, %v2693_v58  ;;  %v2953_v33 = vrot.slane %v14250_v27, 3  ;;  %v13020_v58 = vld [vmem:[%s15425_s19 + $0xa4] sm:$0xff] }
 0x2be   : > { %v2600_v52 = vpop.f32.mrf.mxu1 }
 0x2bf   : > { %v16203_v7 = vadd.f32 %v16157_v1, %v3180_v34  ;;  %v2954_v1 = vsel %vm725_vm0, %v2951_v36, %v2953_v33 }
 0x2c0   : > { %v2103_v19 = vpop.f32.mrf.mxu0 }
 0x2c1   : > { %v2207_v37 = vadd.f32 %v2103_v19, %v15673_v9  ;;  %v14798_v9 = vld [vmem:[%s15425_s19 + $0xb4] sm:$0xff]  }
 0x2c2   : > { %v3087_v14 = vpop.f32.mrf.mxu2 }
 0x2c3   : > { %v2694_v4 = vadd.f32 %v16162_v11, %v2207_v37  ;;  %v3380_v43 = vpop.f32.mrf.mxu3  ;;  %v2466_v11 = vrot.slane %v13020_v58, 1  ;;  %v14750_v58 = vld [vmem:[%s15425_s19 + $0x94] sm:$0xff]  }
 0x2c5   : > { %v3181_v38 = vadd.f32 %v16164_v12, %v2694_v4 }
 0x2c6   : > { %v2603_v44 = vpop.f32.mrf.mxu1 }
 0x2c7   : > { %v16210_v13 = vadd.f32 %v16167_v47, %v3181_v38  ;;  %3129 = vmatmul.bf16.gmra.mxu2 %v2954_v1  ;;  %v2467_v47 = vsel %vm1165_vm1, %v2464_v39, %v2466_v11 }
 0x2c8   : > { %v2106_v18 = vpop.f32.mrf.mxu0  ;;  %3422 = vmatmul.bf16.gmra.mxu3 %v14798_v9  ;;  %v13021_v9 = vld [vmem:[%s15425_s19 + $0xac] sm:$0xff] }
 0x2c9   : > { %v2208_v32 = vadd.f32 %v2106_v18, %v15678_v23  ;;  %2642 = vmatmul.bf16.gmra.mxu1 %v2467_v47  ;;  %v14251_v18 = vld [vmem:[%s15425_s19 + $0xc0] sm:$0xff]   ;;  %v2468_v47 = vrot.slane %v13021_v9, 1 }
 0x2ca   : > { %v16217_v12 = vpop.f32.mrf.mxu2 }
 0x2cb   : > { %v2695_v34 = vadd.f32 %v2593_v60, %v2208_v32  ;;  %2145 = vmatmul.bf16.gmra.mxu0 %v14748_v56  ;;  %v16220_v37 = vpop.f32.mrf.mxu3 }
 0x2cd   : > { %v3182_v19 = vadd.f32 %v3080_v29, %v2695_v34  ;;  %v2955_v29 = vrot.slane %v14251_v18, 3  ;;  %v14800_v34 = vld [vmem:[%s15425_s19 + $0xbc] sm:$0xff]  }
 0x2ce   : > { %v16225_v38 = vpop.f32.mrf.mxu1 }
 0x2cf   : > { %v16222_v36 = vadd.f32 %v3373_v25, %v3182_v19  ;;  %v13088_v25 = vld [vmem:[%s19428_s2 + $0x28] sm:$0xff] }
 0x2d0   : > { %v2108_v23 = vpop.f32.mrf.mxu0  ;;  %5073 = vmatpush.bf16.msra.mxu2 %v13088_v25 }
 0x2d1   : > { %v2209_v4 = vadd.f32 %v2108_v23, %v15682_v40  ;;  %v2956_v40 = vsel %vm725_vm0, %v2953_v33, %v2955_v29 }
 0x2d2   : > { %v16227_v27 = vpop.f32.mrf.mxu2 }
 0x2d3   : > { %v2696_v60 = vadd.f32 %v2595_v51, %v2209_v4  ;;  %v16230_v1 = vpop.f32.mrf.mxu3  ;;  %v2469_v4 = vsel %vm1165_vm1, %v2466_v11, %v2468_v47 }
 0x2d5   : > { %v3183_v56 = vadd.f32 %v3082_v54, %v2696_v60 }
 0x2d6   : > { %v2608_v54 = vpop.f32.mrf.mxu1 }
 0x2d7   : > { %v16232_v39 = vadd.f32 %v3375_v45, %v3183_v56  ;;  %3134 = vmatmul.bf16.gmra.mxu2 %v2956_v40  ;;  %v13096_v45 = vld [vmem:[%s19428_s2 + $0x68] sm:$0xff] }
 0x2d8   : > { %v2111_v32 = vpop.f32.mrf.mxu0  ;;  %3427 = vmatmul.bf16.gmra.mxu3 %v14800_v34  ;;  %4762 = vmatpush.bf16.msra.mxu1 %v13096_v45  ;;  %v14252_v40 = vld [vmem:[%s15425_s19 + $0xc8] sm:$0xff]   ;;  %v13022_v45 = vld [vmem:[%s15425_s19 + $0xb4] sm:$0xff] }
 0x2d9   : > { %v2210_v51 = vadd.f32 %v2111_v32, %v15693_v0  ;;  %2647 = vmatmul.bf16.gmra.mxu1 %v2469_v4  ;;  %v2957_v11 = vrot.slane %v14252_v40, 3  ;;  %v14802_v4 = vld [vmem:[%s15425_s19 + $0xc4] sm:$0xff]  }
 0x2da   : > { %v3095_v23 = vpop.f32.mrf.mxu2 }
 0x2db   : > { %v2697_v19 = vadd.f32 %v2598_v42, %v2210_v51  ;;  %2150 = vmatmul.bf16.gmra.mxu0 %v14750_v58  ;;  %v3388_v0 = vpop.f32.mrf.mxu3 }
 0x2dd   : > { %v3184_v33 = vadd.f32 %v16198_v46, %v2697_v19  ;;  %v14752_v46 = vld [vmem:[%s15425_s19 + $0x9c] sm:$0xff]   ;;  %v2958_v19 = vsel %vm725_vm0, %v2955_v29, %v2957_v11 }
 0x2de   : > { %v2610_v18 = vpop.f32.mrf.mxu1 }
 0x2df   : > { %v16247_v60 = vadd.f32 %v3378_v55, %v3184_v33 }
 0x2e0   : > { %v2113_v42 = vpop.f32.mrf.mxu0 }
 0x2e1   : > { %v2211_v56 = vadd.f32 %v2113_v42, %v15697_v15  ;;  %v2470_v15 = vrot.slane %v13022_v45, 1 }
 0x2e2   : > { %v3097_v25 = vpop.f32.mrf.mxu2 }
 0x2e3   : > { %v2698_v58 = vadd.f32 %v2600_v52, %v2211_v56  ;;  %v3390_v9 = vpop.f32.mrf.mxu3  ;;  %v13076_v52 = vld [vmem:[%s19427_s1 + $0x208] sm:$0xff] }
 0x2e4   : > { %3827 = vmatpush.bf16.msra.mxu0 %v13076_v52 }
 0x2e5   : > { %v3185_v32 = vadd.f32 %v3087_v14, %v2698_v58 }
 0x2e6   : > { %v2613_v33 = vpop.f32.mrf.mxu1 }
 0x2e7   : > { %v16251_v51 = vadd.f32 %v3380_v43, %v3185_v32  ;;  %3139 = vmatmul.bf16.gmra.mxu2 %v2958_v19  ;;  %v2471_v43 = vsel %vm1165_vm1, %v2468_v47, %v2470_v15 }
 0x2e8   : > { %v2116_v34 = vpop.f32.mrf.mxu0  ;;  %3432 = vmatmul.bf16.gmra.mxu3 %v14802_v4 }
 0x2e9   : > { %v2212_v55 = vadd.f32 %v2116_v34, %v15702_v35  ;;  %2652 = vmatmul.bf16.gmra.mxu1 %v2471_v43  ;;  %v14253_v34 = vld [vmem:[%s15425_s19 + $0xd0] sm:$0xff]  }
 0x2ea   : > { %v3100_v14 = vpop.f32.mrf.mxu2 }
 0x2eb   : > { %v2699_v42 = vadd.f32 %v2603_v44, %v2212_v55  ;;  %2155 = vmatmul.bf16.gmra.mxu0 %v14752_v46  ;;  %v3393_v35 = vpop.f32.mrf.mxu3  ;;  %v14754_v55 = vld [vmem:[%s15425_s19 + $0xa4] sm:$0xff]  }
 0x2ed   : > { %v3186_v29 = vadd.f32 %v16217_v12, %v2699_v42  ;;  %v2959_v12 = vrot.slane %v14253_v34, 3  ;;  %v13023_v42 = vld [vmem:[%s15425_s19 + $0xbc] sm:$0xff] }
 0x2ee   : > { %v2615_v32 = vpop.f32.mrf.mxu1  ;;  %v2472_v43 = vrot.slane %v13023_v42, 1  ;;  %v14756_v42 = vld [vmem:[%s15425_s19 + $0xac] sm:$0xff]  }
 0x2ef   : > { %v16264_v56 = vadd.f32 %v16220_v37, %v3186_v29  ;;  %v2960_v37 = vsel %vm725_vm0, %v2957_v11, %v2959_v12 }
 0x2f0   : > { %v2118_v44 = vpop.f32.mrf.mxu0  ;;  %v2473_v29 = vsel %vm1165_vm1, %v2470_v15, %v2472_v43 }
 0x2f1   : > { %v2213_v58 = vadd.f32 %v2118_v44, %v15706_v57  ;;  %v14804_v57 = vld [vmem:[%s15425_s19 + $0xcc] sm:$0xff]  }
 0x2f2   : > { %v3102_v46 = vpop.f32.mrf.mxu2 }
 0x2f3   : > { %v2700_v40 = vadd.f32 %v16225_v38, %v2213_v58  ;;  %v3395_v19 = vpop.f32.mrf.mxu3 }
 0x2f5   : > { %v3187_v47 = vadd.f32 %v16227_v27, %v2700_v40 }
 0x2f6   : > { %v2618_v27 = vpop.f32.mrf.mxu1 }
 0x2f7   : > { %v16271_v45 = vadd.f32 %v16230_v1, %v3187_v47  ;;  %3144 = vmatmul.bf16.gmra.mxu2 %v2960_v37 }
 0x2f8   : > { %v2121_v4 = vpop.f32.mrf.mxu0  ;;  %3437 = vmatmul.bf16.gmra.mxu3 %v14804_v57 }
 0x2f9   : > { %v2214_v52 = vadd.f32 %v2121_v4, %v15711_v16  ;;  %2657 = vmatmul.bf16.gmra.mxu1 %v2473_v29  ;;  %v14254_v4 = vld [vmem:[%s15425_s19 + $0xd8] sm:$0xff]  }
 0x2fa   : > { %v3105_v44 = vpop.f32.mrf.mxu2  ;;  %v2961_v15 = vrot.slane %v14254_v4, 3 }
 0x2fb   : > { %v2701_v38 = vadd.f32 %v2608_v54, %v2214_v52  ;;  %2160 = vmatmul.bf16.gmra.mxu0 %v14754_v55  ;;  %v16279_v58 = vpop.f32.mrf.mxu3 }
 0x2fc   : > { %v2962_v57 = vsel %vm725_vm0, %v2959_v12, %v2961_v15 }
 0x2fd   : > { %v3188_v1 = vadd.f32 %v3095_v23, %v2701_v38 }
 0x2fe   : > { %v2620_v47 = vpop.f32.mrf.mxu1 }
 0x2ff   : > { %v16281_v11 = vadd.f32 %v3388_v0, %v3188_v1  ;;  %v13087_v0 = vld [vmem:[%s19428_s2 + $0x20] sm:$0xff] }
 0x300   : > { %v2123_v16 = vpop.f32.mrf.mxu0  ;;  %5074 = vmatpush.bf16.msra.mxu2 %v13087_v0 }
 0x301   : > { %v2215_v40 = vadd.f32 %v2123_v16, %v15718_v41  ;;  %v13024_v41 = vld [vmem:[%s15425_s19 + $0xc4] sm:$0xff] }
 0x302   : > { %v3107_v55 = vpop.f32.mrf.mxu2  ;;  %v2474_v38 = vrot.slane %v13024_v41, 1 }
 0x303   : > { %v2702_v54 = vadd.f32 %v2610_v18, %v2215_v40  ;;  %v16285_v37 = vpop.f32.mrf.mxu3 }
 0x304   : > { %v2475_v16 = vsel %vm1165_vm1, %v2472_v43, %v2474_v38 }
 0x305   : > { %v3189_v34 = vadd.f32 %v3097_v25, %v2702_v54  ;;  %v14806_v25 = vld [vmem:[%s15425_s19 + $0xd4] sm:$0xff]  }
 0x306   : > { %v2623_v1 = vpop.f32.mrf.mxu1 }
 0x307   : > { %v16287_v23 = vadd.f32 %v3390_v9, %v3189_v34  ;;  %3149 = vmatmul.bf16.gmra.mxu2 %v2962_v57  ;;  %v13095_v9 = vld [vmem:[%s19428_s2 + $0x60] sm:$0xff] }
 0x308   : > { %v2126_v52 = vpop.f32.mrf.mxu0  ;;  %3442 = vmatmul.bf16.gmra.mxu3 %v14806_v25  ;;  %4763 = vmatpush.bf16.msra.mxu1 %v13095_v9 }
 0x309   : > { %v2216_v18 = vadd.f32 %v2126_v52, %v15726_v2  ;;  %2662 = vmatmul.bf16.gmra.mxu1 %v2475_v16 }
 0x30a   : > { %v3110_v12 = vpop.f32.mrf.mxu2 }
 0x30b   : > { %v2703_v29 = vadd.f32 %v2613_v33, %v2216_v18  ;;  %2165 = vmatmul.bf16.gmra.mxu0 %v14756_v42  ;;  %v16301_v2 = vpop.f32.mrf.mxu3  ;;  %v14758_v18 = vld [vmem:[%s15425_s19 + $0xb4] sm:$0xff]  }
 0x30d   : > { %v3190_v40 = vadd.f32 %v3100_v14, %v2703_v29  ;;  %v14255_v14 = vld [vmem:[%s15425_s19 + $0xe0] sm:$0xff]   ;;  %v13025_v29 = vld [vmem:[%s15425_s19 + $0xcc] sm:$0xff] }
 0x30e   : > { %v16306_v42 = vpop.f32.mrf.mxu1  ;;  %v2963_v57 = vrot.slane %v14255_v14, 3 }
 0x30f   : > { %v16303_v54 = vadd.f32 %v3393_v35, %v3190_v40 }
 0x310   : > { %v2128_v33 = vpop.f32.mrf.mxu0  ;;  %v2964_v35 = vsel %vm725_vm0, %v2961_v15, %v2963_v57 }
 0x311   : > { %v2217_v34 = vadd.f32 %v2128_v33, %v15734_v5  ;;  %v14808_v5 = vld [vmem:[%s15425_s19 + $0xdc] sm:$0xff]  }
 0x312   : > { %v16308_v52 = vpop.f32.mrf.mxu2 }
 0x313   : > { %v2704_v4 = vadd.f32 %v2615_v32, %v2217_v34  ;;  %v16311_v43 = vpop.f32.mrf.mxu3  ;;  %v2476_v32 = vrot.slane %v13025_v29, 1 }
 0x315   : > { %v3191_v0 = vadd.f32 %v3102_v46, %v2704_v4  ;;  %v2477_v40 = vsel %vm1165_vm1, %v2474_v38, %v2476_v32 }
 0x316   : > { %v16320_v46 = vpop.f32.mrf.mxu1 }
 0x317   : > { %v16313_v41 = vadd.f32 %v3395_v19, %v3191_v0  ;;  %3154 = vmatmul.bf16.gmra.mxu2 %v2964_v35  ;;  %v13075_v19 = vld [vmem:[%s19427_s1 + $0x200] sm:$0xff] }
 0x318   : > { %v2131_v25 = vpop.f32.mrf.mxu0  ;;  %3447 = vmatmul.bf16.gmra.mxu3 %v14808_v5  ;;  %3828 = vmatpush.bf16.msra.mxu0 %v13075_v19  ;;  %v13026_v5 = vld [vmem:[%s15425_s19 + $0xd4] sm:$0xff]  ;;  %v14810_v19 = vld [vmem:[%s15425_s19 + $0xe4] sm:$0xff]  }
 0x319   : > { %v2218_v9 = vadd.f32 %v2131_v25, %v15742_v24  ;;  %2667 = vmatmul.bf16.gmra.mxu1 %v2477_v40  ;;  %v14256_v25 = vld [vmem:[%s15425_s19 + $0xe8] sm:$0xff]   ;;  %v2478_v40 = vrot.slane %v13026_v5, 1 }
 0x31a   : > { %v16326_v15 = vpop.f32.mrf.mxu2 }
 0x31b   : > { %v2705_v16 = vadd.f32 %v2618_v27, %v2218_v9  ;;  %2170 = vmatmul.bf16.gmra.mxu0 %v14758_v18  ;;  %v16328_v24 = vpop.f32.mrf.mxu3 }
 0x31d   : > { %v3192_v33 = vadd.f32 %v3105_v44, %v2705_v16  ;;  %v13121_v44 = vld [vmem:[%s19428_s2 + $0xb8] sm:$0xff]  ;;  %v919_v16 = vadd.f32 %v15732_v10, %v15762_v50 }
 0x31e   : > { %v16334_v14 = vpop.f32.mrf.mxu1  ;;  %5488 = vmatpush.bf16.msra.mxu3 %v13121_v44 }
 0x31f   : > { %v16331_v27 = vadd.f32 %v16279_v58, %v3192_v33  ;;  %v2965_v58 = vrot.slane %v14256_v25, 3 }
 0x320   : > { %v2133_v34 = vpop.f32.mrf.mxu0 }
 0x321   : > { %v2219_v4 = vadd.f32 %v2133_v34, %v15748_v22  ;;  %v14760_v22 = vld [vmem:[%s15425_s19 + $0xbc] sm:$0xff]   ;;  %v2966_v9 = vsel %vm725_vm0, %v2963_v57, %v2965_v58 }
 0x322   : > { %v16339_v18 = vpop.f32.mrf.mxu2 }
 0x323   : > { %v2706_v0 = vadd.f32 %v2620_v47, %v2219_v4  ;;  %v16342_v35 = vpop.f32.mrf.mxu3  ;;  %v1441_v4 = vadd.f32 %v15739_v53, %v919_v16 }
 0x325   : > { %v3193_v38 = vadd.f32 %v3107_v55, %v2706_v0 }
 0x326   : > { %v2633_v34 = vpop.f32.mrf.mxu1 }
 0x327   : > { %v16345_v29 = vadd.f32 %v16285_v37, %v3193_v38  ;;  %3159 = vmatmul.bf16.gmra.mxu2 %v2966_v9  ;;  %v2479_v37 = vsel %vm1165_vm1, %v2476_v32, %v2478_v40  ;;  %v2779_v38 = vld [vmem:[%s15425_s19 + $0xf0] sm:$0x7] }
 0x328   : > { %v2136_v47 = vpop.f32.mrf.mxu0  ;;  %3452 = vmatmul.bf16.gmra.mxu3 %v14810_v19  ;;  %v2894_v25 = vunpack.c.l.b16 %v2779_v38 }
 0x329   : > { %v2220_v55 = vadd.f32 %v2136_v47, %v15756_v48  ;;  %2672 = vmatmul.bf16.gmra.mxu1 %v2479_v37  ;;  %v1928_v48 = vadd.f32 %v15769_v59, %v1441_v4  ;;  %v14762_v59 = vld [vmem:[%s15425_s19 + $0xc4] sm:$0xff]   ;;  %v14811_v4 = vld [vmem:[%s15425_s19 + $0xec] sm:$0xff] }
 0x32a   : > { %v3120_v0 = vpop.f32.mrf.mxu2  ;;  %v2919_v32 = vpack.c.b16 %v2894_v25, %v2894_v25 }
 0x32b   : > { %v2707_v33 = vadd.f32 %v2623_v1, %v2220_v55  ;;  %2175 = vmatmul.bf16.gmra.mxu0 %v14760_v22  ;;  %v3413_v10 = vpop.f32.mrf.mxu3 }
 0x32c   : > { %v2967_v9 = vrot.slane %v2919_v32, 3  ;;  %v19517_v32 = vld [vmem:[#allocation6_spill] sm:$0xff] }
 0x32d   : > { %v3194_v57 = vadd.f32 %v3110_v12, %v2707_v33  ;;  %v2292_v12 = vld [vmem:[%s15425_s19 + $0xdc] sm:$0x1]  ;;  %v924_v33 = vadd.f32 %v15746_v30, %v15783_v6 }
 0x32e   : > { %v16363_v22 = vpop.f32.mrf.mxu1  ;;  %v2407_v5 = vunpack.c.l.b16 %v2292_v12  ;;  %v2968_v55 = vsel %vm725_vm0, %v2965_v58, %v2967_v9  ;;  %v13094_v58 = vld [vmem:[%s19428_s2 + $0x58] sm:$0xff] }
 0x32f   : > { %v16358_v50 = vadd.f32 %v16301_v2, %v3194_v57  ;;  %v13086_v2 = vld [vmem:[%s19428_s2 + $0x18] sm:$0xff]  ;;  %v1443_v30 = vadd.f32 %v15753_v26, %v924_v33  ;;  %4764 = vmatpush.bf16.msra.mxu1 %v13094_v58  ;;  %v14764_v26 = vld [vmem:[%s15425_s19 + $0xcc] sm:$0xff]  }
 0x330   : > { %v2138_v44 = vpop.f32.mrf.mxu0  ;;  %v2432_v19 = vpack.c.b16 %v2407_v5, %v2407_v5  ;;  %5075 = vmatpush.bf16.msra.mxu2 %v13086_v2  ;;  %v19523_v33 = vld [vmem:[#allocation9_spill] sm:$0xff] }
 0x331   : > { %v16360_v1 = vadd.f32 %v2138_v44, %v1928_v48 }
 0x332   : > { %v16365_v53 = vpop.f32.mrf.mxu2  ;;  %v2480_v57 = vrot.slane %v2432_v19, 1 }
 0x333   : > { %19515 = vst [vmem:[#allocation55_spill] sm:$0xff] %v16365_v53  ;;  %v16368_v47 = vpop.f32.mrf.mxu3 }
 0x334   : > { %19516 = vst [vmem:[#allocation56_spill] sm:$0xff] %v16368_v47  ;;  %v2481_v38 = vsel %vm1165_vm1, %v2478_v40, %v2480_v57  ;;  %v19524_v57 = vld [vmem:[#allocation5_spill] sm:$0xff] }
 0x336   : > { %v2638_v44 = vpop.f32.mrf.mxu1 }
 0x337   : > { %3164 = vmatmul.bf16.gmra.mxu2 %v2968_v55  ;;  %v19522_v55 = vld [vmem:[#allocation4_spill] sm:$0xff] }
 0x338   : > { %v2141_v16 = vpop.f32.mrf.mxu0  ;;  %3457 = vmatmul.bf16.gmra.mxu3 %v14811_v4 }
 0x339   : > { %v2222_v37 = vadd.f32 %v2141_v16, %v15781_v63  ;;  %2677 = vmatmul.bf16.gmra.mxu1 %v2481_v38  ;;  %v19521_v16 = vld [vmem:[#allocation10_spill] sm:$0xff] }
 0x33a   : > { %v3125_v6 = vpop.f32.mrf.mxu2  ;;  %v929_v19 = vadd.f32 %v19522_v55, %v19521_v16  ;;  %v19529_v55 = vld [vmem:[#allocation7_spill] sm:$0xff] }
 0x33b   : > { %v2709_v48 = vadd.f32 %v16320_v46, %v2222_v37  ;;  %2180 = vmatmul.bf16.gmra.mxu0 %v14762_v59  ;;  %v3418_v25 = vpop.f32.mrf.mxu3  ;;  %v1930_v46 = vadd.f32 %v19517_v32, %v1443_v30  ;;  %v19525_v30 = vld [vmem:[#allocation11_spill] sm:$0xff] }
 0x33d   : > { %v3196_v63 = vadd.f32 %v16326_v15, %v2709_v48  ;;  %v1445_v48 = vadd.f32 %v19524_v57, %v929_v19 }
 0x33e   : > { %v16392_v59 = vpop.f32.mrf.mxu1 }
 0x33f   : > { %v16388_v12 = vadd.f32 %v16328_v24, %v3196_v63  ;;  %19518 = vst [vmem:[#allocation6_spill] sm:$0xff] %v16392_v59  ;;  %v1932_v63 = vadd.f32 %v19525_v30, %v1445_v48  ;;  %v19532_v48 = vld [vmem:[#allocation8_spill] sm:$0xff] }
 0x340   : > { %v2143_v9 = vpop.f32.mrf.mxu0 }
 0x341   : > { %v16390_v5 = vadd.f32 %v2143_v9, %v1930_v46 }
 0x342   : > { %v16394_v2 = vpop.f32.mrf.mxu2 }
 0x343   : > { %19519 = vst [vmem:[#allocation57_spill] sm:$0xff] %v16394_v2  ;;  %v16396_v40 = vpop.f32.mrf.mxu3 }
 0x344   : > { %19520 = vst [vmem:[#allocation58_spill] sm:$0xff] %v16396_v40 }
 0x346   : > { %v2643_v24 = vpop.f32.mrf.mxu1 }
 0x348   : > { %v2146_v15 = vpop.f32.mrf.mxu0 }
 0x349   : > { %v2224_v37 = vadd.f32 %v2146_v15, %v19523_v33  ;;  %v19530_v33 = vld [vmem:[#allocation14_spill] sm:$0xff] }
 0x34a   : > { %v3130_v38 = vpop.f32.mrf.mxu2 }
 0x34b   : > { %v2711_v4 = vadd.f32 %v2633_v34, %v2224_v37  ;;  %2185 = vmatmul.bf16.gmra.mxu0 %v14764_v26  ;;  %v3423_v9 = vpop.f32.mrf.mxu3  ;;  %v13120_v34 = vld [vmem:[%s19428_s2 + $0xb0] sm:$0xff] }
 0x34c   : > { %5489 = vmatpush.bf16.msra.mxu3 %v13120_v34  ;;  %v19533_v34 = vld [vmem:[#allocation16_spill] sm:$0xff] }
 0x34d   : > { %v3198_v58 = vadd.f32 %v3120_v0, %v2711_v4  ;;  %v14765_v0 = vld [vmem:[%s15425_s19 + $0xd4] sm:$0xff] }
 0x34e   : > { %v16411_v26 = vpop.f32.mrf.mxu1 }
 0x34f   : > { %v16404_v32 = vadd.f32 %v3413_v10, %v3198_v58  ;;  %19526 = vst [vmem:[#allocation10_spill] sm:$0xff] %v16411_v26  ;;  %v19528_v10 = vld [vmem:[#allocation15_spill] sm:$0xff] }
 0x350   : > { %v2148_v46 = vpop.f32.mrf.mxu0  ;;  %v934_v19 = vadd.f32 %v19529_v55, %v19528_v10 }
 0x351   : > { %v16406_v40 = vadd.f32 %v2148_v46, %v1932_v63  ;;  %v11653_v63 = vld [vmem:[%s15425_s19 + $0x34] sm:$0xe]  ;;  %v13051_v46 = vld [vmem:[%s15425_s19 + $0x34] sm:$0xf0] }
 0x352   : > { %v16414_v16 = vpop.f32.mrf.mxu2  ;;  %v1447_v58 = vadd.f32 %v19532_v48, %v934_v19  ;;  %v11654_v47 = vor.u32 %v13051_v46, %v11653_v63  ;;  %v19537_v48 = vld [vmem:[#allocation19_spill] sm:$0xff] }
 0x353   : > { %19527 = vst [vmem:[#allocation4_spill] sm:$0xff] %v16414_v16  ;;  %v16419_v4 = vpop.f32.mrf.mxu3  ;;  %v13052_v16 = vld [vmem:[%s15425_s19 + $0x3c] sm:$0xff] }
 0x354   : > { %19531 = vst [vmem:[#allocation9_spill] sm:$0xff] %v16419_v4  ;;  %v1934_v26 = vadd.f32 %v19533_v34, %v1447_v58  ;;  %v3700_v55 = vrot.slane %v11654_v47, 1  ;;  %v13093_v47 = vld [vmem:[%s19428_s2 + $0x50] sm:$0xff] }
 0x355   : > { %4765 = vmatpush.bf16.msra.mxu1 %v13093_v47 }
 0x356   : > { %v2648_v53 = vpop.f32.mrf.mxu1 }
 0x358   : > { %v2151_v15 = vpop.f32.mrf.mxu0 }
 0x359   : > { %v2226_v37 = vadd.f32 %v2151_v15, %v19530_v33  ;;  %v3701_v33 = vrot.slane %v13052_v16, 1 }
 0x35a   : > { %v3135_v15 = vpop.f32.mrf.mxu2 }
 0x35b   : > { %v2713_v57 = vadd.f32 %v2638_v44, %v2226_v37  ;;  %2190 = vmatmul.bf16.gmra.mxu0 %v14765_v0  ;;  %v3428_v44 = vpop.f32.mrf.mxu3  ;;  %v3702_v19 = vsel %vm1165_vm1, %v3700_v55, %v3701_v33  ;;  %v19535_v37 = vld [vmem:[#allocation20_spill] sm:$0xff]  ;;  %v19542_v55 = vld [vmem:[#allocation21_spill] sm:$0xff] }
 0x35d   : > { %v3200_v30 = vadd.f32 %v3125_v6, %v2713_v57  ;;  %v13085_v6 = vld [vmem:[%s19428_s2 + $0x10] sm:$0xff] }
 0x35e   : > { %5076 = vmatpush.bf16.msra.mxu2 %v13085_v6 }
 0x35f   : > { %v16425_v2 = vadd.f32 %v3418_v25, %v3200_v30  ;;  %v19536_v25 = vld [vmem:[#allocation12_spill] sm:$0xff]  ;;  %v19540_v30 = vld [vmem:[#allocation13_spill] sm:$0xff] }
 0x360   : > { %v2153_v59 = vpop.f32.mrf.mxu0  ;;  %v939_v57 = vadd.f32 %v19536_v25, %v19535_v37  ;;  %v13053_v25 = vld [vmem:[%s15425_s19 + $0x44] sm:$0xff] }
 0x361   : > { %19534 = vst [vmem:[#allocation5_spill] sm:$0xff] %v16425_v2  ;;  %v16428_v10 = vadd.f32 %v2153_v59, %v1934_v26  ;;  %v16437_v59 = vpop.f32.mrf.mxu1 }
 0x362   : > { %19538 = vst [vmem:[#allocation11_spill] sm:$0xff] %v16437_v59  ;;  %v16442_v16 = vpop.f32.mrf.mxu2  ;;  %v1449_v63 = vadd.f32 %v19540_v30, %v939_v57  ;;  %v19547_v30 = vld [vmem:[#allocation24_spill] sm:$0xff] }
 0x363   : > { %19539 = vst [vmem:[#allocation15_spill] sm:$0xff] %v16442_v16  ;;  %v16445_v34 = vpop.f32.mrf.mxu3 }
 0x364   : > { %19541 = vst [vmem:[#allocation7_spill] sm:$0xff] %v16445_v34  ;;  %v1936_v37 = vadd.f32 %v19542_v55, %v1449_v63 }
 0x368   : > { %v2156_v0 = vpop.f32.mrf.mxu0 }
 0x369   : > { %v2228_v58 = vadd.f32 %v2156_v0, %v19537_v48  ;;  %v2653_v48 = vpop.f32.mrf.mxu1 }
 0x36b   : > { %v2715_v26 = vadd.f32 %v2643_v24, %v2228_v58  ;;  %3829 = vmatmul.bf16.vlgmr.msra.gmra.mxu0 %v3702_v19  ;;  %v3703_v19 = vrot.slane %v13053_v25, 1  ;;  %v3140_v58 = vpop.f32.mrf.mxu2  ;;  %v3433_v57 = vpop.f32.mrf.mxu3 }
 0x36d   : > { %v3202_v46 = vadd.f32 %v3130_v38, %v2715_v26  ;;  %v3704_v16 = vsel %vm1165_vm1, %v3701_v33, %v3703_v19  ;;  %v19545_v38 = vld [vmem:[#allocation25_spill] sm:$0xff] }
 0x36e   : > { %v19546_v26 = vld [vmem:[#allocation17_spill] sm:$0xff] }
 0x36f   : > { %v16448_v0 = vadd.f32 %v3423_v9, %v3202_v46  ;;  %v944_v47 = vadd.f32 %v19546_v26, %v19545_v38  ;;  %v19548_v9 = vld [vmem:[#allocation18_spill] sm:$0xff] }
 0x370   : > { %v2158_v6 = vpop.f32.mrf.mxu0  ;;  %v19555_v26 = vld [vmem:[#allocation22_spill] sm:$0xff] }
 0x371   : > { %19543 = vst [vmem:[#allocation14_spill] sm:$0xff] %v16448_v0  ;;  %v16451_v24 = vadd.f32 %v2158_v6, %v1936_v37  ;;  %v1451_v46 = vadd.f32 %v19548_v9, %v944_v47  ;;  %v16458_v37 = vpop.f32.mrf.mxu1  ;;  %v19550_v6 = vld [vmem:[#allocation26_spill] sm:$0xff] }
 0x372   : > { %19549 = vst [vmem:[#allocation16_spill] sm:$0xff] %v16458_v37  ;;  %v13055_v37 = vld [vmem:[%s15425_s19 + $0x54] sm:$0xff] }
 0x373   : > { %19544 = vst [vmem:[#allocation8_spill] sm:$0xff] %v16451_v24  ;;  %v1938_v25 = vadd.f32 %v19550_v6, %v1451_v46  ;;  %v13054_v24 = vld [vmem:[%s15425_s19 + $0x4c] sm:$0xff]  ;;  %v16464_v33 = vpop.f32.mrf.mxu2  ;;  %v16468_v38 = vpop.f32.mrf.mxu3 }
 0x374   : > { %19552 = vst [vmem:[#allocation12_spill] sm:$0xff] %v16464_v33 }
 0x375   : > { %19553 = vst [vmem:[#allocation19_spill] sm:$0xff] %v16468_v38  ;;  %v19558_v38 = vld [vmem:[#allocation31_spill] sm:$0xff] }
 0x378   : > { %v2161_v59 = vpop.f32.mrf.mxu0 }
 0x379   : > { %v2230_v34 = vadd.f32 %v2161_v59, %v19547_v30  ;;  %v3705_v59 = vrot.slane %v13054_v24, 1  ;;  %v19556_v30 = vld [vmem:[#allocation27_spill] sm:$0xff] }
 0x37b   : > { %v2717_v63 = vadd.f32 %v2648_v53, %v2230_v34  ;;  %3834 = vmatmul.bf16.gmra.mxu0 %v3704_v16  ;;  %v13119_v53 = vld [vmem:[%s19428_s2 + $0xa8] sm:$0xff]  ;;  %v3706_v16 = vsel %vm1165_vm1, %v3703_v19, %v3705_v59  ;;  %v3438_v46 = vpop.f32.mrf.mxu3 }
 0x37c   : > { %5490 = vmatpush.bf16.msra.mxu3 %v13119_v53  ;;  %v19554_v34 = vld [vmem:[#allocation28_spill] sm:$0xff] }
 0x37d   : > { %v3204_v55 = vadd.f32 %v3135_v15, %v2717_v63  ;;  %v949_v47 = vadd.f32 %v19555_v26, %v19554_v34  ;;  %v3707_v34 = vrot.slane %v13055_v37, 1  ;;  %v13092_v37 = vld [vmem:[%s19428_s2 + $0x48] sm:$0xff] }
 0x37e   : > { %4766 = vmatpush.bf16.msra.mxu1 %v13092_v37 }
 0x37f   : > { %v16461_v4 = vadd.f32 %v3428_v44, %v3204_v55  ;;  %v2658_v44 = vpop.f32.mrf.mxu1  ;;  %v19557_v55 = vld [vmem:[#allocation23_spill] sm:$0xff] }
 0x380   : > { %v2163_v0 = vpop.f32.mrf.mxu0  ;;  %v1453_v6 = vadd.f32 %v19557_v55, %v949_v47 }
 0x381   : > { %19551 = vst [vmem:[#allocation20_spill] sm:$0xff] %v16461_v4  ;;  %v16466_v2 = vadd.f32 %v2163_v0, %v1938_v25  ;;  %v3145_v0 = vpop.f32.mrf.mxu2 }
 0x382   : > { %v1940_v24 = vadd.f32 %v19558_v38, %v1453_v6  ;;  %v19563_v38 = vld [vmem:[#allocation33_spill] sm:$0xff]  ;;  %v19566_v6 = vld [vmem:[#allocation30_spill] sm:$0xff] }
 0x387   : > { %v16484_v4 = vpop.f32.mrf.mxu1 }
 0x388   : > { %v2166_v15 = vpop.f32.mrf.mxu0  ;;  %19560 = vst [vmem:[#allocation21_spill] sm:$0xff] %v16484_v4 }
 0x389   : > { %v2232_v63 = vadd.f32 %v2166_v15, %v19556_v30  ;;  %v16486_v26 = vpop.f32.mrf.mxu2  ;;  %v16488_v15 = vpop.f32.mrf.mxu3  ;;  %v19565_v30 = vld [vmem:[#allocation32_spill] sm:$0xff] }
 0x38a   : > { %19561 = vst [vmem:[#allocation25_spill] sm:$0xff] %v16486_v26 }
 0x38b   : > { %v2719_v9 = vadd.f32 %v2653_v48, %v2232_v63  ;;  %3839 = vmatmul.bf16.gmra.mxu0 %v3706_v16  ;;  %19562 = vst [vmem:[#allocation17_spill] sm:$0xff] %v16488_v15  ;;  %v13084_v48 = vld [vmem:[%s19428_s2 + $0x8] sm:$0xff]  ;;  %v19564_v16 = vld [vmem:[#allocation29_spill] sm:$0xff]  ;;  %v19567_v15 = vld [vmem:[#allocation35_spill] sm:$0xff] }
 0x38c   : > { %v954_v47 = vadd.f32 %v19564_v16, %v19563_v38  ;;  %5077 = vmatpush.bf16.msra.mxu2 %v13084_v48  ;;  %v13056_v16 = vld [vmem:[%s15425_s19 + $0x5c] sm:$0xff] }
 0x38d   : > { %v3206_v25 = vadd.f32 %v3140_v58, %v2719_v9 }
 0x38f   : > { %v16479_v33 = vadd.f32 %v3433_v57, %v3206_v25  ;;  %v3708_v57 = vsel %vm1165_vm1, %v3705_v59, %v3707_v34  ;;  %v2663_v55 = vpop.f32.mrf.mxu1  ;;  %v1455_v25 = vadd.f32 %v19566_v6, %v954_v47 }
 0x390   : > { %v2168_v53 = vpop.f32.mrf.mxu0 }
 0x391   : > { %19559 = vst [vmem:[#allocation13_spill] sm:$0xff] %v16479_v33  ;;  %v16482_v19 = vadd.f32 %v2168_v53, %v1940_v24  ;;  %v3150_v53 = vpop.f32.mrf.mxu2  ;;  %v1942_v59 = vadd.f32 %v19567_v15, %v1455_v25  ;;  %v19574_v15 = vld [vmem:[#allocation37_spill] sm:$0xff] }
 0x398   : > { %v2171_v58 = vpop.f32.mrf.mxu0 }
 0x399   : > { %v2234_v63 = vadd.f32 %v2171_v58, %v19565_v30  ;;  %v3443_v58 = vpop.f32.mrf.mxu3  ;;  %v16510_v47 = vpop.f32.mrf.mxu2 }
 0x39a   : > { %19571 = vst [vmem:[#allocation28_spill] sm:$0xff] %v16510_v47 }
 0x39b   : > { %v2721_v9 = vadd.f32 %v2658_v44, %v2234_v63  ;;  %3844 = vmatmul.bf16.gmra.mxu0 %v3708_v57  ;;  %v3709_v44 = vrot.slane %v13056_v16, 1  ;;  %v16507_v57 = vpop.f32.mrf.mxu1  ;;  %v19577_v16 = vld [vmem:[#allocation39_spill] sm:$0xff] }
 0x39c   : > { %19570 = vst [vmem:[#allocation26_spill] sm:$0xff] %v16507_v57 }
 0x39d   : > { %v3208_v24 = vadd.f32 %v3145_v0, %v2721_v9  ;;  %v3710_v63 = vsel %vm1165_vm1, %v3707_v34, %v3709_v44  ;;  %v19572_v0 = vld [vmem:[#allocation38_spill] sm:$0xff] }
 0x39e   : > { %v19573_v9 = vld [vmem:[#allocation34_spill] sm:$0xff] }
 0x39f   : > { %v16502_v26 = vadd.f32 %v3438_v46, %v3208_v24  ;;  %v959_v37 = vadd.f32 %v19573_v9, %v19572_v0  ;;  %v19576_v24 = vld [vmem:[#allocation36_spill] sm:$0xff]  ;;  %v19580_v9 = vld [vmem:[#allocation43_spill] sm:$0xff] }
 0x3a0   : > { %v2173_v38 = vpop.f32.mrf.mxu0 }
 0x3a1   : > { %19568 = vst [vmem:[#allocation24_spill] sm:$0xff] %v16502_v26  ;;  %v16505_v48 = vadd.f32 %v2173_v38, %v1942_v59  ;;  %v16515_v6 = vpop.f32.mrf.mxu3  ;;  %v1457_v59 = vadd.f32 %v19576_v24, %v959_v37  ;;  %v3155_v33 = vpop.f32.mrf.mxu2  ;;  %v19585_v24 = vld [vmem:[#allocation41_spill] sm:$0xff] }
 0x3a2   : > { %19575 = vst [vmem:[#allocation22_spill] sm:$0xff] %v16515_v6 }
 0x3a3   : > { %19569 = vst [vmem:[#allocation18_spill] sm:$0xff] %v16505_v48  ;;  %v1944_v26 = vadd.f32 %v19577_v16, %v1457_v59  ;;  %v2668_v34 = vpop.f32.mrf.mxu1  ;;  %v13057_v48 = vld [vmem:[%s15425_s19 + $0x64] sm:$0xff] }
 0x3a4   : > { %v3711_v0 = vrot.slane %v13057_v48, 1  ;;  %v19587_v16 = vld [vmem:[#allocation44_spill] sm:$0xff] }
 0x3a8   : > { %v2176_v30 = vpop.f32.mrf.mxu0 }
 0x3a9   : > { %v2236_v46 = vadd.f32 %v2176_v30, %v19574_v15  ;;  %v13118_v30 = vld [vmem:[%s19428_s2 + $0xa0] sm:$0xff]  ;;  %v19582_v15 = vld [vmem:[#allocation42_spill] sm:$0xff] }
 0x3aa   : > { %5491 = vmatpush.bf16.msra.mxu3 %v13118_v30 }
 0x3ab   : > { %v2723_v25 = vadd.f32 %v2663_v55, %v2236_v46  ;;  %3849 = vmatmul.bf16.gmra.mxu0 %v3710_v63  ;;  %v3448_v55 = vpop.f32.mrf.mxu3 }
 0x3ad   : > { %v3210_v38 = vadd.f32 %v3150_v53, %v2723_v25  ;;  %v3712_v53 = vsel %vm1165_vm1, %v3709_v44, %v3711_v0  ;;  %v16531_v25 = vpop.f32.mrf.mxu1 }
 0x3ae   : > { %19583 = vst [vmem:[#allocation31_spill] sm:$0xff] %v16531_v25 }
 0x3af   : > { %v16519_v57 = vadd.f32 %v3443_v58, %v3210_v38  ;;  %v19581_v58 = vld [vmem:[#allocation40_spill] sm:$0xff] }
 0x3b0   : > { %v2178_v4 = vpop.f32.mrf.mxu0  ;;  %v964_v37 = vadd.f32 %v19581_v58, %v19580_v9  ;;  %v13058_v58 = vld [vmem:[%s15425_s19 + $0x6c] sm:$0xff] }
 0x3b1   : > { %19578 = vst [vmem:[#allocation27_spill] sm:$0xff] %v16519_v57  ;;  %v16522_v47 = vadd.f32 %v2178_v4, %v1944_v26  ;;  %v16533_v26 = vpop.f32.mrf.mxu2  ;;  %v3713_v25 = vrot.slane %v13058_v58, 1 }
 0x3b2   : > { %19584 = vst [vmem:[#allocation33_spill] sm:$0xff] %v16533_v26  ;;  %v1459_v48 = vadd.f32 %v19585_v24, %v964_v37  ;;  %v19595_v26 = vld [vmem:[#allocation49_spill] sm:$0xff] }
 0x3b3   : > { %19579 = vst [vmem:[#allocation23_spill] sm:$0xff] %v16522_v47  ;;  %v16536_v38 = vpop.f32.mrf.mxu3  ;;  %v3714_v37 = vsel %vm1165_vm1, %v3711_v0, %v3713_v25 }
 0x3b4   : > { %19586 = vst [vmem:[#allocation29_spill] sm:$0xff] %v16536_v38  ;;  %v1946_v30 = vadd.f32 %v19587_v16, %v1459_v48  ;;  %v19592_v48 = vld [vmem:[#allocation47_spill] sm:$0xff] }
 0x3b8   : > { %v2181_v63 = vpop.f32.mrf.mxu0 }
 0x3b9   : > { %v2238_v46 = vadd.f32 %v2181_v63, %v19582_v15  ;;  %v2673_v15 = vpop.f32.mrf.mxu1 }
 0x3bb   : > { %v2725_v4 = vadd.f32 %v2668_v34, %v2238_v46  ;;  %3854 = vmatmul.bf16.gmra.mxu0 %v3712_v53  ;;  %v3160_v34 = vpop.f32.mrf.mxu2  ;;  %v13083_v53 = vld [vmem:[%s19428_s2] sm:$0xff]  ;;  %v3453_v46 = vpop.f32.mrf.mxu3 }
 0x3bc   : > { %5078 = vmatpush.bf16.msra.mxu2 %v13083_v53 }
 0x3bd   : > { %v3212_v59 = vadd.f32 %v3155_v33, %v2725_v4  ;;  %v19590_v4 = vld [vmem:[#allocation48_spill] sm:$0xff] }
 0x3bf   : > { %v16539_v44 = vadd.f32 %v3448_v55, %v3212_v59  ;;  %v19591_v55 = vld [vmem:[#allocation45_spill] sm:$0xff] }
 0x3c0   : > { %v2183_v9 = vpop.f32.mrf.mxu0  ;;  %v969_v24 = vadd.f32 %v19591_v55, %v19590_v4  ;;  %v13059_v4 = vld [vmem:[%s15425_s19 + $0x74] sm:$0xff]  ;;  %v19601_v55 = vld [vmem:[#allocation52_spill] sm:$0xff] }
 0x3c1   : > { %19588 = vst [vmem:[#allocation32_spill] sm:$0xff] %v16539_v44  ;;  %v16542_v63 = vadd.f32 %v2183_v9, %v1946_v30  ;;  %v19593_v30 = vld [vmem:[#allocation46_spill] sm:$0xff]  ;;  %v16554_v38 = vpop.f32.mrf.mxu1 }
 0x3c2   : > { %v1461_v9 = vadd.f32 %v19593_v30, %v969_v24  ;;  %19594 = vst [vmem:[#allocation35_spill] sm:$0xff] %v16554_v38 }
 0x3c3   : > { %19589 = vst [vmem:[#allocation30_spill] sm:$0xff] %v16542_v63  ;;  %v16560_v6 = vpop.f32.mrf.mxu2 }
 0x3c4   : > { %v1948_v44 = vadd.f32 %v19595_v26, %v1461_v9  ;;  %19597 = vst [vmem:[#allocation34_spill] sm:$0xff] %v16560_v6 }
 0x3c8   : > { %v2186_v33 = vpop.f32.mrf.mxu0 }
 0x3c9   : > { %v2240_v59 = vadd.f32 %v2186_v33, %v19592_v48  ;;  %v3715_v33 = vrot.slane %v13059_v4, 1  ;;  %v19602_v48 = vld [vmem:[#allocation50_spill] sm:$0xff] }
 0x3cb   : > { %v2727_v16 = vadd.f32 %v2673_v15, %v2240_v59  ;;  %3859 = vmatmul.bf16.gmra.mxu0 %v3714_v37  ;;  %v16565_v15 = vpop.f32.mrf.mxu3  ;;  %v15343_v37 = vmov 0  }
 0x3cc   : > { %19599 = vst [vmem:[#allocation36_spill] sm:$0xff] %v16565_v15 }
 0x3cd   : > { %v3214_v58 = vadd.f32 %v3160_v34, %v2727_v16  ;;  %v13091_v34 = vld [vmem:[%s19428_s2 + $0x40] sm:$0xff]  ;;  %286 = vst [vmem:[#allocation2] sm:$0xf] %v15343_v37  ;;  %v3165_v16 = vpop.f32.mrf.mxu2 }
 0x3ce   : > { %287 = vst [vmem:[#allocation2 + $0xc4] sm:$0xf] %v15343_v37  ;;  %4767 = vmatpush.bf16.msra.mxu1 %v13091_v34 }
 0x3cf   : > { %v16557_v0 = vadd.f32 %v3453_v46, %v3214_v58  ;;  %288 = vst [vmem:[#allocation3] sm:$0xf] %v15343_v37  ;;  %v2678_v46 = vpop.f32.mrf.mxu1  ;;  %v19603_v58 = vld [vmem:[#allocation53_spill] sm:$0xff] }
 0x3d0   : > { %v2188_v63 = vpop.f32.mrf.mxu0  ;;  %289 = vst [vmem:[#allocation3 + $0x7c] sm:$0xf] %v15343_v37  ;;  %v19604_v37 = vld [vmem:[#allocation54_spill] sm:$0xff] }
 0x3d1   : > { %19596 = vst [vmem:[#allocation38_spill] sm:$0xff] %v16557_v0  ;;  %v16563_v53 = vadd.f32 %v2188_v63, %v1948_v44  ;;  %v3716_v44 = vsel %vm1165_vm1, %v3713_v25, %v3715_v33  ;;  %v19600_v63 = vld [vmem:[#allocation51_spill] sm:$0xff] }
 0x3d2   : > { %v974_v24 = vadd.f32 %v19601_v55, %v19600_v63  ;;  %v13060_v63 = vld [vmem:[%s15425_s19 + $0x7c] sm:$0xff] }
 0x3d3   : > { %19598 = vst [vmem:[#allocation37_spill] sm:$0xff] %v16563_v53  ;;  %v3458_v9 = vpop.f32.mrf.mxu3 }
 0x3d4   : > { %v1463_v4 = vadd.f32 %v19603_v58, %v974_v24  ;;  %v16591_v24 = vld [vmem:[%s19430_s4] ss:$0 sm:$0xff]  ;;  %v13129_v58 = vld [vmem:[%s19428_s2 + $0xf8] sm:$0xff] }
 0x3d5   : > { %5934 = vmatpush.bf16.msrb.mxu1 %v13129_v58 }
 0x3d6   : > { %v1950_v15 = vadd.f32 %v19604_v37, %v1463_v4 }
 0x3d8   : > { %v2191_v26 = vpop.f32.mrf.mxu0 }
 0x3d9   : > { %v2242_v59 = vadd.f32 %v2191_v26, %v19602_v48  ;;  %v4161_v26 = vlaneseq }
 0x3db   : > { %v2729_v30 = vadd.f32 %v2678_v46, %v2242_v59  ;;  %3864 = vmatmul.bf16.gmra.mxu0 %v3716_v44  ;;  %v3717_v46 = vrot.slane %v13060_v63, 1  ;;  %v16586_v44 = vstv %s11779_s12  ;;  %v16593_v48 = vshrl.u32 %v4161_v26, 7 }
 0x3dc   : > { %vm4165_vm2 = vcmp.ge.s32.totalorder %v16586_v44, 0  ;;  %vm4181_vm3 = vcmp.lt.s32.totalorder %v16586_v44, 16 }
 0x3dd   : > { %v3216_v34 = vadd.f32 %v3165_v16, %v2729_v30  ;;  %v16602_v16 = vld [vmem:[%s19430_s4 + $0x1] ss:$0 sm:$0xff]  ;;  %v13117_v30 = vld [vmem:[%s19428_s2 + $0x98] sm:$0xff]  ;;  %vm16608_vm4 = vmand %vm4165_vm2, %vm4181_vm3  ;;  %vm4213_vm5 = vcmp.ge.s32.totalorder %v16593_v48, 4 }
 0x3de   : > { %5492 = vmatpush.bf16.msra.mxu3 %v13117_v30  ;;  %vm4216_vm6 = vmand %vm16608_vm4, %vm4213_vm5  ;;  %v4557_v30 = vld [vmem:[#allocation2] sm:$0xc] }
 0x3df   : > { %v16578_v25 = vadd.f32 %v3458_v9, %v3216_v34  ;;  %v13061_v34 = vld [vmem:[%s15425_s19 + $0x84] sm:$0xff] }
 0x3e0   : > { %v2193_v6 = vpop.f32.mrf.mxu0 }
 0x3e1   : > { %19605 = vst [vmem:[#allocation39_spill] sm:$0xff] %v16578_v25  ;;  %v16582_v55 = vadd.f32 %v2193_v6, %v1950_v15  ;;  %v3718_v6 = vsel %vm1165_vm1, %v3715_v33, %v3717_v46 }
 0x3e3   : > { %19606 = vst [vmem:[#allocation43_spill] sm:$0xff] %v16582_v55 }
 0x3e8   : > { %v3830_v59 = vpop.f32.mrf.mxu0 }
 0x3e9   : > { %v3950_v15 = vadd.f32 %v3830_v59, %v16088_v20  ;;  %v3719_v59 = vrot.slane %v13061_v34, 1  ;;  %v4846_v34 = vunpack.c.l.b16 %v4557_v30 }
 0x3eb   : > { %v3999_v9 = vmul.f32 %v16591_v24, %v3950_v15  ;;  %3869 = vmatmul.bf16.gmra.mxu0 %v3718_v6  ;;  %v16622_v6 = vadd.s32 16, %v16593_v48 }
 0x3ed   : > { %v4048_v20 = vadd.f32 %v16602_v16, %v3999_v9  ;;  %v13116_v9 = vld [vmem:[%s19428_s2 + $0x90] sm:$0xff]  ;;  %vm4266_vm7 = vcmp.lt.s32.totalorder %v16622_v6, 20 }
 0x3ee   : > { %5493 = vmatpush.bf16.msra.mxu3 %v13116_v9  ;;  %vm4269_vm8 = vmand %vm16608_vm4, %vm4266_vm7  ;;  %v16644_v9 = vld [vmem:[%s15425_s19 + $0x8c] sm:$0xff] }
 0x3ef   : > { %v4096_v33 = vmax.f32 %v4048_v20, 0.0  ;;  %v3720_v20 = vsel %vm1165_vm1, %v3717_v46, %v3719_v59  ;;  %v13115_v46 = vld [vmem:[%s19428_s2 + $0x88] sm:$0xff] }
 0x3f0   : > { %v3832_v4 = vpop.f32.mrf.mxu0 }
 0x3f1   : > { %v4411_v37 = vsel %vm4216_vm6, %v4096_v33, 0.0  ;;  %v3951_v63 = vadd.f32 %v3832_v4, %v16098_v17  ;;  %v13137_v4 = vld [vmem:[%s19428_s2 + $0x138] sm:$0xff] }
 0x3f2   : > { %v4459_v26 = vpack.c.bf16 %v4411_v37, %v4411_v37  ;;  %6146 = vmatpush.bf16.msrb.mxu2 %v13137_v4  ;;  %5494 = vmatpush.bf16.msra.mxu3 %v13115_v46 }
 0x3f3   : > { %v4000_v15 = vmul.f32 %v16591_v24, %v3951_v63 }
 0x3f4   : > { %4507 = vst [vmem:[#allocation2 + $0x4] sm:$0xf] %v4459_v26 }
 0x3f5   : > { %v4049_v33 = vadd.f32 %v16602_v16, %v4000_v15 }
 0x3f8   : > { %v3835_v25 = vpop.f32.mrf.mxu0 }
 0x3f9   : > { %v3952_v17 = vadd.f32 %v3835_v25, %v16116_v62  ;;  %v4097_v62 = vmax.f32 %v4049_v33, 0.0 }
 0x3fb   : > { %v4001_v37 = vmul.f32 %v16591_v24, %v3952_v17  ;;  %3874 = vmatmul.bf16.gmra.mxu0 %v3720_v20  ;;  %v4558_v63 = vld [vmem:[#allocation2 + $0x4] sm:$0xf]  ;;  %v4412_v33 = vsel %vm16608_vm4, %v4097_v62, 0.0  ;;  %vm5281_vm4 = vsmask.f32 6400 }
 0x3fc   : > { %v4652_v26 = vunpack.c.l.b16 %v4558_v63  ;;  %v13114_v20 = vld [vmem:[%s19428_s2 + $0x80] sm:$0xff] }
 0x3fd   : > { %v4050_v25 = vadd.f32 %v16602_v16, %v4001_v37  ;;  %5495 = vmatpush.bf16.msra.mxu3 %v13114_v20 }
 0x3fe   : > { %v4848_v15 = vpack.c.b16 %v4652_v26, %v4846_v34  ;;  %v4146_v34 = vadd.s32 1, %v16586_v44 }
 0x3ff   : > { %v4098_v30 = vmax.f32 %v4050_v25, 0.0  ;;  %v3721_v25 = vrot.slane %v16644_v9, 1 }
 0x400   : > { %v3837_v17 = vpop.f32.mrf.mxu0  ;;  %v4866_v4 = vshrl.u32 %v4848_v15, 16  ;;  %v4869_v63 = vshll.u32 %v4848_v15, 16  ;;  %vm4166_vm9 = vcmp.ge.s32.totalorder %v4146_v34, 0  ;;  %vm4182_vm11 = vcmp.lt.s32.totalorder %v4146_v34, 16 }
 0x401   : > { %v4413_v37 = vsel %vm4269_vm8, %v4098_v30, 0.0  ;;  %v3953_v46 = vadd.f32 %v3837_v17, %v16122_v21  ;;  %v3722_v20 = vsel %vm1165_vm1, %v3719_v59, %v3721_v25  ;;  %vm16662_vm12 = vmand %vm4166_vm9, %vm4182_vm11 }
 0x402   : > { %v13587_v55 = vpack.c.bf16 %v4413_v37, %v4412_v33  ;;  %v4868_v0 = vrot.slane %v4866_v4, 2  ;;  %v4871_v53 = vrot.slane %v4869_v63, 3  ;;  %vm4219_vm13 = vmand %vm16662_vm12, %vm4213_vm5 }
 0x403   : > { %v4002_v62 = vmul.f32 %v16591_v24, %v3953_v46  ;;  %vm4272_vm2 = vmand %vm16662_vm12, %vm4266_vm7 }
 0x404   : > { %14372 = vst [vmem:[#allocation2 + $0x8] sm:$0xff] %v13587_v55   ;;  %v13701_v38 = vunpack.c.l.b16 %v13587_v55  ;;  %v4874_v57 = vshrl.u32 %v13587_v55, 16  ;;  %v4877_v47 = vshll.u32 %v13587_v55, 16  ;;  %v4872_v17 = vor.u32 %v4871_v53, %v4868_v0 }
 0x405   : > { %v4051_v4 = vadd.f32 %v16602_v16, %v4002_v62  ;;  %v4147_v62 = vadd.s32 2, %v16586_v44 }
 0x406   : > { %v4682_v15 = vpack.c.b16 %v13701_v38, %v4652_v26  ;;  %v4876_v21 = vrot.slane %v4874_v57, 2  ;;  %v4879_v30 = vrot.slane %v4877_v47, 3 }
 0x407   : > { %v4099_v38 = vmax.f32 %v4051_v4, 0.0  ;;  %vm4167_vm14 = vcmp.ge.s32.totalorder %v4147_v62, 0  ;;  %vm4183_vm15 = vcmp.lt.s32.totalorder %v4147_v62, 16 }
 0x408   : > { %v3840_v9 = vpop.f32.mrf.mxu0  ;;  %4768 = vmatmul.bf16.vlgmr.msra.gmra.mxu1 %v4682_v15  ;;  %v4880_v55 = vor.u32 %v4879_v30, %v4876_v21  ;;  %v11878_v21 = vld [vmem:[#allocation2 + $0x4] sm:$0xe]  ;;  %vm16689_vm0 = vmand %vm4167_vm14, %vm4183_vm15 }
 0x409   : > { %v3954_v63 = vadd.f32 %v3840_v9, %v16138_v8  ;;  %v16673_v8 = vld [vmem:[%s15425_s19 + $0x94] sm:$0xff]  ;;  %v4414_v26 = vsel %vm4219_vm13, %v4099_v38, 0.0  ;;  %vm4222_vm3 = vmand %vm16689_vm0, %vm4213_vm5 }
 0x40a   : > { %v4881_v33 = vsel %vm4864_vm10, %v4872_v17, %v4880_v55  ;;  %v3723_v15 = vrot.slane %v16673_v8, 1  ;;  %vm4275_vm6 = vmand %vm16689_vm0, %vm4266_vm7 }
 0x40b   : > { %v4003_v47 = vmul.f32 %v16591_v24, %v3954_v63  ;;  %3879 = vmatmul.bf16.gmra.mxu0 %v3722_v20  ;;  %5079 = vmatmul.bf16.vlgmr.msra.gmra.mxu2 %v4881_v33  ;;  %v13099_v34 = vld [vmem:[#allocation2 + $0x4] sm:$0xf0] }
 0x40c   : > { %v11879_v20 = vor.u32 %v13099_v34, %v11878_v21  ;;  %v3724_v33 = vsel %vm1165_vm1, %v3721_v25, %v3723_v15 }
 0x40d   : > { %v4052_v59 = vadd.f32 %v16602_v16, %v4003_v47 }
 0x40e   : > { %v5283_v38 = vshrl.u32 %v11879_v20, 16 }
 0x40f   : > { %v4100_v0 = vmax.f32 %v4052_v59, 0.0  ;;  %v5286_v59 = vshll.u32 %v11879_v20, 16 }
 0x410   : > { %v3842_v53 = vpop.f32.mrf.mxu0 }
 0x411   : > { %v4415_v37 = vsel %vm16662_vm12, %v4100_v0, 0.0  ;;  %v3955_v46 = vadd.f32 %v3842_v53, %v16145_v28  ;;  %v13136_v53 = vld [vmem:[%s19428_s2 + $0x130] sm:$0xff]  ;;  %v5288_v62 = vrot.slane %v5286_v59, 2 }
 0x412   : > { %v13592_v58 = vpack.c.bf16 %v4415_v37, %v4414_v26  ;;  %6147 = vmatpush.bf16.msrb.mxu2 %v13136_v53 }
 0x413   : > { %v4004_v17 = vmul.f32 %v16591_v24, %v3955_v46 }
 0x414   : > { %14373 = vst [vmem:[#allocation2 + $0x10] sm:$0xff] %v13592_v58   ;;  %v4883_v30 = vshrl.u32 %v13592_v58, 16  ;;  %v4886_v9 = vshll.u32 %v13592_v58, 16  ;;  %v5285_v58 = vrot.slane %v5283_v38, 1 }
 0x415   : > { %v4053_v0 = vadd.f32 %v16602_v16, %v4004_v17 }
 0x416   : > { %v4885_v4 = vrot.slane %v4883_v30, 2  ;;  %v4888_v63 = vrot.slane %v4886_v9, 3 }
 0x418   : > { %v3845_v47 = vpop.f32.mrf.mxu0  ;;  %v4889_v28 = vor.u32 %v4888_v63, %v4885_v4  ;;  %v5289_v63 = vor.u32 %v5288_v62, %v5285_v58 }
 0x419   : > { %v3956_v8 = vadd.f32 %v3845_v47, %v16159_v61  ;;  %v4101_v61 = vmax.f32 %v4053_v0, 0.0 }
 0x41a   : > { %v4890_v26 = vsel %vm4864_vm10, %v4880_v55, %v4889_v28 }
 0x41b   : > { %v4005_v37 = vmul.f32 %v16591_v24, %v3956_v8  ;;  %3884 = vmatmul.bf16.gmra.mxu0 %v3724_v33  ;;  %v15172_v25 = vld [vmem:[#allocation2 + $0xc] sm:$0xff]   ;;  %5084 = vmatmul.bf16.gmra.mxu2 %v4890_v26  ;;  %v13064_v33 = vld [vmem:[%s15425_s19 + $0x9c] sm:$0xff]  ;;  %v4416_v47 = vsel %vm4272_vm2, %v4101_v61, 0.0 }
 0x41c   : > { %v13100_v34 = vld [vmem:[#allocation2 + $0xc] sm:$0xff]  ;;  %4773 = vmatmul.bf16.gmra.mxu1 %v15172_v25  ;;  %v3725_v53 = vrot.slane %v13064_v33, 1 }
 0x41d   : > { %v4054_v55 = vadd.f32 %v16602_v16, %v4005_v37  ;;  %v5291_v21 = vshrl.u32 %v13100_v34, 16  ;;  %v5294_v30 = vshll.u32 %v13100_v34, 16  ;;  %v13128_v25 = vld [vmem:[%s19428_s2 + $0xf0] sm:$0xff] }
 0x41e   : > { %5935 = vmatpush.bf16.msrb.mxu1 %v13128_v25 }
 0x41f   : > { %v4102_v9 = vmax.f32 %v4054_v55, 0.0  ;;  %v5293_v20 = vrot.slane %v5291_v21, 1  ;;  %v5296_v17 = vrot.slane %v5294_v30, 2 }
 0x420   : > { %v3847_v4 = vpop.f32.mrf.mxu0 }
 0x421   : > { %v4417_v57 = vsel %vm4222_vm3, %v4102_v9, 0.0  ;;  %v3957_v38 = vadd.f32 %v3847_v4, %v16169_v49  ;;  %v5297_v59 = vor.u32 %v5296_v17, %v5293_v20  ;;  %v3726_v49 = vsel %vm1165_vm1, %v3723_v15, %v3725_v53 }
 0x422   : > { %v13597_v0 = vpack.c.bf16 %v4417_v57, %v4416_v47 }
 0x423   : > { %v5298_v8 = vsel %vm5281_vm4, %v5289_v63, %v5297_v59  ;;  %v4006_v34 = vmul.f32 %v16591_v24, %v3957_v38 }
 0x424   : > { %14374 = vst [vmem:[#allocation2 + $0x18] sm:$0xff] %v13597_v0   ;;  %5496 = vmatmul.bf16.vlgmr.msra.gmra.mxu3 %v5298_v8  ;;  %v4892_v26 = vshrl.u32 %v13597_v0, 16  ;;  %v4895_v37 = vshll.u32 %v13597_v0, 16  ;;  %v16720_v0 = vld [vmem:[%s15425_s19 + $0xa4] sm:$0xff] }
 0x425   : > { %v4055_v21 = vadd.f32 %v16602_v16, %v4006_v34 }
 0x426   : > { %v4894_v58 = vrot.slane %v4892_v26, 2  ;;  %v4897_v62 = vrot.slane %v4895_v37, 3 }
 0x427   : > { %v4103_v63 = vmax.f32 %v4055_v21, 0.0 }
 0x428   : > { %v3850_v61 = vpop.f32.mrf.mxu0  ;;  %v4898_v55 = vor.u32 %v4897_v62, %v4894_v58  ;;  %v4148_v62 = vadd.s32 3, %v16586_v44 }
 0x429   : > { %v3958_v30 = vadd.f32 %v3850_v61, %v16184_v31  ;;  %v4418_v8 = vsel %vm16689_vm0, %v4103_v63, 0.0  ;;  %v3727_v61 = vrot.slane %v16720_v0, 1  ;;  %v13135_v63 = vld [vmem:[%s19428_s2 + $0x128] sm:$0xff] }
 0x42a   : > { %v4899_v9 = vsel %vm4864_vm10, %v4889_v28, %v4898_v55  ;;  %vm4168_vm8 = vcmp.ge.s32.totalorder %v4148_v62, 0  ;;  %vm4184_vm9 = vcmp.lt.s32.totalorder %v4148_v62, 16  ;;  %6148 = vmatpush.bf16.msrb.mxu2 %v13135_v63 }
 0x42b   : > { %v4007_v20 = vmul.f32 %v16591_v24, %v3958_v30  ;;  %3889 = vmatmul.bf16.gmra.mxu0 %v3726_v49  ;;  %v15174_v17 = vld [vmem:[#allocation2 + $0x14] sm:$0xff]   ;;  %5089 = vmatmul.bf16.gmra.mxu2 %v4899_v9  ;;  %vm16739_vm11 = vmand %vm4168_vm8, %vm4184_vm9 }
 0x42c   : > { %v13101_v4 = vld [vmem:[#allocation2 + $0x14] sm:$0xff]  ;;  %4778 = vmatmul.bf16.gmra.mxu1 %v15174_v17  ;;  %vm4225_vm12 = vmand %vm16739_vm11, %vm4213_vm5 }
 0x42d   : > { %v4056_v33 = vadd.f32 %v16602_v16, %v4007_v20  ;;  %v5300_v47 = vshrl.u32 %v13101_v4, 16  ;;  %v5303_v15 = vshll.u32 %v13101_v4, 16  ;;  %vm4278_vm0 = vmand %vm16739_vm11, %vm4266_vm7 }
 0x42f   : > { %v4104_v31 = vmax.f32 %v4056_v33, 0.0  ;;  %v5302_v28 = vrot.slane %v5300_v47, 1  ;;  %v5305_v57 = vrot.slane %v5303_v15, 2  ;;  %v13127_v33 = vld [vmem:[%s19428_s2 + $0xe8] sm:$0xff] }
 0x430   : > { %v3852_v38 = vpop.f32.mrf.mxu0  ;;  %5936 = vmatpush.bf16.msrb.mxu1 %v13127_v33 }
 0x431   : > { %v4419_v26 = vsel %vm4275_vm6, %v4104_v31, 0.0  ;;  %v3959_v37 = vadd.f32 %v3852_v38, %v16188_v3  ;;  %v5306_v25 = vor.u32 %v5305_v57, %v5302_v28  ;;  %v3728_v3 = vsel %vm1165_vm1, %v3725_v53, %v3727_v61 }
 0x432   : > { %v13602_v34 = vpack.c.bf16 %v4419_v26, %v4418_v8 }
 0x433   : > { %v5307_v58 = vsel %vm5281_vm4, %v5297_v59, %v5306_v25  ;;  %v4008_v30 = vmul.f32 %v16591_v24, %v3959_v37 }
 0x434   : > { %14375 = vst [vmem:[#allocation2 + $0x20] sm:$0xff] %v13602_v34   ;;  %5501 = vmatmul.bf16.gmra.mxu3 %v5307_v58  ;;  %v4901_v49 = vshrl.u32 %v13602_v34, 16  ;;  %v4904_v21 = vshll.u32 %v13602_v34, 16  ;;  %v13066_v34 = vld [vmem:[%s15425_s19 + $0xac] sm:$0xff] }
 0x435   : > { %v4057_v59 = vadd.f32 %v16602_v16, %v4008_v30 }
 0x436   : > { %v4903_v9 = vrot.slane %v4901_v49, 2  ;;  %v4906_v46 = vrot.slane %v4904_v21, 3 }
 0x437   : > { %v4105_v28 = vmax.f32 %v4057_v59, 0.0 }
 0x438   : > { %v3855_v20 = vpop.f32.mrf.mxu0  ;;  %v4907_v17 = vor.u32 %v4906_v46, %v4903_v9  ;;  %v4149_v46 = vadd.s32 4, %v16586_v44 }
 0x439   : > { %v3960_v4 = vadd.f32 %v3855_v20, %v16203_v7  ;;  %v4420_v58 = vsel %vm4225_vm12, %v4105_v28, 0.0  ;;  %v3729_v20 = vrot.slane %v13066_v34, 1 }
 0x43a   : > { %v4908_v47 = vsel %vm4864_vm10, %v4898_v55, %v4907_v17  ;;  %vm4169_vm13 = vcmp.ge.s32.totalorder %v4149_v46, 0  ;;  %vm4185_vm14 = vcmp.lt.s32.totalorder %v4149_v46, 16 }
 0x43b   : > { %v4009_v53 = vmul.f32 %v16591_v24, %v3960_v4  ;;  %3894 = vmatmul.bf16.gmra.mxu0 %v3728_v3  ;;  %v15176_v31 = vld [vmem:[#allocation2 + $0x1c] sm:$0xff]   ;;  %5094 = vmatmul.bf16.gmra.mxu2 %v4908_v47  ;;  %vm16761_vm15 = vmand %vm4169_vm13, %vm4185_vm14 }
 0x43c   : > { %v13102_v7 = vld [vmem:[#allocation2 + $0x1c] sm:$0xff]  ;;  %4783 = vmatmul.bf16.gmra.mxu1 %v15176_v31  ;;  %vm4228_vm2 = vmand %vm16761_vm15, %vm4213_vm5 }
 0x43d   : > { %v4058_v57 = vadd.f32 %v16602_v16, %v4009_v53  ;;  %v5309_v38 = vshrl.u32 %v13102_v7, 16  ;;  %v5312_v0 = vshll.u32 %v13102_v7, 16  ;;  %vm4281_vm3 = vmand %vm16761_vm15, %vm4266_vm7 }
 0x43f   : > { %v4106_v55 = vmax.f32 %v4058_v57, 0.0  ;;  %v5311_v8 = vrot.slane %v5309_v38, 1  ;;  %v5314_v26 = vrot.slane %v5312_v0, 2  ;;  %v13168_v57 = vld [vmem:[%s19428_s2 + $0x1b8] sm:$0xff] }
 0x440   : > { %v3857_v37 = vpop.f32.mrf.mxu0  ;;  %7038 = vmatpush.bf16.msrb.mxu0 %v13168_v57 }
 0x441   : > { %v4421_v62 = vsel %vm16739_vm11, %v4106_v55, 0.0  ;;  %v3961_v49 = vadd.f32 %v3857_v37, %v16210_v13  ;;  %v5315_v21 = vor.u32 %v5314_v26, %v5311_v8  ;;  %v3730_v13 = vsel %vm1165_vm1, %v3727_v61, %v3729_v20 }
 0x442   : > { %v13607_v30 = vpack.c.bf16 %v4421_v62, %v4420_v58  ;;  %v16775_v58 = vld [vmem:[%s15425_s19 + $0xb4] sm:$0xff] }
 0x443   : > { %v5316_v9 = vsel %vm5281_vm4, %v5306_v25, %v5315_v21  ;;  %v4010_v4 = vmul.f32 %v16591_v24, %v3961_v49 }
 0x444   : > { %14376 = vst [vmem:[#allocation2 + $0x28] sm:$0xff] %v13607_v30   ;;  %5506 = vmatmul.bf16.gmra.mxu3 %v5316_v9  ;;  %v4910_v3 = vshrl.u32 %v13607_v30, 16  ;;  %v4913_v59 = vshll.u32 %v13607_v30, 16 }
 0x445   : > { %v4059_v31 = vadd.f32 %v16602_v16, %v4010_v4 }
 0x446   : > { %v4912_v63 = vrot.slane %v4910_v3, 2  ;;  %v4915_v33 = vrot.slane %v4913_v59, 3  ;;  %v3731_v3 = vrot.slane %v16775_v58, 1 }
 0x447   : > { %v4107_v55 = vmax.f32 %v4059_v31, 0.0 }
 0x448   : > { %v3860_v47 = vpop.f32.mrf.mxu0  ;;  %v4916_v53 = vor.u32 %v4915_v33, %v4912_v63  ;;  %v3732_v31 = vsel %vm1165_vm1, %v3729_v20, %v3731_v3 }
 0x449   : > { %v3962_v25 = vadd.f32 %v3860_v47, %v16222_v36  ;;  %v4422_v62 = vsel %vm4278_vm0, %v4107_v55, 0.0 }
 0x44a   : > { %v4917_v7 = vsel %vm4864_vm10, %v4907_v17, %v4916_v53 }
 0x44b   : > { %v4011_v28 = vmul.f32 %v16591_v24, %v3962_v25  ;;  %3899 = vmatmul.bf16.gmra.mxu0 %v3730_v13  ;;  %v15178_v38 = vld [vmem:[#allocation2 + $0x24] sm:$0xff]   ;;  %5099 = vmatmul.bf16.gmra.mxu2 %v4917_v7 }
 0x44c   : > { %v13103_v0 = vld [vmem:[#allocation2 + $0x24] sm:$0xff]  ;;  %4788 = vmatmul.bf16.gmra.mxu1 %v15178_v38 }
 0x44d   : > { %v4060_v36 = vadd.f32 %v16602_v16, %v4011_v28  ;;  %v5318_v61 = vshrl.u32 %v13103_v0, 16  ;;  %v5321_v17 = vshll.u32 %v13103_v0, 16  ;;  %v13126_v28 = vld [vmem:[%s19428_s2 + $0xe0] sm:$0xff] }
 0x44e   : > { %5937 = vmatpush.bf16.msrb.mxu1 %v13126_v28 }
 0x44f   : > { %v4108_v8 = vmax.f32 %v4060_v36, 0.0  ;;  %v5320_v26 = vrot.slane %v5318_v61, 1  ;;  %v5323_v37 = vrot.slane %v5321_v17, 2 }
 0x450   : > { %v3862_v34 = vpop.f32.mrf.mxu0 }
 0x451   : > { %v4423_v49 = vsel %vm4228_vm2, %v4108_v8, 0.0  ;;  %v3963_v15 = vadd.f32 %v3862_v34, %v16232_v39  ;;  %v5324_v30 = vor.u32 %v5323_v37, %v5320_v26  ;;  %v16798_v34 = vld [vmem:[%s15425_s19 + $0xbc] sm:$0xff] }
 0x452   : > { %v13612_v9 = vpack.c.bf16 %v4423_v49, %v4422_v62 }
 0x453   : > { %v5325_v46 = vsel %vm5281_vm4, %v5315_v21, %v5324_v30  ;;  %v4012_v63 = vmul.f32 %v16591_v24, %v3963_v15  ;;  %v13134_v21 = vld [vmem:[%s19428_s2 + $0x120] sm:$0xff] }
 0x454   : > { %14377 = vst [vmem:[#allocation2 + $0x30] sm:$0xff] %v13612_v9   ;;  %5511 = vmatmul.bf16.gmra.mxu3 %v5325_v46  ;;  %v4919_v59 = vshrl.u32 %v13612_v9, 16  ;;  %v4922_v4 = vshll.u32 %v13612_v9, 16  ;;  %6149 = vmatpush.bf16.msrb.mxu2 %v13134_v21 }
 0x455   : > { %v4061_v39 = vadd.f32 %v16602_v16, %v4012_v63 }
 0x456   : > { %v4921_v33 = vrot.slane %v4919_v59, 2  ;;  %v4924_v47 = vrot.slane %v4922_v4, 3  ;;  %v4150_v59 = vadd.s32 5, %v16586_v44  ;;  %v3733_v4 = vrot.slane %v16798_v34, 1 }
 0x458   : > { %v3865_v13 = vpop.f32.mrf.mxu0  ;;  %v4925_v25 = vor.u32 %v4924_v47, %v4921_v33  ;;  %vm4170_vm6 = vcmp.ge.s32.totalorder %v4150_v59, 0  ;;  %vm4186_vm8 = vcmp.lt.s32.totalorder %v4150_v59, 16 }
 0x459   : > { %v3964_v7 = vadd.f32 %v3865_v13, %v16247_v60  ;;  %v4109_v60 = vmax.f32 %v4061_v39, 0.0  ;;  %vm16814_vm9 = vmand %vm4170_vm6, %vm4186_vm8 }
 0x45a   : > { %v4926_v38 = vsel %vm4864_vm10, %v4916_v53, %v4925_v25  ;;  %vm4231_vm11 = vmand %vm16814_vm9, %vm4213_vm5 }
 0x45b   : > { %v4013_v0 = vmul.f32 %v16591_v24, %v3964_v7  ;;  %3904 = vmatmul.bf16.gmra.mxu0 %v3732_v31  ;;  %v15180_v20 = vld [vmem:[#allocation2 + $0x2c] sm:$0xff]   ;;  %5104 = vmatmul.bf16.gmra.mxu2 %v4926_v38  ;;  %v4424_v58 = vsel %vm16761_vm15, %v4109_v60, 0.0  ;;  %v3734_v31 = vsel %vm1165_vm1, %v3731_v3, %v3733_v4  ;;  %vm4284_vm15 = vmand %vm16814_vm9, %vm4266_vm7 }
 0x45c   : > { %v13104_v55 = vld [vmem:[#allocation2 + $0x2c] sm:$0xff]  ;;  %4793 = vmatmul.bf16.gmra.mxu1 %v15180_v20 }
 0x45d   : > { %v4062_v36 = vadd.f32 %v16602_v16, %v4013_v0  ;;  %v5327_v61 = vshrl.u32 %v13104_v55, 16  ;;  %v5330_v17 = vshll.u32 %v13104_v55, 16 }
 0x45f   : > { %v4110_v53 = vmax.f32 %v4062_v36, 0.0  ;;  %v5329_v8 = vrot.slane %v5327_v61, 1  ;;  %v5332_v26 = vrot.slane %v5330_v17, 2 }
 0x460   : > { %v3867_v37 = vpop.f32.mrf.mxu0 }
 0x461   : > { %v4425_v62 = vsel %vm4281_vm3, %v4110_v53, 0.0  ;;  %v3965_v49 = vadd.f32 %v3867_v37, %v16251_v51  ;;  %v5333_v15 = vor.u32 %v5332_v26, %v5329_v8  ;;  %v16825_v8 = vld [vmem:[%s15425_s19 + $0xc4] sm:$0xff] }
 0x462   : > { %v13617_v9 = vpack.c.bf16 %v4425_v62, %v4424_v58 }
 0x463   : > { %v5334_v46 = vsel %vm5281_vm4, %v5324_v30, %v5333_v15  ;;  %v4014_v47 = vmul.f32 %v16591_v24, %v3965_v49 }
 0x464   : > { %14378 = vst [vmem:[#allocation2 + $0x38] sm:$0xff] %v13617_v9   ;;  %5516 = vmatmul.bf16.gmra.mxu3 %v5334_v46  ;;  %v4928_v63 = vshrl.u32 %v13617_v9, 16  ;;  %v4931_v33 = vshll.u32 %v13617_v9, 16  ;;  %v4151_v9 = vadd.s32 6, %v16586_v44  ;;  %v3735_v46 = vrot.slane %v16825_v8, 1 }
 0x465   : > { %v4063_v7 = vadd.f32 %v16602_v16, %v4014_v47 }
 0x466   : > { %v4930_v13 = vrot.slane %v4928_v63, 2  ;;  %v4933_v51 = vrot.slane %v4931_v33, 3  ;;  %v13133_v33 = vld [vmem:[%s19428_s2 + $0x118] sm:$0xff]  ;;  %vm4171_vm12 = vcmp.ge.s32.totalorder %v4151_v9, 0  ;;  %vm4187_vm13 = vcmp.lt.s32.totalorder %v4151_v9, 16 }
 0x467   : > { %v4111_v60 = vmax.f32 %v4063_v7, 0.0  ;;  %6150 = vmatpush.bf16.msrb.mxu2 %v13133_v33  ;;  %v13125_v7 = vld [vmem:[%s19428_s2 + $0xd8] sm:$0xff]  ;;  %vm16845_vm14 = vmand %vm4171_vm12, %vm4187_vm13 }
 0x468   : > { %v3870_v30 = vpop.f32.mrf.mxu0  ;;  %v4934_v39 = vor.u32 %v4933_v51, %v4930_v13  ;;  %5938 = vmatpush.bf16.msrb.mxu1 %v13125_v7  ;;  %vm4234_vm0 = vmand %vm16845_vm14, %vm4213_vm5 }
 0x469   : > { %v3966_v21 = vadd.f32 %v3870_v30, %v16264_v56  ;;  %v4426_v26 = vsel %vm4231_vm11, %v4111_v60, 0.0  ;;  %vm4287_vm2 = vmand %vm16845_vm14, %vm4266_vm7 }
 0x46a   : > { %v4935_v28 = vsel %vm4864_vm10, %v4925_v25, %v4934_v39 }
 0x46b   : > { %v4015_v0 = vmul.f32 %v16591_v24, %v3966_v21  ;;  %3909 = vmatmul.bf16.gmra.mxu0 %v3734_v31  ;;  %v15182_v20 = vld [vmem:[#allocation2 + $0x34] sm:$0xff]   ;;  %5109 = vmatmul.bf16.gmra.mxu2 %v4935_v28 }
 0x46c   : > { %v13105_v55 = vld [vmem:[#allocation2 + $0x34] sm:$0xff]  ;;  %4798 = vmatmul.bf16.gmra.mxu1 %v15182_v20 }
 0x46d   : > { %v4064_v3 = vadd.f32 %v16602_v16, %v4015_v0  ;;  %v5336_v36 = vshrl.u32 %v13105_v55, 16  ;;  %v5339_v61 = vshll.u32 %v13105_v55, 16  ;;  %v13167_v0 = vld [vmem:[%s19428_s2 + $0x1b0] sm:$0xff] }
 0x46e   : > { %7039 = vmatpush.bf16.msrb.mxu0 %v13167_v0 }
 0x46f   : > { %v4112_v56 = vmax.f32 %v4064_v3, 0.0  ;;  %v5338_v25 = vrot.slane %v5336_v36, 1  ;;  %v5341_v17 = vrot.slane %v5339_v61, 2 }
 0x470   : > { %v3872_v53 = vpop.f32.mrf.mxu0 }
 0x471   : > { %v4427_v37 = vsel %vm16814_vm9, %v4112_v56, 0.0  ;;  %v3967_v34 = vadd.f32 %v3872_v53, %v16271_v45  ;;  %v5342_v58 = vor.u32 %v5341_v17, %v5338_v25  ;;  %v16858_v56 = vpop.f32.mrf.mxu1  ;;  %v16861_v17 = vld [vmem:[%s15425_s19 + $0xcc] sm:$0xff] }
 0x472   : > { %v13622_v62 = vpack.c.bf16 %v4427_v37, %v4426_v26 }
 0x473   : > { %v5343_v49 = vsel %vm5281_vm4, %v5333_v15, %v5342_v58  ;;  %v4016_v57 = vmul.f32 %v16591_v24, %v3967_v34  ;;  %v3736_v15 = vsel %vm1165_vm1, %v3733_v4, %v3735_v46 }
 0x474   : > { %14379 = vst [vmem:[#allocation2 + $0x40] sm:$0xff] %v13622_v62   ;;  %5521 = vmatmul.bf16.gmra.mxu3 %v5343_v49  ;;  %v4937_v59 = vshrl.u32 %v13622_v62, 16  ;;  %v4940_v63 = vshll.u32 %v13622_v62, 16  ;;  %v3737_v62 = vrot.slane %v16861_v17, 1 }
 0x475   : > { %v4065_v30 = vadd.f32 %v16602_v16, %v4016_v57 }
 0x476   : > { %v4939_v47 = vrot.slane %v4937_v59, 2  ;;  %v4942_v45 = vrot.slane %v4940_v63, 3  ;;  %v16867_v63 = vpop.f32.mrf.mxu2 }
 0x477   : > { %v4113_v55 = vmax.f32 %v4065_v30, 0.0 }
 0x478   : > { %v3875_v13 = vpop.f32.mrf.mxu0  ;;  %v4943_v51 = vor.u32 %v4942_v45, %v4939_v47  ;;  %v3738_v45 = vsel %vm1165_vm1, %v3735_v46, %v3737_v62 }
 0x479   : > { %v3968_v31 = vadd.f32 %v3875_v13, %v16281_v11  ;;  %v4428_v38 = vsel %vm4284_vm15, %v4113_v55, 0.0 }
 0x47a   : > { %v4944_v21 = vsel %vm4864_vm10, %v4934_v39, %v4943_v51 }
 0x47b   : > { %v4017_v28 = vmul.f32 %v16591_v24, %v3968_v31  ;;  %3914 = vmatmul.bf16.gmra.mxu0 %v3736_v15  ;;  %v15184_v20 = vld [vmem:[#allocation2 + $0x3c] sm:$0xff]   ;;  %5114 = vmatmul.bf16.gmra.mxu2 %v4944_v21 }
 0x47c   : > { %v13106_v4 = vld [vmem:[#allocation2 + $0x3c] sm:$0xff]  ;;  %4803 = vmatmul.bf16.gmra.mxu1 %v15184_v20 }
 0x47d   : > { %v4066_v11 = vadd.f32 %v16602_v16, %v4017_v28  ;;  %v5345_v39 = vshrl.u32 %v13106_v4, 16  ;;  %v5348_v60 = vshll.u32 %v13106_v4, 16 }
 0x47f   : > { %v4114_v3 = vmax.f32 %v4066_v11, 0.0  ;;  %v5347_v36 = vrot.slane %v5345_v39, 1  ;;  %v5350_v61 = vrot.slane %v5348_v60, 2 }
 0x480   : > { %v3877_v25 = vpop.f32.mrf.mxu0 }
 0x481   : > { %v4429_v53 = vsel %vm4234_vm0, %v4114_v3, 0.0  ;;  %v3969_v8 = vadd.f32 %v3877_v25, %v16287_v23  ;;  %v5351_v26 = vor.u32 %v5350_v61, %v5347_v36  ;;  %v16882_v3 = vld [vmem:[%s15425_s19 + $0xd4] sm:$0xff] }
 0x482   : > { %v13627_v37 = vpack.c.bf16 %v4429_v53, %v4428_v38 }
 0x483   : > { %v5352_v34 = vsel %vm5281_vm4, %v5342_v58, %v5351_v26  ;;  %v4018_v59 = vmul.f32 %v16591_v24, %v3969_v8  ;;  %v4152_v8 = vadd.s32 7, %v16586_v44 }
 0x484   : > { %14380 = vst [vmem:[#allocation2 + $0x48] sm:$0xff] %v13627_v37   ;;  %5526 = vmatmul.bf16.gmra.mxu3 %v5352_v34  ;;  %v4946_v49 = vshrl.u32 %v13627_v37, 16  ;;  %v4949_v9 = vshll.u32 %v13627_v37, 16 }
 0x485   : > { %v4769_v23 = vpop.f32.mrf.mxu1  ;;  %v4067_v15 = vadd.f32 %v16602_v16, %v4018_v59  ;;  %vm4172_vm3 = vcmp.ge.s32.totalorder %v4152_v8, 0  ;;  %vm4188_vm6 = vcmp.lt.s32.totalorder %v4152_v8, 16 }
 0x486   : > { %v4948_v33 = vrot.slane %v4946_v49, 2  ;;  %v4951_v57 = vrot.slane %v4949_v9, 3  ;;  %v3739_v49 = vrot.slane %v16882_v3, 1  ;;  %vm16918_vm8 = vmand %vm4172_vm3, %vm4188_vm6  ;;  %v13160_v3 = vld [vmem:[%s19428_s2 + $0x178] sm:$0xff] }
 0x487   : > { %v4115_v28 = vmax.f32 %v4067_v15, 0.0  ;;  %vm4237_vm9 = vmand %vm16918_vm8, %vm4213_vm5  ;;  %6592 = vmatpush.bf16.msrb.mxu3 %v13160_v3  ;;  %v13131_v3 = vld [vmem:[%s19428_s2 + $0x108] sm:$0xff] }
 0x488   : > { %v3880_v47 = vpop.f32.mrf.mxu0  ;;  %v4952_v13 = vor.u32 %v4951_v57, %v4948_v33 }
 0x489   : > { %v3970_v58 = vadd.f32 %v3880_v47, %v16303_v54  ;;  %v4430_v36 = vsel %vm16845_vm14, %v4115_v28, 0.0  ;;  %vm16985_vm14 = vmand %vm16918_vm8, %vm4266_vm7 }
 0x48a   : > { %v4953_v30 = vsel %vm4864_vm10, %v4943_v51, %v4952_v13 }
 0x48b   : > { %v4019_v31 = vmul.f32 %v16591_v24, %v3970_v58  ;;  %3919 = vmatmul.bf16.gmra.mxu0 %v3738_v45  ;;  %v15186_v7 = vld [vmem:[#allocation2 + $0x44] sm:$0xff]   ;;  %5119 = vmatmul.bf16.gmra.mxu2 %v4953_v30  ;;  %v16889_v34 = vld [vmem:[#allocation2 + $0x4c] sm:$0xf]  ;;  %v3740_v30 = vsel %vm1165_vm1, %v3737_v62, %v3739_v49 }
 0x48c   : > { %v13107_v21 = vld [vmem:[#allocation2 + $0x44] sm:$0xff]  ;;  %4808 = vmatmul.bf16.gmra.mxu1 %v15186_v7 }
 0x48d   : > { %v4068_v20 = vadd.f32 %v16602_v16, %v4019_v31  ;;  %v5354_v46 = vshrl.u32 %v13107_v21, 16  ;;  %v5357_v4 = vshll.u32 %v13107_v21, 16  ;;  %v4771_v53 = vpop.f32.mrf.mxu1 }
 0x48e   : > { %v5080_v54 = vpop.f32.mrf.mxu2 }
 0x48f   : > { %v4116_v51 = vmax.f32 %v4068_v20, 0.0  ;;  %v5356_v55 = vrot.slane %v5354_v46, 1  ;;  %v5359_v11 = vrot.slane %v5357_v4, 2  ;;  %v16879_v39 = vadd.f32 %v5080_v54, %v4769_v23  ;;  %v13124_v20 = vld [vmem:[%s19428_s2 + $0xd0] sm:$0xff] }
 0x490   : > { %v3882_v60 = vpop.f32.mrf.mxu0  ;;  %v6786_v23 = vunpack.c.l.b16 %v16889_v34  ;;  %5939 = vmatpush.bf16.msrb.mxu1 %v13124_v20 }
 0x491   : > { %v4431_v61 = vsel %vm4287_vm2, %v4116_v51, 0.0  ;;  %v3971_v25 = vadd.f32 %v3882_v60, %v16313_v41  ;;  %v5360_v17 = vor.u32 %v5359_v11, %v5356_v55  ;;  %v13132_v41 = vld [vmem:[%s19428_s2 + $0x110] sm:$0xff] }
 0x492   : > { %v13632_v38 = vpack.c.bf16 %v4431_v61, %v4430_v36  ;;  %6151 = vmatpush.bf16.msrb.mxu2 %v13132_v41  ;;  %v16928_v61 = vpop.f32.mrf.mxu3 }
 0x493   : > { %v5361_v37 = vsel %vm5281_vm4, %v5351_v26, %v5360_v17  ;;  %v4020_v33 = vmul.f32 %v16591_v24, %v3971_v25 }
 0x494   : > { %14381 = vst [vmem:[#allocation2 + $0x50] sm:$0xff] %v13632_v38   ;;  %5531 = vmatmul.bf16.gmra.mxu3 %v5361_v37  ;;  %v4955_v9 = vshrl.u32 %v13632_v38, 16  ;;  %v4958_v59 = vshll.u32 %v13632_v38, 16  ;;  %v13813_v57 = vunpack.c.l.b16 %v13632_v38  ;;  %v16933_v37 = vld [vmem:[%s15425_s19 + $0xdc] sm:$0xff] }
 0x495   : > { %v4069_v21 = vadd.f32 %v16602_v16, %v4020_v33 }
 0x496   : > { %v5082_v26 = vpop.f32.mrf.mxu2  ;;  %v4957_v47 = vrot.slane %v4955_v9, 2  ;;  %v4960_v45 = vrot.slane %v4958_v59, 3  ;;  %v16909_v7 = vpack.c.b16 %v13813_v57, %v6786_v23  ;;  %6152 = vmatpush.bf16.msrb.mxu2 %v13131_v3 }
 0x497   : > { %v16900_v15 = vadd.f32 %v5082_v26, %v4771_v53 }
 0x498   : > { %v3885_v58 = vpop.f32.mrf.mxu0  ;;  %v16905_v31 = vor.u32 %v4960_v45, %v4957_v47  ;;  %v3741_v45 = vrot.slane %v16933_v37, 1  ;;  %v13164_v37 = vld [vmem:[%s19428_s2 + $0x198] sm:$0xff] }
 0x499   : > { %v3972_v28 = vadd.f32 %v3885_v58, %v16331_v27  ;;  %v4774_v46 = vpop.f32.mrf.mxu1  ;;  %v4117_v27 = vmax.f32 %v4069_v21, 0.0  ;;  %v4153_v58 = vadd.s32 8, %v16586_v44 }
 0x49a   : > { %v4962_v4 = vsel %vm4864_vm10, %v4952_v13, %v16905_v31 }
 0x49b   : > { %v4021_v54 = vmul.f32 %v16591_v24, %v3972_v28  ;;  %3924 = vmatmul.bf16.gmra.mxu0 %v3740_v30  ;;  %v15188_v51 = vld [vmem:[#allocation2 + $0x4c] sm:$0xff]   ;;  %5124 = vmatmul.bf16.gmra.mxu2 %v4962_v4  ;;  %v4432_v59 = vsel %vm4237_vm9, %v4117_v27, 0.0  ;;  %vm4173_vm11 = vcmp.ge.s32.totalorder %v4153_v58, 0  ;;  %vm4189_vm12 = vcmp.lt.s32.totalorder %v4153_v58, 16 }
 0x49c   : > { %v13108_v55 = vld [vmem:[#allocation2 + $0x4c] sm:$0xff]  ;;  %4813 = vmatmul.bf16.gmra.mxu1 %v15188_v51  ;;  %vm16976_vm13 = vmand %vm4173_vm11, %vm4189_vm12 }
 0x49d   : > { %v4070_v11 = vadd.f32 %v16602_v16, %v4021_v54  ;;  %v5363_v60 = vshrl.u32 %v13108_v55, 16  ;;  %v5366_v36 = vshll.u32 %v13108_v55, 16  ;;  %vm4240_vm15 = vmand %vm16976_vm13, %vm4213_vm5 }
 0x49e   : > { %v5085_v13 = vpop.f32.mrf.mxu2  ;;  %vm4293_vm0 = vmand %vm16976_vm13, %vm4266_vm7 }
 0x49f   : > { %v4118_v25 = vmax.f32 %v4070_v11, 0.0  ;;  %v5365_v38 = vrot.slane %v5363_v60, 1  ;;  %v5368_v53 = vrot.slane %v5366_v36, 2  ;;  %v16930_v8 = vadd.f32 %v5085_v13, %v4774_v46 }
 0x4a0   : > { %v3887_v9 = vpop.f32.mrf.mxu0 }
 0x4a1   : > { %v4433_v0 = vsel %vm16918_vm8, %v4118_v25, 0.0  ;;  %v3973_v41 = vadd.f32 %v3887_v9, %v16345_v29  ;;  %v16938_v33 = vor.u32 %v5368_v53, %v5365_v38  ;;  %v4776_v26 = vpop.f32.mrf.mxu1  ;;  %v2708_v29 = vadd.f32 %v16306_v42, %v16360_v1  ;;  %v16992_v38 = vld [vmem:[%s19430_s4 + $0x1] ss:$0 sm:$0xff] }
 0x4a2   : > { %v13637_v57 = vpack.c.bf16 %v4433_v0, %v4432_v59 }
 0x4a3   : > { %v5370_v47 = vsel %vm5281_vm4, %v5360_v17, %v16938_v33  ;;  %v4022_v28 = vmul.f32 %v16591_v24, %v3973_v41  ;;  %v3742_v17 = vsel %vm1165_vm1, %v3739_v49, %v3741_v45  ;;  %v3195_v49 = vadd.f32 %v16308_v52, %v2708_v29 }
 0x4a4   : > { %14382 = vst [vmem:[#allocation2 + $0x58] sm:$0xff] %v13637_v57   ;;  %5536 = vmatmul.bf16.gmra.mxu3 %v5370_v47  ;;  %v4964_v30 = vshrl.u32 %v13637_v57, 16  ;;  %v4967_v21 = vshll.u32 %v13637_v57, 16 }
 0x4a5   : > { %v4071_v42 = vadd.f32 %v16602_v16, %v4022_v28  ;;  %v3488_v0 = vadd.f32 %v16311_v43, %v3195_v49  ;;  %v17006_v28 = vld [vmem:[%s15425_s19 + $0xe4] sm:$0xff] }
 0x4a6   : > { %v5087_v20 = vpop.f32.mrf.mxu2  ;;  %v4966_v46 = vrot.slane %v4964_v30, 2  ;;  %v4969_v4 = vrot.slane %v4967_v21, 3  ;;  %v13123_v49 = vld [vmem:[%s19428_s2 + $0xc8] sm:$0xff] }
 0x4a7   : > { %v5497_v54 = vpop.f32.mrf.mxu3  ;;  %v16952_v51 = vadd.f32 %v5087_v20, %v4776_v26  ;;  %v4119_v13 = vmax.f32 %v4071_v42, 0.0  ;;  %5940 = vmatpush.bf16.msrb.mxu1 %v13123_v49 }
 0x4a8   : > { %v3890_v55 = vpop.f32.mrf.mxu0  ;;  %v16955_v24 = vadd.f32 %v5497_v54, %v16879_v39  ;;  %v16957_v27 = vor.u32 %v4969_v4, %v4966_v46  ;;  %v16973_v39 = vld [vmem:[%s19430_s4] ss:$0 sm:$0xff] }
 0x4a9   : > { %v3974_v1 = vadd.f32 %v3890_v55, %v16358_v50  ;;  %v4779_v11 = vpop.f32.mrf.mxu1  ;;  %v4434_v43 = vsel %vm16985_vm14, %v4119_v13, 0.0  ;;  %v3743_v55 = vrot.slane %v17006_v28, 1  ;;  %v13165_v13 = vld [vmem:[%s19428_s2 + $0x1a0] sm:$0xff] }
 0x4aa   : > { %v16968_v60 = vsel %vm4864_vm10, %v16905_v31, %v16957_v27 }
 0x4ab   : > { %v4023_v16 = vmul.f32 %v16973_v39, %v3974_v1  ;;  %3929 = vmatmul.bf16.gmra.mxu0 %v3742_v17  ;;  %v15190_v36 = vld [vmem:[#allocation2 + $0x54] sm:$0xff]   ;;  %5129 = vmatmul.bf16.gmra.mxu2 %v16968_v60  ;;  %v13166_v17 = vld [vmem:[%s19428_s2 + $0x1a8] sm:$0xff] }
 0x4ac   : > { %v13109_v52 = vld [vmem:[#allocation2 + $0x54] sm:$0xff]  ;;  %4818 = vmatmul.bf16.gmra.mxu1 %v15190_v36  ;;  %7040 = vmatpush.bf16.msrb.mxu0 %v13166_v17 }
 0x4ad   : > { %v4072_v53 = vadd.f32 %v16992_v38, %v4023_v16  ;;  %v5372_v9 = vshrl.u32 %v13109_v52, 16  ;;  %v5375_v59 = vshll.u32 %v13109_v52, 16 }
 0x4ae   : > { %v5090_v62 = vpop.f32.mrf.mxu2 }
 0x4af   : > { %v4120_v41 = vmax.f32 %v4072_v53, 0.0  ;;  %v5499_v57 = vpop.f32.mrf.mxu3  ;;  %v5374_v26 = vrot.slane %v5372_v9, 1  ;;  %v5377_v47 = vrot.slane %v5375_v59, 2  ;;  %v17000_v58 = vadd.f32 %v5090_v62, %v4779_v11 }
 0x4b0   : > { %v3892_v30 = vpop.f32.mrf.mxu0  ;;  %v17003_v21 = vadd.f32 %v5499_v57, %v16900_v15  ;;  %7041 = vmatpush.bf16.msrb.mxu0 %v13165_v13  ;;  %v13162_v13 = vld [vmem:[%s19428_s2 + $0x188] sm:$0xff] }
 0x4b1   : > { %v4435_v29 = vsel %vm4240_vm15, %v4120_v41, 0.0  ;;  %v3975_v20 = vadd.f32 %v3892_v30, %v3488_v0  ;;  %v17010_v46 = vor.u32 %v5377_v47, %v5374_v26  ;;  %v4781_v54 = vpop.f32.mrf.mxu1 }
 0x4b2   : > { %v13642_v4 = vpack.c.bf16 %v4435_v29, %v4434_v43 }
 0x4b3   : > { %v5379_v15 = vsel %vm5281_vm4, %v16938_v33, %v17010_v46  ;;  %v4024_v11 = vmul.f32 %v16973_v39, %v3975_v20  ;;  %v2710_v33 = vadd.f32 %v16334_v14, %v16390_v5  ;;  %v3744_v14 = vsel %vm1165_vm1, %v3741_v45, %v3743_v55  ;;  %v13163_v20 = vld [vmem:[%s19428_s2 + $0x190] sm:$0xff] }
 0x4b4   : > { %14383 = vst [vmem:[#allocation2 + $0x60] sm:$0xff] %v13642_v4   ;;  %5541 = vmatmul.bf16.gmra.mxu3 %v5379_v15  ;;  %v4973_v42 = vshrl.u32 %v13642_v4, 16  ;;  %v4976_v1 = vshll.u32 %v13642_v4, 16  ;;  %7042 = vmatpush.bf16.msrb.mxu0 %v13164_v37 }
 0x4b5   : > { %v4073_v0 = vadd.f32 %v16992_v38, %v4024_v11  ;;  %v3197_v41 = vadd.f32 %v16339_v18, %v2710_v33 }
 0x4b6   : > { %v5092_v16 = vpop.f32.mrf.mxu2  ;;  %v4975_v36 = vrot.slane %v4973_v42, 2  ;;  %v4978_v52 = vrot.slane %v4976_v1, 3 }
 0x4b7   : > { %v5502_v25 = vpop.f32.mrf.mxu3  ;;  %v17031_v53 = vadd.f32 %v5092_v16, %v4781_v54  ;;  %v3490_v43 = vadd.f32 %v16342_v35, %v3197_v41  ;;  %v17071_v35 = vld [vmem:[%s15425_s19 + $0xec] sm:$0xff] }
 0x4b8   : > { %v3895_v9 = vpop.f32.mrf.mxu0  ;;  %v17034_v59 = vadd.f32 %v5502_v25, %v16930_v8  ;;  %v17041_v5 = vor.u32 %v4978_v52, %v4975_v36  ;;  %7043 = vmatpush.bf16.msrb.mxu0 %v13163_v20  ;;  %v4154_v25 = vadd.s32 9, %v16586_v44  ;;  %v3745_v50 = vrot.slane %v17071_v35, 1 }
 0x4b9   : > { %v3976_v62 = vadd.f32 %v3895_v9, %v16388_v12  ;;  %v4784_v57 = vpop.f32.mrf.mxu1  ;;  %v4121_v12 = vmax.f32 %v4073_v0, 0.0 }
 0x4ba   : > { %v17049_v8 = vsel %vm4864_vm10, %v16957_v27, %v17041_v5  ;;  %vm4174_vm2 = vcmp.ge.s32.totalorder %v4154_v25, 0  ;;  %vm4190_vm3 = vcmp.lt.s32.totalorder %v4154_v25, 16 }
 0x4bb   : > { %v4025_v45 = vmul.f32 %v16973_v39, %v3976_v62  ;;  %3934 = vmatmul.bf16.gmra.mxu0 %v3744_v14  ;;  %v15192_v26 = vld [vmem:[#allocation2 + $0x5c] sm:$0xff]   ;;  %5134 = vmatmul.bf16.gmra.mxu2 %v17049_v8  ;;  %v4436_v49 = vsel %vm16976_vm13, %v4121_v12, 0.0  ;;  %v2712_v62 = vadd.f32 %v16363_v22, %v16406_v40  ;;  %v3746_v22 = vsel %vm1165_vm1, %v3743_v55, %v3745_v50  ;;  %vm17116_vm6 = vmand %vm4174_vm2, %vm4190_vm3 }
 0x4bc   : > { %v13110_v47 = vld [vmem:[#allocation2 + $0x5c] sm:$0xff]  ;;  %4823 = vmatmul.bf16.gmra.mxu1 %v15192_v26  ;;  %7044 = vmatpush.bf16.msrb.mxu0 %v13162_v13  ;;  %vm4243_vm8 = vmand %vm17116_vm6, %vm4213_vm5 }
 0x4bd   : > { %v4074_v18 = vadd.f32 %v16992_v38, %v4025_v45  ;;  %v5381_v30 = vshrl.u32 %v13110_v47, 16  ;;  %v5384_v27 = vshll.u32 %v13110_v47, 16  ;;  %v3559_v47 = vld [vmem:[%s15425_s19 + $0xf4] sm:$0x1]  ;;  %vm17180_vm12 = vmand %vm17116_vm6, %vm4266_vm7  ;;  %s19218_s19 = scalar_lea.vmem %s19431_s5, %s15269_s13 }
 0x4be   : > { %v5095_v29 = vpop.f32.mrf.mxu2  ;;  %v3674_v55 = vunpack.c.l.b16 %v3559_v47 }
 0x4bf   : > { %v4122_v4 = vmax.f32 %v4074_v18, 0.0  ;;  %v5504_v54 = vpop.f32.mrf.mxu3  ;;  %v5383_v17 = vrot.slane %v5381_v30, 1  ;;  %v5386_v15 = vrot.slane %v5384_v27, 2  ;;  %v17065_v42 = vadd.f32 %v5095_v29, %v4784_v57  ;;  %v19627_v29 = vld [vmem:[#allocation55_spill] sm:$0xff] }
 0x4c0   : > { %v3897_v1 = vpop.f32.mrf.mxu0  ;;  %v17068_v3 = vadd.f32 %v5504_v54, %v16952_v51 }
 0x4c1   : > { %v4437_v11 = vsel %vm4293_vm0, %v4122_v4, 0.0  ;;  %v3977_v33 = vadd.f32 %v3897_v1, %v3490_v43  ;;  %v17075_v16 = vor.u32 %v5386_v15, %v5383_v17  ;;  %v4786_v52 = vpop.f32.mrf.mxu1  ;;  %v13159_v43 = vld [vmem:[%s19428_s2 + $0x170] sm:$0xff] }
 0x4c2   : > { %v13647_v36 = vpack.c.bf16 %v4437_v11, %v4436_v49  ;;  %6593 = vmatpush.bf16.msrb.mxu3 %v13159_v43  ;;  %v19630_v11 = vld [vmem:[#allocation56_spill] sm:$0xff] }
 0x4c3   : > { %v5388_v51 = vsel %vm5281_vm4, %v17010_v46, %v17075_v16  ;;  %v4026_v0 = vmul.f32 %v16973_v39, %v3977_v33  ;;  %v13161_v46 = vld [vmem:[%s19428_s2 + $0x180] sm:$0xff] }
 0x4c4   : > { %14384 = vst [vmem:[#allocation2 + $0x68] sm:$0xff] %v13647_v36   ;;  %5546 = vmatmul.bf16.gmra.mxu3 %v5388_v51  ;;  %v4982_v9 = vshrl.u32 %v13647_v36, 16  ;;  %v4985_v14 = vshll.u32 %v13647_v36, 16  ;;  %7045 = vmatpush.bf16.msrb.mxu0 %v13161_v46 }
 0x4c5   : > { %v4075_v30 = vadd.f32 %v16992_v38, %v4026_v0 }
 0x4c6   : > { %v5097_v41 = vpop.f32.mrf.mxu2  ;;  %v4984_v57 = vrot.slane %v4982_v9, 2  ;;  %v4987_v37 = vrot.slane %v4985_v14, 3 }
 0x4c7   : > { %v5507_v45 = vpop.f32.mrf.mxu3  ;;  %v17091_v26 = vadd.f32 %v5097_v41, %v4786_v52  ;;  %v4123_v15 = vmax.f32 %v4075_v30, 0.0  ;;  %v3699_v52 = vpack.c.b16 %v3674_v55, %v3674_v55  ;;  %v6706_v30 = vld [vmem:[#allocation2 + $0x48] sm:$0xc] }
 0x4c8   : > { %v3900_v12 = vpop.f32.mrf.mxu0  ;;  %v17095_v18 = vadd.f32 %v5507_v45, %v17000_v58  ;;  %v17102_v40 = vor.u32 %v4987_v37, %v4984_v57  ;;  %v3199_v58 = vadd.f32 %v19627_v29, %v2712_v62  ;;  %v13130_v29 = vld [vmem:[%s19428_s2 + $0x100] sm:$0xff] }
 0x4c9   : > { %v3978_v27 = vadd.f32 %v3900_v12, %v16404_v32  ;;  %v4789_v20 = vpop.f32.mrf.mxu1  ;;  %v4438_v41 = vsel %vm4243_vm8, %v4123_v15, 0.0  ;;  %6153 = vmatpush.bf16.msrb.mxu2 %v13130_v29 }
 0x4ca   : > { %v17113_v28 = vsel %vm4864_vm10, %v17041_v5, %v17102_v40  ;;  %v3492_v33 = vadd.f32 %v19630_v11, %v3199_v58  ;;  %v13122_v58 = vld [vmem:[%s19428_s2 + $0xc0] sm:$0xff] }
 0x4cb   : > { %v4027_v32 = vmul.f32 %v16973_v39, %v3978_v27  ;;  %3939 = vmatmul.bf16.gmra.mxu0 %v3746_v22  ;;  %v15194_v54 = vld [vmem:[#allocation2 + $0x64] sm:$0xff]   ;;  %5139 = vmatmul.bf16.gmra.mxu2 %v17113_v28  ;;  %v3747_v22 = vrot.slane %v3699_v52, 1  ;;  %v19632_v52 = vld [vmem:[#allocation5_spill] sm:$0xff] }
 0x4cc   : > { %v13111_v17 = vld [vmem:[#allocation2 + $0x64] sm:$0xff]  ;;  %4828 = vmatmul.bf16.gmra.mxu1 %v15194_v54 }
 0x4cd   : > { %v4076_v1 = vadd.f32 %v16992_v38, %v4027_v32  ;;  %v5390_v5 = vshrl.u32 %v13111_v17, 16  ;;  %v5393_v49 = vshll.u32 %v13111_v17, 16  ;;  %5941 = vmatpush.bf16.msrb.mxu1 %v13122_v58 }
 0x4ce   : > { %v5100_v36 = vpop.f32.mrf.mxu2 }
 0x4cf   : > { %v4124_v13 = vmax.f32 %v4076_v1, 0.0  ;;  %v5509_v25 = vpop.f32.mrf.mxu3  ;;  %v5392_v51 = vrot.slane %v5390_v5, 1  ;;  %v5395_v9 = vrot.slane %v5393_v49, 2  ;;  %v17128_v14 = vadd.f32 %v5100_v36, %v4789_v20 }
 0x4d0   : > { %v3902_v0 = vpop.f32.mrf.mxu0  ;;  %v17131_v62 = vadd.f32 %v5509_v25, %v17031_v53  ;;  %v4155_v53 = vadd.s32 10, %v16586_v44  ;;  %v3748_v1 = vsel %vm1165_vm1, %v3745_v50, %v3747_v22  ;;  %v6785_v49 = vunpack.c.l.b16 %v6706_v30  ;;  %v19633_v25 = vld [vmem:[#allocation57_spill] sm:$0xff]  ;;  %v19638_v22 = vld [vmem:[#allocation58_spill] sm:$0xff] }
 0x4d1   : > { %v4439_v57 = vsel %vm17116_vm6, %v4124_v13, 0.0  ;;  %v3979_v37 = vadd.f32 %v3902_v0, %v3492_v33  ;;  %v17135_v46 = vor.u32 %v5395_v9, %v5392_v51  ;;  %v4791_v47 = vpop.f32.mrf.mxu1 }
 0x4d2   : > { %v13652_v45 = vpack.c.bf16 %v4439_v57, %v4438_v41  ;;  %vm4175_vm9 = vcmp.ge.s32.totalorder %v4155_v53, 0  ;;  %vm4191_vm11 = vcmp.lt.s32.totalorder %v4155_v53, 16  ;;  %v6816_v57 = vpack.c.b16 %v6786_v23, %v6785_v49  ;;  %v13158_v23 = vld [vmem:[%s19428_s2 + $0x168] sm:$0xff] }
 0x4d3   : > { %v5397_v12 = vsel %vm5281_vm4, %v17075_v16, %v17135_v46  ;;  %v4028_v20 = vmul.f32 %v16973_v39, %v3979_v37  ;;  %v19631_v16 = vld [vmem:[#allocation6_spill] sm:$0xff]  ;;  %vm17169_vm1 = vmand %vm4175_vm9, %vm4191_vm11  ;;  %6594 = vmatpush.bf16.msrb.mxu3 %v13158_v23 }
 0x4d4   : > { %14385 = vst [vmem:[#allocation2 + $0x70] sm:$0xff] %v13652_v45   ;;  %5551 = vmatmul.bf16.gmra.mxu3 %v5397_v12  ;;  %v4991_v27 = vshrl.u32 %v13652_v45, 16  ;;  %v4994_v43 = vshll.u32 %v13652_v45, 16  ;;  %v2714_v55 = vadd.f32 %v19631_v16, %v16428_v10  ;;  %vm4246_vm13 = vmand %vm17169_vm1, %vm4213_vm5  ;;  %v6833_v16 = vshrl.u32 %v6816_v57, 16 }
 0x4d5   : > { %v4077_v36 = vadd.f32 %v16992_v38, %v4028_v20  ;;  %vm17246_vm14 = vmand %vm17169_vm1, %vm4266_vm7 }
 0x4d6   : > { %v5102_v32 = vpop.f32.mrf.mxu2  ;;  %v4993_v54 = vrot.slane %v4991_v27, 2  ;;  %v4996_v17 = vrot.slane %v4994_v43, 3  ;;  %v3201_v51 = vadd.f32 %v19633_v25, %v2714_v55  ;;  %v6836_v55 = vshll.u32 %v6816_v57, 16  ;;  %v13156_v57 = vld [vmem:[%s19428_s2 + $0x158] sm:$0xff] }
 0x4d7   : > { %v5512_v15 = vpop.f32.mrf.mxu3  ;;  %v17153_v5 = vadd.f32 %v5102_v32, %v4791_v47  ;;  %v4125_v37 = vmax.f32 %v4077_v36, 0.0  ;;  %v19639_v36 = vld [vmem:[#allocation8_spill] sm:$0xff]  ;;  %v6835_v25 = vrot.slane %v6833_v16, 2  ;;  %v13199_v16 = vld [vmem:[%s19428_s2 + $0x238] sm:$0xff] }
 0x4d8   : > { %v3905_v11 = vpop.f32.mrf.mxu0  ;;  %v17156_v33 = vadd.f32 %v5512_v15, %v17065_v42  ;;  %v17158_v10 = vor.u32 %v4996_v17, %v4993_v54  ;;  %v3494_v30 = vadd.f32 %v19638_v22, %v3201_v51  ;;  %v6838_v51 = vrot.slane %v6836_v55, 3  ;;  %7696 = vmatpush.bf16.msra.mxu2 %v13199_v16 }
 0x4d9   : > { %v3980_v13 = vadd.f32 %v3905_v11, %v19632_v52  ;;  %v4794_v35 = vpop.f32.mrf.mxu1  ;;  %v4440_v32 = vsel %vm17180_vm12, %v4125_v37, 0.0  ;;  %v13157_v11 = vld [vmem:[%s19428_s2 + $0x160] sm:$0xff]  ;;  %v19640_v52 = vld [vmem:[#allocation10_spill] sm:$0xff] }
 0x4da   : > { %v17166_v50 = vsel %vm4864_vm10, %v17102_v40, %v17158_v10  ;;  %6595 = vmatpush.bf16.msrb.mxu3 %v13157_v11  ;;  %v6839_v23 = vor.u32 %v6838_v51, %v6835_v25 }
 0x4db   : > { %v4029_v9 = vmul.f32 %v16973_v39, %v3980_v13  ;;  %3944 = vmatmul.bf16.gmra.mxu0 %v3748_v1  ;;  %v15196_v42 = vld [vmem:[#allocation2 + $0x6c] sm:$0xff]   ;;  %5144 = vmatmul.bf16.gmra.mxu2 %v17166_v50 }
 0x4dc   : > { %v13112_v41 = vld [vmem:[#allocation2 + $0x6c] sm:$0xff]  ;;  %4833 = vmatmul.bf16.gmra.mxu1 %v15196_v42  ;;  %v6848_v55 = vsel %vm4864_vm10, %v6839_v23, %v16905_v31 }
 0x4dd   : > { %v4078_v45 = vadd.f32 %v16992_v38, %v4029_v9  ;;  %v5399_v47 = vshrl.u32 %v13112_v41, 16  ;;  %v5402_v12 = vshll.u32 %v13112_v41, 16  ;;  %v19643_v31 = vld [vmem:[#allocation9_spill] sm:$0xff] }
 0x4de   : > { %v5105_v34 = vpop.f32.mrf.mxu2  ;;  %6596 = vmatpush.bf16.msrb.mxu3 %v13156_v57 }
 0x4df   : > { %v4126_v4 = vmax.f32 %v4078_v45, 0.0  ;;  %v5514_v53 = vpop.f32.mrf.mxu3  ;;  %v5401_v27 = vrot.slane %v5399_v47, 1  ;;  %v5404_v43 = vrot.slane %v5402_v12, 2  ;;  %v17193_v29 = vadd.f32 %v5105_v34, %v4794_v35  ;;  %v19641_v12 = vld [vmem:[#allocation4_spill] sm:$0xff] }
 0x4e0   : > { %v3907_v58 = vpop.f32.mrf.mxu0  ;;  %v17196_v20 = vadd.f32 %v5514_v53, %v17091_v26  ;;  %v2716_v26 = vadd.f32 %v19640_v52, %v19639_v36 }
 0x4e1   : > { %v4441_v54 = vsel %vm4246_vm13, %v4126_v4, 0.0  ;;  %v3981_v17 = vadd.f32 %v3907_v58, %v3494_v30  ;;  %v17200_v15 = vor.u32 %v5404_v43, %v5401_v27  ;;  %v4796_v49 = vpop.f32.mrf.mxu1  ;;  %v19642_v27 = vld [vmem:[#allocation14_spill] sm:$0xff]  ;;  %v14884_v58 = vld [vmem:[#allocation2 + $0x24] sm:$0xc] }
 0x4e2   : > { %v13657_v1 = vpack.c.bf16 %v4441_v54, %v4440_v32  ;;  %v3203_v22 = vadd.f32 %v19641_v12, %v2716_v26  ;;  %v15201_v54 = vld [vmem:[#allocation2 + $0x2c] sm:$0xff]  }
 0x4e3   : > { %v5406_v13 = vsel %vm5281_vm4, %v17135_v46, %v17200_v15  ;;  %v4030_v42 = vmul.f32 %v16973_v39, %v3981_v17  ;;  %v15199_v46 = vld [vmem:[#allocation2 + $0x24] sm:$0xf0]   ;;  %v13155_v17 = vld [vmem:[%s19428_s2 + $0x150] sm:$0xff] }
 0x4e4   : > { %14386 = vst [vmem:[#allocation2 + $0x78] sm:$0xff] %v13657_v1   ;;  %5556 = vmatmul.bf16.gmra.mxu3 %v5406_v13  ;;  %v6886_v35 = vshrl.u32 %v13657_v1, 16  ;;  %v6889_v9 = vshll.u32 %v13657_v1, 16  ;;  %v3496_v26 = vadd.f32 %v19643_v31, %v3203_v22  ;;  %v13154_v12 = vld [vmem:[%s19428_s2 + $0x148] sm:$0xff] }
 0x4e5   : > { %v4079_v53 = vadd.f32 %v16992_v38, %v4030_v42  ;;  %6597 = vmatpush.bf16.msrb.mxu3 %v13155_v17  ;;  %v5740_v17 = vshll.u32 %v15201_v54, 16 }
 0x4e6   : > { %v5107_v41 = vpop.f32.mrf.mxu2  ;;  %v6888_v37 = vrot.slane %v6886_v35, 2  ;;  %v6891_v40 = vrot.slane %v6889_v9, 3 }
 0x4e7   : > { %v5517_v45 = vpop.f32.mrf.mxu3  ;;  %v17214_v47 = vadd.f32 %v5107_v41, %v4796_v49  ;;  %v4127_v51 = vmax.f32 %v4079_v53, 0.0 }
 0x4e8   : > { %v3910_v30 = vpop.f32.mrf.mxu0  ;;  %v17218_v34 = vadd.f32 %v5517_v45, %v17128_v14  ;;  %v17220_v4 = vor.u32 %v6891_v40, %v6888_v37  ;;  %v17229_v14 = vor.u32 %v15199_v46, %v14884_v58  ;;  %v5737_v45 = vshrl.u32 %v15201_v54, 16  ;;  %v13153_v54 = vld [vmem:[%s19428_s2 + $0x140] sm:$0xff] }
 0x4e9   : > { %v3982_v43 = vadd.f32 %v3910_v30, %v19642_v27  ;;  %v4799_v32 = vpop.f32.mrf.mxu1  ;;  %6598 = vmatpush.bf16.msrb.mxu3 %v13154_v12 }
 0x4ea   : > { %v17237_v1 = vsel %vm4864_vm10, %v17158_v10, %v17220_v4  ;;  %v5729_v40 = vshrl.u32 %v17229_v14, 16 }
 0x4eb   : > { %v4031_v49 = vmul.f32 %v16973_v39, %v3982_v43  ;;  %7046 = vmatmul.bf16.vlgmr.msrb.gmra.mxu0 %v6848_v55  ;;  %v15197_v11 = vld [vmem:[#allocation2 + $0x74] sm:$0xff]  ;;  %v5185_v25 = vld [vmem:[#allocation2 + $0x7c] sm:$0x3] }
 0x4ec   : > { %v13113_v36 = vld [vmem:[#allocation2 + $0x74] sm:$0xff]  ;;  %4838 = vmatmul.bf16.gmra.mxu1 %v15197_v11  ;;  %v5264_v46 = vunpack.c.l.b16 %v5185_v25 }
 0x4ed   : > { %v4587_v52 = vld [vmem:[#allocation2 + $0x78] sm:$0x7]  ;;  %v4080_v35 = vadd.f32 %v16992_v38, %v4031_v49  ;;  %v5408_v9 = vshrl.u32 %v13113_v36, 16  ;;  %v5411_v42 = vshll.u32 %v13113_v36, 16  ;;  %v4442_v49 = vsel %vm17169_vm1, %v4127_v51, 0.0  ;;  %6599 = vmatpush.bf16.msrb.mxu3 %v13153_v54 }
 0x4ee   : > { %v4847_v13 = vunpack.c.l.b16 %v4587_v52  ;;  %v5110_v57 = vpop.f32.mrf.mxu2  ;;  %v5739_v51 = vrot.slane %v5737_v45, 2  ;;  %v15203_v54 = vld [vmem:[#allocation2 + $0x34] sm:$0xff]  }
 0x4ef   : > { %v4128_v22 = vmax.f32 %v4080_v35, 0.0  ;;  %v5519_v30 = vpop.f32.mrf.mxu3  ;;  %v5410_v23 = vrot.slane %v5408_v9, 1  ;;  %v5413_v53 = vrot.slane %v5411_v42, 2  ;;  %v17254_v27 = vadd.f32 %v5110_v57, %v4799_v32  ;;  %v19646_v57 = vld [vmem:[#allocation11_spill] sm:$0xff] }
 0x4f0   : > { %v4863_v37 = vpack.c.b16 %v4847_v13, %v4847_v13  ;;  %v3912_v43 = vpop.f32.mrf.mxu0  ;;  %v17257_v58 = vadd.f32 %v5519_v30, %v17153_v5  ;;  %v5732_v5 = vshll.u32 %v17229_v14, 16  ;;  %v5280_v35 = vpack.c.b16 %v5264_v46, %v5264_v46  ;;  %v13176_v14 = vld [vmem:[%s19428_s2 + $0x1f8] sm:$0xff] }
 0x4f1   : > { %v4443_v11 = vsel %vm17246_vm14, %v4128_v22, 0.0  ;;  %v3983_v36 = vadd.f32 %v3912_v43, %v3496_v26  ;;  %v17263_v52 = vor.u32 %v5413_v53, %v5410_v23  ;;  %v4801_v32 = vpop.f32.mrf.mxu1  ;;  %v4156_v26 = vadd.s32 11, %v16586_v44  ;;  %7250 = vmatpush.bf16.msra.mxu1 %v13176_v14 }
 0x4f2   : > { %v5000_v16 = vshrl.u32 %v4863_v37, 16  ;;  %v5003_v55 = vshll.u32 %v4863_v37, 16  ;;  %v13662_v31 = vpack.c.bf16 %v4443_v11, %v4442_v49  ;;  %v5742_v42 = vrot.slane %v5740_v17, 3 }
 0x4f3   : > { %v5415_v0 = vsel %vm5281_vm4, %v17200_v15, %v17263_v52  ;;  %v2718_v37 = vadd.f32 %v19646_v57, %v16466_v2  ;;  %v4032_v12 = vmul.f32 %v16973_v39, %v3983_v36  ;;  %v5731_v22 = vrot.slane %v5729_v40, 2  ;;  %v19647_v40 = vld [vmem:[#allocation20_spill] sm:$0xff] }
 0x4f4   : > { %v5002_v13 = vrot.slane %v5000_v16, 2  ;;  %v5005_v25 = vrot.slane %v5003_v55, 3  ;;  %14387 = vst [vmem:[#allocation2 + $0x80] sm:$0xff] %v13662_v31   ;;  %5561 = vmatmul.bf16.gmra.mxu3 %v5415_v0  ;;  %v6895_v41 = vshrl.u32 %v13662_v31, 16  ;;  %v6898_v15 = vshll.u32 %v13662_v31, 16 }
 0x4f5   : > { %v5734_v30 = vrot.slane %v5732_v5, 3  ;;  %v5417_v16 = vshrl.u32 %v5280_v35, 16  ;;  %v5420_v55 = vshll.u32 %v5280_v35, 16  ;;  %vm4176_vm15 = vcmp.ge.s32.totalorder %v4156_v26, 0 }
 0x4f6   : > { %v5006_v9 = vor.u32 %v5005_v25, %v5002_v13  ;;  %v5112_v46 = vpop.f32.mrf.mxu2  ;;  %v6897_v23 = vrot.slane %v6895_v41, 2  ;;  %v6900_v17 = vrot.slane %v6898_v15, 3  ;;  %vm4192_vm0 = vcmp.lt.s32.totalorder %v4156_v26, 16  ;;  %v19648_v13 = vld [vmem:[#allocation15_spill] sm:$0xff] }
 0x4f7   : > { %v5522_v53 = vpop.f32.mrf.mxu3  ;;  %v17281_v43 = vadd.f32 %v5112_v46, %v4801_v32  ;;  %v17286_v11 = vor.u32 %v5742_v42, %v5739_v51  ;;  %v3205_v32 = vadd.f32 %v19648_v13, %v2718_v37  ;;  %v5735_v5 = vor.u32 %v5734_v30, %v5731_v22  ;;  %vm17293_vm2 = vmand %vm4176_vm15, %vm4192_vm0  ;;  %v19651_v41 = vld [vmem:[#allocation7_spill] sm:$0xff] }
 0x4f8   : > { %v5007_v45 = vsel %vm4864_vm10, %v17158_v10, %v5006_v9  ;;  %v3915_v2 = vpop.f32.mrf.mxu0  ;;  %v17284_v49 = vadd.f32 %v5522_v53, %v17193_v29  ;;  %v4081_v10 = vadd.f32 %v16992_v38, %v4032_v12  ;;  %v17290_v31 = vor.u32 %v6900_v17, %v6897_v23  ;;  %vm4249_vm3 = vmand %vm17293_vm2, %vm4213_vm5 }
 0x4f9   : > { %5149 = vmatmul.bf16.gmra.mxu2 %v5007_v45  ;;  %v3984_v36 = vadd.f32 %v3915_v2, %v19647_v40  ;;  %v4804_v25 = vpop.f32.mrf.mxu1  ;;  %v5419_v51 = vrot.slane %v5417_v16, 1  ;;  %v5422_v35 = vrot.slane %v5420_v55, 2  ;;  %v5744_v9 = vsel %vm4864_vm10, %v5735_v5, %v17286_v11  ;;  %v12082_v2 = vld [vmem:[#allocation2 + $0x28] sm:$0xe]  ;;  %vm17358_vm11 = vmand %vm17293_vm2, %vm4266_vm7 }
 0x4fa   : > { %v17302_v26 = vsel %vm4864_vm10, %v17220_v4, %v17290_v31  ;;  %v4129_v42 = vmax.f32 %v4081_v10, 0.0  ;;  %v3498_v57 = vadd.f32 %v19651_v41, %v3205_v32  ;;  %v5746_v37 = vshrl.u32 %v15203_v54, 16  ;;  %v13138_v10 = vld [vmem:[#allocation2 + $0x28] sm:$0xf0]  ;;  %v13139_v32 = vld [vmem:[#allocation2 + $0x30] sm:$0xff] }
 0x4fb   : > { %v4033_v29 = vmul.f32 %v16973_v39, %v3984_v36  ;;  %7051 = vmatmul.bf16.gmra.mxu0 %v16968_v60  ;;  %v5423_v4 = vor.u32 %v5422_v35, %v5419_v51  ;;  %v5749_v46 = vshll.u32 %v15203_v54, 16  ;;  %v19652_v51 = vld [vmem:[#allocation16_spill] sm:$0xff] }
 0x4fc   : > { %5942 = vmatmul.bf16.vlgmr.msrb.gmra.mxu1 %v5744_v9  ;;  %v4444_v23 = vsel %vm4249_vm3, %v4129_v42, 0.0  ;;  %v5748_v36 = vrot.slane %v5746_v37, 2  ;;  %v2720_v35 = vadd.f32 %v19652_v51, %v16482_v19  ;;  %v14409_v9 = vld [vmem:[#allocation2 + $0x28] sm:$0xff]   ;;  %v6395_v37 = vshrl.u32 %v13139_v32, 16  ;;  %v19659_v51 = vld [vmem:[#allocation19_spill] sm:$0xff] }
 0x4fd   : > { %v4082_v14 = vadd.f32 %v16992_v38, %v4033_v29  ;;  %v5424_v40 = vsel %vm5281_vm4, %v17263_v52, %v5423_v4  ;;  %v5751_v13 = vrot.slane %v5749_v46, 3  ;;  %v12083_v29 = vor.u32 %v13138_v10, %v12082_v2 }
 0x4fe   : > { %v5115_v60 = vpop.f32.mrf.mxu2 }
 0x4ff   : > { %v4130_v12 = vmax.f32 %v4082_v14, 0.0  ;;  %v5524_v15 = vpop.f32.mrf.mxu3  ;;  %v17312_v45 = vadd.f32 %v5115_v60, %v4804_v25  ;;  %v17327_v60 = vor.u32 %v5751_v13, %v5748_v36  ;;  %v6397_v13 = vrot.slane %v6395_v37, 1  ;;  %v19666_v36 = vld [vmem:[#allocation26_spill] sm:$0xff] }
 0x500   : > { %v3917_v22 = vpop.f32.mrf.mxu0  ;;  %v17315_v30 = vadd.f32 %v5524_v15, %v17214_v47  ;;  %v4157_v47 = vadd.s32 12, %v16586_v44 }
 0x501   : > { %v4445_v53 = vsel %vm17293_vm2, %v4130_v12, 0.0  ;;  %v3985_v16 = vadd.f32 %v3917_v22, %v3498_v57  ;;  %v4806_v17 = vpop.f32.mrf.mxu1  ;;  %v6398_v12 = vshll.u32 %v13139_v32, 16  ;;  %v19653_v22 = vld [vmem:[#allocation13_spill] sm:$0xff] }
 0x502   : > { %v13667_v55 = vpack.c.bf16 %v4445_v53, %v4444_v23  ;;  %vm4177_vm6 = vcmp.ge.s32.totalorder %v4157_v47, 0  ;;  %vm4193_vm8 = vcmp.lt.s32.totalorder %v4157_v47, 16  ;;  %v6387_v53 = vshrl.u32 %v12083_v29, 16 }
 0x503   : > { %v4034_v54 = vmul.f32 %v16973_v39, %v3985_v16  ;;  %v6390_v16 = vshll.u32 %v12083_v29, 16  ;;  %vm17346_vm9 = vmand %vm4177_vm6, %vm4193_vm8  ;;  %v6400_v32 = vrot.slane %v6398_v12, 2  ;;  %v5753_v47 = vsel %vm4864_vm10, %v17286_v11, %v17327_v60 }
 0x504   : > { %14388 = vst [vmem:[#allocation2 + $0x88] sm:$0xff] %v13667_v55   ;;  %5566 = vmatmul.bf16.gmra.mxu3 %v5424_v40  ;;  %v6904_v25 = vshrl.u32 %v13667_v55, 16  ;;  %v6907_v5 = vshll.u32 %v13667_v55, 16  ;;  %v13198_v55 = vld [vmem:[%s19428_s2 + $0x230] sm:$0xff]  ;;  %vm4252_vm1 = vmand %vm17346_vm9, %vm4213_vm5 }
 0x505   : > { %v4083_v19 = vadd.f32 %v16992_v38, %v4034_v54  ;;  %7697 = vmatpush.bf16.msra.mxu2 %v13198_v55  ;;  %v6392_v29 = vrot.slane %v6390_v16, 2  ;;  %v17368_v0 = vor.u32 %v6400_v32, %v6397_v13  ;;  %v13140_v55 = vld [vmem:[#allocation2 + $0x38] sm:$0xff]  ;;  %vm4305_vm12 = vmand %vm17346_vm9, %vm4266_vm7 }
 0x506   : > { %v5117_v42 = vpop.f32.mrf.mxu2  ;;  %v6906_v14 = vrot.slane %v6904_v25, 2  ;;  %v6909_v41 = vrot.slane %v6907_v5, 3  ;;  %v15205_v25 = vld [vmem:[#allocation2 + $0x3c] sm:$0xff]   ;;  %v14410_v5 = vld [vmem:[#allocation2 + $0x30] sm:$0xff]  }
 0x507   : > { %v5527_v52 = vpop.f32.mrf.mxu3  ;;  %v17325_v57 = vadd.f32 %v5117_v42, %v4806_v17  ;;  %v5755_v37 = vshrl.u32 %v15205_v25, 16  ;;  %v5758_v12 = vshll.u32 %v15205_v25, 16  ;;  %v19660_v32 = vld [vmem:[#allocation18_spill] sm:$0xff] }
 0x508   : > { %v3920_v15 = vpop.f32.mrf.mxu0  ;;  %v17330_v4 = vadd.f32 %v5527_v52, %v17254_v27  ;;  %v17332_v46 = vor.u32 %v6909_v41, %v6906_v14  ;;  %v19654_v27 = vld [vmem:[#allocation12_spill] sm:$0xff] }
 0x509   : > { %6154 = vmatmul.bf16.vlgmr.msrb.gmra.mxu2 %v14409_v9  ;;  %v3986_v23 = vadd.f32 %v3920_v15, %v19653_v22  ;;  %v4809_v17 = vpop.f32.mrf.mxu1  ;;  %v3207_v10 = vadd.f32 %v19654_v27, %v2720_v35 }
 0x50a   : > { %v17342_v2 = vsel %vm4864_vm10, %v17290_v31, %v17332_v46  ;;  %v4131_v31 = vmax.f32 %v4083_v19, 0.0 }
 0x50b   : > { %v4035_v40 = vmul.f32 %v16973_v39, %v3986_v23  ;;  %7056 = vmatmul.bf16.gmra.mxu0 %v17049_v8  ;;  %v6389_v8 = vrot.slane %v6387_v53, 1  ;;  %v3500_v35 = vadd.f32 %v19659_v51, %v3207_v10  ;;  %v5760_v10 = vrot.slane %v5758_v12, 3 }
 0x50c   : > { %5947 = vmatmul.bf16.gmra.mxu1 %v5753_v47  ;;  %v4446_v15 = vsel %vm17358_vm11, %v4131_v31, 0.0  ;;  %v19661_v47 = vld [vmem:[#allocation21_spill] sm:$0xff] }
 0x50d   : > { %v4084_v54 = vadd.f32 %v16992_v38, %v4035_v40  ;;  %v6393_v23 = vor.u32 %v6392_v29, %v6389_v8  ;;  %v2722_v25 = vadd.f32 %v19661_v47, %v19660_v32  ;;  %v6404_v8 = vshrl.u32 %v13140_v55, 16  ;;  %v19664_v32 = vld [vmem:[#allocation17_spill] sm:$0xff] }
 0x50e   : > { %v5120_v11 = vpop.f32.mrf.mxu2  ;;  %v6407_v29 = vshll.u32 %v13140_v55, 16 }
 0x50f   : > { %v4132_v9 = vmax.f32 %v4084_v54, 0.0  ;;  %v5529_v42 = vpop.f32.mrf.mxu3  ;;  %v17370_v14 = vadd.f32 %v5120_v11, %v4809_v17  ;;  %v6402_v27 = vsel %vm5281_vm4, %v6393_v23, %v17368_v0  ;;  %v5757_v17 = vrot.slane %v5755_v37, 2  ;;  %v19663_v23 = vld [vmem:[#allocation25_spill] sm:$0xff] }
 0x510   : > { %v3922_v41 = vpop.f32.mrf.mxu0  ;;  %v17373_v52 = vadd.f32 %v5529_v42, %v17281_v43  ;;  %v13175_v43 = vld [vmem:[%s19428_s2 + $0x1f0] sm:$0xff] }
 0x511   : > { %v4447_v19 = vsel %vm4252_vm1, %v4132_v9, 0.0  ;;  %v3987_v22 = vadd.f32 %v3922_v41, %v3500_v35  ;;  %v4811_v16 = vpop.f32.mrf.mxu1  ;;  %7251 = vmatpush.bf16.msra.mxu1 %v13175_v43  ;;  %v17390_v37 = vor.u32 %v5760_v10, %v5757_v17  ;;  %v6409_v43 = vrot.slane %v6407_v29, 2  ;;  %v15207_v17 = vld [vmem:[#allocation2 + $0x44] sm:$0xff]  }
 0x512   : > { %v13672_v53 = vpack.c.bf16 %v4447_v19, %v4446_v15  ;;  %v19662_v19 = vld [vmem:[#allocation24_spill] sm:$0xff] }
 0x513   : > { %v4036_v31 = vmul.f32 %v16973_v39, %v3987_v22  ;;  %v5762_v10 = vsel %vm4864_vm10, %v17327_v60, %v17390_v37  ;;  %v5767_v60 = vshll.u32 %v15207_v17, 16 }
 0x514   : > { %14389 = vst [vmem:[#allocation2 + $0x90] sm:$0xff] %v13672_v53   ;;  %6600 = vmatmul.bf16.vlgmr.msrb.gmra.mxu3 %v6402_v27  ;;  %v6913_v40 = vshrl.u32 %v13672_v53, 16  ;;  %v6916_v13 = vshll.u32 %v13672_v53, 16  ;;  %v3209_v53 = vadd.f32 %v19663_v23, %v2722_v25  ;;  %v6406_v27 = vrot.slane %v6404_v8, 1 }
 0x515   : > { %v4085_v15 = vadd.f32 %v16992_v38, %v4036_v31 }
 0x516   : > { %v5122_v54 = vpop.f32.mrf.mxu2  ;;  %v6915_v11 = vrot.slane %v6913_v40, 2  ;;  %v6918_v51 = vrot.slane %v6916_v13, 3  ;;  %v3502_v47 = vadd.f32 %v19664_v32, %v3209_v53  ;;  %v5769_v53 = vrot.slane %v5767_v60, 3 }
 0x517   : > { %v5532_v35 = vpop.f32.mrf.mxu3  ;;  %v17385_v9 = vadd.f32 %v5122_v54, %v4811_v16  ;;  %v4133_v40 = vmax.f32 %v4085_v15, 0.0  ;;  %v5764_v54 = vshrl.u32 %v15207_v17, 16 }
 0x518   : > { %v3925_v42 = vpop.f32.mrf.mxu0  ;;  %v17388_v41 = vadd.f32 %v5532_v35, %v17312_v45  ;;  %v17392_v12 = vor.u32 %v6918_v51, %v6915_v11 }
 0x519   : > { %6159 = vmatmul.bf16.gmra.mxu2 %v14410_v5  ;;  %v3988_v22 = vadd.f32 %v3925_v42, %v19662_v19  ;;  %v4814_v55 = vpop.f32.mrf.mxu1  ;;  %v4448_v11 = vsel %vm17346_vm9, %v4133_v40, 0.0  ;;  %v13141_v19 = vld [vmem:[#allocation2 + $0x40] sm:$0xff]  ;;  %v5766_v23 = vrot.slane %v5764_v54, 2 }
 0x51a   : > { %v17400_v16 = vsel %vm4864_vm10, %v17332_v46, %v17392_v12  ;;  %v17413_v46 = vor.u32 %v6409_v43, %v6406_v27  ;;  %v19665_v43 = vld [vmem:[#allocation23_spill] sm:$0xff]  ;;  %v6416_v32 = vshll.u32 %v13141_v19, 16 }
 0x51b   : > { %v4037_v45 = vmul.f32 %v16973_v39, %v3988_v22  ;;  %7061 = vmatmul.bf16.gmra.mxu0 %v17113_v28 }
 0x51c   : > { %5952 = vmatmul.bf16.gmra.mxu1 %v5762_v10  ;;  %v6411_v22 = vsel %vm5281_vm4, %v17368_v0, %v17413_v46  ;;  %v14411_v10 = vld [vmem:[#allocation2 + $0x38] sm:$0xff]  }
 0x51d   : > { %v4086_v13 = vadd.f32 %v16992_v38, %v4037_v45  ;;  %v2724_v45 = vadd.f32 %v19666_v36, %v19665_v43  ;;  %v17469_v36 = vld [vmem:[%s19430_s4 + $0x1] ss:$0 sm:$0xff] }
 0x51e   : > { %v5125_v25 = vpop.f32.mrf.mxu2 }
 0x51f   : > { %v4134_v28 = vmax.f32 %v4086_v13, 0.0  ;;  %v5534_v31 = vpop.f32.mrf.mxu3  ;;  %v17415_v5 = vadd.f32 %v5125_v25, %v4814_v55  ;;  %v4158_v55 = vadd.s32 13, %v16586_v44  ;;  %v6413_v13 = vshrl.u32 %v13141_v19, 16 }
 0x520   : > { %v3927_v8 = vpop.f32.mrf.mxu0  ;;  %v17418_v29 = vadd.f32 %v5534_v31, %v17325_v57  ;;  %v17431_v31 = vor.u32 %v5769_v53, %v5766_v23 }
 0x521   : > { %v4449_v51 = vsel %vm4305_vm12, %v4134_v28, 0.0  ;;  %v3989_v35 = vadd.f32 %v3927_v8, %v3502_v47  ;;  %v4816_v15 = vpop.f32.mrf.mxu1  ;;  %vm4178_vm13 = vcmp.ge.s32.totalorder %v4158_v55, 0  ;;  %vm4194_vm14 = vcmp.lt.s32.totalorder %v4158_v55, 16  ;;  %v17459_v55 = vld [vmem:[%s19430_s4] ss:$0 sm:$0xff] }
 0x522   : > { %v13677_v42 = vpack.c.bf16 %v4449_v51, %v4448_v11  ;;  %v19667_v11 = vld [vmem:[#allocation27_spill] sm:$0xff]  ;;  %v6415_v23 = vrot.slane %v6413_v13, 1  ;;  %vm17452_vm15 = vmand %vm4178_vm13, %vm4194_vm14 }
 0x523   : > { %v4038_v17 = vmul.f32 %v16973_v39, %v3989_v35  ;;  %v13197_v35 = vld [vmem:[%s19428_s2 + $0x228] sm:$0xff]  ;;  %vm4255_vm0 = vmand %vm17452_vm15, %vm4213_vm5 }
 0x524   : > { %14390 = vst [vmem:[#allocation2 + $0x98] sm:$0xff] %v13677_v42   ;;  %6605 = vmatmul.bf16.gmra.mxu3 %v6411_v22  ;;  %v6922_v57 = vshrl.u32 %v13677_v42, 16  ;;  %v6925_v27 = vshll.u32 %v13677_v42, 16  ;;  %v13174_v42 = vld [vmem:[%s19428_s2 + $0x1e8] sm:$0xff]  ;;  %7698 = vmatpush.bf16.msra.mxu2 %v13197_v35  ;;  %vm4308_vm8 = vmand %vm17452_vm15, %vm4266_vm7 }
 0x525   : > { %v4087_v39 = vadd.f32 %v16992_v38, %v4038_v17  ;;  %7252 = vmatpush.bf16.msra.mxu1 %v13174_v42  ;;  %v19671_v17 = vld [vmem:[#allocation22_spill] sm:$0xff] }
 0x526   : > { %v5127_v40 = vpop.f32.mrf.mxu2  ;;  %v6924_v47 = vrot.slane %v6922_v57, 2  ;;  %v6927_v25 = vrot.slane %v6925_v27, 3  ;;  %v15209_v27 = vld [vmem:[#allocation2 + $0x4c] sm:$0xff]  }
 0x527   : > { %v5537_v0 = vpop.f32.mrf.mxu3  ;;  %v17429_v28 = vadd.f32 %v5127_v40, %v4816_v15  ;;  %v19668_v15 = vld [vmem:[#allocation28_spill] sm:$0xff]  ;;  %v4135_v43 = vmax.f32 %v4087_v39, 0.0 }
 0x528   : > { %v3930_v54 = vpop.f32.mrf.mxu0  ;;  %v17434_v60 = vadd.f32 %v5537_v0, %v17370_v14  ;;  %v17436_v8 = vor.u32 %v6927_v25, %v6924_v47  ;;  %v3211_v19 = vadd.f32 %v19668_v15, %v2724_v45  ;;  %v6418_v14 = vrot.slane %v6416_v32, 2 }
 0x529   : > { %6164 = vmatmul.bf16.gmra.mxu2 %v14411_v10  ;;  %v3990_v51 = vadd.f32 %v3930_v54, %v19667_v11  ;;  %v4819_v22 = vpop.f32.mrf.mxu1  ;;  %v5773_v47 = vshrl.u32 %v15209_v27, 16  ;;  %v5776_v25 = vshll.u32 %v15209_v27, 16  ;;  %v4450_v39 = vsel %vm4255_vm0, %v4135_v43, 0.0  ;;  %v19673_v43 = vld [vmem:[#allocation31_spill] sm:$0xff] }
 0x52a   : > { %v17450_v53 = vsel %vm4864_vm10, %v17392_v12, %v17436_v8  ;;  %v5771_v12 = vsel %vm4864_vm10, %v17390_v37, %v17431_v31  ;;  %v3504_v10 = vadd.f32 %v19671_v17, %v3211_v19  ;;  %v14412_v17 = vld [vmem:[#allocation2 + $0x40] sm:$0xff]  }
 0x52b   : > { %v4039_v57 = vmul.f32 %v17459_v55, %v3990_v51  ;;  %7066 = vmatmul.bf16.gmra.mxu0 %v17166_v50  ;;  %v17477_v50 = vor.u32 %v6418_v14, %v6415_v23  ;;  %v5775_v19 = vrot.slane %v5773_v47, 2  ;;  %v13142_v23 = vld [vmem:[#allocation2 + $0x48] sm:$0xff]  ;;  %v4159_v14 = vadd.s32 14, %v16586_v44 }
 0x52c   : > { %5957 = vmatmul.bf16.gmra.mxu1 %v5771_v12  ;;  %v19672_v12 = vld [vmem:[#allocation30_spill] sm:$0xff] }
 0x52d   : > { %v4088_v45 = vadd.f32 %v17469_v36, %v4039_v57  ;;  %v6420_v15 = vsel %vm5281_vm4, %v17413_v46, %v17477_v50  ;;  %vm4179_vm2 = vcmp.ge.s32.totalorder %v4159_v14, 0  ;;  %vm4195_vm3 = vcmp.lt.s32.totalorder %v4159_v14, 16 }
 0x52e   : > { %v5130_v37 = vpop.f32.mrf.mxu2  ;;  %vm17511_vm6 = vmand %vm4179_vm2, %vm4195_vm3 }
 0x52f   : > { %v4136_v40 = vmax.f32 %v4088_v45, 0.0  ;;  %v5539_v13 = vpop.f32.mrf.mxu3  ;;  %v17479_v32 = vadd.f32 %v5130_v37, %v4819_v22  ;;  %v5778_v22 = vrot.slane %v5776_v25, 3  ;;  %v2726_v45 = vadd.f32 %v19673_v43, %v19672_v12  ;;  %v15211_v43 = vld [vmem:[#allocation2 + $0x54] sm:$0xff]   ;;  %vm4258_vm9 = vmand %vm17511_vm6, %vm4213_vm5 }
 0x530   : > { %v3932_v0 = vpop.f32.mrf.mxu0  ;;  %v17482_v54 = vadd.f32 %v5539_v13, %v17385_v9  ;;  %v6422_v25 = vshrl.u32 %v13142_v23, 16  ;;  %vm4311_vm11 = vmand %vm17511_vm6, %vm4266_vm7 }
 0x531   : > { %v4451_v11 = vsel %vm17452_vm15, %v4136_v40, 0.0  ;;  %v3991_v51 = vadd.f32 %v3932_v0, %v3504_v10  ;;  %v4821_v42 = vpop.f32.mrf.mxu1  ;;  %v17495_v47 = vor.u32 %v5778_v22, %v5775_v19  ;;  %v6425_v0 = vshll.u32 %v13142_v23, 16  ;;  %v19675_v19 = vld [vmem:[#allocation33_spill] sm:$0xff] }
 0x532   : > { %v13682_v35 = vpack.c.bf16 %v4451_v11, %v4450_v39  ;;  %v3213_v22 = vadd.f32 %v19675_v19, %v2726_v45  ;;  %v19678_v45 = vld [vmem:[#allocation29_spill] sm:$0xff] }
 0x533   : > { %v4040_v27 = vmul.f32 %v17459_v55, %v3991_v51  ;;  %v5780_v12 = vsel %vm4864_vm10, %v17431_v31, %v17495_v47 }
 0x534   : > { %14391 = vst [vmem:[#allocation2 + $0xa0] sm:$0xff] %v13682_v35   ;;  %6610 = vmatmul.bf16.gmra.mxu3 %v6420_v15  ;;  %v6931_v9 = vshrl.u32 %v13682_v35, 16  ;;  %v6934_v57 = vshll.u32 %v13682_v35, 16  ;;  %v19674_v15 = vld [vmem:[#allocation32_spill] sm:$0xff] }
 0x535   : > { %v4089_v35 = vadd.f32 %v17469_v36, %v4040_v27  ;;  %v6427_v27 = vrot.slane %v6425_v0, 2  ;;  %v5782_v0 = vshrl.u32 %v15211_v43, 16 }
 0x536   : > { %v5132_v10 = vpop.f32.mrf.mxu2  ;;  %v6933_v37 = vrot.slane %v6931_v9, 2  ;;  %v6936_v40 = vrot.slane %v6934_v57, 3 }
 0x537   : > { %v5542_v46 = vpop.f32.mrf.mxu3  ;;  %v17493_v13 = vadd.f32 %v5132_v10, %v4821_v42  ;;  %v3506_v10 = vadd.f32 %v19678_v45, %v3213_v22 }
 0x538   : > { %v3935_v39 = vpop.f32.mrf.mxu0  ;;  %v17498_v11 = vadd.f32 %v5542_v46, %v17415_v5  ;;  %v17500_v51 = vor.u32 %v6936_v40, %v6933_v37  ;;  %v6424_v5 = vrot.slane %v6422_v25, 1 }
 0x539   : > { %6169 = vmatmul.bf16.gmra.mxu2 %v14412_v17  ;;  %v3992_v9 = vadd.f32 %v3935_v39, %v19674_v15  ;;  %v4824_v57 = vpop.f32.mrf.mxu1  ;;  %v4137_v17 = vmax.f32 %v4089_v35, 0.0  ;;  %v5785_v39 = vshll.u32 %v15211_v43, 16 }
 0x53a   : > { %v17507_v42 = vsel %vm4864_vm10, %v17436_v8, %v17500_v51  ;;  %v17529_v40 = vor.u32 %v6427_v27, %v6424_v5 }
 0x53b   : > { %v4041_v23 = vmul.f32 %v17459_v55, %v3992_v9  ;;  %7071 = vmatmul.bf16.gmra.mxu0 %v17237_v1  ;;  %v4452_v35 = vsel %vm4308_vm8, %v4137_v17, 0.0  ;;  %v5787_v5 = vrot.slane %v5785_v39, 3  ;;  %v14413_v17 = vld [vmem:[#allocation2 + $0x48] sm:$0xff]   ;;  %vm8417_vm8 = vsmask.f32 4352 }
 0x53c   : > { %5962 = vmatmul.bf16.gmra.mxu1 %v5780_v12  ;;  %v13143_v12 = vld [vmem:[#allocation2 + $0x50] sm:$0xff]  ;;  %v6429_v22 = vsel %vm5281_vm4, %v17477_v50, %v17529_v40 }
 0x53d   : > { %v4090_v8 = vadd.f32 %v17469_v36, %v4041_v23 }
 0x53e   : > { %v5135_v1 = vpop.f32.mrf.mxu2 }
 0x53f   : > { %v4138_v37 = vmax.f32 %v4090_v8, 0.0  ;;  %v5544_v31 = vpop.f32.mrf.mxu3  ;;  %v17531_v46 = vadd.f32 %v5135_v1, %v4824_v57  ;;  %v5784_v57 = vrot.slane %v5782_v0, 2  ;;  %v19681_v1 = vld [vmem:[#allocation35_spill] sm:$0xff] }
 0x540   : > { %v3937_v25 = vpop.f32.mrf.mxu0  ;;  %v17534_v38 = vadd.f32 %v5544_v31, %v17429_v28  ;;  %v19680_v28 = vld [vmem:[#allocation37_spill] sm:$0xff]  ;;  %v6434_v31 = vshll.u32 %v13143_v12, 16 }
 0x541   : > { %v4453_v15 = vsel %vm4258_vm9, %v4138_v37, 0.0  ;;  %v3993_v9 = vadd.f32 %v3937_v25, %v3506_v10  ;;  %v4826_v23 = vpop.f32.mrf.mxu1  ;;  %v2728_v45 = vadd.f32 %v19681_v1, %v19680_v28  ;;  %v6431_v37 = vshrl.u32 %v13143_v12, 16  ;;  %v19682_v28 = vld [vmem:[#allocation38_spill] sm:$0xff] }
 0x542   : > { %19679 = vst [vmem:[#allocation40_spill] sm:$0xff] %v17534_v38  ;;  %v13687_v19 = vpack.c.bf16 %v4453_v15, %v4452_v35  ;;  %v17547_v39 = vor.u32 %v5787_v5, %v5784_v57  ;;  %v19683_v38 = vld [vmem:[#allocation34_spill] sm:$0xff] }
 0x543   : > { %v4042_v43 = vmul.f32 %v17459_v55, %v3993_v9  ;;  %v3215_v12 = vadd.f32 %v19683_v38, %v2728_v45  ;;  %v15213_v57 = vld [vmem:[#allocation2 + $0x5c] sm:$0xff]  }
 0x544   : > { %14392 = vst [vmem:[#allocation2 + $0xa8] sm:$0xff] %v13687_v19   ;;  %6615 = vmatmul.bf16.gmra.mxu3 %v6429_v22  ;;  %v6940_v27 = vshrl.u32 %v13687_v19, 16  ;;  %v6943_v8 = vshll.u32 %v13687_v19, 16  ;;  %v5789_v5 = vsel %vm4864_vm10, %v17495_v47, %v17547_v39  ;;  %v13196_v38 = vld [vmem:[%s19428_s2 + $0x220] sm:$0xff] }
 0x545   : > { %v4091_v9 = vadd.f32 %v17469_v36, %v4042_v43  ;;  %v13173_v45 = vld [vmem:[%s19428_s2 + $0x1e0] sm:$0xff]  ;;  %7699 = vmatpush.bf16.msra.mxu2 %v13196_v38 }
 0x546   : > { %v5137_v10 = vpop.f32.mrf.mxu2  ;;  %v6942_v25 = vrot.slane %v6940_v27, 2  ;;  %v6945_v35 = vrot.slane %v6943_v8, 3  ;;  %v6433_v8 = vrot.slane %v6431_v37, 1  ;;  %7253 = vmatpush.bf16.msra.mxu1 %v13173_v45  ;;  %v13144_v45 = vld [vmem:[#allocation2 + $0x58] sm:$0xff] }
 0x547   : > { %v5547_v15 = vpop.f32.mrf.mxu3  ;;  %v17542_v50 = vadd.f32 %v5137_v10, %v4826_v23  ;;  %v4139_v43 = vmax.f32 %v4091_v9, 0.0  ;;  %v19684_v10 = vld [vmem:[#allocation36_spill] sm:$0xff] }
 0x548   : > { %v3940_v22 = vpop.f32.mrf.mxu0  ;;  %v17545_v0 = vadd.f32 %v5547_v15, %v17479_v32  ;;  %v17549_v19 = vor.u32 %v6945_v35, %v6942_v25  ;;  %v3508_v37 = vadd.f32 %v19684_v10, %v3215_v12  ;;  %v5791_v15 = vshrl.u32 %v15213_v57, 16 }
 0x549   : > { %6174 = vmatmul.bf16.gmra.mxu2 %v14413_v17  ;;  %v3994_v1 = vadd.f32 %v3940_v22, %v19682_v28  ;;  %v4829_v27 = vpop.f32.mrf.mxu1  ;;  %v6436_v17 = vrot.slane %v6434_v31, 2  ;;  %v5794_v22 = vshll.u32 %v15213_v57, 16  ;;  %v4160_v57 = vadd.s32 15, %v16586_v44 }
 0x54a   : > { %v17557_v23 = vsel %vm4864_vm10, %v17500_v51, %v17549_v19  ;;  %v5793_v38 = vrot.slane %v5791_v15, 2  ;;  %v6443_v44 = vshll.u32 %v13144_v45, 16 }
 0x54b   : > { %v4043_v32 = vmul.f32 %v17459_v55, %v3994_v1  ;;  %7076 = vmatmul.bf16.gmra.mxu0 %v17302_v26  ;;  %v17576_v26 = vor.u32 %v6436_v17, %v6433_v8  ;;  %v4454_v1 = vsel %vm17511_vm6, %v4139_v43, 0.0  ;;  %v19685_v43 = vld [vmem:[#allocation43_spill] sm:$0xff]  ;;  %vm4180_vm1 = vcmp.ge.s32.totalorder %v4160_v57, 0 }
 0x54c   : > { %5967 = vmatmul.bf16.gmra.mxu1 %v5789_v5  ;;  %v2730_v10 = vadd.f32 %v16858_v56, %v19685_v43  ;;  %vm4196_vm12 = vcmp.lt.s32.totalorder %v4160_v57, 16  ;;  %v6445_v57 = vrot.slane %v6443_v44, 2 }
 0x54d   : > { %v4092_v51 = vadd.f32 %v17469_v36, %v4043_v32  ;;  %v6438_v5 = vsel %vm5281_vm4, %v17529_v40, %v17576_v26  ;;  %vm17609_vm13 = vmand %vm4180_vm1, %vm4196_vm12 }
 0x54e   : > { %v5140_v47 = vpop.f32.mrf.mxu2  ;;  %vm4261_vm14 = vmand %vm17609_vm13, %vm4213_vm5 }
 0x54f   : > { %v4140_v31 = vmax.f32 %v4092_v51, 0.0  ;;  %v5549_v25 = vpop.f32.mrf.mxu3  ;;  %v17578_v35 = vadd.f32 %v5140_v47, %v4829_v27  ;;  %v5796_v27 = vrot.slane %v5794_v22, 3  ;;  %vm4314_vm15 = vmand %vm17609_vm13, %vm4266_vm7 }
 0x550   : > { %v3942_v9 = vpop.f32.mrf.mxu0  ;;  %v17581_v28 = vadd.f32 %v5549_v25, %v17493_v13 }
 0x551   : > { %v4455_v12 = vsel %vm4311_vm11, %v4140_v31, 0.0  ;;  %v3995_v32 = vadd.f32 %v3942_v9, %v3508_v37  ;;  %v4831_v17 = vpop.f32.mrf.mxu1  ;;  %v14414_v37 = vld [vmem:[#allocation2 + $0x50] sm:$0xff]   ;;  %v17594_v22 = vor.u32 %v5796_v27, %v5793_v38  ;;  %v6440_v9 = vshrl.u32 %v13144_v45, 16 }
 0x552   : > { %v13692_v8 = vpack.c.bf16 %v4455_v12, %v4454_v1  ;;  %v3217_v38 = vadd.f32 %v16867_v63, %v2730_v10 }
 0x553   : > { %v4044_v14 = vmul.f32 %v17459_v55, %v3995_v32  ;;  %v6442_v45 = vrot.slane %v6440_v9, 1 }
 0x554   : > { %14393 = vst [vmem:[#allocation2 + $0xb0] sm:$0xff] %v13692_v8   ;;  %6620 = vmatmul.bf16.gmra.mxu3 %v6438_v5  ;;  %v6949_v13 = vshrl.u32 %v13692_v8, 16  ;;  %v6952_v51 = vshll.u32 %v13692_v8, 16  ;;  %v19686_v8 = vld [vmem:[#allocation39_spill] sm:$0xff]  ;;  %v3510_v10 = vadd.f32 %v16928_v61, %v3217_v38 }
 0x555   : > { %v4093_v56 = vadd.f32 %v17469_v36, %v4044_v14  ;;  %v15215_v14 = vld [vmem:[#allocation2 + $0x64] sm:$0xff]  }
 0x556   : > { %v5142_v47 = vpop.f32.mrf.mxu2  ;;  %v6951_v31 = vrot.slane %v6949_v13, 2  ;;  %v6954_v25 = vrot.slane %v6952_v51, 3  ;;  %v13195_v51 = vld [vmem:[%s19428_s2 + $0x218] sm:$0xff]  ;;  %v5800_v9 = vshrl.u32 %v15215_v14, 16  ;;  %v5803_v44 = vshll.u32 %v15215_v14, 16 }
 0x557   : > { %v5552_v40 = vpop.f32.mrf.mxu3  ;;  %v17592_v15 = vadd.f32 %v5142_v47, %v4831_v17  ;;  %v4141_v63 = vmax.f32 %v4093_v56, 0.0  ;;  %7700 = vmatpush.bf16.msra.mxu2 %v13195_v51 }
 0x558   : > { %v3945_v1 = vpop.f32.mrf.mxu0  ;;  %v17597_v12 = vadd.f32 %v5552_v40, %v17531_v46  ;;  %v17599_v32 = vor.u32 %v6954_v25, %v6951_v31  ;;  %v6446_v31 = vor.u32 %v6445_v57, %v6442_v45  ;;  %v5802_v45 = vrot.slane %v5800_v9, 2 }
 0x559   : > { %6179 = vmatmul.bf16.gmra.mxu2 %v14414_v37  ;;  %v3996_v5 = vadd.f32 %v3945_v1, %v19686_v8  ;;  %v4834_v13 = vpop.f32.mrf.mxu1  ;;  %v4456_v1 = vsel %vm4261_vm14, %v4141_v63, 0.0  ;;  %v5805_v57 = vrot.slane %v5803_v44, 3 }
 0x55a   : > { %v17606_v17 = vsel %vm4864_vm10, %v17549_v19, %v17599_v32  ;;  %v5798_v19 = vsel %vm4864_vm10, %v17547_v39, %v17594_v22  ;;  %v6447_v38 = vsel %vm5281_vm4, %v17576_v26, %v6446_v31 }
 0x55b   : > { %v4045_v46 = vmul.f32 %v17459_v55, %v3996_v5  ;;  %7081 = vmatmul.bf16.gmra.mxu0 %v17342_v2 }
 0x55c   : > { %5972 = vmatmul.bf16.gmra.mxu1 %v5798_v19 }
 0x55d   : > { %v4094_v43 = vadd.f32 %v17469_v36, %v4045_v46 }
 0x55e   : > { %v5145_v2 = vpop.f32.mrf.mxu2 }
 0x55f   : > { %v4142_v37 = vmax.f32 %v4094_v43, 0.0  ;;  %v5554_v47 = vpop.f32.mrf.mxu3  ;;  %v17627_v25 = vadd.f32 %v5145_v2, %v4834_v13  ;;  %v13145_v13 = vld [vmem:[#allocation2 + $0x60] sm:$0xff] }
 0x560   : > { %v3947_v39 = vpop.f32.mrf.mxu0  ;;  %v17630_v40 = vadd.f32 %v5554_v47, %v17542_v50  ;;  %v13172_v50 = vld [vmem:[%s19428_s2 + $0x1d8] sm:$0xff]  ;;  %v6449_v47 = vshrl.u32 %v13145_v13, 16 }
 0x561   : > { %v4457_v56 = vsel %vm17609_vm13, %v4142_v37, 0.0  ;;  %v3997_v8 = vadd.f32 %v3947_v39, %v3510_v10  ;;  %v4836_v46 = vpop.f32.mrf.mxu1  ;;  %7254 = vmatpush.bf16.msra.mxu1 %v13172_v50  ;;  %v6452_v39 = vshll.u32 %v13145_v13, 16 }
 0x562   : > { %v13697_v5 = vpack.c.bf16 %v4457_v56, %v4456_v1 }
 0x563   : > { %v4046_v61 = vmul.f32 %v17459_v55, %v3997_v8  ;;  %v14415_v55 = vld [vmem:[#allocation2 + $0x58] sm:$0xff]  }
 0x564   : > { %14394 = vst [vmem:[#allocation2 + $0xb8] sm:$0xff] %v13697_v5   ;;  %6625 = vmatmul.bf16.gmra.mxu3 %v6447_v38  ;;  %v6958_v51 = vshrl.u32 %v13697_v5, 16  ;;  %v6961_v19 = vshll.u32 %v13697_v5, 16  ;;  %v6451_v5 = vrot.slane %v6449_v47, 1 }
 0x565   : > { %v4095_v14 = vadd.f32 %v17469_v36, %v4046_v61  ;;  %v5806_v36 = vor.u32 %v5805_v57, %v5802_v45  ;;  %v15217_v61 = vld [vmem:[#allocation2 + $0x6c] sm:$0xff]  }
 0x566   : > { %v5147_v26 = vpop.f32.mrf.mxu2  ;;  %v6960_v63 = vrot.slane %v6958_v51, 2  ;;  %v6963_v43 = vrot.slane %v6961_v19, 3  ;;  %v5809_v45 = vshrl.u32 %v15217_v61, 16  ;;  %v5812_v57 = vshll.u32 %v15217_v61, 16  ;;  %v13146_v19 = vld [vmem:[#allocation2 + $0x68] sm:$0xff] }
 0x567   : > { %v4143_v2 = vmax.f32 %v4095_v14, 0.0  ;;  %v5557_v10 = vpop.f32.mrf.mxu3  ;;  %v5148_v37 = vadd.f32 %v5147_v26, %v4836_v46  ;;  %v6454_v46 = vrot.slane %v6452_v39, 2 }
 0x568   : > { %v17646_v9 = vadd.f32 %v5557_v10, %v17578_v35  ;;  %v17648_v44 = vor.u32 %v6963_v43, %v6960_v63  ;;  %v5807_v35 = vsel %vm4864_vm10, %v17594_v22, %v5806_v36  ;;  %v5814_v14 = vrot.slane %v5812_v57, 3 }
 0x569   : > { %6184 = vmatmul.bf16.gmra.mxu2 %v14415_v55  ;;  %v4458_v1 = vsel %vm4314_vm15, %v4143_v2, 0.0  ;;  %v4839_v27 = vpop.f32.mrf.mxu1  ;;  %v6455_v13 = vor.u32 %v6454_v46, %v6451_v5  ;;  %v14416_v55 = vld [vmem:[#allocation2 + $0x60] sm:$0xff]   ;;  %v6458_v22 = vshrl.u32 %v13146_v19, 16  ;;  %v6461_v63 = vshll.u32 %v13146_v19, 16  ;;  %v15219_v46 = vld [vmem:[#allocation2 + $0x74] sm:$0xff]  }
 0x56a   : > { %v4506_v56 = vpack.c.bf16 %v4458_v1, %v4458_v1  ;;  %v17653_v8 = vsel %vm4864_vm10, %v17599_v32, %v17648_v44  ;;  %v13147_v19 = vld [vmem:[#allocation2 + $0x70] sm:$0xff] }
 0x56b   : > { %7086 = vmatmul.bf16.gmra.mxu0 %v17400_v16  ;;  %v6456_v32 = vsel %vm5281_vm4, %v6446_v31, %v6455_v13  ;;  %v5811_v16 = vrot.slane %v5809_v45, 2  ;;  %v6460_v39 = vrot.slane %v6458_v22, 1  ;;  %v6463_v1 = vrot.slane %v6461_v63, 2 }
 0x56c   : > { %4554 = vst [vmem:[#allocation2 + $0xc0] sm:$0xf] %v4506_v56  ;;  %5977 = vmatmul.bf16.gmra.mxu1 %v5807_v35  ;;  %v13194_v56 = vld [vmem:[%s19428_s2 + $0x210] sm:$0xff]  ;;  %v6470_v22 = vshll.u32 %v13147_v19, 16 }
 0x56d   : > { %v5815_v2 = vor.u32 %v5814_v14, %v5811_v16  ;;  %7701 = vmatpush.bf16.msra.mxu2 %v13194_v56  ;;  %v6464_v35 = vor.u32 %v6463_v1, %v6460_v39 }
 0x56f   : > { %v5559_v38 = vpop.f32.mrf.mxu3  ;;  %v5816_v5 = vsel %vm4864_vm10, %v5806_v36, %v5815_v2  ;;  %v6465_v36 = vsel %vm5281_vm4, %v6455_v13, %v6464_v35 }
 0x570   : > { %v17659_v50 = vadd.f32 %v5559_v38, %v17592_v15  ;;  %v5821_v38 = vshll.u32 %v15219_v46, 16 }
 0x571   : > { %v4841_v51 = vpop.f32.mrf.mxu1 }
 0x572   : > { %v5823_v14 = vrot.slane %v5821_v38, 3 }
 0x574   : > { %6630 = vmatmul.bf16.gmra.mxu3 %v6456_v32 }
 0x577   : > { %v5562_v26 = vpop.f32.mrf.mxu3 }
 0x578   : > { %v17663_v43 = vadd.f32 %v5562_v26, %v17627_v25  ;;  %v6467_v26 = vshrl.u32 %v13147_v19, 16 }
 0x579   : > { %6189 = vmatmul.bf16.gmra.mxu2 %v14416_v55  ;;  %v5943_v10 = vpop.f32.mrf.mxu1 }
 0x57a   : > { %v6018_v31 = vadd.f32 %v5943_v10, %v16955_v24  ;;  %v13171_v24 = vld [vmem:[%s19428_s2 + $0x1d0] sm:$0xff]  ;;  %v6469_v13 = vrot.slane %v6467_v26, 1 }
 0x57b   : > { %7091 = vmatmul.bf16.gmra.mxu0 %v17450_v53  ;;  %7255 = vmatpush.bf16.msra.mxu1 %v13171_v24 }
 0x57c   : > { %v5150_v15 = vpop.f32.mrf.mxu2  ;;  %5982 = vmatmul.bf16.gmra.mxu1 %v5816_v5  ;;  %v15221_v5 = vld [vmem:[#allocation2 + $0x7c] sm:$0xff]  }
 0x57d   : > { %v5151_v47 = vadd.f32 %v5150_v15, %v4839_v27  ;;  %v5818_v27 = vshrl.u32 %v15219_v46, 16  ;;  %v7047_v46 = vpop.f32.mrf.mxu0  ;;  %v5830_v24 = vshll.u32 %v15221_v5, 16 }
 0x57f   : > { %v5564_v25 = vpop.f32.mrf.mxu3  ;;  %v5820_v16 = vrot.slane %v5818_v27, 2 }
 0x580   : > { %v17671_v61 = vadd.f32 %v5564_v25, %v5148_v37  ;;  %v14417_v37 = vld [vmem:[#allocation2 + $0x68] sm:$0xff]  }
 0x581   : > { %v5945_v45 = vpop.f32.mrf.mxu1  ;;  %v5824_v15 = vor.u32 %v5823_v14, %v5820_v16  ;;  %v5832_v16 = vrot.slane %v5830_v24, 3 }
 0x582   : > { %v6019_v32 = vadd.f32 %v5945_v45, %v17003_v21 }
 0x583   : > { %v5825_v56 = vsel %vm4864_vm10, %v5815_v2, %v5824_v15  ;;  %v13215_v2 = vld [vmem:[%s19429_s3 + $0x78] sm:$0xff] }
 0x584   : > { %v5152_v53 = vpop.f32.mrf.mxu2  ;;  %6635 = vmatmul.bf16.gmra.mxu3 %v6465_v36  ;;  %v13148_v36 = vld [vmem:[#allocation2 + $0x78] sm:$0xff] }
 0x585   : > { %v5153_v57 = vadd.f32 %v5152_v53, %v4841_v51  ;;  %v6472_v51 = vrot.slane %v6470_v22, 2  ;;  %8333 = vmatpush.bf16.msra.mxu3 %v13215_v2  ;;  %v7049_v22 = vpop.f32.mrf.mxu0 }
 0x587   : > { %v5567_v55 = vpop.f32.mrf.mxu3  ;;  %v6473_v27 = vor.u32 %v6472_v51, %v6469_v13 }
 0x588   : > { %v17678_v63 = vadd.f32 %v5567_v55, %v5151_v47  ;;  %v5827_v47 = vshrl.u32 %v15221_v5, 16  ;;  %v6479_v55 = vshll.u32 %v13148_v36, 16  ;;  %v13193_v5 = vld [vmem:[%s19428_s2 + $0x208] sm:$0xff] }
 0x589   : > { %6194 = vmatmul.bf16.gmra.mxu2 %v14417_v37  ;;  %v5948_v39 = vpop.f32.mrf.mxu1  ;;  %v6476_v37 = vshrl.u32 %v13148_v36, 16 }
 0x58a   : > { %v6020_v21 = vadd.f32 %v5948_v39, %v17034_v59  ;;  %v6474_v59 = vsel %vm5281_vm4, %v6464_v35, %v6473_v27  ;;  %v5829_v19 = vrot.slane %v5827_v47, 2  ;;  %v15223_v47 = vld [vmem:[#allocation2 + $0x84] sm:$0xff]   ;;  %7702 = vmatpush.bf16.msra.mxu2 %v13193_v5 }
 0x58b   : > { %7096 = vmatmul.bf16.gmra.mxu0 %v17507_v42  ;;  %v6478_v51 = vrot.slane %v6476_v37, 1  ;;  %v5839_v24 = vshll.u32 %v15223_v47, 16  ;;  %v14419_v37 = vld [vmem:[#allocation2 + $0x78] sm:$0xff]  }
 0x58c   : > { %v6155_v10 = vpop.f32.mrf.mxu2  ;;  %5987 = vmatmul.bf16.gmra.mxu1 %v5825_v56  ;;  %v6481_v56 = vrot.slane %v6479_v55, 2 }
 0x58d   : > { %v6230_v1 = vadd.f32 %v6155_v10, %v6018_v31  ;;  %v7052_v36 = vpop.f32.mrf.mxu0 }
 0x58f   : > { %v5569_v25 = vpop.f32.mrf.mxu3 }
 0x590   : > { %v17683_v38 = vadd.f32 %v5569_v25, %v5153_v57  ;;  %v14418_v57 = vld [vmem:[#allocation2 + $0x70] sm:$0xff]  }
 0x591   : > { %v5950_v45 = vpop.f32.mrf.mxu1 }
 0x592   : > { %v6021_v42 = vadd.f32 %v5950_v45, %v17068_v3 }
 0x594   : > { %v6157_v53 = vpop.f32.mrf.mxu2  ;;  %6640 = vmatmul.bf16.gmra.mxu3 %v6474_v59 }
 0x595   : > { %v6231_v31 = vadd.f32 %v6157_v53, %v6019_v32  ;;  %v5833_v32 = vor.u32 %v5832_v16, %v5829_v19 }
 0x597   : > { %v6601_v14 = vpop.f32.mrf.mxu3  ;;  %v5834_v25 = vsel %vm4864_vm10, %v5824_v15, %v5833_v32  ;;  %v13149_v15 = vld [vmem:[#allocation2 + $0x80] sm:$0xff] }
 0x598   : > { %v6676_v26 = vadd.f32 %v6601_v14, %v6230_v1  ;;  %v13170_v1 = vld [vmem:[%s19428_s2 + $0x1c8] sm:$0xff]  ;;  %v5841_v14 = vrot.slane %v5839_v24, 3 }
 0x599   : > { %6199 = vmatmul.bf16.gmra.mxu2 %v14418_v57  ;;  %v5953_v10 = vpop.f32.mrf.mxu1  ;;  %7256 = vmatpush.bf16.msra.mxu1 %v13170_v1 }
 0x59a   : > { %v17690_v35 = vadd.f32 %v7047_v46, %v6676_v26  ;;  %v6022_v13 = vadd.f32 %v5953_v10, %v17095_v18  ;;  %v5836_v18 = vshrl.u32 %v15223_v47, 16  ;;  %v6488_v26 = vshll.u32 %v13149_v15, 16  ;;  %v7054_v47 = vpop.f32.mrf.mxu0 }
 0x59b   : > { %7101 = vmatmul.bf16.gmra.mxu0 %v17557_v23  ;;  %v6482_v23 = vor.u32 %v6481_v56, %v6478_v51 }
 0x59c   : > { %v6160_v3 = vpop.f32.mrf.mxu2  ;;  %5992 = vmatmul.bf16.gmra.mxu1 %v5834_v25  ;;  %v5838_v57 = vrot.slane %v5836_v18, 2  ;;  %v6490_v5 = vrot.slane %v6488_v26, 2  ;;  %v15224_v25 = vld [vmem:[#allocation2 + $0x8c] sm:$0xff]  }
 0x59d   : > { %v6232_v39 = vadd.f32 %v6160_v3, %v6020_v21  ;;  %v6483_v16 = vsel %vm5281_vm4, %v6473_v27, %v6482_v23  ;;  %v5845_v18 = vshrl.u32 %v15224_v25, 16  ;;  %v5848_v24 = vshll.u32 %v15224_v25, 16 }
 0x59e   : > { %v5842_v10 = vor.u32 %v5841_v14, %v5838_v57  ;;  %v17717_v14 = vld [vmem:[#allocation2 + $0x98] sm:$0xff]  }
 0x59f   : > { %v6603_v21 = vpop.f32.mrf.mxu3  ;;  %v5850_v57 = vrot.slane %v5848_v24, 3 }
 0x5a0   : > { %v6677_v46 = vadd.f32 %v6603_v21, %v6231_v31  ;;  %v6485_v31 = vshrl.u32 %v13149_v15, 16  ;;  %v5843_v1 = vsel %vm4864_vm10, %v5833_v32, %v5842_v10  ;;  %v6736_v15 = vld [vmem:[#allocation2 + $0xc0] sm:$0x7] }
 0x5a1   : > { %v5955_v45 = vpop.f32.mrf.mxu1 }
 0x5a2   : > { %v17701_v59 = vadd.f32 %v7049_v22, %v6677_v46  ;;  %v6023_v19 = vadd.f32 %v5955_v45, %v17131_v62  ;;  %v6487_v27 = vrot.slane %v6485_v31, 1  ;;  %v6815_v31 = vunpack.c.l.b16 %v6736_v15  ;;  %v7057_v26 = vpop.f32.mrf.mxu0 }
 0x5a4   : > { %v6162_v53 = vpop.f32.mrf.mxu2  ;;  %6645 = vmatmul.bf16.gmra.mxu3 %v6483_v16  ;;  %v6491_v46 = vor.u32 %v6490_v5, %v6487_v27  ;;  %v13150_v16 = vld [vmem:[#allocation2 + $0x88] sm:$0xff]  ;;  %v13192_v5 = vld [vmem:[%s19428_s2 + $0x200] sm:$0xff] }
 0x5a5   : > { %v6233_v2 = vadd.f32 %v6162_v53, %v6021_v42  ;;  %7703 = vmatpush.bf16.msra.mxu2 %v13192_v5 }
 0x5a7   : > { %v6606_v55 = vpop.f32.mrf.mxu3 }
 0x5a8   : > { %v6678_v3 = vadd.f32 %v6606_v55, %v6232_v39  ;;  %v14420_v55 = vld [vmem:[#allocation2 + $0x80] sm:$0xff]  }
 0x5a9   : > { %6204 = vmatmul.bf16.gmra.mxu2 %v14419_v37  ;;  %v5958_v22 = vpop.f32.mrf.mxu1  ;;  %v15337_v37 = vld [vmem:[#allocation2 + $0x94] sm:$0xf0]  }
 0x5aa   : > { %v17705_v56 = vadd.f32 %v7052_v36, %v6678_v3  ;;  %v6024_v62 = vadd.f32 %v5958_v22, %v17156_v33  ;;  %v6492_v36 = vsel %vm5281_vm4, %v6482_v23, %v6491_v46  ;;  %v6497_v22 = vshll.u32 %v13150_v16, 16 }
 0x5ab   : > { %7106 = vmatmul.bf16.gmra.mxu0 %v17606_v17 }
 0x5ac   : > { %v6165_v51 = vpop.f32.mrf.mxu2  ;;  %5997 = vmatmul.bf16.gmra.mxu1 %v5843_v1 }
 0x5ad   : > { %v6234_v42 = vadd.f32 %v6165_v51, %v6022_v13  ;;  %v13214_v13 = vld [vmem:[%s19429_s3 + $0x70] sm:$0xff]  ;;  %v6494_v51 = vshrl.u32 %v13150_v16, 16 }
 0x5ae   : > { %8334 = vmatpush.bf16.msra.mxu3 %v13214_v13  ;;  %v6499_v13 = vrot.slane %v6497_v22, 2 }
 0x5af   : > { %v6608_v21 = vpop.f32.mrf.mxu3  ;;  %v6496_v24 = vrot.slane %v6494_v51, 1 }
 0x5b0   : > { %v6679_v39 = vadd.f32 %v6608_v21, %v6233_v2  ;;  %v5847_v2 = vrot.slane %v5845_v18, 2 }
 0x5b1   : > { %v5960_v17 = vpop.f32.mrf.mxu1 }
 0x5b2   : > { %v17713_v33 = vadd.f32 %v7054_v47, %v6679_v39  ;;  %v6025_v32 = vadd.f32 %v5960_v17, %v17196_v20  ;;  %v15338_v20 = vld [vmem:[#allocation2 + $0x94] sm:$0xf]  ;;  %v5851_v23 = vor.u32 %v5850_v57, %v5847_v2  ;;  %v6831_v47 = vpack.c.b16 %v6815_v31, %v6815_v31 }
 0x5b3   : > { %v15336_v17 = vor.u32 %v15338_v20, %v15337_v37  ;;  %v13151_v20 = vld [vmem:[#allocation2 + $0x90] sm:$0xff] }
 0x5b4   : > { %v6167_v53 = vpop.f32.mrf.mxu2  ;;  %6650 = vmatmul.bf16.gmra.mxu3 %v6492_v36  ;;  %v6967_v36 = vshrl.u32 %v6831_v47, 16  ;;  %v6970_v16 = vshll.u32 %v6831_v47, 16 }
 0x5b5   : > { %v6235_v45 = vadd.f32 %v6167_v53, %v6023_v19  ;;  %v17719_v19 = vld [vmem:[#allocation2 + $0x90] sm:$0xff]   ;;  %v5852_v53 = vsel %vm4864_vm10, %v5842_v10, %v5851_v23  ;;  %v5854_v57 = vshrl.u32 %v15336_v17, 16 }
 0x5b7   : > { %v6611_v3 = vpop.f32.mrf.mxu3 }
 0x5b8   : > { %v6680_v27 = vadd.f32 %v6611_v3, %v6234_v42  ;;  %v13169_v42 = vld [vmem:[%s19428_s2 + $0x1c0] sm:$0xff]  ;;  %v6972_v3 = vrot.slane %v6970_v16, 3 }
 0x5b9   : > { %6209 = vmatmul.bf16.gmra.mxu2 %v14420_v55  ;;  %v5963_v25 = vpop.f32.mrf.mxu1  ;;  %7257 = vmatpush.bf16.msra.mxu1 %v13169_v42  ;;  %v7059_v55 = vpop.f32.mrf.mxu0 }
 0x5ba   : > { %v17724_v21 = vadd.f32 %v7057_v26, %v6680_v27  ;;  %v6026_v18 = vadd.f32 %v5963_v25, %v17218_v34  ;;  %v6969_v26 = vrot.slane %v6967_v36, 2  ;;  %v5856_v27 = vrot.slane %v5854_v57, 2 }
 0x5bb   : > { %7111 = vmatmul.bf16.gmra.mxu0 %v17653_v8  ;;  %v5857_v8 = vshll.u32 %v15336_v17, 16 }
 0x5bc   : > { %v6170_v1 = vpop.f32.mrf.mxu2  ;;  %6002 = vmatmul.bf16.gmra.mxu1 %v5852_v53  ;;  %v6973_v25 = vor.u32 %v6972_v3, %v6969_v26 }
 0x5bd   : > { %v17726_v39 = vadd.f32 %v6170_v1, %v6024_v62  ;;  %v6500_v62 = vor.u32 %v6499_v13, %v6496_v24  ;;  %v5859_v5 = vrot.slane %v5857_v8, 3  ;;  %v5632_v1 = vld [vmem:[#allocation2 + $0x9c] sm:$0x7]  ;;  %v6503_v24 = vshrl.u32 %v13151_v20, 16 }
 0x5be   : > { %v6506_v13 = vshll.u32 %v13151_v20, 16  ;;  %v5711_v53 = vunpack.c.l.b16 %v5632_v1 }
 0x5bf   : > { %v6613_v15 = vpop.f32.mrf.mxu3  ;;  %v6501_v37 = vsel %vm5281_vm4, %v6491_v46, %v6500_v62  ;;  %v5860_v42 = vor.u32 %v5859_v5, %v5856_v27  ;;  %v6505_v16 = vrot.slane %v6503_v24, 1  ;;  %v13152_v27 = vld [vmem:[#allocation2 + $0x98] sm:$0xff] }
 0x5c0   : > { %v6681_v2 = vadd.f32 %v6613_v15, %v6235_v45  ;;  %v14421_v45 = vld [vmem:[#allocation2 + $0x88] sm:$0xff]   ;;  %v6508_v15 = vrot.slane %v6506_v13, 2  ;;  %v5727_v8 = vpack.c.b16 %v5711_v53, %v5711_v53 }
 0x5c1   : > { %v5965_v31 = vpop.f32.mrf.mxu1  ;;  %v5861_v57 = vsel %vm4864_vm10, %v5851_v23, %v5860_v42 }
 0x5c2   : > { %v17734_v51 = vadd.f32 %v7059_v55, %v6681_v2  ;;  %v6027_v10 = vadd.f32 %v5965_v31, %v17257_v58  ;;  %v6974_v58 = vsel %vm4864_vm10, %v17648_v44, %v6973_v25  ;;  %v13213_v2 = vld [vmem:[%s19429_s3 + $0x68] sm:$0xff]  ;;  %v5866_v31 = vshll.u32 %v5727_v8, 16 }
 0x5c3   : > { %8335 = vmatpush.bf16.msra.mxu3 %v13213_v2 }
 0x5c4   : > { %v6172_v34 = vpop.f32.mrf.mxu2  ;;  %6655 = vmatmul.bf16.gmra.mxu3 %v6501_v37  ;;  %v5868_v23 = vrot.slane %v5866_v31, 3  ;;  %v13178_v31 = vld [vmem:[#allocation2 + $0x54] sm:$0xff] }
 0x5c5   : > { %v6237_v22 = vadd.f32 %v6172_v34, %v6025_v32  ;;  %v6509_v34 = vor.u32 %v6508_v15, %v6505_v16 }
 0x5c7   : > { %v17738_v47 = vpop.f32.mrf.mxu3  ;;  %v6510_v20 = vsel %vm5281_vm4, %v6500_v62, %v6509_v34 }
 0x5c9   : > { %6214 = vmatmul.bf16.gmra.mxu2 %v14421_v45  ;;  %v5968_v32 = vpop.f32.mrf.mxu1  ;;  %v6512_v45 = vshrl.u32 %v13152_v27, 16 }
 0x5ca   : > { %v6028_v36 = vadd.f32 %v5968_v32, %v17284_v49 }
 0x5cb   : > { %7116 = vmatmul.bf16.gmra.mxu0 %v6974_v58  ;;  %v6290_v58 = vld [vmem:[#allocation2 + $0xa0] sm:$0x3] }
 0x5cc   : > { %v6175_v17 = vpop.f32.mrf.mxu2  ;;  %6007 = vmatmul.bf16.gmra.mxu1 %v5861_v57 }
 0x5cd   : > { %v17742_v46 = vadd.f32 %v6175_v17, %v6026_v18  ;;  %v5863_v18 = vshrl.u32 %v5727_v8, 16 }
 0x5cf   : > { %v6618_v55 = vpop.f32.mrf.mxu3  ;;  %v5865_v5 = vrot.slane %v5863_v18, 2 }
 0x5d0   : > { %v17749_v44 = vadd.f32 %v6618_v55, %v6237_v22  ;;  %v6515_v22 = vshll.u32 %v13152_v27, 16 }
 0x5d1   : > { %v5970_v3 = vpop.f32.mrf.mxu1  ;;  %v5869_v25 = vor.u32 %v5868_v23, %v5865_v5  ;;  %v7499_v23 = vshrl.u32 %v13178_v31, 16 }
 0x5d2   : > { %v6029_v37 = vadd.f32 %v5970_v3, %v17315_v30  ;;  %v6514_v30 = vrot.slane %v6512_v45, 1  ;;  %v6517_v17 = vrot.slane %v6515_v22, 2 }
 0x5d3   : > { %v5870_v62 = vsel %vm4864_vm10, %v5860_v42, %v5869_v25 }
 0x5d4   : > { %v6177_v26 = vpop.f32.mrf.mxu2  ;;  %6660 = vmatmul.bf16.gmra.mxu3 %v6510_v20  ;;  %v6518_v16 = vor.u32 %v6517_v17, %v6514_v30  ;;  %v12286_v20 = vld [vmem:[#allocation2 + $0x4c] sm:$0xe] }
 0x5d5   : > { %v6239_v49 = vadd.f32 %v6177_v26, %v6027_v10 }
 0x5d7   : > { %v17754_v1 = vpop.f32.mrf.mxu3 }
 0x5d9   : > { %6219 = vmatmul.bf16.gmra.mxu2 %v17719_v19  ;;  %v5973_v13 = vpop.f32.mrf.mxu1  ;;  %v6369_v19 = vunpack.c.l.b16 %v6290_v58 }
 0x5da   : > { %v6030_v10 = vadd.f32 %v5973_v13, %v17330_v4  ;;  %v13177_v4 = vld [vmem:[#allocation2 + $0x4c] sm:$0xf0]  ;;  %v7501_v13 = vrot.slane %v7499_v23, 1 }
 0x5db   : > { %v6385_v18 = vpack.c.b16 %v6369_v19, %v6369_v19 }
 0x5dc   : > { %v6180_v24 = vpop.f32.mrf.mxu2  ;;  %6012 = vmatmul.bf16.gmra.mxu1 %v5870_v62 }
 0x5dd   : > { %v17756_v53 = vadd.f32 %v6180_v24, %v6028_v36  ;;  %v6519_v36 = vsel %vm5281_vm4, %v6509_v34, %v6518_v16  ;;  %v6521_v26 = vshrl.u32 %v6385_v18, 16  ;;  %v6524_v3 = vshll.u32 %v6385_v18, 16 }
 0x5df   : > { %v6623_v32 = vpop.f32.mrf.mxu3  ;;  %v6523_v34 = vrot.slane %v6521_v26, 1  ;;  %v6526_v22 = vrot.slane %v6524_v3, 2 }
 0x5e0   : > { %v17760_v15 = vadd.f32 %v6623_v32, %v6239_v49  ;;  %v12287_v49 = vor.u32 %v13177_v4, %v12286_v20 }
 0x5e1   : > { %v5975_v57 = vpop.f32.mrf.mxu1  ;;  %v6527_v62 = vor.u32 %v6526_v22, %v6523_v34 }
 0x5e2   : > { %v6031_v55 = vadd.f32 %v5975_v57, %v17373_v52  ;;  %v7491_v25 = vshrl.u32 %v12287_v49, 16  ;;  %v7494_v24 = vshll.u32 %v12287_v49, 16 }
 0x5e3   : > { %v6528_v18 = vsel %vm5281_vm4, %v6518_v16, %v6527_v62 }
 0x5e4   : > { %v6182_v2 = vpop.f32.mrf.mxu2  ;;  %6665 = vmatmul.bf16.gmra.mxu3 %v6519_v36  ;;  %v7496_v32 = vrot.slane %v7494_v24, 2 }
 0x5e5   : > { %v6241_v8 = vadd.f32 %v6182_v2, %v6029_v37  ;;  %v7502_v37 = vshll.u32 %v13178_v31, 16  ;;  %v13179_v31 = vld [vmem:[#allocation2 + $0x5c] sm:$0xff] }
 0x5e6   : > { %v7508_v20 = vshrl.u32 %v13179_v31, 16  ;;  %v7511_v49 = vshll.u32 %v13179_v31, 16 }
 0x5e7   : > { %v17765_v42 = vpop.f32.mrf.mxu3  ;;  %v7504_v30 = vrot.slane %v7502_v37, 2 }
 0x5e8   : > { %v7513_v16 = vrot.slane %v7511_v49, 2  ;;  %v13181_v49 = vld [vmem:[#allocation2 + $0x6c] sm:$0xff] }
 0x5e9   : > { %6224 = vmatmul.bf16.gmra.mxu2 %v17717_v14  ;;  %v5978_v5 = vpop.f32.mrf.mxu1  ;;  %v13212_v14 = vld [vmem:[%s19429_s3 + $0x60] sm:$0xff]  ;;  %v7505_v2 = vor.u32 %v7504_v30, %v7501_v13 }
 0x5ea   : > { %v6032_v52 = vadd.f32 %v5978_v5, %v17388_v41  ;;  %8336 = vmatpush.bf16.msra.mxu3 %v13212_v14  ;;  %v14953_v5 = vld [vmem:[#allocation2 + $0x54] sm:$0xff]   ;;  %v13180_v30 = vld [vmem:[#allocation2 + $0x64] sm:$0xff] }
 0x5eb   : > { %v7517_v62 = vshrl.u32 %v13180_v30, 16 }
 0x5ec   : > { %v6185_v27 = vpop.f32.mrf.mxu2  ;;  %7258 = vmatmul.bf16.vlgmr.msra.gmra.mxu1 %v16909_v7 }
 0x5ed   : > { %v17767_v45 = vadd.f32 %v6185_v27, %v6030_v10  ;;  %v7493_v10 = vrot.slane %v7491_v25, 1 }
 0x5ef   : > { %v6628_v17 = vpop.f32.mrf.mxu3  ;;  %v7497_v4 = vor.u32 %v7496_v32, %v7493_v10  ;;  %v7520_v10 = vshll.u32 %v13180_v30, 16 }
 0x5f0   : > { %v17774_v58 = vadd.f32 %v6628_v17, %v6241_v8 }
 0x5f1   : > { %v5980_v19 = vpop.f32.mrf.mxu1  ;;  %v7506_v7 = vsel %vm5281_vm4, %v7497_v4, %v7505_v2 }
 0x5f2   : > { %v6033_v36 = vadd.f32 %v5980_v19, %v17418_v29  ;;  %v7510_v29 = vrot.slane %v7508_v20, 1  ;;  %v14955_v19 = vld [vmem:[#allocation2 + $0x5c] sm:$0xff]  }
 0x5f4   : > { %v6187_v41 = vpop.f32.mrf.mxu2  ;;  %6670 = vmatmul.bf16.gmra.mxu3 %v6528_v18  ;;  %v7514_v14 = vor.u32 %v7513_v16, %v7510_v29  ;;  %v7526_v16 = vshrl.u32 %v13181_v49, 16 }
 0x5f5   : > { %v6243_v57 = vadd.f32 %v6187_v41, %v6031_v55 }
 0x5f6   : > { %v7515_v13 = vsel %vm5281_vm4, %v7505_v2, %v7514_v14  ;;  %v7522_v2 = vrot.slane %v7520_v10, 2 }
 0x5f7   : > { %v17779_v26 = vpop.f32.mrf.mxu3 }
 0x5f9   : > { %7704 = vmatmul.bf16.vlgmr.msra.gmra.mxu2 %v7506_v7  ;;  %v5983_v3 = vpop.f32.mrf.mxu1 }
 0x5fa   : > { %v6034_v55 = vadd.f32 %v5983_v3, %v17434_v60  ;;  %v19689_v3 = vld [vmem:[#allocation40_spill] sm:$0xff] }
 0x5fc   : > { %v6190_v8 = vpop.f32.mrf.mxu2  ;;  %7263 = vmatmul.bf16.gmra.mxu1 %v14953_v5 }
 0x5fd   : > { %v17781_v27 = vadd.f32 %v6190_v8, %v6032_v52 }
 0x5ff   : > { %v6633_v23 = vpop.f32.mrf.mxu3 }
 0x600   : > { %v17784_v37 = vadd.f32 %v6633_v23, %v6243_v57  ;;  %v13211_v57 = vld [vmem:[%s19429_s3 + $0x58] sm:$0xff]  ;;  %v7529_v23 = vshll.u32 %v13181_v49, 16 }
 0x601   : > { %v5985_v22 = vpop.f32.mrf.mxu1  ;;  %8337 = vmatpush.bf16.msra.mxu3 %v13211_v57 }
 0x602   : > { %v6035_v24 = vadd.f32 %v5985_v22, %v17482_v54  ;;  %v7519_v54 = vrot.slane %v7517_v62, 1 }
 0x604   : > { %v6192_v34 = vpop.f32.mrf.mxu2  ;;  %v7523_v31 = vor.u32 %v7522_v2, %v7519_v54  ;;  %v13182_v54 = vld [vmem:[#allocation2 + $0x74] sm:$0xff] }
 0x605   : > { %v6245_v25 = vadd.f32 %v6192_v34, %v6033_v36 }
 0x607   : > { %v17788_v52 = vpop.f32.mrf.mxu3 }
 0x609   : > { %7709 = vmatmul.bf16.gmra.mxu2 %v7515_v13  ;;  %v5988_v17 = vpop.f32.mrf.mxu1  ;;  %v7528_v13 = vrot.slane %v7526_v16, 1 }
 0x60a   : > { %v6036_v41 = vadd.f32 %v5988_v17, %v17498_v11  ;;  %v7524_v11 = vsel %vm5281_vm4, %v7514_v14, %v7523_v31 }
 0x60c   : > { %v6195_v60 = vpop.f32.mrf.mxu2  ;;  %7268 = vmatmul.bf16.gmra.mxu1 %v14955_v19 }
 0x60d   : > { %v17790_v32 = vadd.f32 %v6195_v60, %v6034_v55 }
 0x60f   : > { %v6638_v36 = vpop.f32.mrf.mxu3 }
 0x610   : > { %v17796_v18 = vadd.f32 %v6638_v36, %v6245_v25  ;;  %v14957_v25 = vld [vmem:[#allocation2 + $0x64] sm:$0xff]  }
 0x611   : > { %v5990_v7 = vpop.f32.mrf.mxu1 }
 0x612   : > { %v6037_v20 = vadd.f32 %v5990_v7, %v19689_v3  ;;  %v7538_v7 = vshll.u32 %v13182_v54, 16 }
 0x614   : > { %v6197_v4 = vpop.f32.mrf.mxu2 }
 0x615   : > { %v6247_v8 = vadd.f32 %v6197_v4, %v6035_v24  ;;  %v7531_v24 = vrot.slane %v7529_v23, 2  ;;  %v7535_v4 = vshrl.u32 %v13182_v54, 16 }
 0x617   : > { %v17800_v55 = vpop.f32.mrf.mxu3  ;;  %v7532_v62 = vor.u32 %v7531_v24, %v7528_v13  ;;  %v13183_v24 = vld [vmem:[#allocation2 + $0x7c] sm:$0xff] }
 0x618   : > { %v7547_v54 = vshll.u32 %v13183_v24, 16 }
 0x619   : > { %7714 = vmatmul.bf16.gmra.mxu2 %v7524_v11  ;;  %v5993_v29 = vpop.f32.mrf.mxu1  ;;  %v7533_v57 = vsel %vm5281_vm4, %v7523_v31, %v7532_v62  ;;  %v7537_v31 = vrot.slane %v7535_v4, 1  ;;  %v7540_v11 = vrot.slane %v7538_v7, 2 }
 0x61a   : > { %v6038_v22 = vadd.f32 %v5993_v29, %v17545_v0  ;;  %v13210_v0 = vld [vmem:[%s19429_s3 + $0x50] sm:$0xff] }
 0x61b   : > { %8338 = vmatpush.bf16.msra.mxu3 %v13210_v0  ;;  %v7541_v23 = vor.u32 %v7540_v11, %v7537_v31 }
 0x61c   : > { %v6200_v5 = vpop.f32.mrf.mxu2  ;;  %7273 = vmatmul.bf16.gmra.mxu1 %v14957_v25 }
 0x61d   : > { %v17802_v34 = vadd.f32 %v6200_v5, %v6036_v41 }
 0x61f   : > { %v6643_v30 = vpop.f32.mrf.mxu3 }
 0x620   : > { %v17805_v60 = vadd.f32 %v6643_v30, %v6247_v8 }
 0x621   : > { %v5995_v17 = vpop.f32.mrf.mxu1 }
 0x622   : > { %v6039_v19 = vadd.f32 %v5995_v17, %v17581_v28  ;;  %v14959_v28 = vld [vmem:[#allocation2 + $0x6c] sm:$0xff]  }
 0x624   : > { %v6202_v14 = vpop.f32.mrf.mxu2 }
 0x625   : > { %v6249_v10 = vadd.f32 %v6202_v14, %v6037_v20  ;;  %v17817_v20 = vpop.f32.mrf.mxu0 }
 0x627   : > { %v17809_v41 = vpop.f32.mrf.mxu3 }
 0x629   : > { %7719 = vmatmul.bf16.gmra.mxu2 %v7533_v57  ;;  %v5998_v36 = vpop.f32.mrf.mxu1  ;;  %v7544_v57 = vshrl.u32 %v13183_v24, 16 }
 0x62a   : > { %v6040_v3 = vadd.f32 %v5998_v36, %v17597_v12 }
 0x62c   : > { %v6205_v2 = vpop.f32.mrf.mxu2  ;;  %7278 = vmatmul.bf16.gmra.mxu1 %v14959_v28 }
 0x62d   : > { %v17814_v8 = vadd.f32 %v6205_v2, %v6038_v22  ;;  %v7542_v22 = vsel %vm5281_vm4, %v7532_v62, %v7541_v23  ;;  %v17823_v30 = vpop.f32.mrf.mxu0  ;;  %v14961_v2 = vld [vmem:[#allocation2 + $0x74] sm:$0xff]  }
 0x62f   : > { %19690 = vst [vmem:[#allocation42_spill] sm:$0xff] %v17814_v8  ;;  %v6648_v49 = vpop.f32.mrf.mxu3 }
 0x630   : > { %v17819_v5 = vadd.f32 %v6648_v49, %v6249_v10 }
 0x631   : > { %v6000_v16 = vpop.f32.mrf.mxu1 }
 0x632   : > { %19691 = vst [vmem:[#allocation41_spill] sm:$0xff] %v17819_v5  ;;  %v6041_v13 = vadd.f32 %v6000_v16, %v17630_v40  ;;  %v7549_v40 = vrot.slane %v7547_v54, 2 }
 0x634   : > { %v6207_v29 = vpop.f32.mrf.mxu2 }
 0x635   : > { %v6251_v25 = vadd.f32 %v6207_v29, %v6039_v19  ;;  %v7546_v19 = vrot.slane %v7544_v57, 1  ;;  %v17832_v4 = vpop.f32.mrf.mxu0  ;;  %v13184_v29 = vld [vmem:[#allocation2 + $0x84] sm:$0xff]  ;;  %v14963_v57 = vld [vmem:[#allocation2 + $0x7c] sm:$0xff]  }
 0x636   : > { %v7553_v24 = vshrl.u32 %v13184_v29, 16 }
 0x637   : > { %v17825_v12 = vpop.f32.mrf.mxu3  ;;  %v7550_v31 = vor.u32 %v7549_v40, %v7546_v19 }
 0x638   : > { %19692 = vst [vmem:[#allocation44_spill] sm:$0xff] %v17825_v12  ;;  %v7555_v54 = vrot.slane %v7553_v24, 1 }
 0x639   : > { %7724 = vmatmul.bf16.gmra.mxu2 %v7542_v22  ;;  %v6003_v17 = vpop.f32.mrf.mxu1 }
 0x63a   : > { %v6042_v0 = vadd.f32 %v6003_v17, %v17646_v9  ;;  %v7551_v9 = vsel %vm5281_vm4, %v7541_v23, %v7550_v31 }
 0x63c   : > { %v6210_v14 = vpop.f32.mrf.mxu2  ;;  %7283 = vmatmul.bf16.gmra.mxu1 %v14961_v2 }
 0x63d   : > { %v17827_v10 = vadd.f32 %v6210_v14, %v6040_v3  ;;  %v13209_v3 = vld [vmem:[%s19429_s3 + $0x48] sm:$0xff]  ;;  %v7556_v14 = vshll.u32 %v13184_v29, 16  ;;  %v17841_v17 = vpop.f32.mrf.mxu0 }
 0x63e   : > { %8339 = vmatpush.bf16.msra.mxu3 %v13209_v3  ;;  %v13185_v29 = vld [vmem:[#allocation2 + $0x8c] sm:$0xff] }
 0x63f   : > { %19693 = vst [vmem:[#allocation48_spill] sm:$0xff] %v17827_v10  ;;  %v6653_v36 = vpop.f32.mrf.mxu3  ;;  %v7558_v2 = vrot.slane %v7556_v14, 2  ;;  %v7565_v24 = vshll.u32 %v13185_v29, 16 }
 0x640   : > { %v17830_v62 = vadd.f32 %v6653_v36, %v6251_v25 }
 0x641   : > { %v6005_v28 = vpop.f32.mrf.mxu1 }
 0x642   : > { %19694 = vst [vmem:[#allocation45_spill] sm:$0xff] %v17830_v62  ;;  %v6043_v49 = vadd.f32 %v6005_v28, %v17659_v50 }
 0x644   : > { %v6212_v7 = vpop.f32.mrf.mxu2 }
 0x645   : > { %v6253_v11 = vadd.f32 %v6212_v7, %v6041_v13  ;;  %v7559_v7 = vor.u32 %v7558_v2, %v7555_v54  ;;  %v14965_v54 = vld [vmem:[#allocation2 + $0x84] sm:$0xff]  }
 0x647   : > { %v17839_v16 = vpop.f32.mrf.mxu3 }
 0x648   : > { %19695 = vst [vmem:[#allocation47_spill] sm:$0xff] %v17839_v16  ;;  %v14971_v16 = vld [vmem:[#allocation2 + $0x9c] sm:$0xff]  }
 0x649   : > { %7729 = vmatmul.bf16.gmra.mxu2 %v7551_v9  ;;  %v6008_v22 = vpop.f32.mrf.mxu1  ;;  %v17855_v9 = vpop.f32.mrf.mxu0 }
 0x64a   : > { %v6044_v50 = vadd.f32 %v6008_v22, %v17663_v43  ;;  %v13251_v43 = vld [vmem:[%s19429_s3 + $0x138] sm:$0xff]  ;;  %v7562_v22 = vshrl.u32 %v13185_v29, 16 }
 0x64b   : > { %9485 = vmatpush.bf16.msrb.mxu2 %v13251_v43  ;;  %v13186_v29 = vld [vmem:[#allocation2 + $0x94] sm:$0xff] }
 0x64c   : > { %v6215_v25 = vpop.f32.mrf.mxu2  ;;  %7288 = vmatmul.bf16.gmra.mxu1 %v14963_v57  ;;  %v7564_v2 = vrot.slane %v7562_v22, 1 }
 0x64d   : > { %v17843_v13 = vadd.f32 %v6215_v25, %v6042_v0  ;;  %v13207_v0 = vld [vmem:[%s19429_s3 + $0x38] sm:$0xff] }
 0x64e   : > { %8594 = vmatpush.bf16.msra.mxu0 %v13207_v0 }
 0x64f   : > { %19696 = vst [vmem:[#allocation46_spill] sm:$0xff] %v17843_v13  ;;  %v6658_v19 = vpop.f32.mrf.mxu3 }
 0x650   : > { %v17846_v23 = vadd.f32 %v6658_v19, %v6253_v11  ;;  %v7560_v11 = vsel %vm5281_vm4, %v7550_v31, %v7559_v7  ;;  %v7567_v19 = vrot.slane %v7565_v24, 2  ;;  %v7571_v24 = vshrl.u32 %v13186_v29, 16 }
 0x651   : > { %v6010_v36 = vpop.f32.mrf.mxu1 }
 0x652   : > { %19697 = vst [vmem:[#allocation49_spill] sm:$0xff] %v17846_v23  ;;  %v6045_v3 = vadd.f32 %v6010_v36, %v17671_v61 }
 0x654   : > { %v6217_v40 = vpop.f32.mrf.mxu2 }
 0x655   : > { %v6255_v28 = vadd.f32 %v6217_v40, %v6043_v49  ;;  %v17863_v40 = vpop.f32.mrf.mxu0 }
 0x657   : > { %v17858_v25 = vpop.f32.mrf.mxu3 }
 0x658   : > { %19698 = vst [vmem:[#allocation51_spill] sm:$0xff] %v17858_v25 }
 0x659   : > { %7734 = vmatmul.bf16.gmra.mxu2 %v7560_v11  ;;  %v6013_v61 = vpop.f32.mrf.mxu1  ;;  %v7568_v11 = vor.u32 %v7567_v19, %v7564_v2  ;;  %v13206_v2 = vld [vmem:[%s19429_s3 + $0x30] sm:$0xff]  ;;  %v7573_v19 = vrot.slane %v7571_v24, 1  ;;  %v13204_v24 = vld [vmem:[%s19429_s3 + $0x20] sm:$0xff] }
 0x65a   : > { %v6046_v57 = vadd.f32 %v6013_v61, %v17678_v63  ;;  %v13243_v63 = vld [vmem:[%s19429_s3 + $0xf8] sm:$0xff]  ;;  %8595 = vmatpush.bf16.msra.mxu0 %v13206_v2 }
 0x65b   : > { %9303 = vmatpush.bf16.msrb.mxu1 %v13243_v63 }
 0x65c   : > { %v6220_v49 = vpop.f32.mrf.mxu2  ;;  %7293 = vmatmul.bf16.gmra.mxu1 %v14965_v54  ;;  %v7574_v54 = vshll.u32 %v13186_v29, 16 }
 0x65d   : > { %v17860_v14 = vadd.f32 %v6220_v49, %v6044_v50  ;;  %v7569_v50 = vsel %vm5281_vm4, %v7559_v7, %v7568_v11  ;;  %v17874_v61 = vpop.f32.mrf.mxu0  ;;  %v13208_v7 = vld [vmem:[%s19429_s3 + $0x40] sm:$0xff] }
 0x65e   : > { %8340 = vmatpush.bf16.msra.mxu3 %v13208_v7  ;;  %v17899_v7 = vstv %s12376_s18 }
 0x65f   : > { %19699 = vst [vmem:[#allocation52_spill] sm:$0xff] %v17860_v14  ;;  %v6663_v36 = vpop.f32.mrf.mxu3  ;;  %vm7913_vm10 = vcmp.ge.s32.totalorder %v17899_v7, 0  ;;  %vm7923_vm0 = vcmp.lt.s32.totalorder %v17899_v7, 16  ;;  %v7904_v12 = vadd.s32 1, %v17899_v7 }
 0x660   : > { %v17865_v31 = vadd.f32 %v6663_v36, %v6255_v28  ;;  %v7576_v36 = vrot.slane %v7574_v54, 2  ;;  %v13187_v54 = vld [vmem:[#allocation2 + $0x9c] sm:$0xff]  ;;  %vm17926_vm2 = vmand %vm7913_vm10, %vm7923_vm0 }
 0x661   : > { %v6015_v43 = vpop.f32.mrf.mxu1  ;;  %vm7943_vm3 = vmand %vm17926_vm2, %vm4213_vm5  ;;  %vm7914_vm9 = vcmp.ge.s32.totalorder %v7904_v12, 0  ;;  %vm7924_vm11 = vcmp.lt.s32.totalorder %v7904_v12, 16  ;;  %v13241_v12 = vld [vmem:[%s19429_s3 + $0xe8] sm:$0xff] }
 0x662   : > { %19700 = vst [vmem:[#allocation50_spill] sm:$0xff] %v17865_v31  ;;  %v6047_v13 = vadd.f32 %v6015_v43, %v17683_v38  ;;  %v14967_v38 = vld [vmem:[#allocation2 + $0x8c] sm:$0xff]   ;;  %v7577_v63 = vor.u32 %v7576_v36, %v7573_v19  ;;  %v13203_v19 = vld [vmem:[%s19429_s3 + $0x18] sm:$0xff]  ;;  %v13200_v31 = vld [vmem:[%s19429_s3] sm:$0xff] }
 0x663   : > { %vm7975_vm6 = vmand %vm17926_vm2, %vm4266_vm7 }
 0x664   : > { %v6222_v0 = vpop.f32.mrf.mxu2  ;;  %vm17984_vm1 = vmand %vm7914_vm9, %vm7924_vm11 }
 0x665   : > { %v6257_v25 = vadd.f32 %v6222_v0, %v6045_v3  ;;  %vm17997_vm12 = vmand %vm17984_vm1, %vm4213_vm5 }
 0x666   : > { %vm18039_vm10 = vmand %vm17984_vm1, %vm4266_vm7 }
 0x667   : > { %v17872_v49 = vpop.f32.mrf.mxu3 }
 0x668   : > { %19701 = vst [vmem:[#allocation53_spill] sm:$0xff] %v17872_v49 }
 0x669   : > { %7739 = vmatmul.bf16.gmra.mxu2 %v7569_v50  ;;  %v7259_v22 = vpop.f32.mrf.mxu1 }
 0x66a   : > { %v7334_v2 = vadd.f32 %v7259_v22, %v17690_v35  ;;  %v17915_v35 = vld [vmem:[%s19430_s4 + $0x3] ss:$0 sm:$0xff]  ;;  %v13250_v22 = vld [vmem:[%s19429_s3 + $0x130] sm:$0xff] }
 0x66b   : > { %9486 = vmatpush.bf16.msrb.mxu2 %v13250_v22 }
 0x66c   : > { %v6225_v28 = vpop.f32.mrf.mxu2  ;;  %7298 = vmatmul.bf16.gmra.mxu1 %v14967_v38 }
 0x66d   : > { %v17876_v3 = vadd.f32 %v6225_v28, %v6046_v57  ;;  %v13205_v57 = vld [vmem:[%s19429_s3 + $0x28] sm:$0xff]  ;;  %v17889_v28 = vpop.f32.mrf.mxu0 }
 0x66e   : > { %8596 = vmatpush.bf16.msra.mxu0 %v13205_v57  ;;  %v7580_v57 = vshrl.u32 %v13187_v54, 16 }
 0x66f   : > { %19702 = vst [vmem:[#allocation54_spill] sm:$0xff] %v17876_v3  ;;  %v6668_v0 = vpop.f32.mrf.mxu3 }
 0x670   : > { %v17884_v43 = vadd.f32 %v6668_v0, %v6257_v25  ;;  %v7578_v25 = vsel %vm5281_vm4, %v7568_v11, %v7577_v63  ;;  %v14969_v0 = vld [vmem:[#allocation2 + $0x94] sm:$0xff]  }
 0x671   : > { %v7261_v29 = vpop.f32.mrf.mxu1 }
 0x672   : > { %19703 = vst [vmem:[#allocation55_spill] sm:$0xff] %v17884_v43  ;;  %8597 = vmatpush.bf16.msra.mxu0 %v13204_v24 }
 0x674   : > { %v6227_v50 = vpop.f32.mrf.mxu2 }
 0x675   : > { %v17891_v38 = vadd.f32 %v6227_v50, %v6047_v13  ;;  %v17905_v13 = vld [vmem:[%s19430_s4 + $0x2] ss:$0 sm:$0xff]  ;;  %v7583_v50 = vshll.u32 %v13187_v54, 16 }
 0x676   : > { %8598 = vmatpush.bf16.msra.mxu0 %v13203_v19 }
 0x677   : > { %19704 = vst [vmem:[#allocation56_spill] sm:$0xff] %v17891_v38  ;;  %v17923_v38 = vpop.f32.mrf.mxu0  ;;  %v7585_v19 = vrot.slane %v7583_v50, 2 }
 0x679   : > { %7744 = vmatmul.bf16.gmra.mxu2 %v7578_v25  ;;  %v7264_v11 = vpop.f32.mrf.mxu1  ;;  %v13242_v25 = vld [vmem:[%s19429_s3 + $0xf0] sm:$0xff] }
 0x67a   : > { %9304 = vmatpush.bf16.msrb.mxu1 %v13242_v25 }
 0x67c   : > { %v7705_v36 = vpop.f32.mrf.mxu2  ;;  %7303 = vmatmul.bf16.gmra.mxu1 %v14969_v0  ;;  %v13201_v0 = vld [vmem:[%s19429_s3 + $0x8] sm:$0xff] }
 0x67d   : > { %v7780_v24 = vadd.f32 %v7705_v36, %v7334_v2  ;;  %v13202_v2 = vld [vmem:[%s19429_s3 + $0x10] sm:$0xff]  ;;  %v7582_v36 = vrot.slane %v7580_v57, 1 }
 0x67e   : > { %8599 = vmatpush.bf16.msra.mxu0 %v13202_v2  ;;  %v13188_v2 = vld [vmem:[#allocation2 + $0xa4] sm:$0xff]  ;;  %9305 = vmatpush.bf16.msrb.mxu1 %v13241_v12  ;;  %v13234_v12 = vld [vmem:[%s19429_s3 + $0xb0] sm:$0xff] }
 0x67f   : > { %v7811_v3 = vmul.f32 %v17905_v13, %v7780_v24  ;;  %v7335_v24 = vadd.f32 %v7261_v29, %v17701_v59  ;;  %v7586_v57 = vor.u32 %v7585_v19, %v7582_v36  ;;  %v7336_v36 = vadd.f32 %v7264_v11, %v17705_v56 }
 0x680   : > { %v7592_v19 = vshll.u32 %v13188_v2, 16 }
 0x681   : > { %v7842_v43 = vadd.f32 %v17915_v35, %v7811_v3  ;;  %v7266_v14 = vpop.f32.mrf.mxu1  ;;  %v7587_v59 = vsel %vm5281_vm4, %v7577_v63, %v7586_v57  ;;  %v13235_v63 = vld [vmem:[%s19429_s3 + $0xb8] sm:$0xff] }
 0x682   : > { %8600 = vmatpush.bf16.msra.mxu0 %v13201_v0  ;;  %8929 = vmatpush.bf16.msrb.mxu3 %v13235_v63 }
 0x683   : > { %v7872_v49 = vmax.f32 %v7842_v43, 0.0  ;;  %v17946_v43 = vpop.f32.mrf.mxu0 }
 0x684   : > { %v7707_v22 = vpop.f32.mrf.mxu2 }
 0x685   : > { %v8063_v50 = vsel %vm7943_vm3, %v7872_v49, 0.0  ;;  %v7781_v25 = vadd.f32 %v7707_v22, %v7335_v24  ;;  %v7589_v49 = vshrl.u32 %v13188_v2, 16  ;;  %v8155_v24 = vld [vmem:[#allocation3] sm:$0x8] }
 0x686   : > { %v8093_v3 = vpack.c.bf16 %v8063_v50, %v8063_v50  ;;  %8601 = vmatpush.bf16.msra.mxu0 %v13200_v31  ;;  %8930 = vmatpush.bf16.msrb.mxu3 %v13234_v12 }
 0x687   : > { %v7812_v29 = vmul.f32 %v17905_v13, %v7781_v25  ;;  %v7591_v31 = vrot.slane %v7589_v49, 1 }
 0x688   : > { %8123 = vst [vmem:[#allocation3 + $0x4] sm:$0xf] %v8093_v3  ;;  %v8403_v3 = vunpack.c.l.b16 %v8155_v24  ;;  %v7337_v24 = vadd.f32 %v7266_v14, %v17713_v33  ;;  %v13189_v33 = vld [vmem:[#allocation2 + $0xac] sm:$0xff] }
 0x689   : > { %7749 = vmatmul.bf16.gmra.mxu2 %v7587_v59  ;;  %v7269_v22 = vpop.f32.mrf.mxu1  ;;  %v7843_v50 = vadd.f32 %v17915_v35, %v7812_v29  ;;  %v7594_v59 = vrot.slane %v7592_v19, 2 }
 0x68b   : > { %v7873_v2 = vmax.f32 %v7843_v50, 0.0 }
 0x68c   : > { %v7710_v0 = vpop.f32.mrf.mxu2  ;;  %7308 = vmatmul.bf16.gmra.mxu1 %v14971_v16  ;;  %v17963_v16 = vor.u32 %v7594_v59, %v7591_v31 }
 0x68d   : > { %v7782_v23 = vadd.f32 %v7710_v0, %v7336_v36  ;;  %v17960_v36 = vpop.f32.mrf.mxu0  ;;  %v8064_v50 = vsel %vm17926_vm2, %v7873_v2, 0.0 }
 0x68f   : > { %v7813_v25 = vmul.f32 %v17905_v13, %v7782_v23  ;;  %v8156_v56 = vld [vmem:[#allocation3 + $0x4] sm:$0xf] }
 0x690   : > { %v8237_v11 = vunpack.c.l.b16 %v8156_v56 }
 0x691   : > { %v7844_v10 = vadd.f32 %v17915_v35, %v7813_v25  ;;  %v7271_v19 = vpop.f32.mrf.mxu1 }
 0x692   : > { %v8404_v29 = vpack.c.b16 %v8237_v11, %v8403_v3  ;;  %v7596_v3 = vsel %vm5281_vm4, %v7586_v57, %v17963_v16 }
 0x693   : > { %v7874_v23 = vmax.f32 %v7844_v10, 0.0 }
 0x694   : > { %v7712_v49 = vpop.f32.mrf.mxu2  ;;  %v8419_v0 = vshrl.u32 %v8404_v29, 16  ;;  %v8422_v63 = vshll.u32 %v8404_v29, 16 }
 0x695   : > { %v8065_v25 = vsel %vm7975_vm6, %v7874_v23, 0.0  ;;  %v7783_v56 = vadd.f32 %v7712_v49, %v7337_v24  ;;  %v7338_v24 = vadd.f32 %v7269_v22, %v17724_v21  ;;  %v7598_v49 = vshrl.u32 %v13189_v33, 16  ;;  %v17972_v5 = vpop.f32.mrf.mxu0  ;;  %v13249_v21 = vld [vmem:[%s19429_s3 + $0x128] sm:$0xff] }
 0x696   : > { %v13870_v62 = vpack.c.bf16 %v8065_v25, %v8064_v50  ;;  %v8421_v8 = vrot.slane %v8419_v0, 3  ;;  %v8424_v14 = vrot.slane %v8422_v63, 4  ;;  %v7601_v50 = vshll.u32 %v13189_v33, 16  ;;  %9487 = vmatpush.bf16.msrb.mxu2 %v13249_v21 }
 0x697   : > { %v7814_v29 = vmul.f32 %v17905_v13, %v7783_v56  ;;  %v14973_v56 = vld [vmem:[#allocation2 + $0xa4] sm:$0xff]   ;;  %v7600_v33 = vrot.slane %v7598_v49, 1  ;;  %v6682_v49 = vadd.f32 %v17738_v47, %v17726_v39  ;;  %v7905_v39 = vadd.s32 2, %v17899_v7 }
 0x698   : > { %14507 = vst [vmem:[#allocation3 + $0x8] sm:$0xff] %v13870_v62   ;;  %v13939_v10 = vunpack.c.l.b16 %v13870_v62  ;;  %v8427_v31 = vshrl.u32 %v13870_v62, 16  ;;  %v8430_v59 = vshll.u32 %v13870_v62, 16  ;;  %v8425_v25 = vor.u32 %v8424_v14, %v8421_v8 }
 0x699   : > { %7754 = vmatmul.bf16.gmra.mxu2 %v7596_v3  ;;  %v7274_v0 = vpop.f32.mrf.mxu1  ;;  %v17975_v62 = vadd.f32 %v17915_v35, %v7814_v29  ;;  %v7339_v29 = vadd.f32 %v7271_v19, %v17734_v51  ;;  %vm7915_vm13 = vcmp.ge.s32.totalorder %v7905_v39, 0  ;;  %vm7925_vm14 = vcmp.lt.s32.totalorder %v7905_v39, 16 }
 0x69a   : > { %v8261_v54 = vpack.c.b16 %v13939_v10, %v8237_v11  ;;  %v8429_v2 = vrot.slane %v8427_v31, 3  ;;  %v8432_v23 = vrot.slane %v8430_v59, 4  ;;  %v7603_v10 = vrot.slane %v7601_v50, 2  ;;  %vm18028_vm15 = vmand %vm7915_vm13, %vm7925_vm14 }
 0x69b   : > { %v19438_v14 = vmax.f32 %v17975_v62, 0.0  ;;  %vm18052_vm0 = vmand %vm18028_vm15, %vm4213_vm5 }
 0x69c   : > { %v7715_v57 = vpop.f32.mrf.mxu2  ;;  %8341 = vmatmul.bf16.vlgmr.msra.gmra.mxu3 %v8261_v54  ;;  %v8433_v63 = vor.u32 %v8432_v23, %v8429_v2  ;;  %7313 = vmatmul.bf16.gmra.mxu1 %v14973_v56  ;;  %vm18114_vm2 = vmand %vm18028_vm15, %vm4266_vm7 }
 0x69d   : > { %v7784_v11 = vadd.f32 %v7715_v57, %v7338_v24  ;;  %v7604_v24 = vor.u32 %v7603_v10, %v7600_v33  ;;  %v8066_v50 = vsel %vm17997_vm12, %v19438_v14, 0.0  ;;  %v18013_v19 = vpop.f32.mrf.mxu0 }
 0x69e   : > { %v8434_v22 = vsel %vm8417_vm8, %v8425_v25, %v8433_v63  ;;  %19711 = vst [vmem:[#allocation6_spill] sm:$0xff] %v18013_v19  ;;  %v14975_v19 = vld [vmem:[#allocation2 + $0xac] sm:$0xff]  }
 0x69f   : > { %v7815_v3 = vmul.f32 %v17905_v13, %v7784_v11  ;;  %8602 = vmatmul.bf16.vlgmr.msra.gmra.mxu0 %v8434_v22  ;;  %v13190_v11 = vld [vmem:[#allocation2 + $0xb4] sm:$0xff]  ;;  %v7605_v56 = vsel %vm5281_vm4, %v17963_v16, %v7604_v24  ;;  %v7128_v22 = vadd.f32 %v17817_v20, %v6682_v49 }
 0x6a1   : > { %v17991_v31 = vadd.f32 %v17915_v35, %v7815_v3  ;;  %v7276_v23 = vpop.f32.mrf.mxu1 }
 0x6a3   : > { %v19437_v54 = vmax.f32 %v17991_v31, 0.0 }
 0x6a4   : > { %v7717_v2 = vpop.f32.mrf.mxu2 }
 0x6a5   : > { %v8067_v57 = vsel %vm17984_vm1, %v19437_v54, 0.0  ;;  %v7785_v25 = vadd.f32 %v7717_v2, %v7339_v29  ;;  %v7340_v29 = vadd.f32 %v7274_v0, %v7128_v22  ;;  %v7607_v2 = vshrl.u32 %v13190_v11, 16 }
 0x6a6   : > { %v13875_v51 = vpack.c.bf16 %v8067_v57, %v8066_v50 }
 0x6a7   : > { %v7816_v3 = vmul.f32 %v17905_v13, %v7785_v25 }
 0x6a8   : > { %14508 = vst [vmem:[#allocation3 + $0x10] sm:$0xff] %v13875_v51   ;;  %v8436_v47 = vshrl.u32 %v13875_v51, 16  ;;  %v8439_v21 = vshll.u32 %v13875_v51, 16  ;;  %v7610_v51 = vshll.u32 %v13190_v11, 16 }
 0x6a9   : > { %7759 = vmatmul.bf16.gmra.mxu2 %v7605_v56  ;;  %v7279_v16 = vpop.f32.mrf.mxu1  ;;  %v18024_v54 = vadd.f32 %v17915_v35, %v7816_v3  ;;  %v7609_v56 = vrot.slane %v7607_v2, 1 }
 0x6aa   : > { %v8438_v33 = vrot.slane %v8436_v47, 3  ;;  %v8441_v10 = vrot.slane %v8439_v21, 4  ;;  %v7612_v39 = vrot.slane %v7610_v51, 2  ;;  %v18032_v47 = vpop.f32.mrf.mxu0 }
 0x6ab   : > { %19714 = vst [vmem:[#allocation5_spill] sm:$0xff] %v18032_v47  ;;  %v19442_v11 = vmax.f32 %v18024_v54, 0.0 }
 0x6ac   : > { %v7720_v50 = vpop.f32.mrf.mxu2  ;;  %v8442_v57 = vor.u32 %v8441_v10, %v8438_v33  ;;  %7318 = vmatmul.bf16.gmra.mxu1 %v14975_v19  ;;  %v18057_v10 = vor.u32 %v7612_v39, %v7609_v56  ;;  %v13239_v39 = vld [vmem:[%s19429_s3 + $0xd8] sm:$0xff] }
 0x6ad   : > { %v7786_v14 = vadd.f32 %v7720_v50, %v7340_v29  ;;  %v13240_v50 = vld [vmem:[%s19429_s3 + $0xe0] sm:$0xff] }
 0x6ae   : > { %v8443_v20 = vsel %vm8417_vm8, %v8433_v63, %v8442_v57  ;;  %9306 = vmatpush.bf16.msrb.mxu1 %v13240_v50 }
 0x6af   : > { %v7817_v49 = vmul.f32 %v17905_v13, %v7786_v14  ;;  %v15227_v0 = vld [vmem:[#allocation3 + $0xc] sm:$0xff]   ;;  %8607 = vmatmul.bf16.gmra.mxu0 %v8443_v20  ;;  %v7129_v14 = vadd.f32 %v17823_v30, %v17749_v44  ;;  %v6684_v44 = vadd.f32 %v17754_v1, %v17742_v46  ;;  %v8068_v30 = vsel %vm18039_vm10, %v19442_v11, 0.0  ;;  %v13191_v20 = vld [vmem:[#allocation2 + $0xbc] sm:$0xff] }
 0x6b0   : > { %8346 = vmatmul.bf16.gmra.mxu3 %v15227_v0  ;;  %v7614_v46 = vsel %vm5281_vm4, %v7604_v24, %v18057_v10  ;;  %v15246_v11 = vld [vmem:[#allocation3 + $0xc] sm:$0xf0]  }
 0x6b1   : > { %v18046_v19 = vadd.f32 %v17915_v35, %v7817_v49  ;;  %v7341_v12 = vadd.f32 %v7276_v23, %v7129_v14  ;;  %v7281_v33 = vpop.f32.mrf.mxu1  ;;  %v13248_v49 = vld [vmem:[%s19429_s3 + $0x120] sm:$0xff]  ;;  %v7130_v0 = vadd.f32 %v17832_v4, %v6684_v44  ;;  %v7616_v4 = vshrl.u32 %v13191_v20, 16 }
 0x6b2   : > { %9488 = vmatpush.bf16.msrb.mxu2 %v13248_v49  ;;  %v18082_v24 = vpop.f32.mrf.mxu0  ;;  %v7619_v44 = vshll.u32 %v13191_v20, 16  ;;  %9307 = vmatpush.bf16.msrb.mxu1 %v13239_v39 }
 0x6b3   : > { %v19439_v22 = vmax.f32 %v18046_v19, 0.0  ;;  %19719 = vst [vmem:[#allocation57_spill] sm:$0xff] %v18082_v24 }
 0x6b4   : > { %v7722_v3 = vpop.f32.mrf.mxu2  ;;  %v7621_v39 = vrot.slane %v7619_v44, 2 }
 0x6b5   : > { %v8069_v29 = vsel %vm18052_vm0, %v19439_v22, 0.0  ;;  %v7787_v23 = vadd.f32 %v7722_v3, %v7341_v12  ;;  %v7342_v3 = vadd.f32 %v7279_v16, %v7130_v0  ;;  %v13238_v16 = vld [vmem:[%s19429_s3 + $0xd0] sm:$0xff]  ;;  %v7394_v0 = vld [vmem:[#allocation2 + $0xc4] sm:$0x3] }
 0x6b6   : > { %v13880_v2 = vpack.c.bf16 %v8069_v29, %v8068_v30  ;;  %9308 = vmatpush.bf16.msrb.mxu1 %v13238_v16 }
 0x6b7   : > { %v7818_v56 = vmul.f32 %v17905_v13, %v7787_v23 }
 0x6b8   : > { %14509 = vst [vmem:[#allocation3 + $0x18] sm:$0xff] %v13880_v2   ;;  %v8445_v1 = vshrl.u32 %v13880_v2, 16  ;;  %v8448_v51 = vshll.u32 %v13880_v2, 16  ;;  %v14977_v2 = vld [vmem:[#allocation2 + $0xb4] sm:$0xff]  }
 0x6b9   : > { %7764 = vmatmul.bf16.gmra.mxu2 %v7614_v46  ;;  %v7284_v29 = vpop.f32.mrf.mxu1  ;;  %v18087_v23 = vadd.f32 %v17915_v35, %v7818_v56  ;;  %v13233_v46 = vld [vmem:[%s19429_s3 + $0xa8] sm:$0xff]  ;;  %v7618_v56 = vrot.slane %v7616_v4, 1 }
 0x6ba   : > { %v8447_v14 = vrot.slane %v8445_v1, 3  ;;  %v8450_v12 = vrot.slane %v8448_v51, 4  ;;  %v13247_v1 = vld [vmem:[%s19429_s3 + $0x118] sm:$0xff]  ;;  %8931 = vmatpush.bf16.msrb.mxu3 %v13233_v46  ;;  %v6686_v46 = vadd.f32 %v17765_v42, %v17756_v53  ;;  %v18125_v16 = vpop.f32.mrf.mxu0  ;;  %v13236_v53 = vld [vmem:[%s19429_s3 + $0xc0] sm:$0xff] }
 0x6bb   : > { %9489 = vmatpush.bf16.msrb.mxu2 %v13247_v1  ;;  %19722 = vst [vmem:[#allocation58_spill] sm:$0xff] %v18125_v16 }
 0x6bc   : > { %v7725_v30 = vpop.f32.mrf.mxu2  ;;  %v18084_v22 = vor.u32 %v8450_v12, %v8447_v14  ;;  %7323 = vmatmul.bf16.gmra.mxu1 %v14977_v2  ;;  %v19441_v14 = vmax.f32 %v18087_v23, 0.0  ;;  %v7131_v12 = vadd.f32 %v17841_v17, %v17760_v15  ;;  %v7473_v2 = vunpack.c.l.b16 %v7394_v0 }
 0x6bd   : > { %v7788_v50 = vadd.f32 %v7725_v30, %v7342_v3  ;;  %v7906_v0 = vadd.s32 3, %v17899_v7 }
 0x6be   : > { %v8452_v51 = vsel %vm8417_vm8, %v8442_v57, %v18084_v22  ;;  %v13237_v57 = vld [vmem:[%s19429_s3 + $0xc8] sm:$0xff]  ;;  %v7343_v4 = vadd.f32 %v7281_v33, %v7131_v12  ;;  %v8070_v1 = vsel %vm18028_vm15, %v19441_v14, 0.0 }
 0x6bf   : > { %v7819_v20 = vmul.f32 %v17905_v13, %v7788_v50  ;;  %v15229_v49 = vld [vmem:[#allocation3 + $0x14] sm:$0xff]   ;;  %8612 = vmatmul.bf16.gmra.mxu0 %v8452_v51  ;;  %v18121_v50 = vor.u32 %v7621_v39, %v7618_v56  ;;  %9309 = vmatpush.bf16.msrb.mxu1 %v13237_v57  ;;  %v18139_v42 = vld [vmem:[#allocation3 + $0x1c] sm:$0xf]  ;;  %v13246_v57 = vld [vmem:[%s19429_s3 + $0x110] sm:$0xff]  ;;  %vm7916_vm3 = vcmp.ge.s32.totalorder %v7906_v0, 0  ;;  %vm7926_vm6 = vcmp.lt.s32.totalorder %v7906_v0, 16 }
 0x6c0   : > { %8351 = vmatmul.bf16.gmra.mxu3 %v15229_v49  ;;  %v7489_v49 = vpack.c.b16 %v7473_v2, %v7473_v2  ;;  %19723 = vst [vmem:[#allocation8_spill] sm:$0xff] %v18139_v42  ;;  %v9936_v2 = vld [vmem:[#allocation3 + $0x18] sm:$0x8]  ;;  %9490 = vmatpush.bf16.msrb.mxu2 %v13246_v57  ;;  %v19443_v16 = vunpack.c.l.b16 %v18139_v42  ;;  %vm18170_vm9 = vmand %vm7916_vm3, %vm7926_vm6 }
 0x6c1   : > { %v18105_v3 = vadd.f32 %v17915_v35, %v7819_v20  ;;  %v18119_v44 = vpop.f32.mrf.mxu1  ;;  %v7623_v56 = vsel %vm5281_vm4, %v18057_v10, %v18121_v50  ;;  %v13245_v10 = vld [vmem:[%s19429_s3 + $0x108] sm:$0xff]  ;;  %v10003_v24 = vunpack.c.l.b16 %v9936_v2  ;;  %vm18187_vm11 = vmand %vm18170_vm9, %vm4213_vm5 }
 0x6c2   : > { %v7628_v14 = vshll.u32 %v7489_v49, 16  ;;  %vm18240_vm3 = vmand %vm18170_vm9, %vm4266_vm7 }
 0x6c3   : > { %v19440_v15 = vmax.f32 %v18105_v3, 0.0  ;;  %9310 = vmatpush.bf16.msrb.mxu1 %v13236_v53  ;;  %v15248_v53 = vld [vmem:[#allocation3 + $0x14] sm:$0xff]  }
 0x6c4   : > { %v7727_v17 = vpop.f32.mrf.mxu2  ;;  %v7630_v2 = vrot.slane %v7628_v14, 2  ;;  %9491 = vmatpush.bf16.msrb.mxu2 %v13245_v10  ;;  %v9136_v14 = vshrl.u32 %v15248_v53, 16  ;;  %v7133_v10 = vadd.f32 %v17863_v40, %v17774_v58 }
 0x6c5   : > { %v8071_v33 = vsel %vm18114_vm2, %v19440_v15, 0.0  ;;  %v7789_v51 = vadd.f32 %v7727_v17, %v7343_v4  ;;  %v7132_v4 = vadd.f32 %v17855_v9, %v6686_v46  ;;  %v7625_v15 = vshrl.u32 %v7489_v49, 16 }
 0x6c6   : > { %v13885_v20 = vpack.c.bf16 %v8071_v33, %v8070_v1 }
 0x6c7   : > { %v7820_v17 = vmul.f32 %v17905_v13, %v7789_v51  ;;  %v7627_v57 = vrot.slane %v7625_v15, 1  ;;  %v9138_v15 = vrot.slane %v9136_v14, 3  ;;  %v7907_v14 = vadd.s32 4, %v17899_v7 }
 0x6c8   : > { %14510 = vst [vmem:[#allocation3 + $0x20] sm:$0xff] %v13885_v20   ;;  %v8454_v39 = vshrl.u32 %v13885_v20, 16  ;;  %v8457_v12 = vshll.u32 %v13885_v20, 16  ;;  %v7344_v20 = vadd.f32 %v7284_v29, %v7132_v4 }
 0x6c9   : > { %7769 = vmatmul.bf16.gmra.mxu2 %v7623_v56  ;;  %v18153_v46 = vpop.f32.mrf.mxu1  ;;  %v18158_v49 = vadd.f32 %v17915_v35, %v7820_v17  ;;  %vm7927_vm13 = vcmp.lt.s32.totalorder %v7907_v14, 16 }
 0x6ca   : > { %v8456_v1 = vrot.slane %v8454_v39, 3  ;;  %v8459_v33 = vrot.slane %v8457_v12, 4  ;;  %v14978_v39 = vld [vmem:[#allocation2 + $0xbc] sm:$0xff]  ;;  %v15031_v12 = vld [vmem:[#allocation3 + $0xc] sm:$0x8] }
 0x6cb   : > { %19724 = vst [vmem:[#allocation10_spill] sm:$0xff] %v18158_v49  ;;  %v15032_v4 = vor.u32 %v15246_v11, %v15031_v12  ;;  %v10028_v11 = vpack.c.b16 %v19443_v16, %v10003_v24  ;;  %v7631_v24 = vor.u32 %v7630_v2, %v7627_v57  ;;  %v19732_v42 = vmax.f32 %v18158_v49, 0.0 }
 0x6cc   : > { %v7730_v9 = vpop.f32.mrf.mxu2  ;;  %v18155_v51 = vor.u32 %v8459_v33, %v8456_v1  ;;  %v13244_v1 = vld [vmem:[%s19429_s3 + $0x100] sm:$0xff]  ;;  %v18166_v33 = vpop.f32.mrf.mxu0  ;;  %7328 = vmatmul.bf16.gmra.mxu1 %v14978_v39 }
 0x6cd   : > { %v7790_v56 = vadd.f32 %v7730_v9, %v7344_v20  ;;  %19725 = vst [vmem:[#allocation4_spill] sm:$0xff] %v18166_v33  ;;  %v9139_v9 = vshll.u32 %v15248_v53, 16  ;;  %v9128_v39 = vshrl.u32 %v15032_v4, 16  ;;  %v9131_v12 = vshll.u32 %v15032_v4, 16  ;;  %9492 = vmatpush.bf16.msrb.mxu2 %v13244_v1 }
 0x6ce   : > { %v8461_v29 = vsel %vm8417_vm8, %v18084_v22, %v18155_v51  ;;  %v10042_v40 = vshrl.u32 %v10028_v11, 16  ;;  %v6688_v53 = vadd.f32 %v17779_v26, %v17767_v45  ;;  %v8072_v57 = vsel %vm18187_vm11, %v19732_v42, 0.0 }
 0x6cf   : > { %v7821_v20 = vmul.f32 %v17905_v13, %v7790_v56  ;;  %v15231_v22 = vld [vmem:[#allocation3 + $0x1c] sm:$0xff]   ;;  %8617 = vmatmul.bf16.gmra.mxu0 %v8461_v29  ;;  %v19729_v56 = vmov 0  ;;  %v7345_v29 = vadd.f32 %v18119_v44, %v7133_v10  ;;  %v9141_v4 = vrot.slane %v9139_v9, 4 }
 0x6d0   : > { %8356 = vmatmul.bf16.gmra.mxu3 %v15231_v22  ;;  %v19730_v56 = vsel %vm18187_vm11, 4294967295, %v19729_v56  ;;  %v14544_v1 = vld [vmem:[#allocation3 + $0x20] sm:$0xff]   ;;  %v7632_v45 = vsel %vm5281_vm4, %v18121_v50, %v7631_v24  ;;  %v9130_v26 = vrot.slane %v9128_v39, 3  ;;  %v9133_v10 = vrot.slane %v9131_v12, 4 }
 0x6d1   : > { %v18181_v0 = vadd.f32 %v17915_v35, %v7821_v20  ;;  %19731 = vst [vmem:[#allocation9_spill] sm:$0xff] %v19730_v56  ;;  %v10045_v20 = vshll.u32 %v10028_v11, 16  ;;  %v7291_v16 = vpop.f32.mrf.mxu1  ;;  %v10044_v33 = vrot.slane %v10042_v40, 3  ;;  %v10053_v9 = vshll.u32 %v14544_v1, 16 }
 0x6d2   : > { %v18213_v24 = vor.u32 %v9141_v4, %v9138_v15  ;;  %vm7917_vm4 = vcmp.ge.s32.totalorder %v7907_v14, 0 }
 0x6d3   : > { %19728 = vst [vmem:[#allocation14_spill] sm:$0xff] %v18181_v0  ;;  %v19447_v58 = vmax.f32 %v18181_v0, 0.0  ;;  %v10047_v49 = vrot.slane %v10045_v20, 4  ;;  %v10055_v20 = vrot.slane %v10053_v9, 4  ;;  %vm18231_vm14 = vmand %vm7917_vm4, %vm7927_vm13 }
 0x6d4   : > { %v7732_v22 = vpop.f32.mrf.mxu2  ;;  %vm18253_vm6 = vmand %vm18231_vm14, %vm4213_vm5 }
 0x6d5   : > { %v8073_v44 = vsel %vm18170_vm9, %v19447_v58, 0.0  ;;  %v7791_v2 = vadd.f32 %v7732_v22, %v7345_v29  ;;  %v13232_v58 = vld [vmem:[%s19429_s3 + $0xa0] sm:$0xff]  ;;  %v10050_v29 = vshrl.u32 %v14544_v1, 16  ;;  %v18209_v22 = vpop.f32.mrf.mxu0  ;;  %v10048_v47 = vor.u32 %v10047_v49, %v10044_v33  ;;  %vm15292_vm4 = vmpackc.low %vm17984_vm1, %vm17997_vm12 }
 0x6d6   : > { %v13890_v11 = vpack.c.bf16 %v8073_v44, %v8072_v57  ;;  %19733 = vst [vmem:[#allocation11_spill] sm:$0xff] %v18209_v22  ;;  %v7134_v57 = vadd.f32 %v17874_v61, %v6688_v53  ;;  %8932 = vmatpush.bf16.msrb.mxu3 %v13232_v58  ;;  %vm18302_vm1 = vmand %vm18231_vm14, %vm4266_vm7 }
 0x6d7   : > { %v7822_v50 = vmul.f32 %v17905_v13, %v7791_v2  ;;  %v10052_v40 = vrot.slane %v10050_v29, 3  ;;  %vm15295_vm12 = vmpackc.low %vm18052_vm0, %vm18039_vm10 }
 0x6d8   : > { %14511 = vst [vmem:[#allocation3 + $0x28] sm:$0xff] %v13890_v11   ;;  %v8463_v42 = vshrl.u32 %v13890_v11, 16  ;;  %v8466_v56 = vshll.u32 %v13890_v11, 16  ;;  %v7346_v44 = vadd.f32 %v18153_v46, %v7134_v57  ;;  %v9134_v11 = vor.u32 %v9133_v10, %v9130_v26  ;;  %v15250_v46 = vld [vmem:[#allocation3 + $0x1c] sm:$0xff]  }
 0x6d9   : > { %7774 = vmatmul.bf16.gmra.mxu2 %v7632_v45  ;;  %v7294_v1 = vpop.f32.mrf.mxu1  ;;  %v18216_v61 = vor.u32 %v10055_v20, %v10052_v40  ;;  %v18219_v53 = vadd.f32 %v17915_v35, %v7822_v50  ;;  %v9145_v14 = vshrl.u32 %v15250_v46, 16  ;;  %v9148_v10 = vshll.u32 %v15250_v46, 16 }
 0x6da   : > { %v8465_v39 = vrot.slane %v8463_v42, 3  ;;  %v8468_v12 = vrot.slane %v8466_v56, 4  ;;  %v9143_v56 = vsel %vm8417_vm8, %v9134_v11, %v18213_v24  ;;  %v6690_v57 = vadd.f32 %v17788_v52, %v17781_v27 }
 0x6db   : > { %v18227_v2 = vsel %vm8417_vm8, %v10048_v47, %v18216_v61  ;;  %v7135_v47 = vadd.f32 %v17889_v28, %v17784_v37  ;;  %v9150_v20 = vrot.slane %v9148_v10, 4  ;;  %v19740_v52 = vmax.f32 %v17975_v62, 0.0  ;;  %v13231_v62 = vld [vmem:[%s19429_s3 + $0x98] sm:$0xff] }
 0x6dc   : > { %v7735_v0 = vpop.f32.mrf.mxu2  ;;  %v8469_v22 = vor.u32 %v8468_v12, %v8465_v39  ;;  %9311 = vmatmul.bf16.vlgmr.msrb.gmra.mxu1 %v9143_v56  ;;  %v19741_v56 = vmax.f32 %v17991_v31, 0.0  ;;  %8933 = vmatpush.bf16.msrb.mxu3 %v13231_v62  ;;  %v19745_v62 = vmax.f32 %v18046_v19, 0.0 }
 0x6dd   : > { %v7792_v15 = vadd.f32 %v7735_v0, %v7346_v44  ;;  %v7883_v0 = vmax.f32 %v18219_v53, 0.0  ;;  %v18257_v42 = vpop.f32.mrf.mxu0  ;;  %v7347_v29 = vadd.f32 %v7291_v16, %v7135_v47  ;;  %v9147_v16 = vrot.slane %v9145_v14, 3 }
 0x6de   : > { %v8470_v58 = vsel %vm8417_vm8, %v18155_v51, %v8469_v22 }
 0x6df   : > { %v7823_v4 = vmul.f32 %v17905_v13, %v7792_v15  ;;  %v15233_v33 = vld [vmem:[#allocation3 + $0x24] sm:$0xff]   ;;  %8622 = vmatmul.bf16.gmra.mxu0 %v8470_v58  ;;  %v8074_v50 = vsel %vm18240_vm3, %v7883_v0, 0.0  ;;  %v7136_v15 = vadd.f32 %v17923_v38, %v6690_v57  ;;  %v15293_v58 = vpack.c.bf16 %v19741_v56, %v19740_v52 }
 0x6e0   : > { %8361 = vmatmul.bf16.gmra.mxu3 %v15233_v33  ;;  %v9151_v46 = vor.u32 %v9150_v20, %v9147_v16  ;;  %v15252_v57 = vld [vmem:[#allocation3 + $0x24] sm:$0xff]  }
 0x6e1   : > { %v18247_v45 = vadd.f32 %v17915_v35, %v7823_v4  ;;  %v7296_v28 = vpop.f32.mrf.mxu1  ;;  %v7348_v47 = vadd.f32 %v7294_v1, %v7136_v15  ;;  %v9157_v16 = vshll.u32 %v15252_v57, 16 }
 0x6e2   : > { %v9152_v31 = vsel %vm8417_vm8, %v18213_v24, %v9151_v46  ;;  %v9154_v24 = vshrl.u32 %v15252_v57, 16 }
 0x6e3   : > { %v7884_v9 = vmax.f32 %v18247_v45, 0.0 }
 0x6e4   : > { %v7737_v37 = vpop.f32.mrf.mxu2 }
 0x6e5   : > { %v8075_v39 = vsel %vm18253_vm6, %v7884_v9, 0.0  ;;  %v7793_v12 = vadd.f32 %v7737_v37, %v7347_v29  ;;  %v18280_v29 = vpop.f32.mrf.mxu0 }
 0x6e6   : > { %v13895_v40 = vpack.c.bf16 %v8075_v39, %v8074_v50 }
 0x6e7   : > { %v7824_v27 = vmul.f32 %v17905_v13, %v7793_v12  ;;  %v7137_v12 = vadd.f32 %v17946_v43, %v17796_v18  ;;  %v6692_v18 = vadd.f32 %v17800_v55, %v17790_v32 }
 0x6e8   : > { %14512 = vst [vmem:[#allocation3 + $0x30] sm:$0xff] %v13895_v40   ;;  %v8472_v44 = vshrl.u32 %v13895_v40, 16  ;;  %v8475_v11 = vshll.u32 %v13895_v40, 16 }
 0x6e9   : > { %15294 = vmatmul.msk.bf16.vlgmr.msrb.gmra.mxu2 %vm15292_vm4, %v15293_v58  ;;  %v7299_v10 = vpop.f32.mrf.mxu1  ;;  %v18283_v59 = vadd.f32 %v17915_v35, %v7824_v27  ;;  %v7349_v20 = vadd.f32 %v7296_v28, %v7137_v12  ;;  %v9156_v28 = vrot.slane %v9154_v24, 3  ;;  %v9159_v58 = vrot.slane %v9157_v16, 4 }
 0x6ea   : > { %v8474_v4 = vrot.slane %v8472_v44, 3  ;;  %v8477_v33 = vrot.slane %v8475_v11, 4 }
 0x6eb   : > { %v7885_v39 = vmax.f32 %v18283_v59, 0.0 }
 0x6ec   : > { %v7740_v14 = vpop.f32.mrf.mxu2  ;;  %v8478_v38 = vor.u32 %v8477_v33, %v8474_v4  ;;  %9316 = vmatmul.bf16.gmra.mxu1 %v9152_v31  ;;  %v7908_v33 = vadd.s32 5, %v17899_v7 }
 0x6ed   : > { %v7794_v8 = vadd.f32 %v7740_v14, %v7348_v47  ;;  %v8076_v43 = vsel %vm18231_vm14, %v7885_v39, 0.0  ;;  %v18317_v4 = vpop.f32.mrf.mxu0  ;;  %v7138_v47 = vadd.f32 %v17960_v36, %v6692_v18 }
 0x6ee   : > { %v8479_v37 = vsel %vm8417_vm8, %v8469_v22, %v8478_v38  ;;  %vm7918_vm13 = vcmp.ge.s32.totalorder %v7908_v33, 0  ;;  %vm7928_vm4 = vcmp.lt.s32.totalorder %v7908_v33, 16 }
 0x6ef   : > { %v7825_v1 = vmul.f32 %v17905_v13, %v7794_v8  ;;  %v15235_v50 = vld [vmem:[#allocation3 + $0x2c] sm:$0xff]   ;;  %8627 = vmatmul.bf16.gmra.mxu0 %v8479_v37  ;;  %v19744_v8 = vmax.f32 %v18024_v54, 0.0  ;;  %v18330_v37 = vor.u32 %v9159_v58, %v9156_v28  ;;  %vm18338_vm10 = vmand %vm7918_vm13, %vm7928_vm4 }
 0x6f0   : > { %8366 = vmatmul.bf16.gmra.mxu3 %v15235_v50  ;;  %v7350_v50 = vadd.f32 %v7299_v10, %v7138_v47  ;;  %v15254_v16 = vld [vmem:[#allocation3 + $0x2c] sm:$0xff]   ;;  %vm18355_vm0 = vmand %vm18338_vm10, %vm4213_vm5 }
 0x6f1   : > { %v18296_v40 = vadd.f32 %v17915_v35, %v7825_v1  ;;  %v7301_v15 = vpop.f32.mrf.mxu1  ;;  %v15296_v31 = vpack.c.bf16 %v19745_v62, %v19744_v8  ;;  %v9161_v54 = vsel %vm8417_vm8, %v9151_v46, %v18330_v37  ;;  %v7909_v62 = vadd.s32 6, %v17899_v7 }
 0x6f3   : > { %v7886_v44 = vmax.f32 %v18296_v40, 0.0  ;;  %vm7919_vm13 = vcmp.ge.s32.totalorder %v7909_v62, 0  ;;  %vm7929_vm4 = vcmp.lt.s32.totalorder %v7909_v62, 16 }
 0x6f4   : > { %v7742_v11 = vpop.f32.mrf.mxu2 }
 0x6f5   : > { %v8077_v27 = vsel %vm18302_vm1, %v7886_v44, 0.0  ;;  %v7795_v52 = vadd.f32 %v7742_v11, %v7349_v20  ;;  %v18343_v18 = vpop.f32.mrf.mxu0 }
 0x6f6   : > { %v13900_v56 = vpack.c.bf16 %v8077_v27, %v8076_v43  ;;  %v7139_v27 = vadd.f32 %v17972_v5, %v17805_v60  ;;  %v6694_v60 = vadd.f32 %v17809_v41, %v17802_v34  ;;  %v13230_v34 = vld [vmem:[%s19429_s3 + $0x90] sm:$0xff]  ;;  %v19750_v41 = vld [vmem:[#allocation6_spill] sm:$0xff] }
 0x6f7   : > { %v7826_v14 = vmul.f32 %v17905_v13, %v7795_v52  ;;  %v9163_v52 = vshrl.u32 %v15254_v16, 16  ;;  %8934 = vmatpush.bf16.msrb.mxu3 %v13230_v34 }
 0x6f8   : > { %14513 = vst [vmem:[#allocation3 + $0x38] sm:$0xff] %v13900_v56   ;;  %v8481_v32 = vshrl.u32 %v13900_v56, 16  ;;  %v8484_v55 = vshll.u32 %v13900_v56, 16  ;;  %v9166_v56 = vshll.u32 %v15254_v16, 16  ;;  %v7351_v28 = vadd.f32 %v7301_v15, %v7139_v27 }
 0x6f9   : > { %15297 = vmatmul.msk.bf16.gmra.mxu2 %vm15295_vm12, %v15296_v31  ;;  %v7304_v12 = vpop.f32.mrf.mxu1  ;;  %v18333_v63 = vadd.f32 %v17915_v35, %v7826_v14  ;;  %v9165_v15 = vrot.slane %v9163_v52, 3  ;;  %vm15298_vm12 = vmpackc.low %vm18114_vm2, %vm18028_vm15 }
 0x6fa   : > { %v8483_v57 = vrot.slane %v8481_v32, 3  ;;  %v8486_v1 = vrot.slane %v8484_v55, 4  ;;  %v9168_v8 = vrot.slane %v9166_v56, 4  ;;  %v18388_v56 = vpop.f32.mrf.mxu3  ;;  %vm18398_vm15 = vmand %vm7919_vm13, %vm7929_vm4 }
 0x6fb   : > { %v7887_v43 = vmax.f32 %v18333_v63, 0.0  ;;  %vm18407_vm2 = vmand %vm18338_vm10, %vm4266_vm7 }
 0x6fc   : > { %v7745_v36 = vpop.f32.mrf.mxu2  ;;  %v8487_v24 = vor.u32 %v8486_v1, %v8483_v57  ;;  %9321 = vmatmul.bf16.gmra.mxu1 %v9161_v54  ;;  %v7140_v1 = vadd.f32 %v19750_v41, %v6694_v60  ;;  %vm15301_vm13 = vmpackc.low %vm18170_vm9, %vm18187_vm11 }
 0x6fd   : > { %v7796_v21 = vadd.f32 %v7745_v36, %v7350_v50  ;;  %v8078_v5 = vsel %vm18355_vm0, %v7887_v43, 0.0  ;;  %v19751_v36 = vmax.f32 %v18087_v23, 0.0  ;;  %vm18484_vm9 = vmand %vm18398_vm15, %vm4266_vm7 }
 0x6fe   : > { %v8488_v19 = vsel %vm8417_vm8, %v8478_v38, %v8487_v24  ;;  %v7352_v27 = vadd.f32 %v7304_v12, %v7140_v1  ;;  %vm15304_vm11 = vmpackc.low %vm18253_vm6, %vm18240_vm3 }
 0x6ff   : > { %v7827_v10 = vmul.f32 %v17905_v13, %v7796_v21  ;;  %v15237_v11 = vld [vmem:[#allocation3 + $0x34] sm:$0xff]   ;;  %8632 = vmatmul.bf16.gmra.mxu0 %v8488_v19  ;;  %v19752_v21 = vmax.f32 %v18105_v3, 0.0  ;;  %v18384_v19 = vor.u32 %v9168_v8, %v9165_v15 }
 0x700   : > { %8371 = vmatmul.bf16.gmra.mxu3 %v15237_v11  ;;  %v18386_v11 = vpop.f32.mrf.mxu0  ;;  %v15256_v60 = vld [vmem:[#allocation3 + $0x34] sm:$0xff]  }
 0x701   : > { %v18349_v46 = vadd.f32 %v17915_v35, %v7827_v10  ;;  %v7306_v32 = vpop.f32.mrf.mxu1  ;;  %v15299_v54 = vpack.c.bf16 %v19752_v21, %v19751_v36  ;;  %v9172_v62 = vshrl.u32 %v15256_v60, 16  ;;  %v19762_v36 = vld [vmem:[#allocation44_spill] sm:$0xff] }
 0x703   : > { %v19451_v58 = vmax.f32 %v18349_v46, 0.0 }
 0x704   : > { %v7747_v33 = vpop.f32.mrf.mxu2 }
 0x705   : > { %v8079_v55 = vsel %vm18338_vm10, %v19451_v58, 0.0  ;;  %v7797_v47 = vadd.f32 %v7747_v33, %v7351_v28  ;;  %v9170_v28 = vsel %vm8417_vm8, %v18330_v37, %v18384_v19  ;;  %v19800_v37 = vld [vmem:[#allocation56_spill] sm:$0xff] }
 0x706   : > { %v13905_v14 = vpack.c.bf16 %v8079_v55, %v8078_v5 }
 0x707   : > { %v7828_v50 = vmul.f32 %v17905_v13, %v7797_v47 }
 0x708   : > { %14514 = vst [vmem:[#allocation3 + $0x40] sm:$0xff] %v13905_v14   ;;  %v8490_v31 = vshrl.u32 %v13905_v14, 16  ;;  %v8493_v57 = vshll.u32 %v13905_v14, 16  ;;  %v19758_v14 = vld [vmem:[#allocation5_spill] sm:$0xff]  ;;  %v18427_v21 = vpop.f32.mrf.mxu0 }
 0x709   : > { %15300 = vmatmul.msk.bf16.gmra.mxu2 %vm15298_vm12, %v15299_v54  ;;  %v7309_v25 = vpop.f32.mrf.mxu1  ;;  %v18391_v23 = vadd.f32 %v17915_v35, %v7828_v50  ;;  %vm18420_vm12 = vmand %vm18398_vm15, %vm4213_vm5  ;;  %v19761_v50 = vld [vmem:[#allocation42_spill] sm:$0xff] }
 0x70a   : > { %v8492_v16 = vrot.slane %v8490_v31, 3  ;;  %v8495_v10 = vrot.slane %v8493_v57, 4  ;;  %v9175_v31 = vshll.u32 %v15256_v60, 16  ;;  %v19763_v60 = vld [vmem:[#allocation57_spill] sm:$0xff] }
 0x70b   : > { %v19450_v47 = vmax.f32 %v18391_v23, 0.0 }
 0x70c   : > { %v7750_v52 = vpop.f32.mrf.mxu2  ;;  %v8496_v30 = vor.u32 %v8495_v10, %v8492_v16  ;;  %9326 = vmatmul.bf16.gmra.mxu1 %v9170_v28 }
 0x70d   : > { %v7798_v3 = vadd.f32 %v7750_v52, %v7352_v27  ;;  %v8080_v54 = vsel %vm18407_vm2, %v19450_v47, 0.0  ;;  %v9174_v27 = vrot.slane %v9172_v62, 3  ;;  %v9177_v52 = vrot.slane %v9175_v31, 4  ;;  %v19767_v31 = vld [vmem:[#allocation14_spill] sm:$0xff]  ;;  %v19775_v47 = vld [vmem:[#allocation4_spill] sm:$0xff] }
 0x70e   : > { %v8497_v33 = vsel %vm8417_vm8, %v8487_v24, %v8496_v30  ;;  %v19757_v24 = vld [vmem:[#allocation41_spill] sm:$0xff] }
 0x70f   : > { %v7829_v12 = vmul.f32 %v17905_v13, %v7798_v3  ;;  %v15239_v55 = vld [vmem:[#allocation3 + $0x3c] sm:$0xff]   ;;  %8637 = vmatmul.bf16.gmra.mxu0 %v8497_v33  ;;  %v7141_v13 = vadd.f32 %v19758_v14, %v19757_v24  ;;  %v18437_v3 = vpop.f32.mrf.mxu3 }
 0x710   : > { %8376 = vmatmul.bf16.gmra.mxu3 %v15239_v55  ;;  %v18443_v55 = vld [vmem:[%s19430_s4 + $0x2] ss:$0 sm:$0xff]  ;;  %v6705_v8 = vadd.f32 %v18437_v3, %v19800_v37 }
 0x711   : > { %v18414_v15 = vadd.f32 %v17915_v35, %v7829_v12  ;;  %v7353_v57 = vadd.f32 %v7306_v32, %v7141_v13  ;;  %v7311_v1 = vpop.f32.mrf.mxu1  ;;  %v6696_v35 = vadd.f32 %v19762_v36, %v19761_v50  ;;  %v19765_v13 = vld [vmem:[#allocation10_spill] sm:$0xff]  ;;  %v18454_v50 = vor.u32 %v9177_v52, %v9174_v27  ;;  %v13229_v27 = vld [vmem:[%s19429_s3 + $0x88] sm:$0xff] }
 0x712   : > { %v19766_v62 = vmax.f32 %v19765_v13, 0.0  ;;  %8935 = vmatpush.bf16.msrb.mxu3 %v13229_v27 }
 0x713   : > { %v19449_v34 = vmax.f32 %v18414_v15, 0.0  ;;  %v7142_v12 = vadd.f32 %v19763_v60, %v6696_v35 }
 0x714   : > { %v7752_v41 = vpop.f32.mrf.mxu2 }
 0x715   : > { %v8081_v16 = vsel %vm18420_vm12, %v19449_v34, 0.0  ;;  %v7799_v32 = vadd.f32 %v7752_v41, %v7353_v57  ;;  %v19768_v57 = vmax.f32 %v19767_v31, 0.0  ;;  %v7910_v34 = vadd.s32 7, %v17899_v7 }
 0x716   : > { %v13910_v10 = vpack.c.bf16 %v8081_v16, %v8080_v54  ;;  %v7354_v54 = vadd.f32 %v7309_v25, %v7142_v12  ;;  %v9179_v25 = vsel %vm8417_vm8, %v18384_v19, %v18454_v50 }
 0x717   : > { %v7830_v24 = vmul.f32 %v18443_v55, %v7799_v32  ;;  %v15302_v41 = vpack.c.bf16 %v19768_v57, %v19766_v62  ;;  %v18459_v32 = vld [vmem:[%s19430_s4 + $0x3] ss:$0 sm:$0xff]  ;;  %v19769_v57 = vld [vmem:[#allocation45_spill] sm:$0xff]  ;;  %vm7920_vm4 = vcmp.ge.s32.totalorder %v7910_v34, 0 }
 0x718   : > { %14515 = vst [vmem:[#allocation3 + $0x48] sm:$0xff] %v13910_v10   ;;  %v8499_v28 = vshrl.u32 %v13910_v10, 16  ;;  %v8502_v33 = vshll.u32 %v13910_v10, 16 }
 0x719   : > { %15303 = vmatmul.msk.bf16.gmra.mxu2 %vm15301_vm13, %v15302_v41  ;;  %v7314_v10 = vpop.f32.mrf.mxu1  ;;  %v18462_v17 = vadd.f32 %v18459_v32, %v7830_v24  ;;  %v19770_v41 = vld [vmem:[#allocation58_spill] sm:$0xff]  ;;  %vm7930_vm13 = vcmp.lt.s32.totalorder %v7910_v34, 16 }
 0x71a   : > { %v8501_v36 = vrot.slane %v8499_v28, 3  ;;  %v8504_v35 = vrot.slane %v8502_v33, 4  ;;  %v15258_v28 = vld [vmem:[#allocation3 + $0x3c] sm:$0xff]   ;;  %vm18526_vm3 = vmand %vm7920_vm4, %vm7930_vm13 }
 0x71b   : > { %v19452_v31 = vmax.f32 %v18462_v17, 0.0  ;;  %vm18541_vm6 = vmand %vm18526_vm3, %vm4213_vm5 }
 0x71c   : > { %v7755_v16 = vpop.f32.mrf.mxu2  ;;  %v8505_v60 = vor.u32 %v8504_v35, %v8501_v36  ;;  %v8603_v13 = vpop.f32.mrf.mxu0  ;;  %9331 = vmatmul.bf16.gmra.mxu1 %v9179_v25  ;;  %v7143_v36 = vadd.f32 %v19770_v41, %v19769_v57  ;;  %v19773_v25 = vld [vmem:[#allocation48_spill] sm:$0xff]  ;;  %vm18611_vm13 = vmand %vm18526_vm3, %vm4266_vm7 }
 0x71d   : > { %v7800_v14 = vadd.f32 %v7755_v16, %v7354_v54  ;;  %v9184_v54 = vshll.u32 %v15258_v28, 16 }
 0x71e   : > { %v8506_v52 = vsel %vm8417_vm8, %v8496_v30, %v8505_v60  ;;  %v9181_v30 = vshrl.u32 %v15258_v28, 16  ;;  %v7355_v16 = vadd.f32 %v7311_v1, %v7143_v36 }
 0x71f   : > { %v7831_v33 = vmul.f32 %v18443_v55, %v7800_v14  ;;  %v15241_v12 = vld [vmem:[#allocation3 + $0x44] sm:$0xff]   ;;  %v8342_v62 = vpop.f32.mrf.mxu3  ;;  %8642 = vmatmul.bf16.gmra.mxu0 %v8506_v52  ;;  %v19774_v52 = vld [vmem:[#allocation47_spill] sm:$0xff]  ;;  %v9186_v36 = vrot.slane %v9184_v54, 4 }
 0x720   : > { %v18472_v24 = vadd.f32 %v8603_v13, %v8342_v62  ;;  %8381 = vmatmul.bf16.gmra.mxu3 %v15241_v12  ;;  %v8082_v12 = vsel %vm18398_vm15, %v19452_v31, 0.0  ;;  %v9183_v41 = vrot.slane %v9181_v30, 3  ;;  %v15305_v30 = vpack.c.bf16 %v7884_v9, %v7883_v0 }
 0x721   : > { %v18478_v35 = vadd.f32 %v18459_v32, %v7831_v33  ;;  %v7316_v27 = vpop.f32.mrf.mxu1  ;;  %v6698_v33 = vadd.f32 %v19774_v52, %v19773_v25 }
 0x722   : > { %v18512_v54 = vor.u32 %v9186_v36, %v9183_v41  ;;  %v19779_v41 = vld [vmem:[#allocation11_spill] sm:$0xff] }
 0x723   : > { %v19455_v14 = vmax.f32 %v18478_v35, 0.0  ;;  %v7144_v58 = vadd.f32 %v19775_v47, %v6698_v33 }
 0x724   : > { %v7757_v13 = vpop.f32.mrf.mxu2  ;;  %v18499_v28 = vpop.f32.mrf.mxu0  ;;  %v9188_v0 = vsel %vm8417_vm8, %v18454_v50, %v18512_v54 }
 0x725   : > { %v8083_v62 = vsel %vm18484_vm9, %v19455_v14, 0.0  ;;  %v7801_v57 = vadd.f32 %v7757_v13, %v7355_v16 }
 0x726   : > { %v13915_v1 = vpack.c.bf16 %v8083_v62, %v8082_v12  ;;  %v7356_v12 = vadd.f32 %v7314_v10, %v7144_v58  ;;  %v15260_v58 = vld [vmem:[#allocation3 + $0x44] sm:$0xff]  }
 0x727   : > { %v7832_v31 = vmul.f32 %v18443_v55, %v7801_v57  ;;  %v18519_v53 = vpop.f32.mrf.mxu3 }
 0x728   : > { %14516 = vst [vmem:[#allocation3 + $0x50] sm:$0xff] %v13915_v1   ;;  %v8508_v25 = vshrl.u32 %v13915_v1, 16  ;;  %v8511_v52 = vshll.u32 %v13915_v1, 16  ;;  %v19778_v1 = vld [vmem:[#allocation49_spill] sm:$0xff] }
 0x729   : > { %15306 = vmatmul.msk.bf16.gmra.mxu2 %vm15304_vm11, %v15305_v30  ;;  %v7319_v33 = vpop.f32.mrf.mxu1  ;;  %v18517_v51 = vadd.f32 %v18459_v32, %v7832_v31  ;;  %v7145_v36 = vadd.f32 %v19779_v41, %v19778_v1  ;;  %vm15307_vm11 = vmpackc.low %vm18302_vm1, %vm18231_vm14 }
 0x72a   : > { %v8510_v16 = vrot.slane %v8508_v25, 3  ;;  %v8513_v13 = vrot.slane %v8511_v52, 4  ;;  %v9190_v25 = vshrl.u32 %v15260_v58, 16  ;;  %v9193_v52 = vshll.u32 %v15260_v58, 16 }
 0x72b   : > { %v19453_v57 = vmax.f32 %v18517_v51, 0.0  ;;  %v7357_v30 = vadd.f32 %v7316_v27, %v7145_v36 }
 0x72c   : > { %v7760_v47 = vpop.f32.mrf.mxu2  ;;  %v18514_v62 = vor.u32 %v8513_v13, %v8510_v16  ;;  %v8608_v45 = vpop.f32.mrf.mxu0  ;;  %9336 = vmatmul.bf16.gmra.mxu1 %v9188_v0  ;;  %v9192_v36 = vrot.slane %v9190_v25, 3 }
 0x72d   : > { %v7802_v26 = vadd.f32 %v7760_v47, %v7356_v12  ;;  %v19782_v12 = vld [vmem:[#allocation46_spill] sm:$0xff]  ;;  %v19783_v47 = vld [vmem:[#allocation51_spill] sm:$0xff]  ;;  %v8084_v0 = vsel %vm18541_vm6, %v19453_v57, 0.0  ;;  %v7911_v57 = vadd.s32 8, %v17899_v7 }
 0x72e   : > { %v8515_v9 = vsel %vm8417_vm8, %v8505_v60, %v18514_v62  ;;  %v13281_v60 = vld [vmem:[%s19429_s3 + $0x1c8] sm:$0xff] }
 0x72f   : > { %v7833_v10 = vmul.f32 %v18443_v55, %v7802_v26  ;;  %v15243_v31 = vld [vmem:[#allocation3 + $0x4c] sm:$0xff]   ;;  %8647 = vmatmul.bf16.gmra.mxu0 %v8515_v9  ;;  %v6700_v26 = vadd.f32 %v19783_v47, %v19782_v12  ;;  %v9195_v12 = vrot.slane %v9193_v52, 4  ;;  %v15308_v52 = vpack.c.bf16 %v7886_v44, %v7885_v39 }
 0x730   : > { %8386 = vmatmul.bf16.gmra.mxu3 %v15243_v31  ;;  %v13271_v47 = vld [vmem:[%s19429_s3 + $0x178] sm:$0xff]  ;;  %vm7921_vm4 = vcmp.ge.s32.totalorder %v7911_v57, 0  ;;  %vm7931_vm14 = vcmp.lt.s32.totalorder %v7911_v57, 16 }
 0x731   : > { %v18535_v50 = vadd.f32 %v18459_v32, %v7833_v10  ;;  %v7321_v1 = vpop.f32.mrf.mxu1  ;;  %9843 = vmatpush.bf16.msrb.mxu0 %v13271_v47  ;;  %vm18602_vm1 = vmand %vm7921_vm4, %vm7931_vm14 }
 0x732   : > { %vm15310_vm4 = vmpackc.low %vm18338_vm10, %vm18355_vm0 }
 0x733   : > { %v19454_v16 = vmax.f32 %v18535_v50, 0.0  ;;  %v8347_v31 = vpop.f32.mrf.mxu3  ;;  %vm18697_vm10 = vmand %vm18602_vm1, %vm4266_vm7 }
 0x734   : > { %v7762_v13 = vpop.f32.mrf.mxu2  ;;  %v8610_v58 = vpop.f32.mrf.mxu0  ;;  %v18558_v41 = vadd.f32 %v8608_v45, %v8347_v31  ;;  %v7146_v45 = vadd.f32 %v18257_v42, %v6700_v26  ;;  %v13269_v31 = vld [vmem:[%s19429_s3 + $0x168] sm:$0xff]  ;;  %vm15313_vm0 = vmpackc.low %vm18420_vm12, %vm18407_vm2 }
 0x735   : > { %v8085_v9 = vsel %vm18526_vm3, %v19454_v16, 0.0  ;;  %v7803_v10 = vadd.f32 %v7762_v13, %v7357_v30  ;;  %v13228_v13 = vld [vmem:[%s19429_s3 + $0x80] sm:$0xff] }
 0x736   : > { %v18556_v27 = vpack.c.bf16 %v8085_v9, %v8084_v0  ;;  %v13270_v0 = vld [vmem:[%s19429_s3 + $0x170] sm:$0xff]  ;;  %v18583_v9 = vor.u32 %v9195_v12, %v9192_v36  ;;  %8936 = vmatpush.bf16.msrb.mxu3 %v13228_v13  ;;  %v7358_v49 = vadd.f32 %v7319_v33, %v7146_v45 }
 0x737   : > { %v7834_v25 = vmul.f32 %v18443_v55, %v7803_v10  ;;  %9844 = vmatpush.bf16.msrb.mxu0 %v13270_v0  ;;  %v15262_v36 = vld [vmem:[#allocation3 + $0x4c] sm:$0xff]  }
 0x738   : > { %14517 = vst [vmem:[#allocation3 + $0x58] sm:$0xff] %v18556_v27   ;;  %v8517_v16 = vshrl.u32 %v18556_v27, 16  ;;  %v8520_v30 = vshll.u32 %v18556_v27, 16  ;;  %v9197_v33 = vsel %vm8417_vm8, %v18512_v54, %v18583_v9  ;;  %v13256_v0 = vld [vmem:[#allocation3 + $0x30] sm:$0xff] }
 0x739   : > { %15309 = vmatmul.msk.bf16.gmra.mxu2 %vm15307_vm11, %v15308_v52  ;;  %v18588_v59 = vadd.f32 %v18459_v32, %v7834_v25  ;;  %v13268_v52 = vld [vmem:[%s19429_s3 + $0x160] sm:$0xff]  ;;  %vm18627_vm11 = vmand %vm18602_vm1, %vm4213_vm5 }
 0x73a   : > { %v8519_v42 = vrot.slane %v8517_v16, 3  ;;  %v8522_v26 = vrot.slane %v8520_v30, 4 }
 0x73b   : > { %v8349_v40 = vpop.f32.mrf.mxu3  ;;  %v19456_v13 = vmax.f32 %v18588_v59, 0.0  ;;  %9845 = vmatpush.bf16.msrb.mxu0 %v13269_v31 }
 0x73c   : > { %v7765_v10 = vpop.f32.mrf.mxu2  ;;  %v18585_v22 = vor.u32 %v8522_v26, %v8519_v42  ;;  %v8613_v44 = vpop.f32.mrf.mxu0  ;;  %v18593_v16 = vadd.f32 %v8610_v58, %v8349_v40  ;;  %9341 = vmatmul.bf16.gmra.mxu1 %v9197_v33  ;;  %v9199_v42 = vshrl.u32 %v15262_v36, 16  ;;  %v9202_v26 = vshll.u32 %v15262_v36, 16  ;;  %v19792_v40 = vld [vmem:[#allocation53_spill] sm:$0xff] }
 0x73d   : > { %v7804_v39 = vadd.f32 %v7765_v10, %v7358_v49  ;;  %v7324_v58 = vpop.f32.mrf.mxu1  ;;  %v8086_v33 = vsel %vm18611_vm13, %v19456_v13, 0.0 }
 0x73e   : > { %v8524_v57 = vsel %vm8417_vm8, %v18514_v62, %v18585_v22  ;;  %v19788_v62 = vld [vmem:[#allocation50_spill] sm:$0xff]  ;;  %v9204_v14 = vrot.slane %v9202_v26, 4 }
 0x73f   : > { %v7835_v12 = vmul.f32 %v18443_v55, %v7804_v39  ;;  %v15244_v30 = vld [vmem:[#allocation3 + $0x54] sm:$0xff]   ;;  %8652 = vmatmul.bf16.gmra.mxu0 %v8524_v57  ;;  %v7147_v45 = vadd.f32 %v18280_v29, %v19788_v62  ;;  %v19791_v39 = vld [vmem:[#allocation52_spill] sm:$0xff] }
 0x740   : > { %8391 = vmatmul.bf16.gmra.mxu3 %v15244_v30  ;;  %v6702_v31 = vadd.f32 %v19792_v40, %v19791_v39  ;;  %9846 = vmatpush.bf16.msrb.mxu0 %v13268_v52  ;;  %v13267_v39 = vld [vmem:[%s19429_s3 + $0x158] sm:$0xff] }
 0x741   : > { %v18618_v25 = vadd.f32 %v18459_v32, %v7835_v12  ;;  %v7359_v29 = vadd.f32 %v7321_v1, %v7147_v45  ;;  %v9201_v45 = vrot.slane %v9199_v42, 3  ;;  %v13266_v42 = vld [vmem:[%s19429_s3 + $0x150] sm:$0xff]  ;;  %v15264_v38 = vld [vmem:[#allocation3 + $0x54] sm:$0xff]  }
 0x742   : > { %v7148_v40 = vadd.f32 %v18317_v4, %v6702_v31 }
 0x743   : > { %v19458_v49 = vmax.f32 %v18618_v25, 0.0  ;;  %v8352_v30 = vpop.f32.mrf.mxu3  ;;  %v18660_v4 = vor.u32 %v9204_v14, %v9201_v45  ;;  %v19794_v45 = vld [vmem:[#allocation55_spill] sm:$0xff] }
 0x744   : > { %v7767_v10 = vpop.f32.mrf.mxu2  ;;  %v8615_v36 = vpop.f32.mrf.mxu0  ;;  %v18642_v62 = vadd.f32 %v8613_v44, %v8352_v30  ;;  %v19793_v44 = vmax.f32 %v18349_v46, 0.0  ;;  %9847 = vmatpush.bf16.msrb.mxu0 %v13267_v39  ;;  %v9208_v30 = vshrl.u32 %v15264_v38, 16  ;;  %v7149_v39 = vadd.f32 %v18343_v18, %v19794_v45 }
 0x745   : > { %v8087_v57 = vsel %vm18627_vm11, %v19458_v49, 0.0  ;;  %v7805_v12 = vadd.f32 %v7767_v10, %v7359_v29  ;;  %v7326_v26 = vpop.f32.mrf.mxu1  ;;  %v7360_v29 = vadd.f32 %v7324_v58, %v7148_v40  ;;  %v9206_v46 = vsel %vm8417_vm8, %v18583_v9, %v18660_v4  ;;  %v13265_v58 = vld [vmem:[%s19429_s3 + $0x148] sm:$0xff]  ;;  %v13307_v9 = vld [vmem:[%s19429_s3 + $0x238] sm:$0xff] }
 0x746   : > { %v13925_v1 = vpack.c.bf16 %v8087_v57, %v8086_v33  ;;  %v15311_v52 = vpack.c.bf16 %v19793_v44, %v7887_v43  ;;  %v9211_v44 = vshll.u32 %v15264_v38, 16  ;;  %10757 = vmatpush.bf16.msra.mxu2 %v13307_v9  ;;  %v9210_v45 = vrot.slane %v9208_v30, 3 }
 0x747   : > { %v7836_v13 = vmul.f32 %v18443_v55, %v7805_v12 }
 0x748   : > { %14518 = vst [vmem:[#allocation3 + $0x60] sm:$0xff] %v13925_v1   ;;  %9848 = vmatpush.bf16.msrb.mxu0 %v13266_v42 }
 0x749   : > { %15312 = vmatmul.msk.bf16.gmra.mxu2 %vm15310_vm4, %v15311_v52  ;;  %v18663_v20 = vadd.f32 %v18459_v32, %v7836_v13  ;;  %v13980_v13 = vunpack.c.h.b16 %v18556_v27  ;;  %v13264_v27 = vld [vmem:[%s19429_s3 + $0x140] sm:$0xff]  ;;  %v13287_v52 = vld [vmem:[%s19429_s3 + $0x1f8] sm:$0xff]  ;;  %vm8768_vm4 = vsmask.f32 7424 }
 0x74a   : > { %10399 = vmatpush.bf16.msra.mxu1 %v13287_v52 }
 0x74b   : > { %v8354_v63 = vpop.f32.mrf.mxu3  ;;  %v19457_v1 = vmax.f32 %v18663_v20, 0.0 }
 0x74c   : > { %v7770_v10 = vpop.f32.mrf.mxu2  ;;  %v8618_v33 = vpop.f32.mrf.mxu0  ;;  %v18665_v43 = vadd.f32 %v8615_v36, %v8354_v63  ;;  %9346 = vmatmul.bf16.gmra.mxu1 %v9206_v46  ;;  %v13279_v36 = vld [vmem:[%s19429_s3 + $0x1b8] sm:$0xff]  ;;  %9849 = vmatpush.bf16.msrb.mxu0 %v13265_v58 }
 0x74d   : > { %v7806_v31 = vadd.f32 %v7770_v10, %v7360_v29  ;;  %10217 = vmatpush.bf16.msra.mxu3 %v13279_v36  ;;  %v7361_v10 = vadd.f32 %v7326_v26, %v7149_v39  ;;  %v7329_v46 = vpop.f32.mrf.mxu1  ;;  %v13216_v39 = vld [vmem:[#allocation3 + $0x4] sm:$0xff] }
 0x74f   : > { %v7837_v57 = vmul.f32 %v18443_v55, %v7806_v31  ;;  %v8179_v14 = vld [vmem:[#allocation3 + $0x60] sm:$0xf]  ;;  %v19797_v31 = vld [vmem:[#allocation54_spill] sm:$0xff] }
 0x750   : > { %v8260_v12 = vunpack.c.l.b16 %v8179_v14  ;;  %v6704_v63 = vadd.f32 %v18388_v56, %v19797_v31  ;;  %v9213_v56 = vrot.slane %v9211_v44, 4  ;;  %9850 = vmatpush.bf16.msrb.mxu0 %v13264_v27  ;;  %v18716_v31 = vld [vmem:[#allocation3 + $0xc] sm:$0xff]  ;;  %v19799_v44 = vmax.f32 %v18414_v15, 0.0 }
 0x751   : > { %v18685_v40 = vadd.f32 %v18459_v32, %v7837_v57  ;;  %v13278_v15 = vld [vmem:[%s19429_s3 + $0x1b0] sm:$0xff] }
 0x752   : > { %v8272_v18 = vpack.c.b16 %v8260_v12, %v13980_v13  ;;  %v8416_v29 = vpack.c.b16 %v8260_v12, %v8260_v12  ;;  %v8088_v13 = vsel %vm18602_vm1, %v19457_v1, 0.0  ;;  %v7912_v1 = vadd.s32 9, %v17899_v7  ;;  %10218 = vmatpush.bf16.msra.mxu3 %v13278_v15 }
 0x753   : > { %v7898_v38 = vmax.f32 %v18685_v40, 0.0  ;;  %v8357_v36 = vpop.f32.mrf.mxu3 }
 0x754   : > { %v7772_v57 = vpop.f32.mrf.mxu2  ;;  %8396 = vmatmul.bf16.gmra.mxu3 %v8272_v18  ;;  %v8526_v14 = vshrl.u32 %v8416_v29, 16  ;;  %v8529_v58 = vshll.u32 %v8416_v29, 16  ;;  %v8620_v9 = vpop.f32.mrf.mxu0  ;;  %v18714_v18 = vadd.f32 %v8618_v33, %v8357_v36  ;;  %v19798_v33 = vmax.f32 %v18391_v23, 0.0 }
 0x755   : > { %v8089_v26 = vsel %vm18697_vm10, %v7898_v38, 0.0  ;;  %v7807_v12 = vadd.f32 %v7772_v57, %v7361_v10  ;;  %v7150_v10 = vadd.f32 %v18386_v11, %v6704_v63  ;;  %v8777_v63 = vshll.u32 %v18716_v31, 16  ;;  %v7331_v36 = vpop.f32.mrf.mxu1 }
 0x756   : > { %v18712_v52 = vpack.c.bf16 %v8089_v26, %v8088_v13  ;;  %v8528_v30 = vrot.slane %v8526_v14, 3  ;;  %v8531_v29 = vrot.slane %v8529_v58, 4  ;;  %v15314_v27 = vpack.c.bf16 %v19799_v44, %v19798_v33  ;;  %v13252_v13 = vld [vmem:[#allocation3 + $0x10] sm:$0xff] }
 0x757   : > { %v7838_v57 = vmul.f32 %v18443_v55, %v7807_v12  ;;  %v8772_v14 = vshll.u32 %v13216_v39, 16  ;;  %v18732_v58 = vor.u32 %v9213_v56, %v9210_v45  ;;  %v7362_v11 = vadd.f32 %v7329_v46, %v7150_v10  ;;  %v18741_v12 = vld [vmem:[#allocation3 + $0x18] sm:$0xff] }
 0x758   : > { %14519 = vst [vmem:[#allocation3 + $0x68] sm:$0xff] %v18712_v52   ;;  %v8532_v49 = vor.u32 %v8531_v29, %v8528_v30  ;;  %vm7922_vm2 = vcmp.ge.s32.totalorder %v7912_v1, 0  ;;  %vm7932_vm12 = vcmp.lt.s32.totalorder %v7912_v1, 16  ;;  %v15266_v30 = vld [vmem:[#allocation3 + $0x5c] sm:$0xff]   ;;  %v13306_v29 = vld [vmem:[%s19429_s3 + $0x230] sm:$0xff]  ;;  %v8779_v33 = vrot.slane %v8777_v63, 1 }
 0x759   : > { %15315 = vmatmul.msk.bf16.gmra.mxu2 %vm15313_vm0, %v15314_v27  ;;  %v7869_v26 = vadd.f32 %v18459_v32, %v7838_v57  ;;  %v8774_v46 = vrot.slane %v8772_v14, 1  ;;  %v9215_v3 = vsel %vm8417_vm8, %v18660_v4, %v18732_v58  ;;  %vm18753_vm14 = vmand %vm7922_vm2, %vm7932_vm12  ;;  %v7151_v44 = vadd.f32 %v18427_v21, %v6705_v8 }
 0x75a   : > { %v8533_v7 = vsel %vm8417_vm8, %v18585_v22, %v8532_v49  ;;  %v9686_v4 = vshll.u32 %v13252_v13, 16  ;;  %10758 = vmatpush.bf16.msra.mxu2 %v13306_v29  ;;  %v9691_v1 = vshll.u32 %v18741_v12, 16  ;;  %vm7970_vm0 = vmand %vm18753_vm14, %vm4213_vm5  ;;  %v9220_v37 = vshll.u32 %v15266_v30, 16 }
 0x75b   : > { %8657 = vmatmul.bf16.gmra.mxu0 %v8533_v7  ;;  %v8359_v49 = vpop.f32.mrf.mxu3  ;;  %v7899_v27 = vmax.f32 %v7869_v26, 0.0  ;;  %v13286_v26 = vld [vmem:[%s19429_s3 + $0x1f0] sm:$0xff]  ;;  %vm15316_vm5 = vmpackc.low %vm18484_vm9, %vm18398_vm15 }
 0x75c   : > { %v7775_v23 = vpop.f32.mrf.mxu2  ;;  %v8623_v45 = vpop.f32.mrf.mxu0  ;;  %v18743_v56 = vadd.f32 %v8620_v9, %v8359_v49  ;;  %9351 = vmatmul.bf16.gmra.mxu1 %v9215_v3  ;;  %v8770_v9 = vshrl.u32 %v13216_v39, 16  ;;  %v7363_v39 = vadd.f32 %v7331_v36, %v7151_v44  ;;  %v9688_v15 = vrot.slane %v9686_v4, 1  ;;  %v18776_v44 = vld [vmem:[#allocation3 + $0x14] sm:$0xff]  ;;  %vm8002_vm2 = vmand %vm18753_vm14, %vm4266_vm7 }
 0x75d   : > { %v7808_v22 = vadd.f32 %v7775_v23, %v7362_v11  ;;  %v9217_v11 = vshrl.u32 %v15266_v30, 16  ;;  %v9684_v23 = vshrl.u32 %v13252_v13, 16  ;;  %v18771_v3 = vrot.slane %v9691_v1, 1  ;;  %10400 = vmatpush.bf16.msra.mxu1 %v13286_v26  ;;  %v18778_v4 = vpop.f32.mrf.mxu1  ;;  %v13305_v26 = vld [vmem:[%s19429_s3 + $0x228] sm:$0xff]  ;;  %vm15319_vm7 = vmpackc.low %vm18526_vm3, %vm18541_vm6 }
 0x75e   : > { %v8775_v7 = vor.u32 %v8774_v46, %v8770_v9  ;;  %v9222_v9 = vrot.slane %v9220_v37, 4  ;;  %v8785_v19 = vshll.u32 %v18776_v44, 16  ;;  %10759 = vmatpush.bf16.msra.mxu2 %v13305_v26  ;;  %vm15322_vm15 = vmpackc.low %vm18627_vm11, %vm18611_vm13 }
 0x75f   : > { %v7839_v57 = vmul.f32 %v18443_v55, %v7808_v22  ;;  %v8090_v22 = vsel %vm7970_vm0, %v7899_v27, 0.0  ;;  %v9689_v27 = vor.u32 %v9688_v15, %v9684_v23  ;;  %v8781_v23 = vshrl.u32 %v18716_v31, 16  ;;  %vm15325_vm9 = vmpackc.low %vm18697_vm10, %vm18602_vm1 }
 0x760   : > { %v8780_v21 = vsel %vm8768_vm4, %v8775_v7, %v8779_v33  ;;  %v19804_v7 = vmax.f32 %v18478_v35, 0.0  ;;  %v18812_v15 = vrot.slane %v8785_v19, 1  ;;  %v18843_v19 = vld [vmem:[#allocation3 + $0x1c] sm:$0xff] }
 0x761   : > { %v7870_v14 = vadd.f32 %v18459_v32, %v7839_v57  ;;  %v9219_v57 = vrot.slane %v9217_v11, 3 }
 0x763   : > { %v7900_v63 = vmax.f32 %v7870_v14, 0.0  ;;  %v8362_v46 = vpop.f32.mrf.mxu3 }
 0x764   : > { %v7777_v8 = vpop.f32.mrf.mxu2  ;;  %8937 = vmatmul.bf16.vlgmr.msrb.gmra.mxu3 %v8780_v21  ;;  %v8625_v36 = vpop.f32.mrf.mxu0  ;;  %v18773_v29 = vadd.f32 %v8623_v45, %v8362_v46  ;;  %v19803_v45 = vmax.f32 %v18462_v17, 0.0  ;;  %v13285_v17 = vld [vmem:[%s19429_s3 + $0x1e8] sm:$0xff] }
 0x765   : > { %v8091_v48 = vsel %vm18753_vm14, %v7900_v63, 0.0  ;;  %v7809_v49 = vadd.f32 %v7777_v8, %v7363_v39  ;;  %10401 = vmatpush.bf16.msra.mxu1 %v13285_v17  ;;  %v18806_v63 = vld [vmem:[#allocation3 + $0x20] sm:$0xff]  ;;  %v13284_v8 = vld [vmem:[%s19429_s3 + $0x1e0] sm:$0xff] }
 0x766   : > { %v13935_v30 = vpack.c.bf16 %v8091_v48, %v8090_v22  ;;  %v15317_v1 = vpack.c.bf16 %v19804_v7, %v19803_v45  ;;  %v15267_v21 = vld [vmem:[#allocation3 + $0x64] sm:$0xff]   ;;  %v8783_v22 = vor.u32 %v8781_v23, %v8779_v33  ;;  %v18820_v48 = vpop.f32.mrf.mxu1  ;;  %v9699_v31 = vshll.u32 %v18806_v63, 16 }
 0x767   : > { %v7840_v13 = vmul.f32 %v18443_v55, %v7809_v49  ;;  %v9694_v55 = vsel %vm8768_vm4, %v9689_v27, %v18771_v3  ;;  %v9226_v46 = vshrl.u32 %v15267_v21, 16  ;;  %v13277_v33 = vld [vmem:[%s19429_s3 + $0x1a8] sm:$0xff] }
 0x768   : > { %14520 = vst [vmem:[#allocation3 + $0x70] sm:$0xff] %v13935_v30   ;;  %v8788_v30 = vsel %vm8768_vm4, %v8783_v22, %v18812_v15  ;;  %v18838_v7 = vrot.slane %v9699_v31, 1  ;;  %10219 = vmatpush.bf16.msra.mxu3 %v13277_v33 }
 0x769   : > { %v7871_v14 = vadd.f32 %v18459_v32, %v7840_v13  ;;  %15318 = vmatmul.msk.bf16.gmra.mxu2 %vm15316_vm5, %v15317_v1  ;;  %v18795_v32 = vor.u32 %v9222_v9, %v9219_v57  ;;  %10402 = vmatpush.bf16.msra.mxu1 %v13284_v8  ;;  %v13304_v57 = vld [vmem:[%s19429_s3 + $0x220] sm:$0xff]  ;;  %v9695_v13 = vshrl.u32 %v18741_v12, 16  ;;  %v9228_v1 = vrot.slane %v9226_v46, 3 }
 0x76a   : > { %10760 = vmatpush.bf16.msra.mxu2 %v13304_v57 }
 0x76b   : > { %v7901_v5 = vmax.f32 %v7871_v14, 0.0  ;;  %9851 = vmatmul.bf16.vlgmr.msrb.gmra.mxu0 %v9694_v55  ;;  %v8364_v11 = vpop.f32.mrf.mxu3  ;;  %v9224_v39 = vsel %vm8417_vm8, %v18732_v58, %v18795_v32  ;;  %v13283_v58 = vld [vmem:[%s19429_s3 + $0x1d8] sm:$0xff]  ;;  %v9697_v12 = vor.u32 %v9695_v13, %v18771_v3  ;;  %v18884_v13 = vld [vmem:[#allocation3 + $0x28] sm:$0xff] }
 0x76c   : > { %v8628_v37 = vpop.f32.mrf.mxu0  ;;  %v18801_v10 = vadd.f32 %v8625_v36, %v8364_v11  ;;  %9356 = vmatmul.bf16.gmra.mxu1 %v9224_v39  ;;  %v18822_v49 = vpop.f32.mrf.mxu2  ;;  %v9229_v36 = vshll.u32 %v15267_v21, 16  ;;  %v19806_v39 = vmax.f32 %v18535_v50, 0.0  ;;  %v13303_v3 = vld [vmem:[%s19429_s3 + $0x218] sm:$0xff]  ;;  %v14028_v50 = vunpack.c.h.b16 %v18712_v52 }
 0x76d   : > { %v8092_v35 = vsel %vm8002_vm2, %v7901_v5, 0.0  ;;  %10403 = vmatpush.bf16.msra.mxu1 %v13283_v58  ;;  %v13282_v5 = vld [vmem:[%s19429_s3 + $0x1d0] sm:$0xff]  ;;  %v9702_v8 = vsel %vm8768_vm4, %v9697_v12, %v18838_v7 }
 0x76e   : > { %v8122_v6 = vpack.c.bf16 %v8092_v35, %v8092_v35  ;;  %v9231_v55 = vrot.slane %v9229_v36, 4  ;;  %10761 = vmatpush.bf16.msra.mxu2 %v13303_v3  ;;  %v18872_v26 = vpop.f32.mrf.mxu1  ;;  %v13302_v58 = vld [vmem:[%s19429_s3 + $0x210] sm:$0xff] }
 0x76f   : > { %v18834_v14 = vld [vmem:[#allocation3 + $0x70] sm:$0xff]  }
 0x770   : > { %8152 = vst [vmem:[#allocation3 + $0x78] sm:$0xf] %v8122_v6  ;;  %v10140_v11 = vshrl.u32 %v18834_v14, 16  ;;  %v19805_v6 = vmax.f32 %v18517_v51, 0.0  ;;  %v18863_v23 = vor.u32 %v9231_v55, %v9228_v1  ;;  %v8793_v51 = vshll.u32 %v18843_v19, 16  ;;  %v13280_v1 = vld [vmem:[%s19429_s3 + $0x1c0] sm:$0xff] }
 0x771   : > { %10404 = vmatpush.bf16.msra.mxu1 %v13282_v5 }
 0x772   : > { %v15320_v21 = vpack.c.bf16 %v19806_v39, %v19805_v6  ;;  %v10142_v31 = vrot.slane %v10140_v11, 3  ;;  %v8795_v12 = vrot.slane %v8793_v51, 1  ;;  %10762 = vmatpush.bf16.msra.mxu2 %v13302_v58  ;;  %v9126_v11 = vpack.c.b16 %v14028_v50, %v14028_v50 }
 0x773   : > { %v8367_v9 = vpop.f32.mrf.mxu3  ;;  %v9707_v39 = vshll.u32 %v18884_v13, 16 }
 0x774   : > { %8942 = vmatmul.bf16.gmra.mxu3 %v8788_v30  ;;  %v8630_v27 = vpop.f32.mrf.mxu0  ;;  %v18836_v45 = vadd.f32 %v8628_v37, %v8367_v9  ;;  %v10143_v37 = vshll.u32 %v18834_v14, 16  ;;  %v18874_v22 = vpop.f32.mrf.mxu2  ;;  %v9233_v9 = vsel %vm8417_vm8, %v18795_v32, %v18863_v23  ;;  %v9235_v3 = vshrl.u32 %v9126_v11, 16 }
 0x775   : > { %10405 = vmatpush.bf16.msra.mxu1 %v13281_v60 }
 0x776   : > { %v10145_v46 = vrot.slane %v10143_v37, 4 }
 0x777   : > { %v9960_v17 = vld [vmem:[#allocation3 + $0x78] sm:$0xf] }
 0x778   : > { %v18846_v35 = vunpack.c.l.b16 %v9960_v17  ;;  %v8789_v17 = vshrl.u32 %v18776_v44, 16  ;;  %v18893_v37 = vor.u32 %v10145_v46, %v10142_v31  ;;  %v9703_v31 = vshrl.u32 %v18806_v63, 16 }
 0x779   : > { %15321 = vmatmul.msk.bf16.gmra.mxu2 %vm15319_vm7, %v15320_v21  ;;  %10406 = vmatpush.bf16.msra.mxu1 %v13280_v1  ;;  %v9709_v46 = vrot.slane %v9707_v39, 1  ;;  %v19809_v1 = vmax.f32 %v18588_v59, 0.0 }
 0x77a   : > { %v10040_v34 = vpack.c.b16 %v18846_v35, %v18846_v35  ;;  %19807 = vst [vmem:[#allocation20_spill] sm:$0xff] %v18893_v37  ;;  %v8791_v6 = vor.u32 %v8789_v17, %v18812_v15  ;;  %v18905_v15 = vpop.f32.mrf.mxu1 }
 0x77b   : > { %9856 = vmatmul.bf16.gmra.mxu0 %v9702_v8  ;;  %v8369_v33 = vpop.f32.mrf.mxu3  ;;  %v9238_v8 = vshll.u32 %v9126_v11, 16 }
 0x77c   : > { %v10149_v36 = vshrl.u32 %v10040_v34, 16  ;;  %v10152_v30 = vshll.u32 %v10040_v34, 16  ;;  %v8633_v57 = vpop.f32.mrf.mxu0  ;;  %v18879_v52 = vadd.f32 %v8630_v27, %v8369_v33  ;;  %9361 = vmatmul.bf16.gmra.mxu1 %v9233_v9  ;;  %v13301_v27 = vld [vmem:[%s19429_s3 + $0x208] sm:$0xff]  ;;  %v8796_v44 = vsel %vm8768_vm4, %v8791_v6, %v8795_v12  ;;  %v13300_v34 = vld [vmem:[%s19429_s3 + $0x200] sm:$0xff]  ;;  %v18907_v60 = vpop.f32.mrf.mxu2 }
 0x77d   : > { %10763 = vmatpush.bf16.msra.mxu2 %v13301_v27  ;;  %v9237_v33 = vrot.slane %v9235_v3, 3  ;;  %v9240_v9 = vrot.slane %v9238_v8, 4  ;;  %v9715_v3 = vshll.u32 %v13256_v0, 16 }
 0x77e   : > { %v10151_v55 = vrot.slane %v10149_v36, 3  ;;  %v10154_v5 = vrot.slane %v10152_v30, 4  ;;  %v13220_v36 = vld [vmem:[#allocation3 + $0x24] sm:$0xff]  ;;  %v9705_v30 = vor.u32 %v9703_v31, %v18838_v7  ;;  %v13276_v7 = vld [vmem:[%s19429_s3 + $0x1a0] sm:$0xff] }
 0x77f   : > { %v9241_v17 = vor.u32 %v9240_v9, %v9237_v33  ;;  %10220 = vmatpush.bf16.msra.mxu3 %v13276_v7  ;;  %v9717_v31 = vrot.slane %v9715_v3, 1  ;;  %v15291_v9 = vld [vmem:[#allocation3 + $0x20] sm:$0xff]  }
 0x780   : > { %v10155_v32 = vor.u32 %v10154_v5, %v10151_v55  ;;  %v19810_v55 = vmax.f32 %v18618_v25, 0.0  ;;  %v9710_v63 = vsel %vm8768_vm4, %v9705_v30, %v9709_v46  ;;  %v8801_v5 = vshll.u32 %v13220_v36, 16  ;;  %v13221_v30 = vld [vmem:[#allocation3 + $0x2c] sm:$0xff] }
 0x781   : > { %10764 = vmatpush.bf16.msra.mxu2 %v13300_v34  ;;  %v9242_v59 = vsel %vm8417_vm8, %v18863_v23, %v9241_v17  ;;  %v8797_v25 = vshrl.u32 %v18843_v19, 16  ;;  %v9711_v23 = vshrl.u32 %v18884_v13, 16  ;;  %v19811_v19 = vmax.f32 %v18663_v20, 0.0 }
 0x782   : > { %v18899_v21 = vsel %vm8417_vm8, %v18893_v37, %v10155_v32  ;;  %v8803_v32 = vrot.slane %v8801_v5, 1  ;;  %v18930_v6 = vpop.f32.mrf.mxu1  ;;  %v8809_v47 = vshll.u32 %v13221_v30, 16  ;;  %v19814_v5 = vld [vmem:[#allocation8_spill] sm:$0xff] }
 0x783   : > { %19808 = vst [vmem:[#allocation15_spill] sm:$0xff] %v18899_v21  ;;  %v8372_v51 = vpop.f32.mrf.mxu3  ;;  %v9713_v33 = vor.u32 %v9711_v23, %v9709_v46  ;;  %v13288_v46 = vld [vmem:[#allocation3 + $0x1c] sm:$0xff]  ;;  %v19815_v17 = vunpack.c.l.b16 %v19814_v5 }
 0x784   : > { %8947 = vmatmul.bf16.gmra.mxu3 %v8796_v44  ;;  %v8635_v50 = vpop.f32.mrf.mxu0  ;;  %v18909_v58 = vadd.f32 %v8633_v57, %v8372_v51  ;;  %v15323_v57 = vpack.c.bf16 %v19810_v55, %v19809_v1  ;;  %v18932_v39 = vpop.f32.mrf.mxu2  ;;  %v8799_v44 = vor.u32 %v8797_v25, %v8795_v12  ;;  %v15326_v12 = vpack.c.bf16 %v7898_v38, %v19811_v19 }
 0x785   : > { %v14031_v1 = vunpack.c.l.b16 %v15291_v9  ;;  %v9718_v13 = vsel %vm8768_vm4, %v9713_v33, %v9717_v31  ;;  %v10600_v38 = vshll.u32 %v13288_v46, 16  ;;  %v10598_v19 = vshrl.u32 %v13288_v46, 16 }
 0x786   : > { %v8804_v8 = vsel %vm8768_vm4, %v8799_v44, %v8803_v32 }
 0x787   : > { %v10327_v20 = vpack.c.b16 %v14031_v1, %v19815_v17  ;;  %v10602_v3 = vrot.slane %v10600_v38, 1  ;;  %v13290_v38 = vld [vmem:[#allocation3 + $0x2c] sm:$0xff] }
 0x789   : > { %15324 = vmatmul.msk.bf16.gmra.mxu2 %vm15322_vm15, %v15323_v57 }
 0x78a   : > { %v18946_v55 = vpop.f32.mrf.mxu1 }
 0x78b   : > { %9861 = vmatmul.bf16.gmra.mxu0 %v9710_v63  ;;  %v8374_v27 = vpop.f32.mrf.mxu3  ;;  %19812 = vst [vmem:[#allocation7_spill] sm:$0xff] %v18946_v55  ;;  %v13289_v63 = vld [vmem:[#allocation3 + $0x24] sm:$0xff] }
 0x78c   : > { %v8638_v54 = vpop.f32.mrf.mxu0  ;;  %v18925_v11 = vadd.f32 %v8635_v50, %v8374_v27  ;;  %9366 = vmatmul.bf16.gmra.mxu1 %v9242_v59  ;;  %v18948_v57 = vpop.f32.mrf.mxu2  ;;  %v13257_v27 = vld [vmem:[#allocation3 + $0x38] sm:$0xff]  ;;  %v8811_v59 = vrot.slane %v8809_v47, 1  ;;  %v10605_v25 = vshll.u32 %v13289_v63, 16 }
 0x78d   : > { %19813 = vst [vmem:[#allocation16_spill] sm:$0xff] %v18948_v57  ;;  %v9727_v21 = vshrl.u32 %v13257_v27, 16 }
 0x792   : > { %v18956_v23 = vpop.f32.mrf.mxu1 }
 0x793   : > { %v8377_v34 = vpop.f32.mrf.mxu3  ;;  %19816 = vst [vmem:[#allocation13_spill] sm:$0xff] %v18956_v23 }
 0x794   : > { %8952 = vmatmul.bf16.gmra.mxu3 %v8804_v8  ;;  %v8640_v51 = vpop.f32.mrf.mxu0  ;;  %v18935_v50 = vadd.f32 %v8638_v54, %v8377_v34  ;;  %v8805_v54 = vshrl.u32 %v13220_v36, 16  ;;  %v9723_v8 = vshll.u32 %v13257_v27, 16  ;;  %v18958_v33 = vpop.f32.mrf.mxu2  ;;  %v13274_v27 = vld [vmem:[%s19429_s3 + $0x190] sm:$0xff] }
 0x795   : > { %19817 = vst [vmem:[#allocation12_spill] sm:$0xff] %v18958_v33 }
 0x796   : > { %v8807_v44 = vor.u32 %v8805_v54, %v8803_v32  ;;  %v10603_v32 = vor.u32 %v10602_v3, %v10598_v19  ;;  %v9725_v47 = vrot.slane %v9723_v8, 1 }
 0x798   : > { %v8812_v34 = vsel %vm8768_vm4, %v8807_v44, %v8811_v59 }
 0x799   : > { %15327 = vmatmul.msk.bf16.gmra.mxu2 %vm15325_vm9, %v15326_v12  ;;  %v10607_v12 = vrot.slane %v10605_v25, 1  ;;  %v15090_v25 = vld [vmem:[#allocation3 + $0x24] sm:$0xff]  }
 0x79a   : > { %v18967_v44 = vpop.f32.mrf.mxu1 }
 0x79b   : > { %9866 = vmatmul.bf16.gmra.mxu0 %v9718_v13  ;;  %v8379_v42 = vpop.f32.mrf.mxu3  ;;  %v9719_v13 = vshrl.u32 %v13256_v0, 16  ;;  %v10608_v5 = vsel %vm8768_vm4, %v10603_v32, %v10607_v12  ;;  %19818 = vst [vmem:[#allocation19_spill] sm:$0xff] %v18967_v44  ;;  %v13258_v0 = vld [vmem:[#allocation3 + $0x40] sm:$0xff] }
 0x79c   : > { %v8643_v7 = vpop.f32.mrf.mxu0  ;;  %v18953_v40 = vadd.f32 %v8640_v51, %v8379_v42  ;;  %10407 = vmatmul.bf16.vlgmr.msra.gmra.mxu1 %v10327_v20  ;;  %v13275_v51 = vld [vmem:[%s19429_s3 + $0x198] sm:$0xff] }
 0x79d   : > { %10221 = vmatpush.bf16.msra.mxu3 %v13275_v51  ;;  %v13222_v42 = vld [vmem:[#allocation3 + $0x34] sm:$0xff]  ;;  %v9721_v17 = vor.u32 %v9719_v13, %v9717_v31  ;;  %v10613_v31 = vshll.u32 %v13290_v38, 16  ;;  %v10609_v13 = vshrl.u32 %v13289_v63, 16 }
 0x79e   : > { %v8817_v20 = vshll.u32 %v13222_v42, 16 }
 0x79f   : > { %v9726_v46 = vsel %vm8768_vm4, %v9721_v17, %v9725_v47  ;;  %v10611_v44 = vor.u32 %v10609_v13, %v10607_v12 }
 0x7a0   : > { %v8819_v19 = vrot.slane %v8817_v20, 1 }
 0x7a1   : > { %10222 = vmatpush.bf16.msra.mxu3 %v13274_v27 }
 0x7a3   : > { %v8382_v9 = vpop.f32.mrf.mxu3 }
 0x7a4   : > { %8957 = vmatmul.bf16.gmra.mxu3 %v8812_v34  ;;  %v8645_v36 = vpop.f32.mrf.mxu0  ;;  %v18963_v1 = vadd.f32 %v8643_v7, %v8382_v9  ;;  %v18969_v7 = vpop.f32.mrf.mxu2  ;;  %v8813_v34 = vshrl.u32 %v13221_v30, 16  ;;  %v9731_v9 = vshll.u32 %v13258_v0, 16 }
 0x7a5   : > { %19819 = vst [vmem:[#allocation18_spill] sm:$0xff] %v18969_v7  ;;  %v18976_v7 = vpop.f32.mrf.mxu1 }
 0x7a6   : > { %v8815_v51 = vor.u32 %v8813_v34, %v8811_v59  ;;  %19820 = vst [vmem:[#allocation21_spill] sm:$0xff] %v18976_v7  ;;  %v9729_v59 = vor.u32 %v9727_v21, %v9725_v47  ;;  %v10617_v7 = vshrl.u32 %v13290_v38, 16  ;;  %v13292_v38 = vld [vmem:[#allocation3 + $0x3c] sm:$0xff] }
 0x7a8   : > { %v8820_v32 = vsel %vm8768_vm4, %v8815_v51, %v8819_v19 }
 0x7a9   : > { %10765 = vmatmul.bf16.vlgmr.msra.gmra.mxu2 %v10608_v5  ;;  %v10615_v5 = vrot.slane %v10613_v31, 1  ;;  %v13291_v31 = vld [vmem:[#allocation3 + $0x34] sm:$0xff] }
 0x7aa   : > { %v10621_v47 = vshll.u32 %v13291_v31, 16 }
 0x7ab   : > { %9871 = vmatmul.bf16.gmra.mxu0 %v9726_v46  ;;  %v8384_v54 = vpop.f32.mrf.mxu3  ;;  %v10616_v30 = vsel %vm8768_vm4, %v10611_v44, %v10615_v5  ;;  %v8821_v44 = vshrl.u32 %v13222_v42, 16  ;;  %v10619_v27 = vor.u32 %v10617_v7, %v10615_v5 }
 0x7ac   : > { %v18971_v3 = vadd.f32 %v8645_v36, %v8384_v54  ;;  %10412 = vmatmul.bf16.gmra.mxu1 %v15090_v25  ;;  %v8648_v8 = vpop.f32.mrf.mxu0  ;;  %v9733_v36 = vrot.slane %v9731_v9, 1  ;;  %v13223_v54 = vld [vmem:[#allocation3 + $0x3c] sm:$0xff]  ;;  %v18978_v25 = vpop.f32.mrf.mxu2  ;;  %v13259_v9 = vld [vmem:[#allocation3 + $0x48] sm:$0xff] }
 0x7ad   : > { %19821 = vst [vmem:[#allocation24_spill] sm:$0xff] %v18978_v25  ;;  %v8825_v63 = vshll.u32 %v13223_v54, 16  ;;  %v18987_v13 = vpop.f32.mrf.mxu1  ;;  %v10623_v25 = vrot.slane %v10621_v47, 1  ;;  %v8829_v5 = vshrl.u32 %v13223_v54, 16 }
 0x7ae   : > { %v9734_v34 = vsel %vm8768_vm4, %v9729_v59, %v9733_v36  ;;  %19822 = vst [vmem:[#allocation25_spill] sm:$0xff] %v18987_v13 }
 0x7af   : > { %v8827_v21 = vrot.slane %v8825_v63, 1  ;;  %v13224_v63 = vld [vmem:[#allocation3 + $0x44] sm:$0xff] }
 0x7b3   : > { %v8387_v17 = vpop.f32.mrf.mxu3 }
 0x7b4   : > { %8962 = vmatmul.bf16.gmra.mxu3 %v8820_v32  ;;  %v18974_v46 = vadd.f32 %v8648_v8, %v8387_v17  ;;  %v8650_v20 = vpop.f32.mrf.mxu0  ;;  %v15092_v8 = vld [vmem:[#allocation3 + $0x2c] sm:$0xff]   ;;  %v8823_v32 = vor.u32 %v8821_v44, %v8819_v19  ;;  %v18989_v17 = vpop.f32.mrf.mxu2  ;;  %v10624_v19 = vsel %vm8768_vm4, %v10619_v27, %v10623_v25 }
 0x7b5   : > { %19823 = vst [vmem:[#allocation17_spill] sm:$0xff] %v18989_v17  ;;  %v8833_v17 = vshll.u32 %v13224_v63, 16  ;;  %v18996_v23 = vpop.f32.mrf.mxu1 }
 0x7b6   : > { %19824 = vst [vmem:[#allocation23_spill] sm:$0xff] %v18996_v23 }
 0x7b9   : > { %10770 = vmatmul.bf16.gmra.mxu2 %v10616_v30  ;;  %v9739_v30 = vshll.u32 %v13259_v9, 16 }
 0x7bb   : > { %9876 = vmatmul.bf16.gmra.mxu0 %v9734_v34  ;;  %v8389_v12 = vpop.f32.mrf.mxu3  ;;  %v8828_v34 = vsel %vm8768_vm4, %v8823_v32, %v8827_v21  ;;  %v9741_v42 = vrot.slane %v9739_v30, 1  ;;  %v8835_v30 = vrot.slane %v8833_v17, 1  ;;  %v13225_v17 = vld [vmem:[#allocation3 + $0x4c] sm:$0xff] }
 0x7bc   : > { %v18985_v51 = vadd.f32 %v8650_v20, %v8389_v12  ;;  %10417 = vmatmul.bf16.gmra.mxu1 %v15092_v8  ;;  %v8653_v59 = vpop.f32.mrf.mxu0  ;;  %v9735_v8 = vshrl.u32 %v13258_v0, 16  ;;  %v18998_v32 = vpop.f32.mrf.mxu2  ;;  %v13260_v0 = vld [vmem:[#allocation3 + $0x50] sm:$0xff] }
 0x7bd   : > { %19825 = vst [vmem:[#allocation26_spill] sm:$0xff] %v18998_v32  ;;  %v9747_v27 = vshll.u32 %v13260_v0, 16  ;;  %v9743_v32 = vshrl.u32 %v13259_v9, 16  ;;  %v8841_v9 = vshll.u32 %v13225_v17, 16  ;;  %v9751_v37 = vshrl.u32 %v13260_v0, 16  ;;  %v15098_v0 = vld [vmem:[#allocation3 + $0x44] sm:$0xff]  }
 0x7be   : > { %v9737_v44 = vor.u32 %v9735_v8, %v9733_v36  ;;  %v10629_v36 = vshll.u32 %v13292_v38, 16  ;;  %v10625_v8 = vshrl.u32 %v13291_v31, 16 }
 0x7bf   : > { %v9749_v33 = vrot.slane %v9747_v27, 1  ;;  %v13261_v27 = vld [vmem:[#allocation3 + $0x58] sm:$0xff] }
 0x7c0   : > { %v9742_v13 = vsel %vm8768_vm4, %v9737_v44, %v9741_v42  ;;  %v19003_v44 = vpop.f32.mrf.mxu1  ;;  %v10627_v23 = vor.u32 %v10625_v8, %v10623_v25  ;;  %v8837_v8 = vshrl.u32 %v13224_v63, 16 }
 0x7c1   : > { %19826 = vst [vmem:[#allocation27_spill] sm:$0xff] %v19003_v44  ;;  %v8843_v44 = vrot.slane %v8841_v9, 1  ;;  %v13226_v9 = vld [vmem:[#allocation3 + $0x54] sm:$0xff] }
 0x7c3   : > { %v8392_v20 = vpop.f32.mrf.mxu3 }
 0x7c4   : > { %8967 = vmatmul.bf16.gmra.mxu3 %v8828_v34  ;;  %v18992_v12 = vadd.f32 %v8653_v59, %v8392_v20  ;;  %v8655_v47 = vpop.f32.mrf.mxu0  ;;  %v15094_v34 = vld [vmem:[#allocation3 + $0x34] sm:$0xff]   ;;  %v8831_v20 = vor.u32 %v8829_v5, %v8827_v21  ;;  %v9745_v5 = vor.u32 %v9743_v32, %v9741_v42 }
 0x7c6   : > { %v9750_v25 = vsel %vm8768_vm4, %v9745_v5, %v9749_v33 }
 0x7c9   : > { %10775 = vmatmul.bf16.gmra.mxu2 %v10624_v19  ;;  %v10631_v19 = vrot.slane %v10629_v36, 1  ;;  %v13293_v36 = vld [vmem:[#allocation3 + $0x44] sm:$0xff] }
 0x7cb   : > { %9881 = vmatmul.bf16.gmra.mxu0 %v9742_v13  ;;  %v8394_v59 = vpop.f32.mrf.mxu3  ;;  %v8836_v13 = vsel %vm8768_vm4, %v8831_v20, %v8835_v30  ;;  %v15096_v20 = vld [vmem:[#allocation3 + $0x3c] sm:$0xff]  }
 0x7cc   : > { %v19000_v7 = vadd.f32 %v8655_v47, %v8394_v59  ;;  %10422 = vmatmul.bf16.gmra.mxu1 %v15094_v34  ;;  %v13273_v47 = vld [vmem:[%s19429_s3 + $0x188] sm:$0xff]  ;;  %v19008_v59 = vpop.f32.mrf.mxu2  ;;  %v10632_v34 = vsel %vm8768_vm4, %v10627_v23, %v10631_v19  ;;  %v10637_v23 = vshll.u32 %v13293_v36, 16 }
 0x7cd   : > { %19827 = vst [vmem:[#allocation28_spill] sm:$0xff] %v19008_v59  ;;  %10223 = vmatpush.bf16.msra.mxu3 %v13273_v47  ;;  %v19014_v59 = vpop.f32.mrf.mxu1  ;;  %v8839_v47 = vor.u32 %v8837_v8, %v8835_v30  ;;  %v8606_v8 = vadd.f32 %v18499_v28, %v18519_v53  ;;  %v10641_v28 = vshrl.u32 %v13293_v36, 16  ;;  %v13295_v36 = vld [vmem:[#allocation3 + $0x54] sm:$0xff] }
 0x7ce   : > { %19828 = vst [vmem:[#allocation22_spill] sm:$0xff] %v19014_v59  ;;  %v10639_v5 = vrot.slane %v10637_v23, 1  ;;  %v13262_v23 = vld [vmem:[#allocation3 + $0x60] sm:$0xff] }
 0x7d4   : > { %8972 = vmatmul.bf16.gmra.mxu3 %v8836_v13  ;;  %v19016_v42 = vpop.f32.mrf.mxu2 }
 0x7d5   : > { %19829 = vst [vmem:[#allocation30_spill] sm:$0xff] %v19016_v42  ;;  %v9753_v42 = vor.u32 %v9751_v37, %v9749_v33 }
 0x7d7   : > { %v8397_v54 = vpop.f32.mrf.mxu3 }
 0x7d8   : > { %v8658_v21 = vpop.f32.mrf.mxu0 }
 0x7d9   : > { %v19011_v31 = vadd.f32 %v8658_v21, %v8397_v54  ;;  %10780 = vmatmul.bf16.gmra.mxu2 %v10632_v34  ;;  %v9755_v54 = vshll.u32 %v13261_v27, 16  ;;  %v8844_v21 = vsel %vm8768_vm4, %v8839_v47, %v8843_v44  ;;  %v10633_v34 = vshrl.u32 %v13292_v38, 16 }
 0x7da   : > { %v8849_v38 = vshll.u32 %v13226_v9, 16 }
 0x7db   : > { %9886 = vmatmul.bf16.gmra.mxu0 %v9750_v25  ;;  %v10635_v25 = vor.u32 %v10633_v34, %v10631_v19  ;;  %v13294_v19 = vld [vmem:[#allocation3 + $0x4c] sm:$0xff] }
 0x7dc   : > { %10427 = vmatmul.bf16.gmra.mxu1 %v15096_v20  ;;  %v9757_v20 = vrot.slane %v9755_v54, 1  ;;  %v8851_v33 = vrot.slane %v8849_v38, 1  ;;  %v13227_v38 = vld [vmem:[#allocation3 + $0x5c] sm:$0xff] }
 0x7dd   : > { %v10640_v57 = vsel %vm8768_vm4, %v10635_v25, %v10639_v5 }
 0x7de   : > { %v9758_v30 = vsel %vm8768_vm4, %v9753_v42, %v9757_v20  ;;  %v10645_v42 = vshll.u32 %v13294_v19, 16 }
 0x7df   : > { %v8399_v13 = vpop.f32.mrf.mxu3 }
 0x7e0   : > { %v8660_v55 = vpop.f32.mrf.mxu0  ;;  %v10647_v53 = vrot.slane %v10645_v42, 1  ;;  %v15100_v42 = vld [vmem:[#allocation3 + $0x4c] sm:$0xff]  }
 0x7e1   : > { %v19018_v32 = vadd.f32 %v8660_v55, %v8399_v13  ;;  %v19025_v55 = vpop.f32.mrf.mxu1  ;;  %v19028_v13 = vpop.f32.mrf.mxu2 }
 0x7e2   : > { %19830 = vst [vmem:[#allocation31_spill] sm:$0xff] %v19025_v55  ;;  %v9759_v55 = vshrl.u32 %v13261_v27, 16 }
 0x7e3   : > { %19831 = vst [vmem:[#allocation32_spill] sm:$0xff] %v19028_v13 }
 0x7e4   : > { %8977 = vmatmul.bf16.gmra.mxu3 %v8844_v21  ;;  %v9763_v21 = vshll.u32 %v13262_v23, 16 }
 0x7e7   : > { %v8938_v63 = vpop.f32.mrf.mxu3 }
 0x7e8   : > { %v19022_v59 = vadd.f32 %v8938_v63, %v18472_v24  ;;  %v13272_v24 = vld [vmem:[%s19429_s3 + $0x180] sm:$0xff] }
 0x7e9   : > { %10785 = vmatmul.bf16.gmra.mxu2 %v10640_v57  ;;  %v8845_v57 = vshrl.u32 %v13225_v17, 16  ;;  %10224 = vmatpush.bf16.msra.mxu3 %v13272_v24  ;;  %v19038_v25 = vpop.f32.mrf.mxu1  ;;  %v19040_v63 = vpop.f32.mrf.mxu2  ;;  %v9761_v24 = vor.u32 %v9759_v55, %v9757_v20  ;;  %v10653_v20 = vshll.u32 %v13295_v36, 16  ;;  %v8687_v55 = vld [vmem:[#allocation3 + $0x64] sm:$0x1] }
 0x7ea   : > { %19832 = vst [vmem:[#allocation33_spill] sm:$0xff] %v19038_v25 }
 0x7eb   : > { %9891 = vmatmul.bf16.gmra.mxu0 %v9758_v30  ;;  %v8847_v54 = vor.u32 %v8845_v57, %v8843_v44  ;;  %19833 = vst [vmem:[#allocation29_spill] sm:$0xff] %v19040_v63  ;;  %v10643_v30 = vor.u32 %v10641_v28, %v10639_v5  ;;  %v8857_v57 = vshll.u32 %v13227_v38, 16  ;;  %v13263_v5 = vld [vmem:[#allocation3 + $0x68] sm:$0xff]  ;;  %v9767_v63 = vshrl.u32 %v13262_v23, 16 }
 0x7ec   : > { %10432 = vmatmul.bf16.gmra.mxu1 %v15098_v0  ;;  %v9765_v0 = vrot.slane %v9763_v21, 1 }
 0x7ed   : > { %v8852_v34 = vsel %vm8768_vm4, %v8847_v54, %v8851_v33  ;;  %v10648_v44 = vsel %vm8768_vm4, %v10643_v30, %v10647_v53 }
 0x7ef   : > { %v8940_v37 = vpop.f32.mrf.mxu3 }
 0x7f0   : > { %v19035_v47 = vadd.f32 %v8940_v37, %v8606_v8  ;;  %v9766_v37 = vsel %vm8768_vm4, %v9761_v24, %v9765_v0  ;;  %v8754_v24 = vunpack.c.l.b16 %v8687_v55  ;;  %v15102_v55 = vld [vmem:[#allocation3 + $0x54] sm:$0xff]  }
 0x7f1   : > { %v19047_v54 = vpop.f32.mrf.mxu1  ;;  %v19049_v27 = vpop.f32.mrf.mxu2 }
 0x7f2   : > { %19834 = vst [vmem:[#allocation37_spill] sm:$0xff] %v19047_v54  ;;  %v10655_v54 = vrot.slane %v10653_v20, 1 }
 0x7f3   : > { %19835 = vst [vmem:[#allocation35_spill] sm:$0xff] %v19049_v27 }
 0x7f4   : > { %8982 = vmatmul.bf16.gmra.mxu3 %v8852_v34  ;;  %v8853_v34 = vshrl.u32 %v13226_v9, 16  ;;  %v9602_v9 = vld [vmem:[#allocation3 + $0x70] sm:$0x1] }
 0x7f5   : > { %v9669_v20 = vunpack.c.l.b16 %v9602_v9 }
 0x7f6   : > { %v8855_v30 = vor.u32 %v8853_v34, %v8851_v33 }
 0x7f7   : > { %v8943_v17 = vpop.f32.mrf.mxu3 }
 0x7f8   : > { %v19043_v8 = vadd.f32 %v8943_v17, %v18558_v41  ;;  %v8859_v41 = vrot.slane %v8857_v57, 1  ;;  %v9771_v17 = vshll.u32 %v13263_v5, 16 }
 0x7f9   : > { %10790 = vmatmul.bf16.gmra.mxu2 %v10648_v44  ;;  %v19055_v57 = vpop.f32.mrf.mxu1  ;;  %v19061_v34 = vpop.f32.mrf.mxu2 }
 0x7fa   : > { %v8860_v44 = vsel %vm8768_vm4, %v8855_v30, %v8859_v41  ;;  %v9773_v27 = vrot.slane %v9771_v17, 1  ;;  %v8861_v30 = vshrl.u32 %v13227_v38, 16  ;;  %v9682_v17 = vpack.c.b16 %v9669_v20, %v9669_v20 }
 0x7fb   : > { %9896 = vmatmul.bf16.gmra.mxu0 %v9766_v37  ;;  %v10649_v37 = vshrl.u32 %v13294_v19, 16 }
 0x7fc   : > { %10437 = vmatmul.bf16.gmra.mxu1 %v15100_v42  ;;  %v8767_v42 = vpack.c.b16 %v8754_v24, %v8754_v24  ;;  %v8863_v24 = vor.u32 %v8861_v30, %v8859_v41 }
 0x7fd   : > { %v10651_v25 = vor.u32 %v10649_v37, %v10647_v53  ;;  %v13296_v53 = vld [vmem:[#allocation3 + $0x5c] sm:$0xff] }
 0x7fe   : > { %v8865_v23 = vshll.u32 %v8767_v42, 16  ;;  %v10657_v42 = vshrl.u32 %v13295_v36, 16  ;;  %v15104_v36 = vld [vmem:[#allocation3 + $0x5c] sm:$0xff]  }
 0x7ff   : > { %v8945_v21 = vpop.f32.mrf.mxu3  ;;  %v10656_v33 = vsel %vm8768_vm4, %v10651_v25, %v10655_v54  ;;  %v10661_v25 = vshll.u32 %v13296_v53, 16 }
 0x800   : > { %v19052_v28 = vadd.f32 %v8945_v21, %v18593_v16  ;;  %v9769_v21 = vor.u32 %v9767_v63, %v9765_v0  ;;  %v9779_v0 = vshll.u32 %v9682_v17, 16  ;;  %v10659_v38 = vor.u32 %v10657_v42, %v10655_v54  ;;  %v13297_v17 = vld [vmem:[#allocation3 + $0x64] sm:$0xff] }
 0x801   : > { %v19067_v63 = vpop.f32.mrf.mxu1  ;;  %v19069_v37 = vpop.f32.mrf.mxu2 }
 0x802   : > { %v9774_v19 = vsel %vm8768_vm4, %v9769_v21, %v9773_v27  ;;  %v9775_v21 = vshrl.u32 %v13263_v5, 16 }
 0x804   : > { %8987 = vmatmul.bf16.gmra.mxu3 %v8860_v44 }
 0x807   : > { %v8948_v13 = vpop.f32.mrf.mxu3 }
 0x808   : > { %v19058_v16 = vadd.f32 %v8948_v13, %v18642_v62  ;;  %v8867_v62 = vrot.slane %v8865_v23, 1  ;;  %v9777_v23 = vor.u32 %v9775_v21, %v9773_v27 }
 0x809   : > { %10795 = vmatmul.bf16.gmra.mxu2 %v10656_v33  ;;  %v10663_v33 = vrot.slane %v10661_v25, 1  ;;  %v19077_v30 = vpop.f32.mrf.mxu1 }
 0x80a   : > { %v8868_v9 = vsel %vm8768_vm4, %v8863_v24, %v8867_v62  ;;  %v10665_v24 = vshrl.u32 %v13296_v53, 16  ;;  %v14545_v62 = vld [vmem:[#allocation3 + $0x28] sm:$0xff]  }
 0x80b   : > { %9901 = vmatmul.bf16.gmra.mxu0 %v9774_v19  ;;  %v9781_v19 = vrot.slane %v9779_v0, 1  ;;  %v10062_v21 = vshll.u32 %v14545_v62, 16  ;;  %v15106_v53 = vld [vmem:[#allocation3 + $0x64] sm:$0xff]  }
 0x80c   : > { %10442 = vmatmul.bf16.gmra.mxu1 %v15102_v55  ;;  %v10667_v0 = vor.u32 %v10665_v24, %v10663_v33  ;;  %v10673_v24 = vshrl.u32 %v13297_v17, 16 }
 0x80d   : > { %v9782_v55 = vsel %vm8768_vm4, %v9777_v23, %v9781_v19 }
 0x80f   : > { %v8950_v44 = vpop.f32.mrf.mxu3 }
 0x810   : > { %v19065_v13 = vadd.f32 %v8950_v44, %v18665_v43  ;;  %v10664_v43 = vsel %vm8768_vm4, %v10659_v38, %v10663_v33  ;;  %v19079_v44 = vpop.f32.mrf.mxu2  ;;  %v10059_v38 = vshrl.u32 %v14545_v62, 16 }
 0x811   : > { %v19085_v25 = vpop.f32.mrf.mxu1 }
 0x812   : > { %19836 = vst [vmem:[#allocation38_spill] sm:$0xff] %v19085_v25 }
 0x814   : > { %8992 = vmatmul.bf16.gmra.mxu3 %v8868_v9 }
 0x817   : > { %v8953_v20 = vpop.f32.mrf.mxu3 }
 0x818   : > { %v19073_v41 = vadd.f32 %v8953_v20, %v18714_v18  ;;  %v10669_v18 = vshll.u32 %v13297_v17, 16  ;;  %v19087_v9 = vpop.f32.mrf.mxu2  ;;  %v10061_v20 = vrot.slane %v10059_v38, 3  ;;  %v15107_v17 = vld [vmem:[#allocation3 + $0x6c] sm:$0xff]  }
 0x819   : > { %10800 = vmatmul.bf16.gmra.mxu2 %v10664_v43  ;;  %v10064_v43 = vrot.slane %v10062_v21, 4 }
 0x81a   : > { %v10671_v27 = vrot.slane %v10669_v18, 1 }
 0x81b   : > { %9906 = vmatmul.bf16.gmra.mxu0 %v9782_v55  ;;  %v10065_v55 = vor.u32 %v10064_v43, %v10061_v20 }
 0x81c   : > { %10447 = vmatmul.bf16.gmra.mxu1 %v15104_v36  ;;  %v19093_v36 = vpop.f32.mrf.mxu1 }
 0x81d   : > { %19837 = vst [vmem:[#allocation34_spill] sm:$0xff] %v19093_v36 }
 0x81f   : > { %v8955_v54 = vpop.f32.mrf.mxu3 }
 0x820   : > { %v19082_v5 = vadd.f32 %v8955_v54, %v18743_v56  ;;  %v10672_v56 = vsel %vm8768_vm4, %v10667_v0, %v10671_v27  ;;  %v19098_v18 = vpop.f32.mrf.mxu2  ;;  %v14546_v0 = vld [vmem:[#allocation3 + $0x30] sm:$0xff]  }
 0x821   : > { %19838 = vst [vmem:[#allocation36_spill] sm:$0xff] %v19098_v18  ;;  %v10068_v21 = vshrl.u32 %v14546_v0, 16 }
 0x824   : > { %10225 = vmatmul.bf16.vlgmr.msra.gmra.mxu3 %v18227_v2  ;;  %v13298_v2 = vld [vmem:[#allocation3 + $0x6c] sm:$0xff]  ;;  %v19106_v43 = vpop.f32.mrf.mxu1 }
 0x825   : > { %v10677_v54 = vshll.u32 %v13298_v2, 16  ;;  %19839 = vst [vmem:[#allocation43_spill] sm:$0xff] %v19106_v43  ;;  %v14547_v43 = vld [vmem:[#allocation3 + $0x38] sm:$0xff]  }
 0x826   : > { %v10077_v18 = vshrl.u32 %v14547_v43, 16 }
 0x827   : > { %v8958_v42 = vpop.f32.mrf.mxu3  ;;  %v10679_v62 = vrot.slane %v10677_v54, 1 }
 0x828   : > { %v19090_v19 = vadd.f32 %v8958_v42, %v18773_v29  ;;  %v10066_v29 = vsel %vm8417_vm8, %v18216_v61, %v10065_v55  ;;  %v10675_v42 = vor.u32 %v10673_v24, %v10671_v27 }
 0x829   : > { %10805 = vmatmul.bf16.gmra.mxu2 %v10672_v56  ;;  %v10071_v56 = vshll.u32 %v14546_v0, 16 }
 0x82b   : > { %v10073_v61 = vrot.slane %v10071_v56, 4 }
 0x82c   : > { %10452 = vmatmul.bf16.gmra.mxu1 %v15106_v53  ;;  %v19108_v53 = vpop.f32.mrf.mxu2 }
 0x82d   : > { %19840 = vst [vmem:[#allocation39_spill] sm:$0xff] %v19108_v53 }
 0x82f   : > { %v8960_v23 = vpop.f32.mrf.mxu3 }
 0x830   : > { %v19096_v33 = vadd.f32 %v8960_v23, %v18801_v10  ;;  %v10680_v10 = vsel %vm8768_vm4, %v10675_v42, %v10679_v62  ;;  %v10070_v23 = vrot.slane %v10068_v21, 3  ;;  %v10681_v42 = vshrl.u32 %v13298_v2, 16  ;;  %v10516_v21 = vld [vmem:[#allocation3 + $0x7c] sm:$0x1] }
 0x832   : > { %v10074_v27 = vor.u32 %v10073_v61, %v10070_v23  ;;  %v10683_v56 = vor.u32 %v10681_v42, %v10679_v62  ;;  %v10583_v61 = vunpack.c.l.b16 %v10516_v21 }
 0x834   : > { %10230 = vmatmul.bf16.gmra.mxu3 %v10066_v29  ;;  %v13299_v29 = vld [vmem:[#allocation3 + $0x74] sm:$0xff]  ;;  %v19116_v53 = vpop.f32.mrf.mxu2 }
 0x835   : > { %v10685_v0 = vshll.u32 %v13299_v29, 16  ;;  %19842 = vst [vmem:[#allocation6_spill] sm:$0xff] %v19116_v53  ;;  %v10689_v21 = vshrl.u32 %v13299_v29, 16 }
 0x837   : > { %v8963_v38 = vpop.f32.mrf.mxu3 }
 0x838   : > { %v19103_v20 = vadd.f32 %v8963_v38, %v18836_v45  ;;  %v10075_v45 = vsel %vm8417_vm8, %v10065_v55, %v10074_v27  ;;  %v19114_v38 = vpop.f32.mrf.mxu1  ;;  %v14072_v55 = vunpack.c.h.b16 %v18834_v14 }
 0x839   : > { %10810 = vmatmul.bf16.gmra.mxu2 %v10680_v10  ;;  %19841 = vst [vmem:[#allocation40_spill] sm:$0xff] %v19114_v38  ;;  %v10687_v10 = vrot.slane %v10685_v0, 1  ;;  %v10596_v0 = vpack.c.b16 %v10583_v61, %v10583_v61 }
 0x83b   : > { %v10691_v14 = vor.u32 %v10689_v21, %v10687_v10 }
 0x83c   : > { %10457 = vmatmul.bf16.gmra.mxu1 %v15107_v17  ;;  %v10080_v17 = vshll.u32 %v14547_v43, 16  ;;  %v19126_v62 = vpop.f32.mrf.mxu2 }
 0x83d   : > { %19844 = vst [vmem:[#allocation5_spill] sm:$0xff] %v19126_v62 }
 0x83e   : > { %v10082_v2 = vrot.slane %v10080_v17, 4  ;;  %v14548_v17 = vld [vmem:[#allocation3 + $0x40] sm:$0xff]  }
 0x83f   : > { %v8965_v54 = vpop.f32.mrf.mxu3  ;;  %v10089_v61 = vshll.u32 %v14548_v17, 16 }
 0x840   : > { %v19111_v24 = vadd.f32 %v8965_v54, %v18879_v52  ;;  %v10688_v52 = vsel %vm8768_vm4, %v10683_v56, %v10687_v10  ;;  %v10079_v54 = vrot.slane %v10077_v18, 3  ;;  %v19124_v38 = vpop.f32.mrf.mxu1 }
 0x841   : > { %19843 = vst [vmem:[#allocation41_spill] sm:$0xff] %v19124_v38 }
 0x842   : > { %v10083_v43 = vor.u32 %v10082_v2, %v10079_v54  ;;  %v10091_v2 = vrot.slane %v10089_v61, 4  ;;  %v14550_v61 = vld [vmem:[#allocation3 + $0x50] sm:$0xff]  }
 0x844   : > { %10235 = vmatmul.bf16.gmra.mxu3 %v10075_v45  ;;  %v10338_v45 = vpack.c.b16 %v18846_v35, %v14072_v55  ;;  %v10084_v56 = vsel %vm8417_vm8, %v10074_v27, %v10083_v43  ;;  %v10086_v35 = vshrl.u32 %v14548_v17, 16  ;;  %v19136_v54 = vpop.f32.mrf.mxu2 }
 0x845   : > { %19845 = vst [vmem:[#allocation42_spill] sm:$0xff] %v19136_v54 }
 0x847   : > { %v8968_v36 = vpop.f32.mrf.mxu3 }
 0x848   : > { %v19119_v23 = vadd.f32 %v8968_v36, %v18909_v58  ;;  %v10693_v36 = vshll.u32 %v10596_v0, 16 }
 0x849   : > { %10815 = vmatmul.bf16.gmra.mxu2 %v10688_v52 }
 0x84a   : > { %v10695_v18 = vrot.slane %v10693_v36, 1 }
 0x84c   : > { %10462 = vmatmul.bf16.gmra.mxu1 %v10338_v45  ;;  %v10696_v45 = vsel %vm8768_vm4, %v10691_v14, %v10695_v18 }
 0x84f   : > { %v8970_v42 = vpop.f32.mrf.mxu3 }
 0x850   : > { %v19129_v58 = vadd.f32 %v8970_v42, %v18925_v11  ;;  %v10088_v11 = vrot.slane %v10086_v35, 3  ;;  %v14549_v42 = vld [vmem:[#allocation3 + $0x48] sm:$0xff]  }
 0x851   : > { %v10095_v21 = vshrl.u32 %v14549_v42, 16 }
 0x852   : > { %v10092_v0 = vor.u32 %v10091_v2, %v10088_v11  ;;  %v10104_v11 = vshrl.u32 %v14550_v61, 16  ;;  %v10107_v2 = vshll.u32 %v14550_v61, 16 }
 0x853   : > { %v10097_v14 = vrot.slane %v10095_v21, 3 }
 0x854   : > { %10240 = vmatmul.bf16.gmra.mxu3 %v10084_v56  ;;  %v10093_v10 = vsel %vm8417_vm8, %v10083_v43, %v10092_v0  ;;  %v9852_v43 = vpop.f32.mrf.mxu0 }
 0x857   : > { %v8973_v52 = vpop.f32.mrf.mxu3 }
 0x858   : > { %v19133_v55 = vadd.f32 %v8973_v52, %v18935_v50  ;;  %v10098_v50 = vshll.u32 %v14549_v42, 16  ;;  %v10109_v42 = vrot.slane %v10107_v2, 4 }
 0x859   : > { %10820 = vmatmul.bf16.gmra.mxu2 %v10696_v45 }
 0x85a   : > { %v10100_v18 = vrot.slane %v10098_v50, 4 }
 0x85c   : > { %v10101_v52 = vor.u32 %v10100_v18, %v10097_v14  ;;  %v9854_v14 = vpop.f32.mrf.mxu0  ;;  %v14551_v18 = vld [vmem:[#allocation3 + $0x58] sm:$0xff]  }
 0x85d   : > { %v10113_v61 = vshrl.u32 %v14551_v18, 16 }
 0x85f   : > { %v8975_v29 = vpop.f32.mrf.mxu3 }
 0x860   : > { %v19139_v27 = vadd.f32 %v8975_v29, %v18953_v40  ;;  %v10102_v40 = vsel %vm8417_vm8, %v10092_v0, %v10101_v52 }
 0x864   : > { %10245 = vmatmul.bf16.gmra.mxu3 %v10093_v10  ;;  %v10106_v10 = vrot.slane %v10104_v11, 3  ;;  %v19163_v2 = vpop.f32.mrf.mxu0 }
 0x866   : > { %v10110_v50 = vor.u32 %v10109_v42, %v10106_v10  ;;  %v10115_v10 = vrot.slane %v10113_v61, 3 }
 0x867   : > { %v8978_v36 = vpop.f32.mrf.mxu3 }
 0x868   : > { %v19143_v56 = vadd.f32 %v8978_v36, %v18963_v1  ;;  %v10408_v1 = vpop.f32.mrf.mxu1  ;;  %v10766_v36 = vpop.f32.mrf.mxu2  ;;  %v10111_v0 = vsel %vm8417_vm8, %v10101_v52, %v10110_v50 }
 0x86c   : > { %v19173_v62 = vpop.f32.mrf.mxu0 }
 0x86f   : > { %v8980_v17 = vpop.f32.mrf.mxu3 }
 0x870   : > { %v19146_v35 = vadd.f32 %v8980_v17, %v18971_v3  ;;  %v19156_v17 = vpop.f32.mrf.mxu1 }
 0x874   : > { %10250 = vmatmul.bf16.gmra.mxu3 %v10102_v40  ;;  %v19158_v40 = vpop.f32.mrf.mxu2 }
 0x877   : > { %v8983_v45 = vpop.f32.mrf.mxu3 }
 0x878   : > { %v19150_v29 = vadd.f32 %v8983_v45, %v18974_v46  ;;  %v10116_v45 = vshll.u32 %v14551_v18, 16  ;;  %v19165_v42 = vpop.f32.mrf.mxu1  ;;  %v14552_v18 = vld [vmem:[#allocation3 + $0x60] sm:$0xff]  }
 0x879   : > { %v10125_v53 = vshll.u32 %v14552_v18, 16 }
 0x87c   : > { %v19170_v54 = vpop.f32.mrf.mxu2 }
 0x87f   : > { %v8985_v21 = vpop.f32.mrf.mxu3 }
 0x880   : > { %v19153_v3 = vadd.f32 %v8985_v21, %v18985_v51  ;;  %v10118_v51 = vrot.slane %v10116_v45, 4  ;;  %v19178_v45 = vpop.f32.mrf.mxu1 }
 0x882   : > { %v10119_v52 = vor.u32 %v10118_v51, %v10115_v10  ;;  %v10127_v51 = vrot.slane %v10125_v53, 4 }
 0x884   : > { %10255 = vmatmul.bf16.gmra.mxu3 %v10111_v0  ;;  %v10120_v38 = vsel %vm8417_vm8, %v10110_v50, %v10119_v52  ;;  %v19180_v10 = vpop.f32.mrf.mxu2  ;;  %v19184_v50 = vpop.f32.mrf.mxu0 }
 0x887   : > { %v8988_v46 = vpop.f32.mrf.mxu3 }
 0x888   : > { %v19161_v11 = vadd.f32 %v8988_v46, %v18992_v12  ;;  %v10122_v46 = vshrl.u32 %v14552_v18, 16  ;;  %v19190_v18 = vpop.f32.mrf.mxu1 }
 0x88a   : > { %19846 = vst [vmem:[#allocation44_spill] sm:$0xff] %v19161_v11 }
 0x88c   : > { %v19193_v53 = vpop.f32.mrf.mxu2 }
 0x88f   : > { %v8990_v21 = vpop.f32.mrf.mxu3 }
 0x890   : > { %v19168_v0 = vadd.f32 %v8990_v21, %v19000_v7  ;;  %v10124_v7 = vrot.slane %v10122_v46, 3  ;;  %v9372_v21 = vadd.f32 %v18778_v4, %v19022_v59  ;;  %v14553_v46 = vld [vmem:[#allocation3 + $0x68] sm:$0xff]   ;;  %v9373_v4 = vadd.f32 %v18820_v48, %v19035_v47  ;;  %v19209_v48 = vld [vmem:[%s19430_s4 + $0x5] ss:$0 sm:$0xff]  ;;  %v19211_v47 = vpop.f32.mrf.mxu1 }
 0x892   : > { %19847 = vst [vmem:[#allocation57_spill] sm:$0xff] %v19168_v0  ;;  %v10128_v0 = vor.u32 %v10127_v51, %v10124_v7  ;;  %v10131_v7 = vshrl.u32 %v14553_v46, 16  ;;  %v10134_v51 = vshll.u32 %v14553_v46, 16 }
 0x894   : > { %10260 = vmatmul.bf16.gmra.mxu3 %v10120_v38 }
 0x897   : > { %v8993_v12 = vpop.f32.mrf.mxu3 }
 0x898   : > { %v19176_v61 = vadd.f32 %v8993_v12, %v19011_v31  ;;  %v9554_v31 = vadd.f32 %v18822_v49, %v9372_v21  ;;  %v10129_v12 = vsel %vm8417_vm8, %v10119_v52, %v10128_v0  ;;  %v9555_v49 = vadd.f32 %v18874_v22, %v9373_v4  ;;  %v19204_v52 = vld [vmem:[%s19430_s4 + $0x4] ss:$0 sm:$0xff] }
 0x899   : > { %v9374_v22 = vadd.f32 %v18872_v26, %v19043_v8 }
 0x89a   : > { %19848 = vst [vmem:[#allocation9_spill] sm:$0xff] %v19176_v61  ;;  %v9912_v61 = vadd.f32 %v9852_v43, %v9554_v31  ;;  %v10136_v43 = vrot.slane %v10134_v51, 4 }
 0x89f   : > { %v8995_v38 = vpop.f32.mrf.mxu3 }
 0x8a0   : > { %v19187_v11 = vadd.f32 %v8995_v38, %v19018_v32  ;;  %v19197_v32 = vpop.f32.mrf.mxu0  ;;  %v10133_v38 = vrot.slane %v10131_v7, 3 }
 0x8a4   : > { %10265 = vmatmul.bf16.gmra.mxu3 %v10129_v12  ;;  %v10137_v12 = vor.u32 %v10136_v43, %v10133_v38  ;;  %v19241_v43 = vpop.f32.mrf.mxu1 }
 0x8a6   : > { %v10138_v51 = vsel %vm8417_vm8, %v10128_v0, %v10137_v12 }
 0x8a7   : > { %v10226_v59 = vpop.f32.mrf.mxu3 }
 0x8a8   : > { %v10286_v25 = vadd.f32 %v10226_v59, %v9912_v61  ;;  %v9913_v61 = vadd.f32 %v9854_v14, %v9555_v49  ;;  %v10924_v59 = vld [vmem:[%s19218_s19] sm:$0xff]  ;;  %v9556_v14 = vadd.f32 %v18907_v60, %v9374_v22  ;;  %v19227_v8 = vpop.f32.mrf.mxu0 }
 0x8aa   : > { %v10468_v21 = vadd.f32 %v10408_v1, %v10286_v25  ;;  %v19221_v1 = vpop.f32.mrf.mxu2  ;;  %v9914_v60 = vadd.f32 %v19163_v2, %v9556_v14 }
 0x8ac   : > { %v10826_v31 = vadd.f32 %v10766_v36, %v10468_v21 }
 0x8ae   : > { %v10851_v25 = vmul.f32 %v19204_v52, %v10826_v31 }
 0x8af   : > { %v10228_v36 = vpop.f32.mrf.mxu3 }
 0x8b0   : > { %v10876_v46 = vadd.f32 %v19209_v48, %v10851_v25  ;;  %v10287_v4 = vadd.f32 %v10228_v36, %v9913_v61 }
 0x8b2   : > { %v10900_v7 = vmax.f32 %v10876_v46, 0.0  ;;  %v10469_v26 = vadd.f32 %v19156_v17, %v10287_v4  ;;  %v9375_v17 = vadd.f32 %v18905_v15, %v19052_v28  ;;  %v19244_v0 = vpop.f32.mrf.mxu2  ;;  %v19250_v46 = vpop.f32.mrf.mxu0 }
 0x8b4   : > { %v10948_v49 = vadd.f32 %v10924_v59, %v10900_v7  ;;  %v10827_v21 = vadd.f32 %v19158_v40, %v10469_v26  ;;  %10270 = vmatmul.bf16.gmra.mxu3 %v10138_v51  ;;  %v10925_v40 = vld [vmem:[%s19218_s19 + $0x8] sm:$0xff]  ;;  %v9557_v25 = vadd.f32 %v18932_v39, %v9375_v17  ;;  %v9376_v59 = vadd.f32 %v18930_v6, %v19058_v16  ;;  %v19258_v51 = vpop.f32.mrf.mxu1 }
 0x8b5   : > { %v19850_v6 = vld [vmem:[#allocation20_spill] sm:$0xff] }
 0x8b6   : > { %10972 = vst [vmem:[%s19232_s24] sm:$0xff] %v10948_v49  ;;  %v10852_v38 = vmul.f32 %v19204_v52, %v10827_v21  ;;  %v9915_v4 = vadd.f32 %v19173_v62, %v9557_v25  ;;  %v19849_v49 = vld [vmem:[#allocation16_spill] sm:$0xff]  ;;  %v10147_v16 = vsel %vm8417_vm8, %v10137_v12, %v19850_v6  ;;  %v19854_v6 = vld [vmem:[#allocation18_spill] sm:$0xff] }
 0x8b7   : > { %v10231_v31 = vpop.f32.mrf.mxu3  ;;  %v19852_v12 = vld [vmem:[#allocation12_spill] sm:$0xff] }
 0x8b8   : > { %v10877_v61 = vadd.f32 %v19209_v48, %v10852_v38  ;;  %v10288_v22 = vadd.f32 %v10231_v31, %v9914_v60 }
 0x8ba   : > { %v10901_v2 = vmax.f32 %v10877_v61, 0.0  ;;  %v10470_v36 = vadd.f32 %v19165_v42, %v10288_v22  ;;  %v10926_v42 = vld [vmem:[%s19218_s19 + $0x10] sm:$0xff]  ;;  %v19263_v60 = vpop.f32.mrf.mxu2  ;;  %v19851_v61 = vld [vmem:[#allocation7_spill] sm:$0xff]  ;;  %v9872_v25 = vpop.f32.mrf.mxu0 }
 0x8bb   : > { %v9377_v22 = vadd.f32 %v19851_v61, %v19065_v13 }
 0x8bc   : > { %v10949_v15 = vadd.f32 %v10925_v40, %v10901_v2  ;;  %v10828_v28 = vadd.f32 %v19170_v54, %v10470_v36  ;;  %v9558_v54 = vadd.f32 %v19849_v49, %v9376_v59 }
 0x8be   : > { %10973 = vst [vmem:[%s19232_s24 + $0x8] sm:$0xff] %v10949_v15  ;;  %v10853_v14 = vmul.f32 %v19204_v52, %v10828_v28  ;;  %v9916_v31 = vadd.f32 %v19184_v50, %v9558_v54  ;;  %v10927_v15 = vld [vmem:[%s19218_s19 + $0x18] sm:$0xff]  ;;  %v9559_v28 = vadd.f32 %v19852_v12, %v9377_v22  ;;  %v10428_v50 = vpop.f32.mrf.mxu1  ;;  %v19856_v22 = vld [vmem:[#allocation19_spill] sm:$0xff]  ;;  %v10929_v12 = vld [vmem:[%s19218_s19 + $0x28] sm:$0xff] }
 0x8bf   : > { %v10233_v7 = vpop.f32.mrf.mxu3 }
 0x8c0   : > { %v10878_v39 = vadd.f32 %v19209_v48, %v10853_v14  ;;  %v10289_v26 = vadd.f32 %v10233_v7, %v9915_v4  ;;  %v9917_v7 = vadd.f32 %v19197_v32, %v9559_v28  ;;  %v19857_v28 = vld [vmem:[#allocation24_spill] sm:$0xff] }
 0x8c2   : > { %v10902_v21 = vmax.f32 %v10878_v39, 0.0  ;;  %v10471_v62 = vadd.f32 %v19178_v45, %v10289_v26  ;;  %v10786_v14 = vpop.f32.mrf.mxu2  ;;  %v19853_v39 = vld [vmem:[#allocation13_spill] sm:$0xff] }
 0x8c3   : > { %v9378_v26 = vadd.f32 %v19853_v39, %v19073_v41  ;;  %v19855_v41 = vld [vmem:[#allocation15_spill] sm:$0xff] }
 0x8c4   : > { %v10950_v17 = vadd.f32 %v10926_v42, %v10902_v21  ;;  %v10829_v38 = vadd.f32 %v19180_v10, %v10471_v62  ;;  %10275 = vmatmul.bf16.gmra.mxu3 %v10147_v16  ;;  %v9874_v62 = vpop.f32.mrf.mxu0 }
 0x8c5   : > { %v9560_v16 = vadd.f32 %v19854_v6, %v9378_v26  ;;  %v19859_v6 = vld [vmem:[#allocation17_spill] sm:$0xff] }
 0x8c6   : > { %10974 = vst [vmem:[%s19232_s24 + $0x10] sm:$0xff] %v10950_v17  ;;  %v10854_v40 = vmul.f32 %v19204_v52, %v10829_v38 }
 0x8c7   : > { %v10236_v45 = vpop.f32.mrf.mxu3  ;;  %v9918_v61 = vadd.f32 %v19227_v8, %v9560_v16 }
 0x8c8   : > { %v10879_v2 = vadd.f32 %v19209_v48, %v10854_v40  ;;  %v10290_v36 = vadd.f32 %v10236_v45, %v9916_v31  ;;  %v10430_v31 = vpop.f32.mrf.mxu1  ;;  %v9379_v40 = vadd.f32 %v19856_v22, %v19082_v5 }
 0x8ca   : > { %v10903_v10 = vmax.f32 %v10879_v2, 0.0  ;;  %v10472_v4 = vadd.f32 %v19190_v18, %v10290_v36  ;;  %v10928_v18 = vld [vmem:[%s19218_s19 + $0x20] sm:$0xff]  ;;  %v10788_v2 = vpop.f32.mrf.mxu2 }
 0x8cc   : > { %v10951_v59 = vadd.f32 %v10927_v15, %v10903_v10  ;;  %v10830_v13 = vadd.f32 %v19193_v53, %v10472_v4  ;;  %v9877_v8 = vpop.f32.mrf.mxu0 }
 0x8ce   : > { %10975 = vst [vmem:[%s19232_s24 + $0x18] sm:$0xff] %v10951_v59  ;;  %v10855_v42 = vmul.f32 %v19204_v52, %v10830_v13 }
 0x8cf   : > { %v10238_v49 = vpop.f32.mrf.mxu3 }
 0x8d0   : > { %v10880_v54 = vadd.f32 %v19209_v48, %v10855_v42  ;;  %v10291_v21 = vadd.f32 %v10238_v49, %v9917_v7  ;;  %v19858_v7 = vld [vmem:[#allocation21_spill] sm:$0xff]  ;;  %v10433_v42 = vpop.f32.mrf.mxu1 }
 0x8d1   : > { %v9380_v39 = vadd.f32 %v19858_v7, %v19090_v19 }
 0x8d2   : > { %v10904_v53 = vmax.f32 %v10880_v54, 0.0  ;;  %v10473_v17 = vadd.f32 %v19211_v47, %v10291_v21 }
 0x8d3   : > { %v9562_v16 = vadd.f32 %v19859_v6, %v9380_v39 }
 0x8d4   : > { %v10952_v32 = vadd.f32 %v10928_v18, %v10904_v53  ;;  %v10831_v38 = vadd.f32 %v19221_v1, %v10473_v17  ;;  %10280 = vmatmul.bf16.gmra.mxu3 %v19855_v41  ;;  %v9561_v1 = vadd.f32 %v19857_v28, %v9379_v40  ;;  %v10791_v18 = vpop.f32.mrf.mxu2  ;;  %v9879_v17 = vpop.f32.mrf.mxu0 }
 0x8d6   : > { %10976 = vst [vmem:[%s19232_s24 + $0x20] sm:$0xff] %v10952_v32  ;;  %v10856_v45 = vmul.f32 %v19204_v52, %v10831_v38  ;;  %v9919_v13 = vadd.f32 %v19250_v46, %v9561_v1  ;;  %v9920_v32 = vadd.f32 %v9872_v25, %v9562_v16  ;;  %v19860_v38 = vld [vmem:[#allocation25_spill] sm:$0xff]  ;;  %v19864_v16 = vld [vmem:[#allocation27_spill] sm:$0xff] }
 0x8d7   : > { %v10241_v36 = vpop.f32.mrf.mxu3  ;;  %v9381_v41 = vadd.f32 %v19860_v38, %v19096_v33  ;;  %v19862_v33 = vld [vmem:[#allocation23_spill] sm:$0xff] }
 0x8d8   : > { %v10881_v15 = vadd.f32 %v19209_v48, %v10856_v45  ;;  %v10292_v47 = vadd.f32 %v10241_v36, %v9918_v61  ;;  %v10435_v36 = vpop.f32.mrf.mxu1 }
 0x8da   : > { %v10905_v10 = vmax.f32 %v10881_v15, 0.0  ;;  %v10474_v4 = vadd.f32 %v19241_v43, %v10292_v47  ;;  %v10930_v43 = vld [vmem:[%s19218_s19 + $0x30] sm:$0xff]  ;;  %v10931_v15 = vld [vmem:[%s19218_s19 + $0x38] sm:$0xff] }
 0x8dc   : > { %v10953_v59 = vadd.f32 %v10929_v12, %v10905_v10  ;;  %v10832_v5 = vadd.f32 %v19244_v0, %v10474_v4  ;;  %v10793_v28 = vpop.f32.mrf.mxu2  ;;  %v9382_v4 = vadd.f32 %v19862_v33, %v19103_v20  ;;  %v19867_v33 = vld [vmem:[#allocation32_spill] sm:$0xff] }
 0x8de   : > { %10977 = vst [vmem:[%s19232_s24 + $0x28] sm:$0xff] %v10953_v59  ;;  %v10857_v26 = vmul.f32 %v19204_v52, %v10832_v5  ;;  %v9882_v5 = vpop.f32.mrf.mxu0 }
 0x8df   : > { %v10243_v49 = vpop.f32.mrf.mxu3 }
 0x8e0   : > { %v10882_v54 = vadd.f32 %v19209_v48, %v10857_v26  ;;  %v10293_v21 = vadd.f32 %v10243_v49, %v9919_v13  ;;  %v10932_v26 = vld [vmem:[%s19218_s19 + $0x40] sm:$0xff]  ;;  %v19863_v49 = vld [vmem:[#allocation28_spill] sm:$0xff] }
 0x8e2   : > { %v10906_v0 = vmax.f32 %v10882_v54, 0.0  ;;  %v10475_v46 = vadd.f32 %v19258_v51, %v10293_v21  ;;  %v19861_v51 = vld [vmem:[#allocation26_spill] sm:$0xff] }
 0x8e3   : > { %v9563_v47 = vadd.f32 %v19861_v51, %v9381_v41  ;;  %v10933_v41 = vld [vmem:[%s19218_s19 + $0x48] sm:$0xff] }
 0x8e4   : > { %v10954_v53 = vadd.f32 %v10930_v43, %v10906_v0  ;;  %v10833_v19 = vadd.f32 %v19263_v60, %v10475_v46  ;;  %v10796_v6 = vpop.f32.mrf.mxu2  ;;  %v9383_v0 = vadd.f32 %v19864_v16, %v19111_v24  ;;  %v19866_v24 = vld [vmem:[#allocation22_spill] sm:$0xff] }
 0x8e5   : > { %v9921_v10 = vadd.f32 %v9874_v62, %v9563_v47  ;;  %v9384_v51 = vadd.f32 %v19866_v24, %v19119_v23  ;;  %v19868_v23 = vld [vmem:[#allocation31_spill] sm:$0xff] }
 0x8e6   : > { %10978 = vst [vmem:[%s19232_s24 + $0x30] sm:$0xff] %v10954_v53  ;;  %v10858_v61 = vmul.f32 %v19204_v52, %v10833_v19  ;;  %v9884_v38 = vpop.f32.mrf.mxu0 }
 0x8e7   : > { %v10246_v22 = vpop.f32.mrf.mxu3 }
 0x8e8   : > { %v10883_v40 = vadd.f32 %v19209_v48, %v10858_v61  ;;  %v10294_v45 = vadd.f32 %v10246_v22, %v9920_v32 }
 0x8ea   : > { %v10907_v12 = vmax.f32 %v10883_v40, 0.0  ;;  %v10476_v60 = vadd.f32 %v10428_v50, %v10294_v45  ;;  %v9564_v50 = vadd.f32 %v19863_v49, %v9382_v4 }
 0x8ec   : > { %v10955_v25 = vadd.f32 %v10931_v15, %v10907_v12  ;;  %v10834_v1 = vadd.f32 %v10786_v14, %v10476_v60  ;;  %v10438_v14 = vpop.f32.mrf.mxu1  ;;  %v9922_v20 = vadd.f32 %v9877_v8, %v9564_v50  ;;  %v10798_v12 = vpop.f32.mrf.mxu2 }
 0x8ee   : > { %10979 = vst [vmem:[%s19232_s24 + $0x38] sm:$0xff] %v10955_v25  ;;  %v10859_v59 = vmul.f32 %v19204_v52, %v10834_v1 }
 0x8ef   : > { %v10248_v13 = vpop.f32.mrf.mxu3 }
 0x8f0   : > { %v10884_v7 = vadd.f32 %v19209_v48, %v10859_v59  ;;  %v10295_v39 = vadd.f32 %v10248_v13, %v9921_v10  ;;  %v10934_v10 = vld [vmem:[%s19218_s19 + $0x50] sm:$0xff]  ;;  %v9887_v59 = vpop.f32.mrf.mxu0 }
 0x8f2   : > { %v10908_v54 = vmax.f32 %v10884_v7, 0.0  ;;  %v10477_v21 = vadd.f32 %v10430_v31, %v10295_v39  ;;  %v19865_v31 = vld [vmem:[#allocation30_spill] sm:$0xff]  ;;  %v9385_v39 = vadd.f32 %v19868_v23, %v19129_v58 }
 0x8f3   : > { %v9565_v61 = vadd.f32 %v19865_v31, %v9383_v0 }
 0x8f4   : > { %v10956_v62 = vadd.f32 %v10932_v26, %v10908_v54  ;;  %v10835_v43 = vadd.f32 %v10788_v2, %v10477_v21  ;;  %v10440_v45 = vpop.f32.mrf.mxu1 }
 0x8f5   : > { %v9923_v15 = vadd.f32 %v9879_v17, %v9565_v61 }
 0x8f6   : > { %10980 = vst [vmem:[%s19232_s24 + $0x40] sm:$0xff] %v10956_v62  ;;  %v10860_v46 = vmul.f32 %v19204_v52, %v10835_v43  ;;  %v10801_v62 = vpop.f32.mrf.mxu2  ;;  %v10935_v43 = vld [vmem:[%s19218_s19 + $0x58] sm:$0xff] }
 0x8f7   : > { %v10251_v53 = vpop.f32.mrf.mxu3 }
 0x8f8   : > { %v10885_v19 = vadd.f32 %v19209_v48, %v10860_v46  ;;  %v10296_v32 = vadd.f32 %v10251_v53, %v9922_v20  ;;  %v9889_v46 = vpop.f32.mrf.mxu0  ;;  %v19870_v53 = vld [vmem:[#allocation33_spill] sm:$0xff] }
 0x8fa   : > { %v10909_v22 = vmax.f32 %v10885_v19, 0.0  ;;  %v10478_v2 = vadd.f32 %v10433_v42, %v10296_v32  ;;  %v9566_v42 = vadd.f32 %v19867_v33, %v9384_v51  ;;  %v9386_v19 = vadd.f32 %v19870_v53, %v19133_v55  ;;  %v19872_v55 = vld [vmem:[#allocation37_spill] sm:$0xff] }
 0x8fc   : > { %v10957_v40 = vadd.f32 %v10933_v41, %v10909_v22  ;;  %v10836_v8 = vadd.f32 %v10791_v18, %v10478_v2  ;;  %v9924_v7 = vadd.f32 %v9882_v5, %v9566_v42  ;;  %v10443_v49 = vpop.f32.mrf.mxu1  ;;  %v10936_v2 = vld [vmem:[%s19218_s19 + $0x60] sm:$0xff]  ;;  %v10937_v42 = vld [vmem:[%s19218_s19 + $0x68] sm:$0xff] }
 0x8fe   : > { %10981 = vst [vmem:[%s19232_s24 + $0x48] sm:$0xff] %v10957_v40  ;;  %v10861_v47 = vmul.f32 %v19204_v52, %v10836_v8  ;;  %v19871_v40 = vld [vmem:[#allocation35_spill] sm:$0xff] }
 0x8ff   : > { %v10253_v60 = vpop.f32.mrf.mxu3 }
 0x900   : > { %v10886_v25 = vadd.f32 %v19209_v48, %v10861_v47  ;;  %v10297_v1 = vadd.f32 %v10253_v60, %v9923_v15  ;;  %v10803_v15 = vpop.f32.mrf.mxu2  ;;  %v9387_v47 = vadd.f32 %v19872_v55, %v19139_v27 }
 0x902   : > { %v10910_v4 = vmax.f32 %v10886_v25, 0.0  ;;  %v10479_v18 = vadd.f32 %v10435_v36, %v10297_v1  ;;  %v19869_v36 = vld [vmem:[#allocation29_spill] sm:$0xff]  ;;  %v9892_v25 = vpop.f32.mrf.mxu0 }
 0x903   : > { %v9567_v20 = vadd.f32 %v19869_v36, %v9385_v39 }
 0x904   : > { %v10958_v17 = vadd.f32 %v10934_v10, %v10910_v4  ;;  %v10837_v13 = vadd.f32 %v10793_v28, %v10479_v18  ;;  %v10445_v22 = vpop.f32.mrf.mxu1 }
 0x905   : > { %v9925_v58 = vadd.f32 %v9884_v38, %v9567_v20 }
 0x906   : > { %10982 = vst [vmem:[%s19232_s24 + $0x50] sm:$0xff] %v10958_v17  ;;  %v10862_v26 = vmul.f32 %v19204_v52, %v10837_v13 }
 0x907   : > { %v10256_v50 = vpop.f32.mrf.mxu3 }
 0x908   : > { %v10887_v54 = vadd.f32 %v19209_v48, %v10862_v26  ;;  %v10298_v21 = vadd.f32 %v10256_v50, %v9924_v7  ;;  %v10806_v13 = vpop.f32.mrf.mxu2  ;;  %v9388_v7 = vadd.f32 %v19055_v57, %v19143_v56  ;;  %v9389_v57 = vadd.f32 %v19067_v63, %v19146_v35 }
 0x909   : > { %v9390_v63 = vadd.f32 %v19077_v30, %v19150_v29  ;;  %v19873_v29 = vld [vmem:[#allocation38_spill] sm:$0xff] }
 0x90a   : > { %v10911_v16 = vmax.f32 %v10887_v54, 0.0  ;;  %v10480_v28 = vadd.f32 %v10438_v14, %v10298_v21  ;;  %v9568_v14 = vadd.f32 %v19871_v40, %v9386_v19  ;;  %v9894_v54 = vpop.f32.mrf.mxu0 }
 0x90c   : > { %v10959_v5 = vadd.f32 %v10935_v43, %v10911_v16  ;;  %v10838_v0 = vadd.f32 %v10796_v6, %v10480_v28  ;;  %v9926_v51 = vadd.f32 %v9887_v59, %v9568_v14 }
 0x90e   : > { %10983 = vst [vmem:[%s19232_s24 + $0x58] sm:$0xff] %v10959_v5  ;;  %v10863_v32 = vmul.f32 %v19204_v52, %v10838_v0 }
 0x90f   : > { %v10258_v41 = vpop.f32.mrf.mxu3 }
 0x910   : > { %v10888_v31 = vadd.f32 %v19209_v48, %v10863_v32  ;;  %v10299_v61 = vadd.f32 %v10258_v41, %v9925_v58  ;;  %v10808_v28 = vpop.f32.mrf.mxu2  ;;  %v10939_v58 = vld [vmem:[%s19218_s19 + $0x78] sm:$0xff] }
 0x912   : > { %v10912_v8 = vmax.f32 %v10888_v31, 0.0  ;;  %v10481_v6 = vadd.f32 %v10440_v45, %v10299_v61  ;;  %v9569_v45 = vadd.f32 %v19061_v34, %v9387_v47  ;;  %v10938_v34 = vld [vmem:[%s19218_s19 + $0x70] sm:$0xff]  ;;  %v9897_v32 = vpop.f32.mrf.mxu0  ;;  %v9391_v47 = vadd.f32 %v19873_v29, %v19153_v3  ;;  %v19875_v3 = vld [vmem:[#allocation44_spill] sm:$0xff] }
 0x914   : > { %v10960_v38 = vadd.f32 %v10936_v2, %v10912_v8  ;;  %v10839_v24 = vadd.f32 %v10798_v12, %v10481_v6  ;;  %v10448_v12 = vpop.f32.mrf.mxu1  ;;  %v9927_v27 = vadd.f32 %v9889_v46, %v9569_v45  ;;  %v9572_v6 = vadd.f32 %v19087_v9, %v9390_v63  ;;  %v10941_v9 = vld [vmem:[%s19218_s19 + $0x88] sm:$0xff] }
 0x916   : > { %10984 = vst [vmem:[%s19232_s24 + $0x60] sm:$0xff] %v10960_v38  ;;  %v10864_v60 = vmul.f32 %v19204_v52, %v10839_v24  ;;  %v9930_v30 = vadd.f32 %v9897_v32, %v9572_v6  ;;  %v10943_v32 = vld [vmem:[%s19218_s19 + $0x98] sm:$0xff] }
 0x917   : > { %v10261_v1 = vpop.f32.mrf.mxu3 }
 0x918   : > { %v10889_v10 = vadd.f32 %v19209_v48, %v10864_v60  ;;  %v10300_v33 = vadd.f32 %v10261_v1, %v9926_v51  ;;  %v10811_v8 = vpop.f32.mrf.mxu2 }
 0x91a   : > { %v10913_v4 = vmax.f32 %v10889_v10, 0.0  ;;  %v10482_v18 = vadd.f32 %v10443_v49, %v10300_v33  ;;  %v9570_v49 = vadd.f32 %v19069_v37, %v9388_v7  ;;  %v9571_v37 = vadd.f32 %v19079_v44, %v9389_v57  ;;  %v10940_v44 = vld [vmem:[%s19218_s19 + $0x80] sm:$0xff]  ;;  %v9899_v55 = vpop.f32.mrf.mxu0 }
 0x91c   : > { %v10961_v59 = vadd.f32 %v10937_v42, %v10913_v4  ;;  %v10840_v17 = vadd.f32 %v10801_v62, %v10482_v18  ;;  %v10450_v20 = vpop.f32.mrf.mxu1  ;;  %v9928_v16 = vadd.f32 %v9892_v25, %v9570_v49  ;;  %v9929_v61 = vadd.f32 %v9894_v54, %v9571_v37  ;;  %v19874_v42 = vld [vmem:[#allocation36_spill] sm:$0xff]  ;;  %v19877_v49 = vld [vmem:[#allocation39_spill] sm:$0xff] }
 0x91d   : > { %v9573_v45 = vadd.f32 %v19874_v42, %v9391_v47 }
 0x91e   : > { %10985 = vst [vmem:[%s19232_s24 + $0x68] sm:$0xff] %v10961_v59  ;;  %v10865_v23 = vmul.f32 %v19204_v52, %v10840_v17 }
 0x91f   : > { %v10263_v39 = vpop.f32.mrf.mxu3 }
 0x920   : > { %v10890_v26 = vadd.f32 %v19209_v48, %v10865_v23  ;;  %v10301_v50 = vadd.f32 %v10263_v39, %v9927_v27  ;;  %v19876_v27 = vld [vmem:[#allocation34_spill] sm:$0xff] }
 0x921   : > { %v9392_v7 = vadd.f32 %v19876_v27, %v19875_v3  ;;  %v19885_v3 = vld [vmem:[#allocation42_spill] sm:$0xff] }
 0x922   : > { %v10914_v21 = vmax.f32 %v10890_v26, 0.0  ;;  %v10483_v62 = vadd.f32 %v10445_v22, %v10301_v50  ;;  %v9902_v39 = vpop.f32.mrf.mxu0 }
 0x924   : > { %v10962_v43 = vadd.f32 %v10938_v34, %v10914_v21  ;;  %v10841_v36 = vadd.f32 %v10803_v15, %v10483_v62  ;;  %v10453_v22 = vpop.f32.mrf.mxu1  ;;  %v10942_v34 = vld [vmem:[%s19218_s19 + $0x90] sm:$0xff]  ;;  %v9574_v21 = vadd.f32 %v19877_v49, %v9392_v7 }
 0x926   : > { %10986 = vst [vmem:[%s19232_s24 + $0x70] sm:$0xff] %v10962_v43  ;;  %v10866_v56 = vmul.f32 %v19204_v52, %v10841_v36 }
 0x927   : > { %v10266_v5 = vpop.f32.mrf.mxu3 }
 0x928   : > { %v10891_v0 = vadd.f32 %v19209_v48, %v10866_v56  ;;  %v10302_v46 = vadd.f32 %v10266_v5, %v9928_v16  ;;  %v9932_v56 = vadd.f32 %v9902_v39, %v9574_v21  ;;  %v19879_v5 = vld [vmem:[#allocation43_spill] sm:$0xff] }
 0x92a   : > { %v10915_v53 = vmax.f32 %v10891_v0, 0.0  ;;  %v10484_v19 = vadd.f32 %v10448_v12, %v10302_v46  ;;  %v10813_v12 = vpop.f32.mrf.mxu2 }
 0x92c   : > { %v10963_v41 = vadd.f32 %v10939_v58, %v10915_v53  ;;  %v10842_v31 = vadd.f32 %v10806_v13, %v10484_v19  ;;  %v10455_v33 = vpop.f32.mrf.mxu1  ;;  %v9931_v13 = vadd.f32 %v9899_v55, %v9573_v45  ;;  %v9904_v19 = vpop.f32.mrf.mxu0  ;;  %v10944_v55 = vld [vmem:[%s19218_s19 + $0xa0] sm:$0xff] }
 0x92e   : > { %10987 = vst [vmem:[%s19232_s24 + $0x78] sm:$0xff] %v10963_v41  ;;  %v10867_v35 = vmul.f32 %v19204_v52, %v10842_v31  ;;  %v19880_v41 = vld [vmem:[#allocation6_spill] sm:$0xff] }
 0x92f   : > { %v10268_v2 = vpop.f32.mrf.mxu3 }
 0x930   : > { %v10892_v40 = vadd.f32 %v19209_v48, %v10867_v35  ;;  %v10303_v14 = vadd.f32 %v10268_v2, %v9929_v61 }
 0x932   : > { %v10916_v15 = vmax.f32 %v10892_v40, 0.0  ;;  %v10485_v38 = vadd.f32 %v10450_v20, %v10303_v14  ;;  %v10816_v57 = vpop.f32.mrf.mxu2  ;;  %v19881_v14 = vld [vmem:[#allocation9_spill] sm:$0xff] }
 0x934   : > { %v10964_v24 = vadd.f32 %v10940_v44, %v10916_v15  ;;  %v10843_v51 = vadd.f32 %v10808_v28, %v10485_v38  ;;  %v10458_v36 = vpop.f32.mrf.mxu1  ;;  %v19878_v28 = vld [vmem:[#allocation57_spill] sm:$0xff] }
 0x935   : > { %v9393_v0 = vadd.f32 %v19879_v5, %v19878_v28 }
 0x936   : > { %10988 = vst [vmem:[%s19232_s24 + $0x80] sm:$0xff] %v10964_v24  ;;  %v10868_v60 = vmul.f32 %v19204_v52, %v10843_v51 }
 0x937   : > { %v10271_v25 = vpop.f32.mrf.mxu3  ;;  %v9575_v31 = vadd.f32 %v19880_v41, %v9393_v0  ;;  %v10947_v0 = vld [vmem:[%s19218_s19 + $0xb8] sm:$0xff] }
 0x938   : > { %v10893_v1 = vadd.f32 %v19209_v48, %v10868_v60  ;;  %v10304_v10 = vadd.f32 %v10271_v25, %v9930_v30  ;;  %v19883_v30 = vld [vmem:[#allocation5_spill] sm:$0xff]  ;;  %v9907_v25 = vpop.f32.mrf.mxu0 }
 0x939   : > { %v9933_v40 = vadd.f32 %v9904_v19, %v9575_v31 }
 0x93a   : > { %v10917_v4 = vmax.f32 %v10893_v1, 0.0  ;;  %v10486_v18 = vadd.f32 %v10453_v22, %v10304_v10  ;;  %v10818_v15 = vpop.f32.mrf.mxu2 }
 0x93c   : > { %v10965_v59 = vadd.f32 %v10941_v9, %v10917_v4  ;;  %v10844_v17 = vadd.f32 %v10811_v8, %v10486_v18  ;;  %v10460_v2 = vpop.f32.mrf.mxu1  ;;  %v19882_v8 = vld [vmem:[#allocation40_spill] sm:$0xff]  ;;  %v19884_v9 = vld [vmem:[#allocation41_spill] sm:$0xff] }
 0x93d   : > { %v9394_v44 = vadd.f32 %v19882_v8, %v19881_v14  ;;  %v9395_v42 = vadd.f32 %v19884_v9, %v19187_v11 }
 0x93e   : > { %10989 = vst [vmem:[%s19232_s24 + $0x88] sm:$0xff] %v10965_v59  ;;  %v10869_v23 = vmul.f32 %v19204_v52, %v10844_v17 }
 0x93f   : > { %v10273_v26 = vpop.f32.mrf.mxu3  ;;  %v9576_v29 = vadd.f32 %v19883_v30, %v9394_v44  ;;  %v9577_v27 = vadd.f32 %v19885_v3, %v9395_v42 }
 0x940   : > { %v10894_v50 = vadd.f32 %v19209_v48, %v10869_v23  ;;  %v10305_v54 = vadd.f32 %v10273_v26, %v9931_v13  ;;  %v10945_v13 = vld [vmem:[%s19218_s19 + $0xa8] sm:$0xff]  ;;  %v9909_v11 = vpop.f32.mrf.mxu0 }
 0x942   : > { %v10918_v62 = vmax.f32 %v10894_v50, 0.0  ;;  %v10487_v43 = vadd.f32 %v10455_v33, %v10305_v54  ;;  %v9934_v33 = vadd.f32 %v9907_v25, %v9576_v29  ;;  %v10821_v17 = vpop.f32.mrf.mxu2  ;;  %v9935_v50 = vadd.f32 %v9909_v11, %v9577_v27 }
 0x944   : > { %v10966_v20 = vadd.f32 %v10942_v34, %v10918_v62  ;;  %v10845_v16 = vadd.f32 %v10813_v12, %v10487_v43  ;;  %v10463_v4 = vpop.f32.mrf.mxu1  ;;  %v10946_v43 = vld [vmem:[%s19218_s19 + $0xb0] sm:$0xff] }
 0x946   : > { %10990 = vst [vmem:[%s19232_s24 + $0x90] sm:$0xff] %v10966_v20  ;;  %v10870_v46 = vmul.f32 %v19204_v52, %v10845_v16 }
 0x947   : > { %v10276_v58 = vpop.f32.mrf.mxu3 }
 0x948   : > { %v10895_v37 = vadd.f32 %v19209_v48, %v10870_v46  ;;  %v10306_v53 = vadd.f32 %v10276_v58, %v9932_v56 }
 0x94a   : > { %v10919_v61 = vmax.f32 %v10895_v37, 0.0  ;;  %v10488_v63 = vadd.f32 %v10458_v36, %v10306_v53  ;;  %v10823_v16 = vpop.f32.mrf.mxu2 }
 0x94c   : > { %v10967_v35 = vadd.f32 %v10943_v32, %v10919_v61  ;;  %v10846_v22 = vadd.f32 %v10816_v57, %v10488_v63  ;;  %v10465_v62 = vpop.f32.mrf.mxu1 }
 0x94e   : > { %10991 = vst [vmem:[%s19232_s24 + $0x98] sm:$0xff] %v10967_v35  ;;  %v10871_v6 = vmul.f32 %v19204_v52, %v10846_v22 }
 0x94f   : > { %v10278_v38 = vpop.f32.mrf.mxu3 }
 0x950   : > { %v10896_v24 = vadd.f32 %v19209_v48, %v10871_v6  ;;  %v10307_v51 = vadd.f32 %v10278_v38, %v9933_v40 }
 0x952   : > { %v10920_v47 = vmax.f32 %v10896_v24, 0.0  ;;  %v10489_v60 = vadd.f32 %v10460_v2, %v10307_v51 }
 0x954   : > { %v10968_v1 = vadd.f32 %v10944_v55, %v10920_v47  ;;  %v10847_v10 = vadd.f32 %v10818_v15, %v10489_v60 }
 0x956   : > { %10992 = vst [vmem:[%s19232_s24 + $0xa0] sm:$0xff] %v10968_v1  ;;  %v10872_v45 = vmul.f32 %v19204_v52, %v10847_v10 }
 0x957   : > { %v10281_v18 = vpop.f32.mrf.mxu3 }
 0x958   : > { %v10897_v12 = vadd.f32 %v19209_v48, %v10872_v45  ;;  %v10308_v59 = vadd.f32 %v10281_v18, %v9934_v33 }
 0x95a   : > { %v10921_v7 = vmax.f32 %v10897_v12, 0.0  ;;  %v10490_v23 = vadd.f32 %v10463_v4, %v10308_v59 }
 0x95c   : > { %v10969_v39 = vadd.f32 %v10945_v13, %v10921_v7  ;;  %v10848_v26 = vadd.f32 %v10821_v17, %v10490_v23 }
 0x95e   : > { %10993 = vst [vmem:[%s19232_s24 + $0xa8] sm:$0xff] %v10969_v39  ;;  %v10873_v54 = vmul.f32 %v19204_v52, %v10848_v26 }
 0x95f   : > { %v10283_v34 = vpop.f32.mrf.mxu3 }
 0x960   : > { %v10898_v49 = vadd.f32 %v19209_v48, %v10873_v54  ;;  %v10309_v21 = vadd.f32 %v10283_v34, %v9935_v50 }
 0x962   : > { %v10922_v36 = vmax.f32 %v10898_v49, 0.0  ;;  %v10491_v20 = vadd.f32 %v10465_v62, %v10309_v21 }
 0x964   : > { %v10970_v57 = vadd.f32 %v10946_v43, %v10922_v36  ;;  %v10849_v56 = vadd.f32 %v10823_v16, %v10491_v20 }
 0x966   : > { %10994 = vst [vmem:[%s19232_s24 + $0xb0] sm:$0xff] %v10970_v57  ;;  %v10874_v28 = vmul.f32 %v19204_v52, %v10849_v56 }
 0x968   : > { %v10899_v5 = vadd.f32 %v19209_v48, %v10874_v28 }
 0x96a   : > { %v10923_v46 = vmax.f32 %v10899_v5, 0.0 }
 0x96c   : > { %v10971_v58 = vadd.f32 %v10947_v0, %v10923_v46 }
 0x96e   : > { %10995 = vst [vmem:[%s19232_s24 + $0xb8] sm:$0xff] %v10971_v58 }
 0x96f PF: > { %s16_s21 = sadd.s32 1, %s15341_s21  }
 0x970   : > { %p13_p6 = scmp.ge.s32.totalorder %s16_s21, 6  }
 0x972   :  { %15 = sbr.rel (!%p13_p6) target bundleno = 1 (0x1), region = 101 }

</bundles_post_ra>
